<compile_context>
chip_gen: v7x
topology: tpu7x:2x2x1
jax: 0.10.0
libtpu: 0.0.40
codegen_flags: <defaults>
</compile_context>

<pallas_src>
import functools

import jax
import jax.numpy as jnp
import numpy as np
from jax.experimental import pallas as pl
from jax.experimental.pallas import tpu as pltpu


def _round_up(x, m):
    return ((x + m - 1) // m) * m


# ----------------------------------------------------------------------------
# Pallas kernels
# ----------------------------------------------------------------------------
def _matmul_bn_act_kernel(*refs, n, relu, has_head):
    # refs = a_0..a_{n-1}, w_0..w_{n-1}, scale, bias, [head_w, head_b], out
    # sum_i A_i @ W_i on the MXU (bf16 in, f32 acc), fused per-channel
    # scale/bias (folded BN, optionally per-row) + ReLU, and an optional
    # fused linear head (dec_cls 1x1 conv) before the store.
    a_refs = refs[:n]
    w_refs = refs[n:2 * n]
    s_ref, b_ref = refs[2 * n], refs[2 * n + 1]
    if has_head:
        hw_ref, hb_ref, o_ref = refs[2 * n + 2], refs[2 * n + 3], refs[2 * n + 4]
    else:
        o_ref = refs[2 * n + 2]

    acc = jnp.dot(a_refs[0][...], w_refs[0][...],
                  preferred_element_type=jnp.float32)
    for i in range(1, n):
        acc = acc + jnp.dot(a_refs[i][...], w_refs[i][...],
                            preferred_element_type=jnp.float32)
    y = acc * s_ref[...] + b_ref[...]
    if relu:
        y = jnp.maximum(y, 0.0)
    if has_head:
        y = jnp.dot(y.astype(jnp.bfloat16), hw_ref[...],
                    preferred_element_type=jnp.float32) + hb_ref[...]
    o_ref[...] = y.astype(o_ref.dtype)


def _bilerp_kernel(tl_ref, tr_ref, bl_ref, br_ref, fy_ref, fx_ref, o_ref):
    # Bilinear (align_corners=True) blend; blend weights are computed
    # in-kernel from the small fy / fx vectors (VPU ops, hidden under loads).
    fy = fy_ref[...]
    fx = fx_ref[...]
    wy0 = 1.0 - fy
    wx0 = 1.0 - fx
    tl = tl_ref[...].astype(jnp.float32)
    tr = tr_ref[...].astype(jnp.float32)
    bl = bl_ref[...].astype(jnp.float32)
    br = br_ref[...].astype(jnp.float32)
    out = wy0 * (tl * wx0 + tr * fx) + fy * (bl * wx0 + br * fx)
    o_ref[...] = out.astype(o_ref.dtype)


# ----------------------------------------------------------------------------
# Pallas wrappers
# ----------------------------------------------------------------------------
def fused_matmul_bn_act(A_parts, W_parts, scale, bias, relu, *,
                        out_dtype=jnp.float32, head_w=None, head_b=None,
                        tm=512):
    """sum_i A_i @ W_i with fused scale/bias/ReLU (+ optional linear head).

    A_parts: array (M, K) or list of arrays (M, K_i).
    W_parts: array (K, N) or list of arrays (K_i, N).
    bias   : (N,) per-channel, or (M, N) per-row (used for the per-batch
             image-pooling contribution of the ASPP projection).
    M is tiled over the grid; W/scale/bias stay resident across the grid.
    """
    if not isinstance(A_parts, (list, tuple)):
        A_parts = [A_parts]
        W_parts = [W_parts]
    n = len(A_parts)
    M = A_parts[0].shape[0]
    N = W_parts[0].shape[1]

    # TM multiple of 16 (bf16 sublane packing); keep >= 2 grid steps whenever
    # M allows so both v7x TensorCores get work; cap at `tm` for roofline.
    if M > 16:
        TM = min(tm, _round_up((M + 1) // 2, 16))
    else:
        TM = _round_up(max(M, 1), 16)
    Mp = _round_up(M, TM)

    def pad_rows(a):
        return jnp.pad(a, ((0, Mp - M), (0, 0))) if Mp != M else a

    A_b = [pad_rows(a).astype(jnp.bfloat16) for a in A_parts]
    W_b = [w.astype(jnp.bfloat16) for w in W_parts]
    s2 = jnp.asarray(scale, jnp.float32).reshape(1, N)

    bias = jnp.asarray(bias, jnp.float32)
    if bias.ndim == 2 and bias.shape[0] == M:       # per-row (per-batch) bias
        b2 = pad_rows(bias)
        bias_spec = pl.BlockSpec((TM, N), lambda i: (i, 0))
    else:
        b2 = bias.reshape(1, N)
        bias_spec = pl.BlockSpec((1, N), lambda i: (0, 0))

    inputs = list(A_b) + list(W_b) + [s2, b2]
    in_specs = (
        [pl.BlockSpec((TM, a.shape[1]), lambda i: (i, 0)) for a in A_b] +
        [pl.BlockSpec((w.shape[0], N), lambda i: (0, 0)) for w in W_b] +
        [pl.BlockSpec((1, N), lambda i: (0, 0)), bias_spec]
    )

    has_head = head_w is not None
    if has_head:
        N_out = head_w.shape[1]
        inputs += [head_w.astype(jnp.bfloat16),
                   jnp.asarray(head_b, jnp.float32).reshape(1, N_out)]
        in_specs += [pl.BlockSpec((N, N_out), lambda i: (0, 0)),
                     pl.BlockSpec((1, N_out), lambda i: (0, 0))]
    else:
        N_out = N

    out = pl.pallas_call(
        functools.partial(_matmul_bn_act_kernel, n=n, relu=relu,
                          has_head=has_head),
        grid=(Mp // TM,),
        in_specs=in_specs,
        out_specs=pl.BlockSpec((TM, N_out), lambda i: (i, 0)),
        out_shape=jax.ShapeDtypeStruct((Mp, N_out), out_dtype),
        compiler_params=pltpu.CompilerParams(
            dimension_semantics=("parallel",)),
    )(*inputs)
    return out[:M] if Mp != M else out


def _im2col(x, kh, kw, stride, dilation, padding):
    """x: (B,H,W,Cin) -> (A[M, kh*kw*Cin], Hout, Wout).  Plain-JAX glue."""
    B, H, W, Cin = x.shape
    xp = jnp.pad(x, ((0, 0), (padding, padding), (padding, padding), (0, 0)))
    Hout = (H + 2 * padding - dilation * (kh - 1) - 1) // stride + 1
    Wout = (W + 2 * padding - dilation * (kw - 1) - 1) // stride + 1
    if kh == 1 and kw == 1 and stride == 1:
        A = xp.reshape(B * Hout * Wout, Cin)
    else:
        cols = []
        for i in range(kh):
            for j in range(kw):
                sl = xp[:, i * dilation: i * dilation + (Hout - 1) * stride + 1: stride,
                           j * dilation: j * dilation + (Wout - 1) * stride + 1: stride, :]
                cols.append(sl)
        A = jnp.concatenate(cols, axis=-1).reshape(B * Hout * Wout,
                                                   kh * kw * Cin)
    return A, Hout, Wout


def conv2d_bn_act(x, w, scale, bias, *, stride=1, dilation=1, padding=0,
                  relu=True, out_dtype=jnp.float32):
    """x: (B,H,W,Cin) NHWC; w: (kh,kw,Cin,Cout). Returns (B,Hout,Wout,Cout)."""
    B = x.shape[0]
    kh, kw, Cin, Cout = w.shape
    A, Hout, Wout = _im2col(x, kh, kw, stride, dilation, padding)
    out = fused_matmul_bn_act(A, w.reshape(kh * kw * Cin, Cout), scale, bias,
                              relu, out_dtype=out_dtype)
    return out.reshape(B, Hout, Wout, Cout)


def bilinear_upsample(x, out_h, out_w):
    """align_corners=True bilinear resize, NHWC. Lane-dense Pallas blend."""
    B, Hin, Win, C = x.shape
    dtype = x.dtype

    def coords(inp, outp):
        if outp == 1:
            pos = jnp.zeros((1,), jnp.float32)
        else:
            pos = jnp.arange(outp, dtype=jnp.float32) * ((inp - 1) / (outp - 1))
        i0 = jnp.clip(jnp.floor(pos).astype(jnp.int32), 0, max(inp - 1, 0))
        i1 = jnp.minimum(i0 + 1, inp - 1)
        return i0, i1, pos - i0.astype(jnp.float32)

    y0, y1, fy = coords(Hin, out_h)
    x0, x1, fx = coords(Win, out_w)
    # corner gathers are plain-JAX index glue; the blend runs in Pallas.
    tl = x[:, y0][:, :, x0]
    tr = x[:, y0][:, :, x1]
    bl = x[:, y1][:, :, x0]
    br = x[:, y1][:, :, x1]

    WC = out_w * C
    if WC % 128 == 0:
        # row layout: rows = B*out_h (sublanes), lanes = out_w*C (lane-dense)
        R, L = B * out_h, WC
        fy_a = jnp.tile(fy, (B,)).reshape(R, 1)
        fx_a = jnp.repeat(fx, C).reshape(1, L)
        fy_shape = (R, 1)
    else:
        # flat layout: rows = B, all of (h,w,c) in lanes -> unmasked stores
        R, L = B, out_h * WC
        fy_a = jnp.repeat(fy, WC).reshape(1, L)
        fx_a = jnp.tile(jnp.repeat(fx, C), (out_h,)).reshape(1, L)
        fy_shape = (1, L)

    def flat(c):
        return c.reshape(R, L)

    out = pl.pallas_call(
        _bilerp_kernel,
        grid=(1,),
        in_specs=[pl.BlockSpec((R, L), lambda i: (0, 0)) for _ in range(4)] +
                 [pl.BlockSpec(fy_shape, lambda i: (0, 0)),
                  pl.BlockSpec((1, L), lambda i: (0, 0))],
        out_specs=pl.BlockSpec((R, L), lambda i: (0, 0)),
        out_shape=jax.ShapeDtypeStruct((R, L), dtype),
        compiler_params=pltpu.CompilerParams(
            dimension_semantics=("arbitrary",)),
    )(flat(tl), flat(tr), flat(bl), flat(br),
      fy_a.astype(jnp.float32), fx_a.astype(jnp.float32))
    return out.reshape(B, out_h, out_w, C)


# ----------------------------------------------------------------------------
# Parameters (deterministic, synthetic) and the DeepLab forward pass
# ----------------------------------------------------------------------------
_BN_EPS = 1e-5
_BN_SCALE = 1.0 / float(np.sqrt(1.0 + _BN_EPS))   # fresh-init BN, eval mode


def _bn_fold(cout):
    # gamma=1, beta=0, running_mean=0, running_var=1  ->  scale, bias
    return (jnp.full((cout,), _BN_SCALE, jnp.float32),
            jnp.zeros((cout,), jnp.float32))


def init_params(key):
    def conv_w(k, kh, kw, cin, cout):
        bound = 1.0 / float(np.sqrt(kh * kw * cin))
        return jax.random.uniform(k, (kh, kw, cin, cout), jnp.float32,
                                  -bound, bound)

    ks = jax.random.split(key, 16)
    p = {}
    # reduced ResNet-style backbone (output_stride=16, low-level at stride 4)
    p['b1'] = conv_w(ks[0], 3, 3, 3, 16)     # /2
    p['b2'] = conv_w(ks[1], 3, 3, 16, 24)    # /4  -> low_level_feat
    p['b3'] = conv_w(ks[2], 3, 3, 24, 32)    # /8
    p['b4'] = conv_w(ks[3], 3, 3, 32, 48)    # /16 -> x
    # ASPP (rates 1, 6, 12, 18) + image-level branch + projection
    p['aspp1'] = conv_w(ks[4], 1, 1, 48, 32)
    p['aspp2'] = conv_w(ks[5], 3, 3, 48, 32)
    p['aspp3'] = conv_w(ks[6], 3, 3, 48, 32)
    p['aspp4'] = conv_w(ks[7], 3, 3, 48, 32)
    p['aspp_pool'] = conv_w(ks[8], 1, 1, 48, 32)
    p['aspp_proj'] = conv_w(ks[9], 1, 1, 5 * 32, 32)
    # decoder
    p['dec_low'] = conv_w(ks[10], 1, 1, 24, 12)
    p['dec1'] = conv_w(ks[11], 3, 3, 32 + 12, 32)
    p['dec2'] = conv_w(ks[12], 3, 3, 32, 32)
    p['dec_cls'] = conv_w(ks[13], 1, 1, 32, 1)
    p['dec_cls_b'] = jax.random.uniform(ks[14], (1,), jnp.float32,
                                        -1.0 / np.sqrt(32), 1.0 / np.sqrt(32))
    return p


def deeplab_forward(params, x_nchw):
    x = jnp.transpose(x_nchw, (0, 2, 3, 1)).astype(jnp.float32)  # NCHW -> NHWC
    B, H, W, _ = x.shape
    bf16 = jnp.bfloat16

    # ---- backbone (bf16 activations out of the fused matmul epilogue) ----
    f1 = conv2d_bn_act(x, params['b1'], *_bn_fold(16), stride=2, padding=1,
                       out_dtype=bf16)
    f2 = conv2d_bn_act(f1, params['b2'], *_bn_fold(24), stride=2, padding=1,
                       out_dtype=bf16)
    f3 = conv2d_bn_act(f2, params['b3'], *_bn_fold(32), stride=2, padding=1,
                       out_dtype=bf16)
    f4 = conv2d_bn_act(f3, params['b4'], *_bn_fold(48), stride=2, padding=1,
                       out_dtype=bf16)
    low_level_feat, feat = f2, f4

    # ---- ASPP branches 1-4 (conv+BN+ReLU) ----
    a1 = conv2d_bn_act(feat, params['aspp1'], *_bn_fold(32), padding=0,
                       out_dtype=bf16)
    a2 = conv2d_bn_act(feat, params['aspp2'], *_bn_fold(32),
                       dilation=6, padding=6, out_dtype=bf16)
    a3 = conv2d_bn_act(feat, params['aspp3'], *_bn_fold(32),
                       dilation=12, padding=12, out_dtype=bf16)
    a4 = conv2d_bn_act(feat, params['aspp4'], *_bn_fold(32),
                       dilation=18, padding=18, out_dtype=bf16)

    # ---- image-pooling branch folded into a per-batch bias ----
    # GAP -> 1x1 conv -> BN -> ReLU is a (B,32) vector (upsampling a 1x1
    # source with align_corners=True is a pure broadcast), so its
    # contribution through Wproj[4*32:] is a per-batch additive term that is
    # applied before the projection BN scale.  Computed in plain JAX (tiny).
    Bf, Hf, Wf, Cb = a1.shape
    gp = jnp.mean(feat.astype(jnp.float32), axis=(1, 2))            # (B, 48)
    pool_s, pool_b = _bn_fold(32)
    a5 = jnp.maximum(gp @ params['aspp_pool'].reshape(48, 32) * pool_s
                     + pool_b, 0.0)                                  # (B, 32)
    Wproj = params['aspp_proj'].reshape(5 * Cb, 32)
    ps, pb = _bn_fold(32)
    eff_bias = (a5 @ Wproj[4 * Cb:]) * ps + pb                       # (B, 32)
    Mproj = Bf * Hf * Wf
    bias_rows = jnp.broadcast_to(eff_bias[:, None, :],
                                 (Bf, Hf * Wf, 32)).reshape(Mproj, 32)

    # Fused concat + 1x1 projection: sum_i branch_i @ Wproj[i*32:(i+1)*32]
    # with the image-pooling branch as the per-batch bias term.
    A_parts = [a.reshape(Mproj, Cb) for a in (a1, a2, a3, a4)]
    W_parts = [Wproj[i * Cb:(i + 1) * Cb] for i in range(4)]
    aspp_out = fused_matmul_bn_act(A_parts, W_parts, ps, bias_rows, relu=True,
                                   out_dtype=bf16)
    aspp_out = aspp_out.reshape(Bf, Hf, Wf, 32)
    # dropout(0.5): identity in eval mode

    # ---- decoder ----
    low = conv2d_bn_act(low_level_feat, params['dec_low'], *_bn_fold(12),
                        padding=0, out_dtype=bf16)
    up = bilinear_upsample(aspp_out, low.shape[1], low.shape[2])     # bf16

    # dec1: 3x3 conv on concat([up, low]) -- two K-chunks, concat never built.
    A_up, Hd, Wd = _im2col(up, 3, 3, 1, 1, 1)
    A_low, _, _ = _im2col(low, 3, 3, 1, 1, 1)
    w1 = params['dec1'].reshape(9, 32 + 12, 32)
    W1_up = w1[:, :32, :].reshape(9 * 32, 32)
    W1_low = w1[:, 32:, :].reshape(9 * 12, 32)
    d1 = fused_matmul_bn_act([A_up, A_low], [W1_up, W1_low], *_bn_fold(32),
                             relu=True, out_dtype=bf16)
    d1 = d1.reshape(B, Hd, Wd, 32)

    # dec2 (3x3 + BN + ReLU) fused with the dec_cls 1x1+bias head: d2 never
    # hits HBM and there is no standalone (M,1) store.
    A2, _, _ = _im2col(d1, 3, 3, 1, 1, 1)
    logits = fused_matmul_bn_act(A2, params['dec2'].reshape(9 * 32, 32),
                                 *_bn_fold(32), relu=True,
                                 out_dtype=jnp.float32,
                                 head_w=params['dec_cls'].reshape(32, 1),
                                 head_b=params['dec_cls_b'])
    logits = logits.reshape(B, Hd, Wd, 1)

    # ---- final upsample to input resolution (bilinear, align_corners=True) --
    out = bilinear_upsample(logits, H, W)
    return jnp.transpose(out, (0, 3, 1, 2))  # NHWC -> NCHW


if __name__ == "__main__":
    key = jax.random.PRNGKey(0)
    k_param, k_input = jax.random.split(key)
    params = init_params(k_param)
    # PyTorch-convention NCHW input: batch=2, in_ch=3, 64x64 spatial
    x = jax.random.normal(k_input, (2, 3, 64, 64), jnp.float32)

    fwd = jax.jit(deeplab_forward)
    out = fwd(params, x)
    out = jax.block_until_ready(out)

    assert out.shape == (2, 1, 64, 64), out.shape
    assert out.dtype == jnp.float32
    assert bool(jnp.all(jnp.isfinite(out)))
    print("KERNEL_OK")
</pallas_src>

<mosaic_0001>
module attributes {stable_mosaic.version = 11 : i64} {
  func.func @_matmul_bn_act_kernel(%arg0: i32, %arg1: memref<512x27xbf16, #tpu.memory_space<vmem>>, %arg2: memref<27x16xbf16, #tpu.memory_space<vmem>>, %arg3: memref<1x16xf32, #tpu.memory_space<vmem>>, %arg4: memref<1x16xf32, #tpu.memory_space<vmem>>, %arg5: memref<512x16xbf16, #tpu.memory_space<vmem>>) attributes {dimension_semantics = [#tpu.dimension_semantics<parallel>], iteration_bounds = array<i64: 4>, scalar_prefetch = 0 : i64, scratch_operands = 0 : i64, tpu.core_type = #tpu.core_type<tc>, window_params = [{transform_indices = @transform_0, window_bounds = array<i64: 512, 27>}, {pipeline_mode = #tpu.pipeline_mode<synchronous>, transform_indices = @transform_1, window_bounds = array<i64: 27, 16>}, {pipeline_mode = #tpu.pipeline_mode<synchronous>, transform_indices = @transform_2, window_bounds = array<i64: 1, 16>}, {pipeline_mode = #tpu.pipeline_mode<synchronous>, transform_indices = @transform_3, window_bounds = array<i64: 1, 16>}, {transform_indices = @transform_4, window_bounds = array<i64: 512, 16>}]} {
    %c0 = arith.constant 0 : index
    %c0_0 = arith.constant 0 : index
    %0 = vector.load %arg1[%c0, %c0_0] : memref<512x27xbf16, #tpu.memory_space<vmem>>, vector<512x27xbf16>
    %c0_1 = arith.constant 0 : index
    %c0_2 = arith.constant 0 : index
    %1 = vector.load %arg2[%c0_1, %c0_2] : memref<27x16xbf16, #tpu.memory_space<vmem>>, vector<27x16xbf16>
    %cst = arith.constant dense<0.000000e+00> : vector<512x16xf32>
    %2 = tpu.matmul %0, %1, %cst {dimension_numbers = #tpu.dot_dimension_numbers<[1], [0], [0], [1], [0, 0, 1, 1], [], []>} : vector<512x27xbf16>, vector<27x16xbf16>, vector<512x16xf32> -> vector<512x16xf32>
    %c0_3 = arith.constant 0 : index
    %c0_4 = arith.constant 0 : index
    %3 = vector.load %arg3[%c0_3, %c0_4] : memref<1x16xf32, #tpu.memory_space<vmem>>, vector<1x16xf32>
    %4 = vector.broadcast %3 : vector<1x16xf32> to vector<512x16xf32>
    %5 = arith.mulf %2, %4 : vector<512x16xf32>
    %c0_5 = arith.constant 0 : index
    %c0_6 = arith.constant 0 : index
    %6 = vector.load %arg4[%c0_5, %c0_6] : memref<1x16xf32, #tpu.memory_space<vmem>>, vector<1x16xf32>
    %7 = vector.broadcast %6 : vector<1x16xf32> to vector<512x16xf32>
    %8 = arith.addf %5, %7 : vector<512x16xf32>
    %cst_7 = arith.constant 0.000000e+00 : f32
    %9 = vector.broadcast %cst_7 : f32 to vector<512x16xf32>
    %10 = arith.maximumf %8, %9 : vector<512x16xf32>
    %11 = arith.truncf %10 : vector<512x16xf32> to vector<512x16xbf16>
    %c0_8 = arith.constant 0 : index
    %c0_9 = arith.constant 0 : index
    %12 = vector.load %arg5[%c0_8, %c0_9] : memref<512x16xbf16, #tpu.memory_space<vmem>>, vector<512x16xbf16>
    tpu.vector_store %arg5[%c0_8, %c0_9], %11 {strides = array<i32>} : memref<512x16xbf16, #tpu.memory_space<vmem>>, vector<512x16xbf16>,
    return
  }
  func.func @transform_0(%arg0: i32) -> (i32, i32) {
    %c0_i32 = arith.constant 0 : i32
    %c0_i32_0 = arith.constant 0 : i32
    return %arg0, %c0_i32 : i32, i32
  }
  func.func @transform_1(%arg0: i32) -> (i32, i32) {
    %c0_i32 = arith.constant 0 : i32
    %c0_i32_0 = arith.constant 0 : i32
    %c0_i32_1 = arith.constant 0 : i32
    return %c0_i32, %c0_i32_0 : i32, i32
  }
  func.func @transform_2(%arg0: i32) -> (i32, i32) {
    %c0_i32 = arith.constant 0 : i32
    %c0_i32_0 = arith.constant 0 : i32
    %c0_i32_1 = arith.constant 0 : i32
    return %c0_i32, %c0_i32_0 : i32, i32
  }
  func.func @transform_3(%arg0: i32) -> (i32, i32) {
    %c0_i32 = arith.constant 0 : i32
    %c0_i32_0 = arith.constant 0 : i32
    %c0_i32_1 = arith.constant 0 : i32
    return %c0_i32, %c0_i32_0 : i32, i32
  }
  func.func @transform_4(%arg0: i32) -> (i32, i32) {
    %c0_i32 = arith.constant 0 : i32
    %c0_i32_0 = arith.constant 0 : i32
    return %arg0, %c0_i32 : i32, i32
  }
}

module attributes {stable_mosaic.version = 11 : i64} {
  func.func @_matmul_bn_act_kernel(%arg0: i32, %arg1: memref<256x24xbf16, #tpu.memory_space<vmem>>, %arg2: memref<24x12xbf16, #tpu.memory_space<vmem>>, %arg3: memref<1x12xf32, #tpu.memory_space<vmem>>, %arg4: memref<1x12xf32, #tpu.memory_space<vmem>>, %arg5: memref<256x12xbf16, #tpu.memory_space<vmem>>) attributes {dimension_semantics = [#tpu.dimension_semantics<parallel>], iteration_bounds = array<i64: 2>, scalar_prefetch = 0 : i64, scratch_operands = 0 : i64, tpu.core_type = #tpu.core_type<tc>, window_params = [{transform_indices = @transform_0, window_bounds = array<i64: 256, 24>}, {pipeline_mode = #tpu.pipeline_mode<synchronous>, transform_indices = @transform_1, window_bounds = array<i64: 24, 12>}, {pipeline_mode = #tpu.pipeline_mode<synchronous>, transform_indices = @transform_2, window_bounds = array<i64: 1, 12>}, {pipeline_mode = #tpu.pipeline_mode<synchronous>, transform_indices = @transform_3, window_bounds = array<i64: 1, 12>}, {transform_indices = @transform_4, window_bounds = array<i64: 256, 12>}]} {
    %c0 = arith.constant 0 : index
    %c0_0 = arith.constant 0 : index
    %0 = vector.load %arg1[%c0, %c0_0] : memref<256x24xbf16, #tpu.memory_space<vmem>>, vector<256x24xbf16>
    %c0_1 = arith.constant 0 : index
    %c0_2 = arith.constant 0 : index
    %1 = vector.load %arg2[%c0_1, %c0_2] : memref<24x12xbf16, #tpu.memory_space<vmem>>, vector<24x12xbf16>
    %cst = arith.constant dense<0.000000e+00> : vector<256x12xf32>
    %2 = tpu.matmul %0, %1, %cst {dimension_numbers = #tpu.dot_dimension_numbers<[1], [0], [0], [1], [0, 0, 1, 1], [], []>} : vector<256x24xbf16>, vector<24x12xbf16>, vector<256x12xf32> -> vector<256x12xf32>
    %c0_3 = arith.constant 0 : index
    %c0_4 = arith.constant 0 : index
    %3 = vector.load %arg3[%c0_3, %c0_4] : memref<1x12xf32, #tpu.memory_space<vmem>>, vector<1x12xf32>
    %4 = vector.broadcast %3 : vector<1x12xf32> to vector<256x12xf32>
    %5 = arith.mulf %2, %4 : vector<256x12xf32>
    %c0_5 = arith.constant 0 : index
    %c0_6 = arith.constant 0 : index
    %6 = vector.load %arg4[%c0_5, %c0_6] : memref<1x12xf32, #tpu.memory_space<vmem>>, vector<1x12xf32>
    %7 = vector.broadcast %6 : vector<1x12xf32> to vector<256x12xf32>
    %8 = arith.addf %5, %7 : vector<256x12xf32>
    %cst_7 = arith.constant 0.000000e+00 : f32
    %9 = vector.broadcast %cst_7 : f32 to vector<256x12xf32>
    %10 = arith.maximumf %8, %9 : vector<256x12xf32>
    %11 = arith.truncf %10 : vector<256x12xf32> to vector<256x12xbf16>
    %c0_8 = arith.constant 0 : index
    %c0_9 = arith.constant 0 : index
    %12 = vector.load %arg5[%c0_8, %c0_9] : memref<256x12xbf16, #tpu.memory_space<vmem>>, vector<256x12xbf16>
    tpu.vector_store %arg5[%c0_8, %c0_9], %11 {strides = array<i32>} : memref<256x12xbf16, #tpu.memory_space<vmem>>, vector<256x12xbf16>,
    return
  }
  func.func @transform_0(%arg0: i32) -> (i32, i32) {
    %c0_i32 = arith.constant 0 : i32
    %c0_i32_0 = arith.constant 0 : i32
    return %arg0, %c0_i32 : i32, i32
  }
  func.func @transform_1(%arg0: i32) -> (i32, i32) {
    %c0_i32 = arith.constant 0 : i32
    %c0_i32_0 = arith.constant 0 : i32
    %c0_i32_1 = arith.constant 0 : i32
    return %c0_i32, %c0_i32_0 : i32, i32
  }
  func.func @transform_2(%arg0: i32) -> (i32, i32) {
    %c0_i32 = arith.constant 0 : i32
    %c0_i32_0 = arith.constant 0 : i32
    %c0_i32_1 = arith.constant 0 : i32
    return %c0_i32, %c0_i32_0 : i32, i32
  }
  func.func @transform_3(%arg0: i32) -> (i32, i32) {
    %c0_i32 = arith.constant 0 : i32
    %c0_i32_0 = arith.constant 0 : i32
    %c0_i32_1 = arith.constant 0 : i32
    return %c0_i32, %c0_i32_0 : i32, i32
  }
  func.func @transform_4(%arg0: i32) -> (i32, i32) {
    %c0_i32 = arith.constant 0 : i32
    %c0_i32_0 = arith.constant 0 : i32
    return %arg0, %c0_i32 : i32, i32
  }
}

module attributes {stable_mosaic.version = 11 : i64} {
  func.func @_matmul_bn_act_kernel(%arg0: i32, %arg1: memref<256x144xbf16, #tpu.memory_space<vmem>>, %arg2: memref<144x24xbf16, #tpu.memory_space<vmem>>, %arg3: memref<1x24xf32, #tpu.memory_space<vmem>>, %arg4: memref<1x24xf32, #tpu.memory_space<vmem>>, %arg5: memref<256x24xbf16, #tpu.memory_space<vmem>>) attributes {dimension_semantics = [#tpu.dimension_semantics<parallel>], iteration_bounds = array<i64: 2>, scalar_prefetch = 0 : i64, scratch_operands = 0 : i64, tpu.core_type = #tpu.core_type<tc>, window_params = [{transform_indices = @transform_0, window_bounds = array<i64: 256, 144>}, {pipeline_mode = #tpu.pipeline_mode<synchronous>, transform_indices = @transform_1, window_bounds = array<i64: 144, 24>}, {pipeline_mode = #tpu.pipeline_mode<synchronous>, transform_indices = @transform_2, window_bounds = array<i64: 1, 24>}, {pipeline_mode = #tpu.pipeline_mode<synchronous>, transform_indices = @transform_3, window_bounds = array<i64: 1, 24>}, {transform_indices = @transform_4, window_bounds = array<i64: 256, 24>}]} {
    %c0 = arith.constant 0 : index
    %c0_0 = arith.constant 0 : index
    %0 = vector.load %arg1[%c0, %c0_0] : memref<256x144xbf16, #tpu.memory_space<vmem>>, vector<256x144xbf16>
    %c0_1 = arith.constant 0 : index
    %c0_2 = arith.constant 0 : index
    %1 = vector.load %arg2[%c0_1, %c0_2] : memref<144x24xbf16, #tpu.memory_space<vmem>>, vector<144x24xbf16>
    %cst = arith.constant dense<0.000000e+00> : vector<256x24xf32>
    %2 = tpu.matmul %0, %1, %cst {dimension_numbers = #tpu.dot_dimension_numbers<[1], [0], [0], [1], [0, 0, 1, 1], [], []>} : vector<256x144xbf16>, vector<144x24xbf16>, vector<256x24xf32> -> vector<256x24xf32>
    %c0_3 = arith.constant 0 : index
    %c0_4 = arith.constant 0 : index
    %3 = vector.load %arg3[%c0_3, %c0_4] : memref<1x24xf32, #tpu.memory_space<vmem>>, vector<1x24xf32>
    %4 = vector.broadcast %3 : vector<1x24xf32> to vector<256x24xf32>
    %5 = arith.mulf %2, %4 : vector<256x24xf32>
    %c0_5 = arith.constant 0 : index
    %c0_6 = arith.constant 0 : index
    %6 = vector.load %arg4[%c0_5, %c0_6] : memref<1x24xf32, #tpu.memory_space<vmem>>, vector<1x24xf32>
    %7 = vector.broadcast %6 : vector<1x24xf32> to vector<256x24xf32>
    %8 = arith.addf %5, %7 : vector<256x24xf32>
    %cst_7 = arith.constant 0.000000e+00 : f32
    %9 = vector.broadcast %cst_7 : f32 to vector<256x24xf32>
    %10 = arith.maximumf %8, %9 : vector<256x24xf32>
    %11 = arith.truncf %10 : vector<256x24xf32> to vector<256x24xbf16>
    %c0_8 = arith.constant 0 : index
    %c0_9 = arith.constant 0 : index
    %12 = vector.load %arg5[%c0_8, %c0_9] : memref<256x24xbf16, #tpu.memory_space<vmem>>, vector<256x24xbf16>
    tpu.vector_store %arg5[%c0_8, %c0_9], %11 {strides = array<i32>} : memref<256x24xbf16, #tpu.memory_space<vmem>>, vector<256x24xbf16>,
    return
  }
  func.func @transform_0(%arg0: i32) -> (i32, i32) {
    %c0_i32 = arith.constant 0 : i32
    %c0_i32_0 = arith.constant 0 : i32
    return %arg0, %c0_i32 : i32, i32
  }
  func.func @transform_1(%arg0: i32) -> (i32, i32) {
    %c0_i32 = arith.constant 0 : i32
    %c0_i32_0 = arith.constant 0 : i32
    %c0_i32_1 = arith.constant 0 : i32
    return %c0_i32, %c0_i32_0 : i32, i32
  }
  func.func @transform_2(%arg0: i32) -> (i32, i32) {
    %c0_i32 = arith.constant 0 : i32
    %c0_i32_0 = arith.constant 0 : i32
    %c0_i32_1 = arith.constant 0 : i32
    return %c0_i32, %c0_i32_0 : i32, i32
  }
  func.func @transform_3(%arg0: i32) -> (i32, i32) {
    %c0_i32 = arith.constant 0 : i32
    %c0_i32_0 = arith.constant 0 : i32
    %c0_i32_1 = arith.constant 0 : i32
    return %c0_i32, %c0_i32_0 : i32, i32
  }
  func.func @transform_4(%arg0: i32) -> (i32, i32) {
    %c0_i32 = arith.constant 0 : i32
    %c0_i32_0 = arith.constant 0 : i32
    return %arg0, %c0_i32 : i32, i32
  }
}

module attributes {stable_mosaic.version = 11 : i64} {
  func.func @_matmul_bn_act_kernel(%arg0: i32, %arg1: memref<64x216xbf16, #tpu.memory_space<vmem>>, %arg2: memref<216x32xbf16, #tpu.memory_space<vmem>>, %arg3: memref<1x32xf32, #tpu.memory_space<vmem>>, %arg4: memref<1x32xf32, #tpu.memory_space<vmem>>, %arg5: memref<64x32xbf16, #tpu.memory_space<vmem>>) attributes {dimension_semantics = [#tpu.dimension_semantics<parallel>], iteration_bounds = array<i64: 2>, scalar_prefetch = 0 : i64, scratch_operands = 0 : i64, tpu.core_type = #tpu.core_type<tc>, window_params = [{transform_indices = @transform_0, window_bounds = array<i64: 64, 216>}, {pipeline_mode = #tpu.pipeline_mode<synchronous>, transform_indices = @transform_1, window_bounds = array<i64: 216, 32>}, {pipeline_mode = #tpu.pipeline_mode<synchronous>, transform_indices = @transform_2, window_bounds = array<i64: 1, 32>}, {pipeline_mode = #tpu.pipeline_mode<synchronous>, transform_indices = @transform_3, window_bounds = array<i64: 1, 32>}, {transform_indices = @transform_4, window_bounds = array<i64: 64, 32>}]} {
    %c0 = arith.constant 0 : index
    %c0_0 = arith.constant 0 : index
    %0 = vector.load %arg1[%c0, %c0_0] : memref<64x216xbf16, #tpu.memory_space<vmem>>, vector<64x216xbf16>
    %c0_1 = arith.constant 0 : index
    %c0_2 = arith.constant 0 : index
    %1 = vector.load %arg2[%c0_1, %c0_2] : memref<216x32xbf16, #tpu.memory_space<vmem>>, vector<216x32xbf16>
    %cst = arith.constant dense<0.000000e+00> : vector<64x32xf32>
    %2 = tpu.matmul %0, %1, %cst {dimension_numbers = #tpu.dot_dimension_numbers<[1], [0], [0], [1], [0, 0, 1, 1], [], []>} : vector<64x216xbf16>, vector<216x32xbf16>, vector<64x32xf32> -> vector<64x32xf32>
    %c0_3 = arith.constant 0 : index
    %c0_4 = arith.constant 0 : index
    %3 = vector.load %arg3[%c0_3, %c0_4] : memref<1x32xf32, #tpu.memory_space<vmem>>, vector<1x32xf32>
    %4 = vector.broadcast %3 : vector<1x32xf32> to vector<64x32xf32>
    %5 = arith.mulf %2, %4 : vector<64x32xf32>
    %c0_5 = arith.constant 0 : index
    %c0_6 = arith.constant 0 : index
    %6 = vector.load %arg4[%c0_5, %c0_6] : memref<1x32xf32, #tpu.memory_space<vmem>>, vector<1x32xf32>
    %7 = vector.broadcast %6 : vector<1x32xf32> to vector<64x32xf32>
    %8 = arith.addf %5, %7 : vector<64x32xf32>
    %cst_7 = arith.constant 0.000000e+00 : f32
    %9 = vector.broadcast %cst_7 : f32 to vector<64x32xf32>
    %10 = arith.maximumf %8, %9 : vector<64x32xf32>
    %11 = arith.truncf %10 : vector<64x32xf32> to vector<64x32xbf16>
    %c0_8 = arith.constant 0 : index
    %c0_9 = arith.constant 0 : index
    %12 = vector.load %arg5[%c0_8, %c0_9] : memref<64x32xbf16, #tpu.memory_space<vmem>>, vector<64x32xbf16>
    tpu.vector_store %arg5[%c0_8, %c0_9], %11 {strides = array<i32>} : memref<64x32xbf16, #tpu.memory_space<vmem>>, vector<64x32xbf16>,
    return
  }
  func.func @transform_0(%arg0: i32) -> (i32, i32) {
    %c0_i32 = arith.constant 0 : i32
    %c0_i32_0 = arith.constant 0 : i32
    return %arg0, %c0_i32 : i32, i32
  }
  func.func @transform_1(%arg0: i32) -> (i32, i32) {
    %c0_i32 = arith.constant 0 : i32
    %c0_i32_0 = arith.constant 0 : i32
    %c0_i32_1 = arith.constant 0 : i32
    return %c0_i32, %c0_i32_0 : i32, i32
  }
  func.func @transform_2(%arg0: i32) -> (i32, i32) {
    %c0_i32 = arith.constant 0 : i32
    %c0_i32_0 = arith.constant 0 : i32
    %c0_i32_1 = arith.constant 0 : i32
    return %c0_i32, %c0_i32_0 : i32, i32
  }
  func.func @transform_3(%arg0: i32) -> (i32, i32) {
    %c0_i32 = arith.constant 0 : i32
    %c0_i32_0 = arith.constant 0 : i32
    %c0_i32_1 = arith.constant 0 : i32
    return %c0_i32, %c0_i32_0 : i32, i32
  }
  func.func @transform_4(%arg0: i32) -> (i32, i32) {
    %c0_i32 = arith.constant 0 : i32
    %c0_i32_0 = arith.constant 0 : i32
    return %arg0, %c0_i32 : i32, i32
  }
}

module attributes {stable_mosaic.version = 11 : i64} {
  func.func @_matmul_bn_act_kernel(%arg0: i32, %arg1: memref<16x288xbf16, #tpu.memory_space<vmem>>, %arg2: memref<288x48xbf16, #tpu.memory_space<vmem>>, %arg3: memref<1x48xf32, #tpu.memory_space<vmem>>, %arg4: memref<1x48xf32, #tpu.memory_space<vmem>>, %arg5: memref<16x48xbf16, #tpu.memory_space<vmem>>) attributes {dimension_semantics = [#tpu.dimension_semantics<parallel>], iteration_bounds = array<i64: 2>, scalar_prefetch = 0 : i64, scratch_operands = 0 : i64, tpu.core_type = #tpu.core_type<tc>, window_params = [{transform_indices = @transform_0, window_bounds = array<i64: 16, 288>}, {pipeline_mode = #tpu.pipeline_mode<synchronous>, transform_indices = @transform_1, window_bounds = array<i64: 288, 48>}, {pipeline_mode = #tpu.pipeline_mode<synchronous>, transform_indices = @transform_2, window_bounds = array<i64: 1, 48>}, {pipeline_mode = #tpu.pipeline_mode<synchronous>, transform_indices = @transform_3, window_bounds = array<i64: 1, 48>}, {transform_indices = @transform_4, window_bounds = array<i64: 16, 48>}]} {
    %c0 = arith.constant 0 : index
    %c0_0 = arith.constant 0 : index
    %0 = vector.load %arg1[%c0, %c0_0] : memref<16x288xbf16, #tpu.memory_space<vmem>>, vector<16x288xbf16>
    %c0_1 = arith.constant 0 : index
    %c0_2 = arith.constant 0 : index
    %1 = vector.load %arg2[%c0_1, %c0_2] : memref<288x48xbf16, #tpu.memory_space<vmem>>, vector<288x48xbf16>
    %cst = arith.constant dense<0.000000e+00> : vector<16x48xf32>
    %2 = tpu.matmul %0, %1, %cst {dimension_numbers = #tpu.dot_dimension_numbers<[1], [0], [0], [1], [0, 0, 1, 1], [], []>} : vector<16x288xbf16>, vector<288x48xbf16>, vector<16x48xf32> -> vector<16x48xf32>
    %c0_3 = arith.constant 0 : index
    %c0_4 = arith.constant 0 : index
    %3 = vector.load %arg3[%c0_3, %c0_4] : memref<1x48xf32, #tpu.memory_space<vmem>>, vector<1x48xf32>
    %4 = vector.broadcast %3 : vector<1x48xf32> to vector<16x48xf32>
    %5 = arith.mulf %2, %4 : vector<16x48xf32>
    %c0_5 = arith.constant 0 : index
    %c0_6 = arith.constant 0 : index
    %6 = vector.load %arg4[%c0_5, %c0_6] : memref<1x48xf32, #tpu.memory_space<vmem>>, vector<1x48xf32>
    %7 = vector.broadcast %6 : vector<1x48xf32> to vector<16x48xf32>
    %8 = arith.addf %5, %7 : vector<16x48xf32>
    %cst_7 = arith.constant 0.000000e+00 : f32
    %9 = vector.broadcast %cst_7 : f32 to vector<16x48xf32>
    %10 = arith.maximumf %8, %9 : vector<16x48xf32>
    %11 = arith.truncf %10 : vector<16x48xf32> to vector<16x48xbf16>
    %c0_8 = arith.constant 0 : index
    %c0_9 = arith.constant 0 : index
    %12 = vector.load %arg5[%c0_8, %c0_9] : memref<16x48xbf16, #tpu.memory_space<vmem>>, vector<16x48xbf16>
    tpu.vector_store %arg5[%c0_8, %c0_9], %11 {strides = array<i32>} : memref<16x48xbf16, #tpu.memory_space<vmem>>, vector<16x48xbf16>,
    return
  }
  func.func @transform_0(%arg0: i32) -> (i32, i32) {
    %c0_i32 = arith.constant 0 : i32
    %c0_i32_0 = arith.constant 0 : i32
    return %arg0, %c0_i32 : i32, i32
  }
  func.func @transform_1(%arg0: i32) -> (i32, i32) {
    %c0_i32 = arith.constant 0 : i32
    %c0_i32_0 = arith.constant 0 : i32
    %c0_i32_1 = arith.constant 0 : i32
    return %c0_i32, %c0_i32_0 : i32, i32
  }
  func.func @transform_2(%arg0: i32) -> (i32, i32) {
    %c0_i32 = arith.constant 0 : i32
    %c0_i32_0 = arith.constant 0 : i32
    %c0_i32_1 = arith.constant 0 : i32
    return %c0_i32, %c0_i32_0 : i32, i32
  }
  func.func @transform_3(%arg0: i32) -> (i32, i32) {
    %c0_i32 = arith.constant 0 : i32
    %c0_i32_0 = arith.constant 0 : i32
    %c0_i32_1 = arith.constant 0 : i32
    return %c0_i32, %c0_i32_0 : i32, i32
  }
  func.func @transform_4(%arg0: i32) -> (i32, i32) {
    %c0_i32 = arith.constant 0 : i32
    %c0_i32_0 = arith.constant 0 : i32
    return %arg0, %c0_i32 : i32, i32
  }
}

module attributes {stable_mosaic.version = 11 : i64} {
  func.func @_matmul_bn_act_kernel(%arg0: i32, %arg1: memref<16x432xbf16, #tpu.memory_space<vmem>>, %arg2: memref<432x32xbf16, #tpu.memory_space<vmem>>, %arg3: memref<1x32xf32, #tpu.memory_space<vmem>>, %arg4: memref<1x32xf32, #tpu.memory_space<vmem>>, %arg5: memref<16x32xbf16, #tpu.memory_space<vmem>>) attributes {dimension_semantics = [#tpu.dimension_semantics<parallel>], iteration_bounds = array<i64: 2>, scalar_prefetch = 0 : i64, scratch_operands = 0 : i64, tpu.core_type = #tpu.core_type<tc>, window_params = [{transform_indices = @transform_0, window_bounds = array<i64: 16, 432>}, {pipeline_mode = #tpu.pipeline_mode<synchronous>, transform_indices = @transform_1, window_bounds = array<i64: 432, 32>}, {pipeline_mode = #tpu.pipeline_mode<synchronous>, transform_indices = @transform_2, window_bounds = array<i64: 1, 32>}, {pipeline_mode = #tpu.pipeline_mode<synchronous>, transform_indices = @transform_3, window_bounds = array<i64: 1, 32>}, {transform_indices = @transform_4, window_bounds = array<i64: 16, 32>}]} {
    %c0 = arith.constant 0 : index
    %c0_0 = arith.constant 0 : index
    %0 = vector.load %arg1[%c0, %c0_0] : memref<16x432xbf16, #tpu.memory_space<vmem>>, vector<16x432xbf16>
    %c0_1 = arith.constant 0 : index
    %c0_2 = arith.constant 0 : index
    %1 = vector.load %arg2[%c0_1, %c0_2] : memref<432x32xbf16, #tpu.memory_space<vmem>>, vector<432x32xbf16>
    %cst = arith.constant dense<0.000000e+00> : vector<16x32xf32>
    %2 = tpu.matmul %0, %1, %cst {dimension_numbers = #tpu.dot_dimension_numbers<[1], [0], [0], [1], [0, 0, 1, 1], [], []>} : vector<16x432xbf16>, vector<432x32xbf16>, vector<16x32xf32> -> vector<16x32xf32>
    %c0_3 = arith.constant 0 : index
    %c0_4 = arith.constant 0 : index
    %3 = vector.load %arg3[%c0_3, %c0_4] : memref<1x32xf32, #tpu.memory_space<vmem>>, vector<1x32xf32>
    %4 = vector.broadcast %3 : vector<1x32xf32> to vector<16x32xf32>
    %5 = arith.mulf %2, %4 : vector<16x32xf32>
    %c0_5 = arith.constant 0 : index
    %c0_6 = arith.constant 0 : index
    %6 = vector.load %arg4[%c0_5, %c0_6] : memref<1x32xf32, #tpu.memory_space<vmem>>, vector<1x32xf32>
    %7 = vector.broadcast %6 : vector<1x32xf32> to vector<16x32xf32>
    %8 = arith.addf %5, %7 : vector<16x32xf32>
    %cst_7 = arith.constant 0.000000e+00 : f32
    %9 = vector.broadcast %cst_7 : f32 to vector<16x32xf32>
    %10 = arith.maximumf %8, %9 : vector<16x32xf32>
    %11 = arith.truncf %10 : vector<16x32xf32> to vector<16x32xbf16>
    %c0_8 = arith.constant 0 : index
    %c0_9 = arith.constant 0 : index
    %12 = vector.load %arg5[%c0_8, %c0_9] : memref<16x32xbf16, #tpu.memory_space<vmem>>, vector<16x32xbf16>
    tpu.vector_store %arg5[%c0_8, %c0_9], %11 {strides = array<i32>} : memref<16x32xbf16, #tpu.memory_space<vmem>>, vector<16x32xbf16>,
    return
  }
  func.func @transform_0(%arg0: i32) -> (i32, i32) {
    %c0_i32 = arith.constant 0 : i32
    %c0_i32_0 = arith.constant 0 : i32
    return %arg0, %c0_i32 : i32, i32
  }
  func.func @transform_1(%arg0: i32) -> (i32, i32) {
    %c0_i32 = arith.constant 0 : i32
    %c0_i32_0 = arith.constant 0 : i32
    %c0_i32_1 = arith.constant 0 : i32
    return %c0_i32, %c0_i32_0 : i32, i32
  }
  func.func @transform_2(%arg0: i32) -> (i32, i32) {
    %c0_i32 = arith.constant 0 : i32
    %c0_i32_0 = arith.constant 0 : i32
    %c0_i32_1 = arith.constant 0 : i32
    return %c0_i32, %c0_i32_0 : i32, i32
  }
  func.func @transform_3(%arg0: i32) -> (i32, i32) {
    %c0_i32 = arith.constant 0 : i32
    %c0_i32_0 = arith.constant 0 : i32
    %c0_i32_1 = arith.constant 0 : i32
    return %c0_i32, %c0_i32_0 : i32, i32
  }
  func.func @transform_4(%arg0: i32) -> (i32, i32) {
    %c0_i32 = arith.constant 0 : i32
    %c0_i32_0 = arith.constant 0 : i32
    return %arg0, %c0_i32 : i32, i32
  }
}

module attributes {stable_mosaic.version = 11 : i64} {
  func.func @_matmul_bn_act_kernel(%arg0: i32, %arg1: memref<16x32xbf16, #tpu.memory_space<vmem>>, %arg2: memref<16x32xbf16, #tpu.memory_space<vmem>>, %arg3: memref<16x32xbf16, #tpu.memory_space<vmem>>, %arg4: memref<16x32xbf16, #tpu.memory_space<vmem>>, %arg5: memref<32x32xbf16, #tpu.memory_space<vmem>>, %arg6: memref<32x32xbf16, #tpu.memory_space<vmem>>, %arg7: memref<32x32xbf16, #tpu.memory_space<vmem>>, %arg8: memref<32x32xbf16, #tpu.memory_space<vmem>>, %arg9: memref<1x32xf32, #tpu.memory_space<vmem>>, %arg10: memref<16x32xf32, #tpu.memory_space<vmem>>, %arg11: memref<16x32xbf16, #tpu.memory_space<vmem>>) attributes {dimension_semantics = [#tpu.dimension_semantics<parallel>], iteration_bounds = array<i64: 2>, scalar_prefetch = 0 : i64, scratch_operands = 0 : i64, tpu.core_type = #tpu.core_type<tc>, window_params = [{transform_indices = @transform_0, window_bounds = array<i64: 16, 32>}, {transform_indices = @transform_1, window_bounds = array<i64: 16, 32>}, {transform_indices = @transform_2, window_bounds = array<i64: 16, 32>}, {transform_indices = @transform_3, window_bounds = array<i64: 16, 32>}, {pipeline_mode = #tpu.pipeline_mode<synchronous>, transform_indices = @transform_4, window_bounds = array<i64: 32, 32>}, {pipeline_mode = #tpu.pipeline_mode<synchronous>, transform_indices = @transform_5, window_bounds = array<i64: 32, 32>}, {pipeline_mode = #tpu.pipeline_mode<synchronous>, transform_indices = @transform_6, window_bounds = array<i64: 32, 32>}, {pipeline_mode = #tpu.pipeline_mode<synchronous>, transform_indices = @transform_7, window_bounds = array<i64: 32, 32>}, {pipeline_mode = #tpu.pipeline_mode<synchronous>, transform_indices = @transform_8, window_bounds = array<i64: 1, 32>}, {transform_indices = @transform_9, window_bounds = array<i64: 16, 32>}, {transform_indices = @transform_10, window_bounds = array<i64: 16, 32>}]} {
    %c0 = arith.constant 0 : index
    %c0_0 = arith.constant 0 : index
    %0 = vector.load %arg1[%c0, %c0_0] : memref<16x32xbf16, #tpu.memory_space<vmem>>, vector<16x32xbf16>
    %c0_1 = arith.constant 0 : index
    %c0_2 = arith.constant 0 : index
    %1 = vector.load %arg5[%c0_1, %c0_2] : memref<32x32xbf16, #tpu.memory_space<vmem>>, vector<32x32xbf16>
    %cst = arith.constant dense<0.000000e+00> : vector<16x32xf32>
    %2 = tpu.matmul %0, %1, %cst {dimension_numbers = #tpu.dot_dimension_numbers<[1], [0], [0], [1], [0, 0, 1, 1], [], []>} : vector<16x32xbf16>, vector<32x32xbf16>, vector<16x32xf32> -> vector<16x32xf32>
    %c0_3 = arith.constant 0 : index
    %c0_4 = arith.constant 0 : index
    %3 = vector.load %arg2[%c0_3, %c0_4] : memref<16x32xbf16, #tpu.memory_space<vmem>>, vector<16x32xbf16>
    %c0_5 = arith.constant 0 : index
    %c0_6 = arith.constant 0 : index
    %4 = vector.load %arg6[%c0_5, %c0_6] : memref<32x32xbf16, #tpu.memory_space<vmem>>, vector<32x32xbf16>
    %cst_7 = arith.constant dense<0.000000e+00> : vector<16x32xf32>
    %5 = tpu.matmul %3, %4, %cst_7 {dimension_numbers = #tpu.dot_dimension_numbers<[1], [0], [0], [1], [0, 0, 1, 1], [], []>} : vector<16x32xbf16>, vector<32x32xbf16>, vector<16x32xf32> -> vector<16x32xf32>
    %6 = arith.addf %2, %5 : vector<16x32xf32>
    %c0_8 = arith.constant 0 : index
    %c0_9 = arith.constant 0 : index
    %7 = vector.load %arg3[%c0_8, %c0_9] : memref<16x32xbf16, #tpu.memory_space<vmem>>, vector<16x32xbf16>
    %c0_10 = arith.constant 0 : index
    %c0_11 = arith.constant 0 : index
    %8 = vector.load %arg7[%c0_10, %c0_11] : memref<32x32xbf16, #tpu.memory_space<vmem>>, vector<32x32xbf16>
    %cst_12 = arith.constant dense<0.000000e+00> : vector<16x32xf32>
    %9 = tpu.matmul %7, %8, %cst_12 {dimension_numbers = #tpu.dot_dimension_numbers<[1], [0], [0], [1], [0, 0, 1, 1], [], []>} : vector<16x32xbf16>, vector<32x32xbf16>, vector<16x32xf32> -> vector<16x32xf32>
    %10 = arith.addf %6, %9 : vector<16x32xf32>
    %c0_13 = arith.constant 0 : index
    %c0_14 = arith.constant 0 : index
    %11 = vector.load %arg4[%c0_13, %c0_14] : memref<16x32xbf16, #tpu.memory_space<vmem>>, vector<16x32xbf16>
    %c0_15 = arith.constant 0 : index
    %c0_16 = arith.constant 0 : index
    %12 = vector.load %arg8[%c0_15, %c0_16] : memref<32x32xbf16, #tpu.memory_space<vmem>>, vector<32x32xbf16>
    %cst_17 = arith.constant dense<0.000000e+00> : vector<16x32xf32>
    %13 = tpu.matmul %11, %12, %cst_17 {dimension_numbers = #tpu.dot_dimension_numbers<[1], [0], [0], [1], [0, 0, 1, 1], [], []>} : vector<16x32xbf16>, vector<32x32xbf16>, vector<16x32xf32> -> vector<16x32xf32>
    %14 = arith.addf %10, %13 : vector<16x32xf32>
    %c0_18 = arith.constant 0 : index
    %c0_19 = arith.constant 0 : index
    %15 = vector.load %arg9[%c0_18, %c0_19] : memref<1x32xf32, #tpu.memory_space<vmem>>, vector<1x32xf32>
    %16 = vector.broadcast %15 : vector<1x32xf32> to vector<16x32xf32>
    %17 = arith.mulf %14, %16 : vector<16x32xf32>
    %c0_20 = arith.constant 0 : index
    %c0_21 = arith.constant 0 : index
    %18 = vector.load %arg10[%c0_20, %c0_21] : memref<16x32xf32, #tpu.memory_space<vmem>>, vector<16x32xf32>
    %19 = arith.addf %17, %18 : vector<16x32xf32>
    %cst_22 = arith.constant 0.000000e+00 : f32
    %20 = vector.broadcast %cst_22 : f32 to vector<16x32xf32>
    %21 = arith.maximumf %19, %20 : vector<16x32xf32>
    %22 = arith.truncf %21 : vector<16x32xf32> to vector<16x32xbf16>
    %c0_23 = arith.constant 0 : index
    %c0_24 = arith.constant 0 : index
    %23 = vector.load %arg11[%c0_23, %c0_24] : memref<16x32xbf16, #tpu.memory_space<vmem>>, vector<16x32xbf16>
    tpu.vector_store %arg11[%c0_23, %c0_24], %22 {strides = array<i32>} : memref<16x32xbf16, #tpu.memory_space<vmem>>, vector<16x32xbf16>,
    return
  }
  func.func @transform_0(%arg0: i32) -> (i32, i32) {
    %c0_i32 = arith.constant 0 : i32
    %c0_i32_0 = arith.constant 0 : i32
    return %arg0, %c0_i32 : i32, i32
  }
  func.func @transform_1(%arg0: i32) -> (i32, i32) {
    %c0_i32 = arith.constant 0 : i32
    %c0_i32_0 = arith.constant 0 : i32
    return %arg0, %c0_i32 : i32, i32
  }
  func.func @transform_2(%arg0: i32) -> (i32, i32) {
    %c0_i32 = arith.constant 0 : i32
    %c0_i32_0 = arith.constant 0 : i32
    return %arg0, %c0_i32 : i32, i32
  }
  func.func @transform_3(%arg0: i32) -> (i32, i32) {
    %c0_i32 = arith.constant 0 : i32
    %c0_i32_0 = arith.constant 0 : i32
    return %arg0, %c0_i32 : i32, i32
  }
  func.func @transform_4(%arg0: i32) -> (i32, i32) {
    %c0_i32 = arith.constant 0 : i32
    %c0_i32_0 = arith.constant 0 : i32
    %c0_i32_1 = arith.constant 0 : i32
    return %c0_i32, %c0_i32_0 : i32, i32
  }
  func.func @transform_5(%arg0: i32) -> (i32, i32) {
    %c0_i32 = arith.constant 0 : i32
    %c0_i32_0 = arith.constant 0 : i32
    %c0_i32_1 = arith.constant 0 : i32
    return %c0_i32, %c0_i32_0 : i32, i32
  }
  func.func @transform_6(%arg0: i32) -> (i32, i32) {
    %c0_i32 = arith.constant 0 : i32
    %c0_i32_0 = arith.constant 0 : i32
    %c0_i32_1 = arith.constant 0 : i32
    return %c0_i32, %c0_i32_0 : i32, i32
  }
  func.func @transform_7(%arg0: i32) -> (i32, i32) {
    %c0_i32 = arith.constant 0 : i32
    %c0_i32_0 = arith.constant 0 : i32
    %c0_i32_1 = arith.constant 0 : i32
    return %c0_i32, %c0_i32_0 : i32, i32
  }
  func.func @transform_8(%arg0: i32) -> (i32, i32) {
    %c0_i32 = arith.constant 0 : i32
    %c0_i32_0 = arith.constant 0 : i32
    %c0_i32_1 = arith.constant 0 : i32
    return %c0_i32, %c0_i32_0 : i32, i32
  }
  func.func @transform_9(%arg0: i32) -> (i32, i32) {
    %c0_i32 = arith.constant 0 : i32
    %c0_i32_0 = arith.constant 0 : i32
    return %arg0, %c0_i32 : i32, i32
  }
  func.func @transform_10(%arg0: i32) -> (i32, i32) {
    %c0_i32 = arith.constant 0 : i32
    %c0_i32_0 = arith.constant 0 : i32
    return %arg0, %c0_i32 : i32, i32
  }
}

module attributes {stable_mosaic.version = 11 : i64} {
  func.func @_matmul_bn_act_kernel(%arg0: i32, %arg1: memref<16x48xbf16, #tpu.memory_space<vmem>>, %arg2: memref<48x32xbf16, #tpu.memory_space<vmem>>, %arg3: memref<1x32xf32, #tpu.memory_space<vmem>>, %arg4: memref<1x32xf32, #tpu.memory_space<vmem>>, %arg5: memref<16x32xbf16, #tpu.memory_space<vmem>>) attributes {dimension_semantics = [#tpu.dimension_semantics<parallel>], iteration_bounds = array<i64: 2>, scalar_prefetch = 0 : i64, scratch_operands = 0 : i64, tpu.core_type = #tpu.core_type<tc>, window_params = [{transform_indices = @transform_0, window_bounds = array<i64: 16, 48>}, {pipeline_mode = #tpu.pipeline_mode<synchronous>, transform_indices = @transform_1, window_bounds = array<i64: 48, 32>}, {pipeline_mode = #tpu.pipeline_mode<synchronous>, transform_indices = @transform_2, window_bounds = array<i64: 1, 32>}, {pipeline_mode = #tpu.pipeline_mode<synchronous>, transform_indices = @transform_3, window_bounds = array<i64: 1, 32>}, {transform_indices = @transform_4, window_bounds = array<i64: 16, 32>}]} {
    %c0 = arith.constant 0 : index
    %c0_0 = arith.constant 0 : index
    %0 = vector.load %arg1[%c0, %c0_0] : memref<16x48xbf16, #tpu.memory_space<vmem>>, vector<16x48xbf16>
    %c0_1 = arith.constant 0 : index
    %c0_2 = arith.constant 0 : index
    %1 = vector.load %arg2[%c0_1, %c0_2] : memref<48x32xbf16, #tpu.memory_space<vmem>>, vector<48x32xbf16>
    %cst = arith.constant dense<0.000000e+00> : vector<16x32xf32>
    %2 = tpu.matmul %0, %1, %cst {dimension_numbers = #tpu.dot_dimension_numbers<[1], [0], [0], [1], [0, 0, 1, 1], [], []>} : vector<16x48xbf16>, vector<48x32xbf16>, vector<16x32xf32> -> vector<16x32xf32>
    %c0_3 = arith.constant 0 : index
    %c0_4 = arith.constant 0 : index
    %3 = vector.load %arg3[%c0_3, %c0_4] : memref<1x32xf32, #tpu.memory_space<vmem>>, vector<1x32xf32>
    %4 = vector.broadcast %3 : vector<1x32xf32> to vector<16x32xf32>
    %5 = arith.mulf %2, %4 : vector<16x32xf32>
    %c0_5 = arith.constant 0 : index
    %c0_6 = arith.constant 0 : index
    %6 = vector.load %arg4[%c0_5, %c0_6] : memref<1x32xf32, #tpu.memory_space<vmem>>, vector<1x32xf32>
    %7 = vector.broadcast %6 : vector<1x32xf32> to vector<16x32xf32>
    %8 = arith.addf %5, %7 : vector<16x32xf32>
    %cst_7 = arith.constant 0.000000e+00 : f32
    %9 = vector.broadcast %cst_7 : f32 to vector<16x32xf32>
    %10 = arith.maximumf %8, %9 : vector<16x32xf32>
    %11 = arith.truncf %10 : vector<16x32xf32> to vector<16x32xbf16>
    %c0_8 = arith.constant 0 : index
    %c0_9 = arith.constant 0 : index
    %12 = vector.load %arg5[%c0_8, %c0_9] : memref<16x32xbf16, #tpu.memory_space<vmem>>, vector<16x32xbf16>
    tpu.vector_store %arg5[%c0_8, %c0_9], %11 {strides = array<i32>} : memref<16x32xbf16, #tpu.memory_space<vmem>>, vector<16x32xbf16>,
    return
  }
  func.func @transform_0(%arg0: i32) -> (i32, i32) {
    %c0_i32 = arith.constant 0 : i32
    %c0_i32_0 = arith.constant 0 : i32
    return %arg0, %c0_i32 : i32, i32
  }
  func.func @transform_1(%arg0: i32) -> (i32, i32) {
    %c0_i32 = arith.constant 0 : i32
    %c0_i32_0 = arith.constant 0 : i32
    %c0_i32_1 = arith.constant 0 : i32
    return %c0_i32, %c0_i32_0 : i32, i32
  }
  func.func @transform_2(%arg0: i32) -> (i32, i32) {
    %c0_i32 = arith.constant 0 : i32
    %c0_i32_0 = arith.constant 0 : i32
    %c0_i32_1 = arith.constant 0 : i32
    return %c0_i32, %c0_i32_0 : i32, i32
  }
  func.func @transform_3(%arg0: i32) -> (i32, i32) {
    %c0_i32 = arith.constant 0 : i32
    %c0_i32_0 = arith.constant 0 : i32
    %c0_i32_1 = arith.constant 0 : i32
    return %c0_i32, %c0_i32_0 : i32, i32
  }
  func.func @transform_4(%arg0: i32) -> (i32, i32) {
    %c0_i32 = arith.constant 0 : i32
    %c0_i32_0 = arith.constant 0 : i32
    return %arg0, %c0_i32 : i32, i32
  }
}

module attributes {stable_mosaic.version = 11 : i64} {
  func.func @_bilerp_kernel(%arg0: i32, %arg1: memref<32x512xbf16, #tpu.memory_space<vmem>>, %arg2: memref<32x512xbf16, #tpu.memory_space<vmem>>, %arg3: memref<32x512xbf16, #tpu.memory_space<vmem>>, %arg4: memref<32x512xbf16, #tpu.memory_space<vmem>>, %arg5: memref<32x1xf32, #tpu.memory_space<vmem>>, %arg6: memref<1x512xf32, #tpu.memory_space<vmem>>, %arg7: memref<32x512xbf16, #tpu.memory_space<vmem>>) attributes {dimension_semantics = [#tpu.dimension_semantics<arbitrary>], iteration_bounds = array<i64: 1>, scalar_prefetch = 0 : i64, scratch_operands = 0 : i64, tpu.core_type = #tpu.core_type<tc>, window_params = [{pipeline_mode = #tpu.pipeline_mode<synchronous>, transform_indices = @transform_0, window_bounds = array<i64: 32, 512>}, {pipeline_mode = #tpu.pipeline_mode<synchronous>, transform_indices = @transform_1, window_bounds = array<i64: 32, 512>}, {pipeline_mode = #tpu.pipeline_mode<synchronous>, transform_indices = @transform_2, window_bounds = array<i64: 32, 512>}, {pipeline_mode = #tpu.pipeline_mode<synchronous>, transform_indices = @transform_3, window_bounds = array<i64: 32, 512>}, {pipeline_mode = #tpu.pipeline_mode<synchronous>, transform_indices = @transform_4, window_bounds = array<i64: 32, 1>}, {pipeline_mode = #tpu.pipeline_mode<synchronous>, transform_indices = @transform_5, window_bounds = array<i64: 1, 512>}, {pipeline_mode = #tpu.pipeline_mode<synchronous>, transform_indices = @transform_6, window_bounds = array<i64: 32, 512>}]} {
    %c0 = arith.constant 0 : index
    %c0_0 = arith.constant 0 : index
    %0 = vector.load %arg5[%c0, %c0_0] : memref<32x1xf32, #tpu.memory_space<vmem>>, vector<32x1xf32>
    %c0_1 = arith.constant 0 : index
    %c0_2 = arith.constant 0 : index
    %1 = vector.load %arg6[%c0_1, %c0_2] : memref<1x512xf32, #tpu.memory_space<vmem>>, vector<1x512xf32>
    %cst = arith.constant 1.000000e+00 : f32
    %2 = vector.broadcast %cst : f32 to vector<32x1xf32>
    %3 = arith.subf %2, %0 : vector<32x1xf32>
    %cst_3 = arith.constant 1.000000e+00 : f32
    %4 = vector.broadcast %cst_3 : f32 to vector<1x512xf32>
    %5 = arith.subf %4, %1 : vector<1x512xf32>
    %c0_4 = arith.constant 0 : index
    %c0_5 = arith.constant 0 : index
    %6 = vector.load %arg1[%c0_4, %c0_5] : memref<32x512xbf16, #tpu.memory_space<vmem>>, vector<32x512xbf16>
    %7 = arith.extf %6 : vector<32x512xbf16> to vector<32x512xf32>
    %c0_6 = arith.constant 0 : index
    %c0_7 = arith.constant 0 : index
    %8 = vector.load %arg2[%c0_6, %c0_7] : memref<32x512xbf16, #tpu.memory_space<vmem>>, vector<32x512xbf16>
    %9 = arith.extf %8 : vector<32x512xbf16> to vector<32x512xf32>
    %c0_8 = arith.constant 0 : index
    %c0_9 = arith.constant 0 : index
    %10 = vector.load %arg3[%c0_8, %c0_9] : memref<32x512xbf16, #tpu.memory_space<vmem>>, vector<32x512xbf16>
    %11 = arith.extf %10 : vector<32x512xbf16> to vector<32x512xf32>
    %c0_10 = arith.constant 0 : index
    %c0_11 = arith.constant 0 : index
    %12 = vector.load %arg4[%c0_10, %c0_11] : memref<32x512xbf16, #tpu.memory_space<vmem>>, vector<32x512xbf16>
    %13 = arith.extf %12 : vector<32x512xbf16> to vector<32x512xf32>
    %14 = vector.broadcast %5 : vector<1x512xf32> to vector<32x512xf32>
    %15 = arith.mulf %7, %14 : vector<32x512xf32>
    %16 = vector.broadcast %1 : vector<1x512xf32> to vector<32x512xf32>
    %17 = arith.mulf %9, %16 : vector<32x512xf32>
    %18 = arith.addf %15, %17 : vector<32x512xf32>
    %19 = vector.broadcast %3 : vector<32x1xf32> to vector<32x512xf32>
    %20 = arith.mulf %19, %18 : vector<32x512xf32>
    %21 = vector.broadcast %5 : vector<1x512xf32> to vector<32x512xf32>
    %22 = arith.mulf %11, %21 : vector<32x512xf32>
    %23 = vector.broadcast %1 : vector<1x512xf32> to vector<32x512xf32>
    %24 = arith.mulf %13, %23 : vector<32x512xf32>
    %25 = arith.addf %22, %24 : vector<32x512xf32>
    %26 = vector.broadcast %0 : vector<32x1xf32> to vector<32x512xf32>
    %27 = arith.mulf %26, %25 : vector<32x512xf32>
    %28 = arith.addf %20, %27 : vector<32x512xf32>
    %29 = arith.truncf %28 : vector<32x512xf32> to vector<32x512xbf16>
    %c0_12 = arith.constant 0 : index
    %c0_13 = arith.constant 0 : index
    %30 = vector.load %arg7[%c0_12, %c0_13] : memref<32x512xbf16, #tpu.memory_space<vmem>>, vector<32x512xbf16>
    tpu.vector_store %arg7[%c0_12, %c0_13], %29 {strides = array<i32>} : memref<32x512xbf16, #tpu.memory_space<vmem>>, vector<32x512xbf16>,
    return
  }
  func.func @transform_0(%arg0: i32) -> (i32, i32) {
    %c0_i32 = arith.constant 0 : i32
    %c0_i32_0 = arith.constant 0 : i32
    %c0_i32_1 = arith.constant 0 : i32
    return %c0_i32, %c0_i32_0 : i32, i32
  }
  func.func @transform_1(%arg0: i32) -> (i32, i32) {
    %c0_i32 = arith.constant 0 : i32
    %c0_i32_0 = arith.constant 0 : i32
    %c0_i32_1 = arith.constant 0 : i32
    return %c0_i32, %c0_i32_0 : i32, i32
  }
  func.func @transform_2(%arg0: i32) -> (i32, i32) {
    %c0_i32 = arith.constant 0 : i32
    %c0_i32_0 = arith.constant 0 : i32
    %c0_i32_1 = arith.constant 0 : i32
    return %c0_i32, %c0_i32_0 : i32, i32
  }
  func.func @transform_3(%arg0: i32) -> (i32, i32) {
    %c0_i32 = arith.constant 0 : i32
    %c0_i32_0 = arith.constant 0 : i32
    %c0_i32_1 = arith.constant 0 : i32
    return %c0_i32, %c0_i32_0 : i32, i32
  }
  func.func @transform_4(%arg0: i32) -> (i32, i32) {
    %c0_i32 = arith.constant 0 : i32
    %c0_i32_0 = arith.constant 0 : i32
    %c0_i32_1 = arith.constant 0 : i32
    return %c0_i32, %c0_i32_0 : i32, i32
  }
  func.func @transform_5(%arg0: i32) -> (i32, i32) {
    %c0_i32 = arith.constant 0 : i32
    %c0_i32_0 = arith.constant 0 : i32
    %c0_i32_1 = arith.constant 0 : i32
    return %c0_i32, %c0_i32_0 : i32, i32
  }
  func.func @transform_6(%arg0: i32) -> (i32, i32) {
    %c0_i32 = arith.constant 0 : i32
    %c0_i32_0 = arith.constant 0 : i32
    %c0_i32_1 = arith.constant 0 : i32
    return %c0_i32, %c0_i32_0 : i32, i32
  }
}

module attributes {stable_mosaic.version = 11 : i64} {
  func.func @_matmul_bn_act_kernel(%arg0: i32, %arg1: memref<256x288xbf16, #tpu.memory_space<vmem>>, %arg2: memref<256x108xbf16, #tpu.memory_space<vmem>>, %arg3: memref<288x32xbf16, #tpu.memory_space<vmem>>, %arg4: memref<108x32xbf16, #tpu.memory_space<vmem>>, %arg5: memref<1x32xf32, #tpu.memory_space<vmem>>, %arg6: memref<1x32xf32, #tpu.memory_space<vmem>>, %arg7: memref<256x32xbf16, #tpu.memory_space<vmem>>) attributes {dimension_semantics = [#tpu.dimension_semantics<parallel>], iteration_bounds = array<i64: 2>, scalar_prefetch = 0 : i64, scratch_operands = 0 : i64, tpu.core_type = #tpu.core_type<tc>, window_params = [{transform_indices = @transform_0, window_bounds = array<i64: 256, 288>}, {transform_indices = @transform_1, window_bounds = array<i64: 256, 108>}, {pipeline_mode = #tpu.pipeline_mode<synchronous>, transform_indices = @transform_2, window_bounds = array<i64: 288, 32>}, {pipeline_mode = #tpu.pipeline_mode<synchronous>, transform_indices = @transform_3, window_bounds = array<i64: 108, 32>}, {pipeline_mode = #tpu.pipeline_mode<synchronous>, transform_indices = @transform_4, window_bounds = array<i64: 1, 32>}, {pipeline_mode = #tpu.pipeline_mode<synchronous>, transform_indices = @transform_5, window_bounds = array<i64: 1, 32>}, {transform_indices = @transform_6, window_bounds = array<i64: 256, 32>}]} {
    %c0 = arith.constant 0 : index
    %c0_0 = arith.constant 0 : index
    %0 = vector.load %arg1[%c0, %c0_0] : memref<256x288xbf16, #tpu.memory_space<vmem>>, vector<256x288xbf16>
    %c0_1 = arith.constant 0 : index
    %c0_2 = arith.constant 0 : index
    %1 = vector.load %arg3[%c0_1, %c0_2] : memref<288x32xbf16, #tpu.memory_space<vmem>>, vector<288x32xbf16>
    %cst = arith.constant dense<0.000000e+00> : vector<256x32xf32>
    %2 = tpu.matmul %0, %1, %cst {dimension_numbers = #tpu.dot_dimension_numbers<[1], [0], [0], [1], [0, 0, 1, 1], [], []>} : vector<256x288xbf16>, vector<288x32xbf16>, vector<256x32xf32> -> vector<256x32xf32>
    %c0_3 = arith.constant 0 : index
    %c0_4 = arith.constant 0 : index
    %3 = vector.load %arg2[%c0_3, %c0_4] : memref<256x108xbf16, #tpu.memory_space<vmem>>, vector<256x108xbf16>
    %c0_5 = arith.constant 0 : index
    %c0_6 = arith.constant 0 : index
    %4 = vector.load %arg4[%c0_5, %c0_6] : memref<108x32xbf16, #tpu.memory_space<vmem>>, vector<108x32xbf16>
    %cst_7 = arith.constant dense<0.000000e+00> : vector<256x32xf32>
    %5 = tpu.matmul %3, %4, %cst_7 {dimension_numbers = #tpu.dot_dimension_numbers<[1], [0], [0], [1], [0, 0, 1, 1], [], []>} : vector<256x108xbf16>, vector<108x32xbf16>, vector<256x32xf32> -> vector<256x32xf32>
    %6 = arith.addf %2, %5 : vector<256x32xf32>
    %c0_8 = arith.constant 0 : index
    %c0_9 = arith.constant 0 : index
    %7 = vector.load %arg5[%c0_8, %c0_9] : memref<1x32xf32, #tpu.memory_space<vmem>>, vector<1x32xf32>
    %8 = vector.broadcast %7 : vector<1x32xf32> to vector<256x32xf32>
    %9 = arith.mulf %6, %8 : vector<256x32xf32>
    %c0_10 = arith.constant 0 : index
    %c0_11 = arith.constant 0 : index
    %10 = vector.load %arg6[%c0_10, %c0_11] : memref<1x32xf32, #tpu.memory_space<vmem>>, vector<1x32xf32>
    %11 = vector.broadcast %10 : vector<1x32xf32> to vector<256x32xf32>
    %12 = arith.addf %9, %11 : vector<256x32xf32>
    %cst_12 = arith.constant 0.000000e+00 : f32
    %13 = vector.broadcast %cst_12 : f32 to vector<256x32xf32>
    %14 = arith.maximumf %12, %13 : vector<256x32xf32>
    %15 = arith.truncf %14 : vector<256x32xf32> to vector<256x32xbf16>
    %c0_13 = arith.constant 0 : index
    %c0_14 = arith.constant 0 : index
    %16 = vector.load %arg7[%c0_13, %c0_14] : memref<256x32xbf16, #tpu.memory_space<vmem>>, vector<256x32xbf16>
    tpu.vector_store %arg7[%c0_13, %c0_14], %15 {strides = array<i32>} : memref<256x32xbf16, #tpu.memory_space<vmem>>, vector<256x32xbf16>,
    return
  }
  func.func @transform_0(%arg0: i32) -> (i32, i32) {
    %c0_i32 = arith.constant 0 : i32
    %c0_i32_0 = arith.constant 0 : i32
    return %arg0, %c0_i32 : i32, i32
  }
  func.func @transform_1(%arg0: i32) -> (i32, i32) {
    %c0_i32 = arith.constant 0 : i32
    %c0_i32_0 = arith.constant 0 : i32
    return %arg0, %c0_i32 : i32, i32
  }
  func.func @transform_2(%arg0: i32) -> (i32, i32) {
    %c0_i32 = arith.constant 0 : i32
    %c0_i32_0 = arith.constant 0 : i32
    %c0_i32_1 = arith.constant 0 : i32
    return %c0_i32, %c0_i32_0 : i32, i32
  }
  func.func @transform_3(%arg0: i32) -> (i32, i32) {
    %c0_i32 = arith.constant 0 : i32
    %c0_i32_0 = arith.constant 0 : i32
    %c0_i32_1 = arith.constant 0 : i32
    return %c0_i32, %c0_i32_0 : i32, i32
  }
  func.func @transform_4(%arg0: i32) -> (i32, i32) {
    %c0_i32 = arith.constant 0 : i32
    %c0_i32_0 = arith.constant 0 : i32
    %c0_i32_1 = arith.constant 0 : i32
    return %c0_i32, %c0_i32_0 : i32, i32
  }
  func.func @transform_5(%arg0: i32) -> (i32, i32) {
    %c0_i32 = arith.constant 0 : i32
    %c0_i32_0 = arith.constant 0 : i32
    %c0_i32_1 = arith.constant 0 : i32
    return %c0_i32, %c0_i32_0 : i32, i32
  }
  func.func @transform_6(%arg0: i32) -> (i32, i32) {
    %c0_i32 = arith.constant 0 : i32
    %c0_i32_0 = arith.constant 0 : i32
    return %arg0, %c0_i32 : i32, i32
  }
}

module attributes {stable_mosaic.version = 11 : i64} {
  func.func @_matmul_bn_act_kernel(%arg0: i32, %arg1: memref<256x288xbf16, #tpu.memory_space<vmem>>, %arg2: memref<288x32xbf16, #tpu.memory_space<vmem>>, %arg3: memref<1x32xf32, #tpu.memory_space<vmem>>, %arg4: memref<1x32xf32, #tpu.memory_space<vmem>>, %arg5: memref<32x1xbf16, #tpu.memory_space<vmem>>, %arg6: memref<1x1xf32, #tpu.memory_space<vmem>>, %arg7: memref<256x1xf32, #tpu.memory_space<vmem>>) attributes {dimension_semantics = [#tpu.dimension_semantics<parallel>], iteration_bounds = array<i64: 2>, scalar_prefetch = 0 : i64, scratch_operands = 0 : i64, tpu.core_type = #tpu.core_type<tc>, window_params = [{transform_indices = @transform_0, window_bounds = array<i64: 256, 288>}, {pipeline_mode = #tpu.pipeline_mode<synchronous>, transform_indices = @transform_1, window_bounds = array<i64: 288, 32>}, {pipeline_mode = #tpu.pipeline_mode<synchronous>, transform_indices = @transform_2, window_bounds = array<i64: 1, 32>}, {pipeline_mode = #tpu.pipeline_mode<synchronous>, transform_indices = @transform_3, window_bounds = array<i64: 1, 32>}, {pipeline_mode = #tpu.pipeline_mode<synchronous>, transform_indices = @transform_4, window_bounds = array<i64: 32, 1>}, {pipeline_mode = #tpu.pipeline_mode<synchronous>, transform_indices = @transform_5, window_bounds = array<i64: 1, 1>}, {transform_indices = @transform_6, window_bounds = array<i64: 256, 1>}]} {
    %c0 = arith.constant 0 : index
    %c0_0 = arith.constant 0 : index
    %0 = vector.load %arg1[%c0, %c0_0] : memref<256x288xbf16, #tpu.memory_space<vmem>>, vector<256x288xbf16>
    %c0_1 = arith.constant 0 : index
    %c0_2 = arith.constant 0 : index
    %1 = vector.load %arg2[%c0_1, %c0_2] : memref<288x32xbf16, #tpu.memory_space<vmem>>, vector<288x32xbf16>
    %cst = arith.constant dense<0.000000e+00> : vector<256x32xf32>
    %2 = tpu.matmul %0, %1, %cst {dimension_numbers = #tpu.dot_dimension_numbers<[1], [0], [0], [1], [0, 0, 1, 1], [], []>} : vector<256x288xbf16>, vector<288x32xbf16>, vector<256x32xf32> -> vector<256x32xf32>
    %c0_3 = arith.constant 0 : index
    %c0_4 = arith.constant 0 : index
    %3 = vector.load %arg3[%c0_3, %c0_4] : memref<1x32xf32, #tpu.memory_space<vmem>>, vector<1x32xf32>
    %4 = vector.broadcast %3 : vector<1x32xf32> to vector<256x32xf32>
    %5 = arith.mulf %2, %4 : vector<256x32xf32>
    %c0_5 = arith.constant 0 : index
    %c0_6 = arith.constant 0 : index
    %6 = vector.load %arg4[%c0_5, %c0_6] : memref<1x32xf32, #tpu.memory_space<vmem>>, vector<1x32xf32>
    %7 = vector.broadcast %6 : vector<1x32xf32> to vector<256x32xf32>
    %8 = arith.addf %5, %7 : vector<256x32xf32>
    %cst_7 = arith.constant 0.000000e+00 : f32
    %9 = vector.broadcast %cst_7 : f32 to vector<256x32xf32>
    %10 = arith.maximumf %8, %9 : vector<256x32xf32>
    %11 = arith.truncf %10 : vector<256x32xf32> to vector<256x32xbf16>
    %c0_8 = arith.constant 0 : index
    %c0_9 = arith.constant 0 : index
    %12 = vector.load %arg5[%c0_8, %c0_9] : memref<32x1xbf16, #tpu.memory_space<vmem>>, vector<32x1xbf16>
    %cst_10 = arith.constant dense<0.000000e+00> : vector<256x1xf32>
    %13 = tpu.matmul %11, %12, %cst_10 {dimension_numbers = #tpu.dot_dimension_numbers<[1], [0], [0], [1], [0, 0, 1, 1], [], []>} : vector<256x32xbf16>, vector<32x1xbf16>, vector<256x1xf32> -> vector<256x1xf32>
    %c0_11 = arith.constant 0 : index
    %c0_12 = arith.constant 0 : index
    %14 = vector.load %arg6[%c0_11, %c0_12] : memref<1x1xf32, #tpu.memory_space<vmem>>, vector<1x1xf32>
    %15 = vector.broadcast %14 : vector<1x1xf32> to vector<256x1xf32>
    %16 = arith.addf %13, %15 : vector<256x1xf32>
    %c0_13 = arith.constant 0 : index
    %c0_14 = arith.constant 0 : index
    %17 = vector.load %arg7[%c0_13, %c0_14] : memref<256x1xf32, #tpu.memory_space<vmem>>, vector<256x1xf32>
    tpu.vector_store %arg7[%c0_13, %c0_14], %16 {strides = array<i32>} : memref<256x1xf32, #tpu.memory_space<vmem>>, vector<256x1xf32>,
    return
  }
  func.func @transform_0(%arg0: i32) -> (i32, i32) {
    %c0_i32 = arith.constant 0 : i32
    %c0_i32_0 = arith.constant 0 : i32
    return %arg0, %c0_i32 : i32, i32
  }
  func.func @transform_1(%arg0: i32) -> (i32, i32) {
    %c0_i32 = arith.constant 0 : i32
    %c0_i32_0 = arith.constant 0 : i32
    %c0_i32_1 = arith.constant 0 : i32
    return %c0_i32, %c0_i32_0 : i32, i32
  }
  func.func @transform_2(%arg0: i32) -> (i32, i32) {
    %c0_i32 = arith.constant 0 : i32
    %c0_i32_0 = arith.constant 0 : i32
    %c0_i32_1 = arith.constant 0 : i32
    return %c0_i32, %c0_i32_0 : i32, i32
  }
  func.func @transform_3(%arg0: i32) -> (i32, i32) {
    %c0_i32 = arith.constant 0 : i32
    %c0_i32_0 = arith.constant 0 : i32
    %c0_i32_1 = arith.constant 0 : i32
    return %c0_i32, %c0_i32_0 : i32, i32
  }
  func.func @transform_4(%arg0: i32) -> (i32, i32) {
    %c0_i32 = arith.constant 0 : i32
    %c0_i32_0 = arith.constant 0 : i32
    %c0_i32_1 = arith.constant 0 : i32
    return %c0_i32, %c0_i32_0 : i32, i32
  }
  func.func @transform_5(%arg0: i32) -> (i32, i32) {
    %c0_i32 = arith.constant 0 : i32
    %c0_i32_0 = arith.constant 0 : i32
    %c0_i32_1 = arith.constant 0 : i32
    return %c0_i32, %c0_i32_0 : i32, i32
  }
  func.func @transform_6(%arg0: i32) -> (i32, i32) {
    %c0_i32 = arith.constant 0 : i32
    %c0_i32_0 = arith.constant 0 : i32
    return %arg0, %c0_i32 : i32, i32
  }
}

module attributes {stable_mosaic.version = 11 : i64} {
  func.func @_bilerp_kernel(%arg0: i32, %arg1: memref<2x4096xf32, #tpu.memory_space<vmem>>, %arg2: memref<2x4096xf32, #tpu.memory_space<vmem>>, %arg3: memref<2x4096xf32, #tpu.memory_space<vmem>>, %arg4: memref<2x4096xf32, #tpu.memory_space<vmem>>, %arg5: memref<1x4096xf32, #tpu.memory_space<vmem>>, %arg6: memref<1x4096xf32, #tpu.memory_space<vmem>>, %arg7: memref<2x4096xf32, #tpu.memory_space<vmem>>) attributes {dimension_semantics = [#tpu.dimension_semantics<arbitrary>], iteration_bounds = array<i64: 1>, scalar_prefetch = 0 : i64, scratch_operands = 0 : i64, tpu.core_type = #tpu.core_type<tc>, window_params = [{pipeline_mode = #tpu.pipeline_mode<synchronous>, transform_indices = @transform_0, window_bounds = array<i64: 2, 4096>}, {pipeline_mode = #tpu.pipeline_mode<synchronous>, transform_indices = @transform_1, window_bounds = array<i64: 2, 4096>}, {pipeline_mode = #tpu.pipeline_mode<synchronous>, transform_indices = @transform_2, window_bounds = array<i64: 2, 4096>}, {pipeline_mode = #tpu.pipeline_mode<synchronous>, transform_indices = @transform_3, window_bounds = array<i64: 2, 4096>}, {pipeline_mode = #tpu.pipeline_mode<synchronous>, transform_indices = @transform_4, window_bounds = array<i64: 1, 4096>}, {pipeline_mode = #tpu.pipeline_mode<synchronous>, transform_indices = @transform_5, window_bounds = array<i64: 1, 4096>}, {pipeline_mode = #tpu.pipeline_mode<synchronous>, transform_indices = @transform_6, window_bounds = array<i64: 2, 4096>}]} {
    %c0 = arith.constant 0 : index
    %c0_0 = arith.constant 0 : index
    %0 = vector.load %arg5[%c0, %c0_0] : memref<1x4096xf32, #tpu.memory_space<vmem>>, vector<1x4096xf32>
    %c0_1 = arith.constant 0 : index
    %c0_2 = arith.constant 0 : index
    %1 = vector.load %arg6[%c0_1, %c0_2] : memref<1x4096xf32, #tpu.memory_space<vmem>>, vector<1x4096xf32>
    %cst = arith.constant 1.000000e+00 : f32
    %2 = vector.broadcast %cst : f32 to vector<1x4096xf32>
    %3 = arith.subf %2, %0 : vector<1x4096xf32>
    %cst_3 = arith.constant 1.000000e+00 : f32
    %4 = vector.broadcast %cst_3 : f32 to vector<1x4096xf32>
    %5 = arith.subf %4, %1 : vector<1x4096xf32>
    %c0_4 = arith.constant 0 : index
    %c0_5 = arith.constant 0 : index
    %6 = vector.load %arg1[%c0_4, %c0_5] : memref<2x4096xf32, #tpu.memory_space<vmem>>, vector<2x4096xf32>
    %c0_6 = arith.constant 0 : index
    %c0_7 = arith.constant 0 : index
    %7 = vector.load %arg2[%c0_6, %c0_7] : memref<2x4096xf32, #tpu.memory_space<vmem>>, vector<2x4096xf32>
    %c0_8 = arith.constant 0 : index
    %c0_9 = arith.constant 0 : index
    %8 = vector.load %arg3[%c0_8, %c0_9] : memref<2x4096xf32, #tpu.memory_space<vmem>>, vector<2x4096xf32>
    %c0_10 = arith.constant 0 : index
    %c0_11 = arith.constant 0 : index
    %9 = vector.load %arg4[%c0_10, %c0_11] : memref<2x4096xf32, #tpu.memory_space<vmem>>, vector<2x4096xf32>
    %10 = vector.broadcast %5 : vector<1x4096xf32> to vector<2x4096xf32>
    %11 = arith.mulf %6, %10 : vector<2x4096xf32>
    %12 = vector.broadcast %1 : vector<1x4096xf32> to vector<2x4096xf32>
    %13 = arith.mulf %7, %12 : vector<2x4096xf32>
    %14 = arith.addf %11, %13 : vector<2x4096xf32>
    %15 = vector.broadcast %3 : vector<1x4096xf32> to vector<2x4096xf32>
    %16 = arith.mulf %15, %14 : vector<2x4096xf32>
    %17 = vector.broadcast %5 : vector<1x4096xf32> to vector<2x4096xf32>
    %18 = arith.mulf %8, %17 : vector<2x4096xf32>
    %19 = vector.broadcast %1 : vector<1x4096xf32> to vector<2x4096xf32>
    %20 = arith.mulf %9, %19 : vector<2x4096xf32>
    %21 = arith.addf %18, %20 : vector<2x4096xf32>
    %22 = vector.broadcast %0 : vector<1x4096xf32> to vector<2x4096xf32>
    %23 = arith.mulf %22, %21 : vector<2x4096xf32>
    %24 = arith.addf %16, %23 : vector<2x4096xf32>
    %c0_12 = arith.constant 0 : index
    %c0_13 = arith.constant 0 : index
    %25 = vector.load %arg7[%c0_12, %c0_13] : memref<2x4096xf32, #tpu.memory_space<vmem>>, vector<2x4096xf32>
    tpu.vector_store %arg7[%c0_12, %c0_13], %24 {strides = array<i32>} : memref<2x4096xf32, #tpu.memory_space<vmem>>, vector<2x4096xf32>,
    return
  }
  func.func @transform_0(%arg0: i32) -> (i32, i32) {
    %c0_i32 = arith.constant 0 : i32
    %c0_i32_0 = arith.constant 0 : i32
    %c0_i32_1 = arith.constant 0 : i32
    return %c0_i32, %c0_i32_0 : i32, i32
  }
  func.func @transform_1(%arg0: i32) -> (i32, i32) {
    %c0_i32 = arith.constant 0 : i32
    %c0_i32_0 = arith.constant 0 : i32
    %c0_i32_1 = arith.constant 0 : i32
    return %c0_i32, %c0_i32_0 : i32, i32
  }
  func.func @transform_2(%arg0: i32) -> (i32, i32) {
    %c0_i32 = arith.constant 0 : i32
    %c0_i32_0 = arith.constant 0 : i32
    %c0_i32_1 = arith.constant 0 : i32
    return %c0_i32, %c0_i32_0 : i32, i32
  }
  func.func @transform_3(%arg0: i32) -> (i32, i32) {
    %c0_i32 = arith.constant 0 : i32
    %c0_i32_0 = arith.constant 0 : i32
    %c0_i32_1 = arith.constant 0 : i32
    return %c0_i32, %c0_i32_0 : i32, i32
  }
  func.func @transform_4(%arg0: i32) -> (i32, i32) {
    %c0_i32 = arith.constant 0 : i32
    %c0_i32_0 = arith.constant 0 : i32
    %c0_i32_1 = arith.constant 0 : i32
    return %c0_i32, %c0_i32_0 : i32, i32
  }
  func.func @transform_5(%arg0: i32) -> (i32, i32) {
    %c0_i32 = arith.constant 0 : i32
    %c0_i32_0 = arith.constant 0 : i32
    %c0_i32_1 = arith.constant 0 : i32
    return %c0_i32, %c0_i32_0 : i32, i32
  }
  func.func @transform_6(%arg0: i32) -> (i32, i32) {
    %c0_i32 = arith.constant 0 : i32
    %c0_i32_0 = arith.constant 0 : i32
    %c0_i32_1 = arith.constant 0 : i32
    return %c0_i32, %c0_i32_0 : i32, i32
  }
}

</mosaic_0001>

<bundles_post_ra>
// kernel: deeplab_forward.14
= control target key start
LH: loop header
LB: loop body
LE: loop exit
PB: predicated region body
PF: predicated region fallthrough
CT: control target
= control target key end

     0   :  { %s1807_s15 = smov 0   ;;  %s2171_s0 = inlined_call_operand.vmem [shape: bf16[2048,27], index: 0, kind: input, shape index: {}]   ;;  %s2172_s1 = inlined_call_operand.vmem [shape: bf16[27,16], index: 1, kind: input, shape index: {}]   ;;  %s2173_s2 = inlined_call_operand.vmem [shape: f32[1,16], index: 2, kind: input, shape index: {}]   ;;  %s2174_s3 = inlined_call_operand.vmem [shape: f32[1,16], index: 3, kind: input, shape index: {}]   ;;  %s2175_s4 = inlined_call_operand.vmem [shape: bf16[2048,16], index: 4, kind: output, shape index: {}]  }
   0x1 LB: > { %s1417_s16 = sadd.s32 4294967295, %s1779_s15   ;;  %p1421_p0 = scmp.ge.s32.totalorder %s1779_s15, 1  ;;  %s1779_s15 = sphi %s1807_s15, %s14_s15  }
   0x2   : > { %p163_p1 = scmp.lt.s32.totalorder %s1779_s15, 5 }
   0x4   : > { %p164_p2 = pnand %p1421_p0, %p163_p1 }
   0x5   : > { %v1739_v0 = vld [vmem:[%s2172_s1] sm:$0xff] (!%p164_p2)   ;;  %vm538_vm0 = vcmask (!%p164_p2), 1044480   ;;  %v1740_v1 = vld [vmem:[%s2172_s1 + $0x8] sm:$0x3f] (!%p164_p2)   ;;  %vm539_vm1 = vcmask (!%p164_p2), 1045504   ;;  %s1422_s21 = sshll.u32 (!%p164_p2), %s1417_s16, 6 }
   0x6   : > { %167 = sbr.rel (%p164_p2) target bundleno = 302 (0x12e), region = 36  ;;  %1658 = vmatprep.subr.bf16.mxu0 (!%p164_p2), %v1739_v0  ;;  %1726 = vmatprep.subr.bf16.mxu1 (!%p164_p2), %v1739_v0  ;;  %v1781_v2 = vmov (!%p164_p2), 65535   ;;  %p190_p3 = scmp.lt.s32.totalorder (!%p164_p2), %s1422_s21, 255  ;;  %vm441_vm2 = vcmask (!%p164_p2), 220160   ;;  %v1898_v38 = vld [vmem:[%s2173_s2] ss:$0 sm:$0xff] (!%p164_p2) }
   0x7   : > { %1659 = vmatpush3.bf16.msra.mxu0 (!%p164_p2), %v1739_v0  ;;  %1728 = vmatpush3.bf16.msra.mxu1 (!%p164_p2), %v1739_v0  ;;  %v540_v3 = vsel (!%p164_p2), %vm538_vm0, 4294967295, %v1781_v2  ;;  %v1903_v40 = vld [vmem:[%s2174_s3] ss:$0 sm:$0xff] (!%p164_p2)  ;;  %vm1296_vm3 = vcmask (!%p164_p2), 125952  }
   0x8   : > { %v541_v4 = vsel (!%p164_p2), %vm539_vm1, %v540_v3, 0 }
   0x9   : > { %v543_v5 = vand.u32 (!%p164_p2), %v1740_v1, %v541_v4 }
   0xb   : > { %1660 = vmatprep.subr.bf16.mxu0 (!%p164_p2), %v543_v5  ;;  %1727 = vmatprep.subr.bf16.mxu1 (!%p164_p2), %v543_v5 }
   0xc   : > { %1661 = vmatpush3.bf16.msra.mxu0 (!%p164_p2), %v543_v5  ;;  %1729 = vmatpush3.bf16.msra.mxu1 (!%p164_p2), %v543_v5 }
   0xd   : > { %s2177_s21 = smov (!%p190_p3, %s1422_s21), 255 }
   0xe   : > { %s1423_s22 = sshll.u32 %s2177_s21, 2 }
   0xf   : > { %s1829_s25 = scalar_lea.vmem %s2171_s0, %s1423_s22  ;;  %s1923_s6 = scalar_lea.vmem %s2175_s4, %s1423_s22 }
  0x10   : > { %v1741_v6 = vld [vmem:[%s1829_s25] sm:$0xff]   ;;  %v1743_v8 = vld [vmem:[%s1829_s25 + $0x8] sm:$0xff]   ;;  %v1745_v10 = vld [vmem:[%s1829_s25 + $0x10] sm:$0xff]  }
  0x11   : > { %v1742_v7 = vld [vmem:[%s1829_s25 + $0x80] sm:$0xff]   ;;  %1662 = vmatprep.mubr.msk.bf16.mxu0 %vm441_vm2, %v1741_v6  ;;  %v1744_v9 = vld [vmem:[%s1829_s25 + $0x88] sm:$0xff]   ;;  %v1746_v11 = vld [vmem:[%s1829_s25 + $0x90] sm:$0xff]  }
  0x12   : > { %1694 = vmatprep.mubr.msk.bf16.mxu1 %vm441_vm2, %v1742_v7  ;;  %1663 = vmatmul.mubr.msk.bf16.vlgmr.msra.gmra.mrb[0].mxu0 %vm441_vm2, %v1743_v8  ;;  %v1747_v12 = vld [vmem:[%s1829_s25 + $0x18] sm:$0xff]   ;;  %v1749_v14 = vld [vmem:[%s1829_s25 + $0x20] sm:$0xff]   ;;  %v1751_v16 = vld [vmem:[%s1829_s25 + $0x28] sm:$0xff]  }
  0x13   : > { %1695 = vmatmul.mubr.msk.bf16.vlgmr.msra.gmra.mrb[0].mxu1 %vm441_vm2, %v1744_v9  ;;  %1666 = vmatprep.mubr.msk.bf16.mxu0 %vm441_vm2, %v1745_v10  ;;  %v1748_v13 = vld [vmem:[%s1829_s25 + $0x98] sm:$0xff]   ;;  %v1750_v15 = vld [vmem:[%s1829_s25 + $0xa0] sm:$0xff]   ;;  %v1752_v17 = vld [vmem:[%s1829_s25 + $0xa8] sm:$0xff]  }
  0x14   : > { %1698 = vmatprep.mubr.msk.bf16.mxu1 %vm441_vm2, %v1746_v11  ;;  %v1753_v18 = vld [vmem:[%s1829_s25 + $0x30] sm:$0xff]   ;;  %v1755_v20 = vld [vmem:[%s1829_s25 + $0x38] sm:$0xff]   ;;  %v1757_v22 = vld [vmem:[%s1829_s25 + $0x40] sm:$0xff]  }
  0x15   : > { %v1754_v19 = vld [vmem:[%s1829_s25 + $0xb0] sm:$0xff]   ;;  %v1756_v21 = vld [vmem:[%s1829_s25 + $0xb8] sm:$0xff]   ;;  %v1758_v23 = vld [vmem:[%s1829_s25 + $0xc0] sm:$0xff]  }
  0x16   : > { %v1759_v24 = vld [vmem:[%s1829_s25 + $0x48] sm:$0xff]   ;;  %v1761_v26 = vld [vmem:[%s1829_s25 + $0x50] sm:$0xff]   ;;  %v1763_v28 = vld [vmem:[%s1829_s25 + $0x58] sm:$0xff]  }
  0x17   : > { %v1760_v25 = vld [vmem:[%s1829_s25 + $0xc8] sm:$0xff]   ;;  %v1762_v27 = vld [vmem:[%s1829_s25 + $0xd0] sm:$0xff]   ;;  %v1764_v29 = vld [vmem:[%s1829_s25 + $0xd8] sm:$0xff]  }
  0x18   : > { %v1765_v30 = vld [vmem:[%s1829_s25 + $0x60] sm:$0xff]   ;;  %v1767_v32 = vld [vmem:[%s1829_s25 + $0x68] sm:$0xff]   ;;  %v1769_v34 = vld [vmem:[%s1829_s25 + $0x70] sm:$0xff]  }
  0x19   : > { %v1766_v31 = vld [vmem:[%s1829_s25 + $0xe0] sm:$0xff]   ;;  %v1768_v33 = vld [vmem:[%s1829_s25 + $0xe8] sm:$0xff]   ;;  %v1770_v35 = vld [vmem:[%s1829_s25 + $0xf0] sm:$0xff]  }
  0x1a   : > { %1667 = vmatmul.mubr.msk.bf16.gmra.mrb[4].mxu0 %vm441_vm2, %v1747_v12  ;;  %v1771_v36 = vld [vmem:[%s1829_s25 + $0x78] sm:$0xff]  }
  0x1b   : > { %1699 = vmatmul.mubr.msk.bf16.gmra.mrb[4].mxu1 %vm441_vm2, %v1748_v13  ;;  %1670 = vmatprep.mubr.msk.bf16.mxu0 %vm441_vm2, %v1749_v14  ;;  %v1772_v37 = vld [vmem:[%s1829_s25 + $0xf8] sm:$0xff]  }
  0x1c   : > { %1702 = vmatprep.mubr.msk.bf16.mxu1 %vm441_vm2, %v1750_v15 }
  0x22   : > { %1671 = vmatmul.mubr.msk.bf16.gmra.mrb[8].mxu0 %vm441_vm2, %v1751_v16 }
  0x23   : > { %1703 = vmatmul.mubr.msk.bf16.gmra.mrb[8].mxu1 %vm441_vm2, %v1752_v17  ;;  %1674 = vmatprep.mubr.msk.bf16.mxu0 %vm441_vm2, %v1753_v18 }
  0x24   : > { %1706 = vmatprep.mubr.msk.bf16.mxu1 %vm441_vm2, %v1754_v19 }
  0x2a   : > { %1675 = vmatmul.mubr.msk.bf16.gmra.mrb[12].mxu0 %vm441_vm2, %v1755_v20 }
  0x2b   : > { %1707 = vmatmul.mubr.msk.bf16.gmra.mrb[12].mxu1 %vm441_vm2, %v1756_v21  ;;  %1678 = vmatprep.mubr.msk.bf16.mxu0 %vm441_vm2, %v1757_v22 }
  0x2c   : > { %1710 = vmatprep.mubr.msk.bf16.mxu1 %vm441_vm2, %v1758_v23 }
  0x32   : > { %1679 = vmatmul.mubr.msk.bf16.gmra.mrb[16].mxu0 %vm441_vm2, %v1759_v24 }
  0x33   : > { %1711 = vmatmul.mubr.msk.bf16.gmra.mrb[16].mxu1 %vm441_vm2, %v1760_v25  ;;  %1682 = vmatprep.mubr.msk.bf16.mxu0 %vm441_vm2, %v1761_v26 }
  0x34   : > { %1714 = vmatprep.mubr.msk.bf16.mxu1 %vm441_vm2, %v1762_v27 }
  0x3a   : > { %1683 = vmatmul.mubr.msk.bf16.gmra.mrb[20].mxu0 %vm441_vm2, %v1763_v28 }
  0x3b   : > { %1715 = vmatmul.mubr.msk.bf16.gmra.mrb[20].mxu1 %vm441_vm2, %v1764_v29  ;;  %1686 = vmatprep.mubr.msk.bf16.mxu0 %vm441_vm2, %v1765_v30 }
  0x3c   : > { %1718 = vmatprep.mubr.msk.bf16.mxu1 %vm441_vm2, %v1766_v31 }
  0x42   : > { %1687 = vmatmul.mubr.msk.bf16.gmra.mrb[24].mxu0 %vm441_vm2, %v1767_v32 }
  0x43   : > { %1719 = vmatmul.mubr.msk.bf16.gmra.mrb[24].mxu1 %vm441_vm2, %v1768_v33  ;;  %1690 = vmatprep.mubr.msk.bf16.mxu0 %vm441_vm2, %v1769_v34 }
  0x44   : > { %1722 = vmatprep.mubr.msk.bf16.mxu1 %vm441_vm2, %v1770_v35 }
  0x4a   : > { %1691 = vmatmul.mubr.msk.bf16.gmra.mrb[28].mxu0 %vm441_vm2, %v1771_v36 }
  0x4b   : > { %1723 = vmatmul.mubr.msk.bf16.gmra.mrb[28].mxu1 %vm441_vm2, %v1772_v37 }
  0xe5   : > { %v1664_v39 = vpop.f32.mrb[0].mxu0 }
  0xe6   : > { %v843_v41 = vmul.f32 %v1664_v39, %v1898_v38  ;;  %v1696_v42 = vpop.f32.mrb[0].mxu1  ;;  %v579_v43 = vpop.f32.mrb[1].mxu0 }
  0xe7   : > { %v875_v44 = vmul.f32 %v1696_v42, %v1898_v38  ;;  %v841_v45 = vmul.f32 %v1898_v38, %v579_v43  ;;  %v707_v46 = vpop.f32.mrb[1].mxu1  ;;  %v1665_v47 = vpop.f32.mrb[2].mxu0 }
  0xe8   : > { %v914_v48 = vadd.f32 %v1903_v40, %v843_v41  ;;  %v873_v49 = vmul.f32 %v1898_v38, %v707_v46  ;;  %v844_v50 = vmul.f32 %v1665_v47, %v1898_v38  ;;  %v1697_v51 = vpop.f32.mrb[2].mxu1  ;;  %v582_v52 = vpop.f32.mrb[3].mxu0 }
  0xe9   : > { %v946_v53 = vadd.f32 %v1903_v40, %v875_v44  ;;  %v912_v54 = vadd.f32 %v1903_v40, %v841_v45  ;;  %v876_v55 = vmul.f32 %v1697_v51, %v1898_v38  ;;  %v842_v56 = vmul.f32 %v1898_v38, %v582_v52  ;;  %v710_v57 = vpop.f32.mrb[3].mxu1 }
  0xea   : > { %v978_v58 = vmax.f32 %v914_v48, 0.0  ;;  %v944_v59 = vadd.f32 %v1903_v40, %v873_v49  ;;  %v915_v60 = vadd.f32 %v1903_v40, %v844_v50  ;;  %v874_v61 = vmul.f32 %v1898_v38, %v710_v57 }
  0xeb   : > { %v1010_v62 = vmax.f32 %v946_v53, 0.0  ;;  %v976_v63 = vmax.f32 %v912_v54, 0.0  ;;  %v947_v0 = vadd.f32 %v1903_v40, %v876_v55  ;;  %v913_v1 = vadd.f32 %v1903_v40, %v842_v56 }
  0xec   : > { %v1562_v2 = vpack.c.bf16 %v978_v58, %v978_v58  ;;  %v1008_v3 = vmax.f32 %v944_v59, 0.0  ;;  %v979_v4 = vmax.f32 %v915_v60, 0.0  ;;  %v945_v5 = vadd.f32 %v1903_v40, %v874_v61 }
  0xed   : > { %v1594_v6 = vpack.c.bf16 %v1010_v62, %v1010_v62  ;;  %v1560_v7 = vpack.c.bf16 %v976_v63, %v976_v63  ;;  %v1011_v8 = vmax.f32 %v947_v0, 0.0  ;;  %v977_v9 = vmax.f32 %v913_v1, 0.0  ;;  %v1668_v10 = vpop.f32.mrb[4].mxu0 }
  0xee   : > { %1299 = vst.msk [vmem:[%s1923_s6 + $0x8] sm:$0xf] %vm1296_vm3, %v1562_v2  ;;  %v1592_v11 = vpack.c.bf16 %v1008_v3, %v1008_v3  ;;  %v1563_v12 = vpack.c.bf16 %v979_v4, %v979_v4  ;;  %v1009_v13 = vmax.f32 %v945_v5, 0.0  ;;  %v847_v14 = vmul.f32 %v1668_v10, %v1898_v38  ;;  %v1700_v15 = vpop.f32.mrb[4].mxu1  ;;  %v595_v16 = vpop.f32.mrb[5].mxu0 }
  0xef   : > { %1331 = vst.msk [vmem:[%s1923_s6 + $0x88] sm:$0xf] %vm1296_vm3, %v1594_v6  ;;  %1297 = vst.msk [vmem:[%s1923_s6] sm:$0xf] %vm1296_vm3, %v1560_v7  ;;  %v1595_v17 = vpack.c.bf16 %v1011_v8, %v1011_v8  ;;  %v1561_v18 = vpack.c.bf16 %v977_v9, %v977_v9  ;;  %v879_v19 = vmul.f32 %v1700_v15, %v1898_v38  ;;  %v723_v21 = vpop.f32.mrb[5].mxu1  ;;  %v1669_v22 = vpop.f32.mrb[6].mxu0 }
  0xf0   : > { %v845_v20 = vmul.f32 %v1898_v38, %v595_v16  ;;  %1329 = vst.msk [vmem:[%s1923_s6 + $0x80] sm:$0xf] %vm1296_vm3, %v1592_v11  ;;  %1300 = vst.msk [vmem:[%s1923_s6 + $0xc] sm:$0xf] %vm1296_vm3, %v1563_v12  ;;  %v1593_v23 = vpack.c.bf16 %v1009_v13, %v1009_v13  ;;  %v918_v24 = vadd.f32 %v1903_v40, %v847_v14  ;;  %v1701_v27 = vpop.f32.mrb[6].mxu1  ;;  %v598_v28 = vpop.f32.mrb[7].mxu0 }
  0xf1   : > { %v877_v25 = vmul.f32 %v1898_v38, %v723_v21  ;;  %v848_v26 = vmul.f32 %v1669_v22, %v1898_v38  ;;  %1332 = vst.msk [vmem:[%s1923_s6 + $0x8c] sm:$0xf] %vm1296_vm3, %v1595_v17  ;;  %1298 = vst.msk [vmem:[%s1923_s6 + $0x4] sm:$0xf] %vm1296_vm3, %v1561_v18  ;;  %v950_v29 = vadd.f32 %v1903_v40, %v879_v19  ;;  %v726_v33 = vpop.f32.mrb[7].mxu1 }
  0xf2   : > { %v916_v30 = vadd.f32 %v1903_v40, %v845_v20  ;;  %v880_v31 = vmul.f32 %v1701_v27, %v1898_v38  ;;  %v846_v32 = vmul.f32 %v1898_v38, %v598_v28  ;;  %1330 = vst.msk [vmem:[%s1923_s6 + $0x84] sm:$0xf] %vm1296_vm3, %v1593_v23  ;;  %v982_v34 = vmax.f32 %v918_v24, 0.0 }
  0xf3   : > { %v948_v35 = vadd.f32 %v1903_v40, %v877_v25  ;;  %v919_v36 = vadd.f32 %v1903_v40, %v848_v26  ;;  %v878_v37 = vmul.f32 %v1898_v38, %v726_v33  ;;  %v1014_v39 = vmax.f32 %v950_v29, 0.0 }
  0xf4   : > { %v980_v41 = vmax.f32 %v916_v30, 0.0  ;;  %v951_v42 = vadd.f32 %v1903_v40, %v880_v31  ;;  %v917_v43 = vadd.f32 %v1903_v40, %v846_v32  ;;  %v1566_v44 = vpack.c.bf16 %v982_v34, %v982_v34 }
  0xf5   : > { %v1012_v45 = vmax.f32 %v948_v35, 0.0  ;;  %v983_v46 = vmax.f32 %v919_v36, 0.0  ;;  %v949_v47 = vadd.f32 %v1903_v40, %v878_v37  ;;  %v1598_v48 = vpack.c.bf16 %v1014_v39, %v1014_v39  ;;  %v1672_v52 = vpop.f32.mrb[8].mxu0 }
  0xf6   : > { %v1564_v49 = vpack.c.bf16 %v980_v41, %v980_v41  ;;  %v1015_v50 = vmax.f32 %v951_v42, 0.0  ;;  %v981_v51 = vmax.f32 %v917_v43, 0.0  ;;  %1303 = vst.msk [vmem:[%s1923_s6 + $0x18] sm:$0xf] %vm1296_vm3, %v1566_v44  ;;  %v851_v56 = vmul.f32 %v1672_v52, %v1898_v38  ;;  %v1704_v57 = vpop.f32.mrb[8].mxu1  ;;  %v611_v58 = vpop.f32.mrb[9].mxu0 }
  0xf7   : > { %v1596_v53 = vpack.c.bf16 %v1012_v45, %v1012_v45  ;;  %v1567_v54 = vpack.c.bf16 %v983_v46, %v983_v46  ;;  %v1013_v55 = vmax.f32 %v949_v47, 0.0  ;;  %1335 = vst.msk [vmem:[%s1923_s6 + $0x98] sm:$0xf] %vm1296_vm3, %v1598_v48  ;;  %v883_v61 = vmul.f32 %v1704_v57, %v1898_v38  ;;  %v739_v63 = vpop.f32.mrb[9].mxu1  ;;  %v1673_v0 = vpop.f32.mrb[10].mxu0 }
  0xf8   : > { %1301 = vst.msk [vmem:[%s1923_s6 + $0x10] sm:$0xf] %vm1296_vm3, %v1564_v49  ;;  %v1599_v59 = vpack.c.bf16 %v1015_v50, %v1015_v50  ;;  %v1565_v60 = vpack.c.bf16 %v981_v51, %v981_v51  ;;  %v849_v62 = vmul.f32 %v1898_v38, %v611_v58  ;;  %v922_v2 = vadd.f32 %v1903_v40, %v851_v56  ;;  %v1705_v5 = vpop.f32.mrb[10].mxu1  ;;  %v614_v6 = vpop.f32.mrb[11].mxu0 }
  0xf9   : > { %1333 = vst.msk [vmem:[%s1923_s6 + $0x90] sm:$0xf] %vm1296_vm3, %v1596_v53  ;;  %1304 = vst.msk [vmem:[%s1923_s6 + $0x1c] sm:$0xf] %vm1296_vm3, %v1567_v54  ;;  %v1597_v1 = vpack.c.bf16 %v1013_v55, %v1013_v55  ;;  %v881_v3 = vmul.f32 %v1898_v38, %v739_v63  ;;  %v852_v4 = vmul.f32 %v1673_v0, %v1898_v38  ;;  %v742_v11 = vpop.f32.mrb[11].mxu1 }
  0xfa   : > { %1336 = vst.msk [vmem:[%s1923_s6 + $0x9c] sm:$0xf] %vm1296_vm3, %v1599_v59  ;;  %1302 = vst.msk [vmem:[%s1923_s6 + $0x14] sm:$0xf] %vm1296_vm3, %v1565_v60  ;;  %v954_v7 = vadd.f32 %v1903_v40, %v883_v61  ;;  %v920_v8 = vadd.f32 %v1903_v40, %v849_v62  ;;  %v884_v9 = vmul.f32 %v1705_v5, %v1898_v38  ;;  %v986_v12 = vmax.f32 %v922_v2, 0.0 }
  0xfb   : > { %v850_v10 = vmul.f32 %v1898_v38, %v614_v6  ;;  %1334 = vst.msk [vmem:[%s1923_s6 + $0x94] sm:$0xf] %vm1296_vm3, %v1597_v1  ;;  %v952_v13 = vadd.f32 %v1903_v40, %v881_v3  ;;  %v923_v14 = vadd.f32 %v1903_v40, %v852_v4  ;;  %v882_v15 = vmul.f32 %v1898_v38, %v742_v11 }
  0xfc   : > { %v1018_v16 = vmax.f32 %v954_v7, 0.0  ;;  %v984_v17 = vmax.f32 %v920_v8, 0.0  ;;  %v955_v18 = vadd.f32 %v1903_v40, %v884_v9  ;;  %v1570_v20 = vpack.c.bf16 %v986_v12, %v986_v12 }
  0xfd   : > { %v921_v19 = vadd.f32 %v1903_v40, %v850_v10  ;;  %v1016_v21 = vmax.f32 %v952_v13, 0.0  ;;  %v987_v22 = vmax.f32 %v923_v14, 0.0  ;;  %v953_v23 = vadd.f32 %v1903_v40, %v882_v15  ;;  %v1676_v28 = vpop.f32.mrb[12].mxu0 }
  0xfe   : > { %v1602_v24 = vpack.c.bf16 %v1018_v16, %v1018_v16  ;;  %v1568_v25 = vpack.c.bf16 %v984_v17, %v984_v17  ;;  %v1019_v26 = vmax.f32 %v955_v18, 0.0  ;;  %1307 = vst.msk [vmem:[%s1923_s6 + $0x28] sm:$0xf] %vm1296_vm3, %v1570_v20  ;;  %v855_v32 = vmul.f32 %v1676_v28, %v1898_v38  ;;  %v1708_v33 = vpop.f32.mrb[12].mxu1  ;;  %v627_v34 = vpop.f32.mrb[13].mxu0 }
  0xff   : > { %v985_v27 = vmax.f32 %v921_v19, 0.0  ;;  %v1600_v29 = vpack.c.bf16 %v1016_v21, %v1016_v21  ;;  %v1571_v30 = vpack.c.bf16 %v987_v22, %v987_v22  ;;  %v1017_v31 = vmax.f32 %v953_v23, 0.0  ;;  %v755_v41 = vpop.f32.mrb[13].mxu1  ;;  %v1677_v42 = vpop.f32.mrb[14].mxu0 }
 0x100   : > { %1339 = vst.msk [vmem:[%s1923_s6 + $0xa8] sm:$0xf] %vm1296_vm3, %v1602_v24  ;;  %1305 = vst.msk [vmem:[%s1923_s6 + $0x20] sm:$0xf] %vm1296_vm3, %v1568_v25  ;;  %v1603_v35 = vpack.c.bf16 %v1019_v26, %v1019_v26  ;;  %v887_v37 = vmul.f32 %v1708_v33, %v1898_v38  ;;  %v853_v39 = vmul.f32 %v1898_v38, %v627_v34  ;;  %v1709_v47 = vpop.f32.mrb[14].mxu1  ;;  %v630_v48 = vpop.f32.mrb[15].mxu0 }
 0x101   : > { %v1569_v36 = vpack.c.bf16 %v985_v27, %v985_v27  ;;  %1337 = vst.msk [vmem:[%s1923_s6 + $0xa0] sm:$0xf] %vm1296_vm3, %v1600_v29  ;;  %1308 = vst.msk [vmem:[%s1923_s6 + $0x2c] sm:$0xf] %vm1296_vm3, %v1571_v30  ;;  %v1601_v43 = vpack.c.bf16 %v1017_v31, %v1017_v31  ;;  %v926_v44 = vadd.f32 %v1903_v40, %v855_v32  ;;  %v758_v53 = vpop.f32.mrb[15].mxu1 }
 0x102   : > { %v885_v45 = vmul.f32 %v1898_v38, %v755_v41  ;;  %v856_v46 = vmul.f32 %v1677_v42, %v1898_v38  ;;  %1340 = vst.msk [vmem:[%s1923_s6 + $0xac] sm:$0xf] %vm1296_vm3, %v1603_v35  ;;  %v958_v49 = vadd.f32 %v1903_v40, %v887_v37  ;;  %v924_v50 = vadd.f32 %v1903_v40, %v853_v39 }
 0x103   : > { %1306 = vst.msk [vmem:[%s1923_s6 + $0x24] sm:$0xf] %vm1296_vm3, %v1569_v36  ;;  %v888_v51 = vmul.f32 %v1709_v47, %v1898_v38  ;;  %v854_v52 = vmul.f32 %v1898_v38, %v630_v48  ;;  %1338 = vst.msk [vmem:[%s1923_s6 + $0xa4] sm:$0xf] %vm1296_vm3, %v1601_v43  ;;  %v990_v54 = vmax.f32 %v926_v44, 0.0  ;;  %v886_v57 = vmul.f32 %v1898_v38, %v758_v53 }
 0x104   : > { %v956_v55 = vadd.f32 %v1903_v40, %v885_v45  ;;  %v927_v56 = vadd.f32 %v1903_v40, %v856_v46  ;;  %v1022_v58 = vmax.f32 %v958_v49, 0.0  ;;  %v988_v59 = vmax.f32 %v924_v50, 0.0 }
 0x105   : > { %v959_v60 = vadd.f32 %v1903_v40, %v888_v51  ;;  %v925_v61 = vadd.f32 %v1903_v40, %v854_v52  ;;  %v1574_v62 = vpack.c.bf16 %v990_v54, %v990_v54  ;;  %v957_v1 = vadd.f32 %v1903_v40, %v886_v57  ;;  %v1680_v6 = vpop.f32.mrb[16].mxu0 }
 0x106   : > { %v1020_v63 = vmax.f32 %v956_v55, 0.0  ;;  %v991_v0 = vmax.f32 %v927_v56, 0.0  ;;  %v1606_v2 = vpack.c.bf16 %v1022_v58, %v1022_v58  ;;  %v1572_v3 = vpack.c.bf16 %v988_v59, %v988_v59  ;;  %v1712_v11 = vpop.f32.mrb[16].mxu1  ;;  %v643_v12 = vpop.f32.mrb[17].mxu0 }
 0x107   : > { %v1023_v4 = vmax.f32 %v959_v60, 0.0  ;;  %v989_v5 = vmax.f32 %v925_v61, 0.0  ;;  %1311 = vst.msk [vmem:[%s1923_s6 + $0x38] sm:$0xf] %vm1296_vm3, %v1574_v62  ;;  %v1021_v9 = vmax.f32 %v957_v1, 0.0  ;;  %v859_v10 = vmul.f32 %v1680_v6, %v1898_v38  ;;  %v771_v17 = vpop.f32.mrb[17].mxu1 }
 0x108   : > { %v1604_v7 = vpack.c.bf16 %v1020_v63, %v1020_v63  ;;  %v1575_v8 = vpack.c.bf16 %v991_v0, %v991_v0  ;;  %1343 = vst.msk [vmem:[%s1923_s6 + $0xb8] sm:$0xf] %vm1296_vm3, %v1606_v2  ;;  %1309 = vst.msk [vmem:[%s1923_s6 + $0x30] sm:$0xf] %vm1296_vm3, %v1572_v3  ;;  %v891_v15 = vmul.f32 %v1712_v11, %v1898_v38  ;;  %v1681_v18 = vpop.f32.mrb[18].mxu0  ;;  %v1713_v23 = vpop.f32.mrb[18].mxu1 }
 0x109   : > { %v1607_v13 = vpack.c.bf16 %v1023_v4, %v1023_v4  ;;  %v1573_v14 = vpack.c.bf16 %v989_v5, %v989_v5  ;;  %v857_v16 = vmul.f32 %v1898_v38, %v643_v12  ;;  %v1605_v19 = vpack.c.bf16 %v1021_v9, %v1021_v9  ;;  %v646_v24 = vpop.f32.mrb[19].mxu0  ;;  %v774_v29 = vpop.f32.mrb[19].mxu1 }
 0x10a   : > { %1341 = vst.msk [vmem:[%s1923_s6 + $0xb0] sm:$0xf] %vm1296_vm3, %v1604_v7  ;;  %1312 = vst.msk [vmem:[%s1923_s6 + $0x3c] sm:$0xf] %vm1296_vm3, %v1575_v8  ;;  %v930_v20 = vadd.f32 %v1903_v40, %v859_v10  ;;  %v889_v21 = vmul.f32 %v1898_v38, %v771_v17  ;;  %v860_v22 = vmul.f32 %v1681_v18, %v1898_v38 }
 0x10b   : > { %1344 = vst.msk [vmem:[%s1923_s6 + $0xbc] sm:$0xf] %vm1296_vm3, %v1607_v13  ;;  %1310 = vst.msk [vmem:[%s1923_s6 + $0x34] sm:$0xf] %vm1296_vm3, %v1573_v14  ;;  %v962_v25 = vadd.f32 %v1903_v40, %v891_v15  ;;  %v928_v26 = vadd.f32 %v1903_v40, %v857_v16  ;;  %v892_v27 = vmul.f32 %v1713_v23, %v1898_v38 }
 0x10c   : > { %v858_v28 = vmul.f32 %v1898_v38, %v646_v24  ;;  %1342 = vst.msk [vmem:[%s1923_s6 + $0xb4] sm:$0xf] %vm1296_vm3, %v1605_v19  ;;  %v994_v30 = vmax.f32 %v930_v20, 0.0  ;;  %v960_v31 = vadd.f32 %v1903_v40, %v889_v21  ;;  %v931_v32 = vadd.f32 %v1903_v40, %v860_v22 }
 0x10d   : > { %v890_v33 = vmul.f32 %v1898_v38, %v774_v29  ;;  %v1026_v34 = vmax.f32 %v962_v25, 0.0  ;;  %v992_v35 = vmax.f32 %v928_v26, 0.0  ;;  %v963_v36 = vadd.f32 %v1903_v40, %v892_v27  ;;  %v1684_v48 = vpop.f32.mrb[20].mxu0 }
 0x10e   : > { %v929_v37 = vadd.f32 %v1903_v40, %v858_v28  ;;  %v1578_v39 = vpack.c.bf16 %v994_v30, %v994_v30  ;;  %v1024_v41 = vmax.f32 %v960_v31, 0.0  ;;  %v995_v42 = vmax.f32 %v931_v32, 0.0  ;;  %v1716_v53 = vpop.f32.mrb[20].mxu1  ;;  %v659_v54 = vpop.f32.mrb[21].mxu0 }
 0x10f   : > { %v961_v43 = vadd.f32 %v1903_v40, %v890_v33  ;;  %v1610_v44 = vpack.c.bf16 %v1026_v34, %v1026_v34  ;;  %v1576_v45 = vpack.c.bf16 %v992_v35, %v992_v35  ;;  %v1027_v46 = vmax.f32 %v963_v36, 0.0  ;;  %v787_v59 = vpop.f32.mrb[21].mxu1  ;;  %v1685_v60 = vpop.f32.mrb[22].mxu0 }
 0x110   : > { %v993_v47 = vmax.f32 %v929_v37, 0.0  ;;  %1315 = vst.msk [vmem:[%s1923_s6 + $0x48] sm:$0xf] %vm1296_vm3, %v1578_v39  ;;  %v1608_v49 = vpack.c.bf16 %v1024_v41, %v1024_v41  ;;  %v1579_v50 = vpack.c.bf16 %v995_v42, %v995_v42  ;;  %v863_v52 = vmul.f32 %v1684_v48, %v1898_v38  ;;  %v1717_v1 = vpop.f32.mrb[22].mxu1  ;;  %v662_v2 = vpop.f32.mrb[23].mxu0 }
 0x111   : > { %v1025_v51 = vmax.f32 %v961_v43, 0.0  ;;  %1347 = vst.msk [vmem:[%s1923_s6 + $0xc8] sm:$0xf] %vm1296_vm3, %v1610_v44  ;;  %1313 = vst.msk [vmem:[%s1923_s6 + $0x40] sm:$0xf] %vm1296_vm3, %v1576_v45  ;;  %v1611_v55 = vpack.c.bf16 %v1027_v46, %v1027_v46  ;;  %v895_v57 = vmul.f32 %v1716_v53, %v1898_v38  ;;  %v861_v58 = vmul.f32 %v1898_v38, %v659_v54  ;;  %v790_v7 = vpop.f32.mrb[23].mxu1 }
 0x112   : > { %v1577_v56 = vpack.c.bf16 %v993_v47, %v993_v47  ;;  %1345 = vst.msk [vmem:[%s1923_s6 + $0xc0] sm:$0xf] %vm1296_vm3, %v1608_v49  ;;  %1316 = vst.msk [vmem:[%s1923_s6 + $0x4c] sm:$0xf] %vm1296_vm3, %v1579_v50  ;;  %v934_v62 = vadd.f32 %v1903_v40, %v863_v52  ;;  %v893_v63 = vmul.f32 %v1898_v38, %v787_v59 }
 0x113   : > { %v1609_v61 = vpack.c.bf16 %v1025_v51, %v1025_v51  ;;  %v864_v0 = vmul.f32 %v1685_v60, %v1898_v38  ;;  %1348 = vst.msk [vmem:[%s1923_s6 + $0xcc] sm:$0xf] %vm1296_vm3, %v1611_v55  ;;  %v966_v3 = vadd.f32 %v1903_v40, %v895_v57  ;;  %v932_v4 = vadd.f32 %v1903_v40, %v861_v58 }
 0x114   : > { %1314 = vst.msk [vmem:[%s1923_s6 + $0x44] sm:$0xf] %vm1296_vm3, %v1577_v56  ;;  %v896_v5 = vmul.f32 %v1717_v1, %v1898_v38  ;;  %v862_v6 = vmul.f32 %v1898_v38, %v662_v2  ;;  %v998_v8 = vmax.f32 %v934_v62, 0.0  ;;  %v964_v9 = vadd.f32 %v1903_v40, %v893_v63 }
 0x115   : > { %1346 = vst.msk [vmem:[%s1923_s6 + $0xc4] sm:$0xf] %vm1296_vm3, %v1609_v61  ;;  %v935_v10 = vadd.f32 %v1903_v40, %v864_v0  ;;  %v894_v11 = vmul.f32 %v1898_v38, %v790_v7  ;;  %v1030_v12 = vmax.f32 %v966_v3, 0.0  ;;  %v996_v13 = vmax.f32 %v932_v4, 0.0  ;;  %v1688_v24 = vpop.f32.mrb[24].mxu0 }
 0x116   : > { %v967_v14 = vadd.f32 %v1903_v40, %v896_v5  ;;  %v933_v15 = vadd.f32 %v1903_v40, %v862_v6  ;;  %v1582_v16 = vpack.c.bf16 %v998_v8, %v998_v8  ;;  %v1028_v17 = vmax.f32 %v964_v9, 0.0  ;;  %v1720_v29 = vpop.f32.mrb[24].mxu1  ;;  %v675_v30 = vpop.f32.mrb[25].mxu0 }
 0x117   : > { %v999_v18 = vmax.f32 %v935_v10, 0.0  ;;  %v965_v19 = vadd.f32 %v1903_v40, %v894_v11  ;;  %v1614_v20 = vpack.c.bf16 %v1030_v12, %v1030_v12  ;;  %v1580_v21 = vpack.c.bf16 %v996_v13, %v996_v13  ;;  %v803_v35 = vpop.f32.mrb[25].mxu1  ;;  %v1689_v36 = vpop.f32.mrb[26].mxu0 }
 0x118   : > { %v1031_v22 = vmax.f32 %v967_v14, 0.0  ;;  %v997_v23 = vmax.f32 %v933_v15, 0.0  ;;  %1319 = vst.msk [vmem:[%s1923_s6 + $0x58] sm:$0xf] %vm1296_vm3, %v1582_v16  ;;  %v1612_v25 = vpack.c.bf16 %v1028_v17, %v1028_v17  ;;  %v867_v28 = vmul.f32 %v1688_v24, %v1898_v38  ;;  %v1721_v43 = vpop.f32.mrb[26].mxu1  ;;  %v678_v44 = vpop.f32.mrb[27].mxu0 }
 0x119   : > { %v1583_v26 = vpack.c.bf16 %v999_v18, %v999_v18  ;;  %v1029_v27 = vmax.f32 %v965_v19, 0.0  ;;  %1351 = vst.msk [vmem:[%s1923_s6 + $0xd8] sm:$0xf] %vm1296_vm3, %v1614_v20  ;;  %1317 = vst.msk [vmem:[%s1923_s6 + $0x50] sm:$0xf] %vm1296_vm3, %v1580_v21  ;;  %v899_v33 = vmul.f32 %v1720_v29, %v1898_v38  ;;  %v865_v34 = vmul.f32 %v1898_v38, %v675_v30  ;;  %v806_v49 = vpop.f32.mrb[27].mxu1 }
 0x11a   : > { %v1615_v31 = vpack.c.bf16 %v1031_v22, %v1031_v22  ;;  %v1581_v32 = vpack.c.bf16 %v997_v23, %v997_v23  ;;  %1349 = vst.msk [vmem:[%s1923_s6 + $0xd0] sm:$0xf] %vm1296_vm3, %v1612_v25  ;;  %v938_v39 = vadd.f32 %v1903_v40, %v867_v28  ;;  %v897_v41 = vmul.f32 %v1898_v38, %v803_v35 }
 0x11b   : > { %1320 = vst.msk [vmem:[%s1923_s6 + $0x5c] sm:$0xf] %vm1296_vm3, %v1583_v26  ;;  %v1613_v37 = vpack.c.bf16 %v1029_v27, %v1029_v27  ;;  %v868_v42 = vmul.f32 %v1689_v36, %v1898_v38  ;;  %v970_v45 = vadd.f32 %v1903_v40, %v899_v33  ;;  %v936_v46 = vadd.f32 %v1903_v40, %v865_v34 }
 0x11c   : > { %1352 = vst.msk [vmem:[%s1923_s6 + $0xdc] sm:$0xf] %vm1296_vm3, %v1615_v31  ;;  %1318 = vst.msk [vmem:[%s1923_s6 + $0x54] sm:$0xf] %vm1296_vm3, %v1581_v32  ;;  %v900_v47 = vmul.f32 %v1721_v43, %v1898_v38  ;;  %v866_v48 = vmul.f32 %v1898_v38, %v678_v44  ;;  %v1002_v50 = vmax.f32 %v938_v39, 0.0  ;;  %v968_v51 = vadd.f32 %v1903_v40, %v897_v41 }
 0x11d   : > { %1350 = vst.msk [vmem:[%s1923_s6 + $0xd4] sm:$0xf] %vm1296_vm3, %v1613_v37  ;;  %v939_v52 = vadd.f32 %v1903_v40, %v868_v42  ;;  %v898_v53 = vmul.f32 %v1898_v38, %v806_v49  ;;  %v1034_v54 = vmax.f32 %v970_v45, 0.0  ;;  %v1000_v55 = vmax.f32 %v936_v46, 0.0  ;;  %v1692_v2 = vpop.f32.mrb[28].mxu0 }
 0x11e   : > { %v971_v56 = vadd.f32 %v1903_v40, %v900_v47  ;;  %v937_v57 = vadd.f32 %v1903_v40, %v866_v48  ;;  %v1586_v58 = vpack.c.bf16 %v1002_v50, %v1002_v50  ;;  %v1032_v59 = vmax.f32 %v968_v51, 0.0  ;;  %v1724_v7 = vpop.f32.mrb[28].mxu1  ;;  %v691_v8 = vpop.f32.mrb[29].mxu0 }
 0x11f   : > { %v1003_v60 = vmax.f32 %v939_v52, 0.0  ;;  %v969_v61 = vadd.f32 %v1903_v40, %v898_v53  ;;  %v1618_v62 = vpack.c.bf16 %v1034_v54, %v1034_v54  ;;  %v1584_v63 = vpack.c.bf16 %v1000_v55, %v1000_v55  ;;  %v819_v13 = vpop.f32.mrb[29].mxu1  ;;  %v1693_v14 = vpop.f32.mrb[30].mxu0 }
 0x120   : > { %v1035_v0 = vmax.f32 %v971_v56, 0.0  ;;  %v1001_v1 = vmax.f32 %v937_v57, 0.0  ;;  %1323 = vst.msk [vmem:[%s1923_s6 + $0x68] sm:$0xf] %vm1296_vm3, %v1586_v58  ;;  %v1616_v3 = vpack.c.bf16 %v1032_v59, %v1032_v59  ;;  %v871_v6 = vmul.f32 %v1692_v2, %v1898_v38  ;;  %v1725_v19 = vpop.f32.mrb[30].mxu1  ;;  %v694_v20 = vpop.f32.mrb[31].mxu0 }
 0x121   : > { %v1587_v4 = vpack.c.bf16 %v1003_v60, %v1003_v60  ;;  %v1033_v5 = vmax.f32 %v969_v61, 0.0  ;;  %1355 = vst.msk [vmem:[%s1923_s6 + $0xe8] sm:$0xf] %vm1296_vm3, %v1618_v62  ;;  %1321 = vst.msk [vmem:[%s1923_s6 + $0x60] sm:$0xf] %vm1296_vm3, %v1584_v63  ;;  %v903_v11 = vmul.f32 %v1724_v7, %v1898_v38  ;;  %v869_v12 = vmul.f32 %v1898_v38, %v691_v8  ;;  %v822_v25 = vpop.f32.mrb[31].mxu1 }
 0x122   : > { %v1619_v9 = vpack.c.bf16 %v1035_v0, %v1035_v0  ;;  %v1585_v10 = vpack.c.bf16 %v1001_v1, %v1001_v1  ;;  %1353 = vst.msk [vmem:[%s1923_s6 + $0xe0] sm:$0xf] %vm1296_vm3, %v1616_v3  ;;  %v942_v16 = vadd.f32 %v1903_v40, %v871_v6  ;;  %v901_v17 = vmul.f32 %v1898_v38, %v819_v13 }
 0x123   : > { %1324 = vst.msk [vmem:[%s1923_s6 + $0x6c] sm:$0xf] %vm1296_vm3, %v1587_v4  ;;  %v1617_v15 = vpack.c.bf16 %v1033_v5, %v1033_v5  ;;  %v872_v18 = vmul.f32 %v1693_v14, %v1898_v38  ;;  %v974_v21 = vadd.f32 %v1903_v40, %v903_v11  ;;  %v940_v22 = vadd.f32 %v1903_v40, %v869_v12 }
 0x124   : > { %1356 = vst.msk [vmem:[%s1923_s6 + $0xec] sm:$0xf] %vm1296_vm3, %v1619_v9  ;;  %1322 = vst.msk [vmem:[%s1923_s6 + $0x64] sm:$0xf] %vm1296_vm3, %v1585_v10  ;;  %v904_v23 = vmul.f32 %v1725_v19, %v1898_v38  ;;  %v870_v24 = vmul.f32 %v1898_v38, %v694_v20  ;;  %v1006_v26 = vmax.f32 %v942_v16, 0.0  ;;  %v972_v27 = vadd.f32 %v1903_v40, %v901_v17 }
 0x125   : > { %1354 = vst.msk [vmem:[%s1923_s6 + $0xe4] sm:$0xf] %vm1296_vm3, %v1617_v15  ;;  %v943_v28 = vadd.f32 %v1903_v40, %v872_v18  ;;  %v902_v29 = vmul.f32 %v1898_v38, %v822_v25  ;;  %v1038_v30 = vmax.f32 %v974_v21, 0.0  ;;  %v1004_v31 = vmax.f32 %v940_v22, 0.0 }
 0x126   : > { %v975_v32 = vadd.f32 %v1903_v40, %v904_v23  ;;  %v941_v33 = vadd.f32 %v1903_v40, %v870_v24  ;;  %v1590_v34 = vpack.c.bf16 %v1006_v26, %v1006_v26  ;;  %v1036_v35 = vmax.f32 %v972_v27, 0.0 }
 0x127   : > { %v1007_v36 = vmax.f32 %v943_v28, 0.0  ;;  %v973_v37 = vadd.f32 %v1903_v40, %v902_v29  ;;  %v1622_v39 = vpack.c.bf16 %v1038_v30, %v1038_v30  ;;  %v1588_v41 = vpack.c.bf16 %v1004_v31, %v1004_v31 }
 0x128   : > { %v1039_v38 = vmax.f32 %v975_v32, 0.0  ;;  %v1005_v42 = vmax.f32 %v941_v33, 0.0  ;;  %1327 = vst.msk [vmem:[%s1923_s6 + $0x78] sm:$0xf] %vm1296_vm3, %v1590_v34  ;;  %v1620_v43 = vpack.c.bf16 %v1036_v35, %v1036_v35 }
 0x129   : > { %v1591_v44 = vpack.c.bf16 %v1007_v36, %v1007_v36  ;;  %v1037_v45 = vmax.f32 %v973_v37, 0.0  ;;  %1359 = vst.msk [vmem:[%s1923_s6 + $0xf8] sm:$0xf] %vm1296_vm3, %v1622_v39  ;;  %1325 = vst.msk [vmem:[%s1923_s6 + $0x70] sm:$0xf] %vm1296_vm3, %v1588_v41 }
 0x12a   : > { %v1623_v46 = vpack.c.bf16 %v1039_v38, %v1039_v38  ;;  %v1589_v47 = vpack.c.bf16 %v1005_v42, %v1005_v42  ;;  %1357 = vst.msk [vmem:[%s1923_s6 + $0xf0] sm:$0xf] %vm1296_vm3, %v1620_v43 }
 0x12b   : > { %1328 = vst.msk [vmem:[%s1923_s6 + $0x7c] sm:$0xf] %vm1296_vm3, %v1591_v44  ;;  %v1621_v40 = vpack.c.bf16 %v1037_v45, %v1037_v45 }
 0x12c   : > { %1360 = vst.msk [vmem:[%s1923_s6 + $0xfc] sm:$0xf] %vm1296_vm3, %v1623_v46  ;;  %1326 = vst.msk [vmem:[%s1923_s6 + $0x74] sm:$0xf] %vm1296_vm3, %v1589_v47 }
 0x12d   : > { %1358 = vst.msk [vmem:[%s1923_s6 + $0xf4] sm:$0xf] %vm1296_vm3, %v1621_v40 }
 0x12e PF: > { %s14_s15 = sadd.s32 1, %s1779_s15  }
 0x12f   : > { %p11_p4 = scmp.ge.s32.totalorder %s14_s15, 6  }
 0x131   :  { %13 = sbr.rel (!%p11_p4) target bundleno = 1 (0x1), region = 66 }

// kernel: deeplab_forward.23
= control target key start
LH: loop header
LB: loop body
LE: loop exit
PB: predicated region body
PF: predicated region fallthrough
CT: control target
= control target key end

     0   :  { %s1097_s15 = smov 0   ;;  %s1301_s0 = inlined_call_operand.vmem [shape: bf16[512,24], index: 0, kind: input, shape index: {}]   ;;  %s1302_s1 = inlined_call_operand.vmem [shape: bf16[24,12], index: 1, kind: input, shape index: {}]   ;;  %s1303_s2 = inlined_call_operand.vmem [shape: f32[1,12], index: 2, kind: input, shape index: {}]   ;;  %s1304_s3 = inlined_call_operand.vmem [shape: f32[1,12], index: 3, kind: input, shape index: {}]   ;;  %s1305_s4 = inlined_call_operand.vmem [shape: bf16[512,12], index: 4, kind: output, shape index: {}]  }
   0x1 LB: > { %s867_s16 = sadd.s32 4294967295, %s1070_s15   ;;  %p871_p0 = scmp.ge.s32.totalorder %s1070_s15, 1  ;;  %s1070_s15 = sphi %s1097_s15, %s14_s15  }
   0x2   : > { %p163_p1 = scmp.lt.s32.totalorder %s1070_s15, 3 }
   0x4   : > { %p164_p2 = pnand %p871_p0, %p163_p1 }
   0x5   : > { %v1046_v0 = vld [vmem:[%s1302_s1] sm:$0xff] (!%p164_p2)   ;;  %v1047_v1 = vld [vmem:[%s1302_s1 + $0x8] ss:$0 sps:$4 sm:$0xff] (!%p164_p2)   ;;  %vm375_vm0 = vcmask (!%p164_p2), 1043456   ;;  %s872_s21 = sshll.u32 (!%p164_p2), %s867_s16, 5  ;;  %vm326_vm1 = vcmask (!%p164_p2), 195584  }
   0x6   : > { %167 = sbr.rel (%p164_p2) target bundleno = 269 (0x10d), region = 36  ;;  %996 = vmatprep.subr.bf16.mxu0 (!%p164_p2), %v1046_v0  ;;  %1032 = vmatprep.subr.bf16.mxu1 (!%p164_p2), %v1046_v0  ;;  %p190_p3 = scmp.lt.s32.totalorder (!%p164_p2), %s872_s21, 63  ;;  %v377_v2 = vsel (!%p164_p2), %vm375_vm0, %v1047_v1, 0  ;;  %v1156_v19 = vld [vmem:[%s1303_s2] ss:$0 sm:$0xff] (!%p164_p2)  ;;  %vm778_vm2 = vcmask (!%p164_p2), 93184  }
   0x7   : > { %997 = vmatpush3.bf16.msra.mxu0 (!%p164_p2), %v1046_v0  ;;  %1034 = vmatpush3.bf16.msra.mxu1 (!%p164_p2), %v1046_v0  ;;  %v1161_v21 = vld [vmem:[%s1304_s3] ss:$0 sm:$0xff] (!%p164_p2) }
   0x8   : > { %1036 = vmatprep.subr.msk.bf16.mxu0 (!%p164_p2), %vm375_vm0, %v1047_v1  ;;  %1037 = vmatprep.subr.msk.bf16.mxu1 (!%p164_p2), %vm375_vm0, %v1047_v1 }
   0xb   : > { %999 = vmatpush3.bf16.msra.mxu0 (!%p164_p2), %v377_v2  ;;  %1035 = vmatpush3.bf16.msra.mxu1 (!%p164_p2), %v377_v2 }
   0xd   : > { %s1307_s21 = smov (!%p190_p3, %s872_s21), 63 }
   0xe   : > { %s873_s22 = sshll.u32 %s1307_s21, 2 }
   0xf   : > { %s1119_s25 = scalar_lea.vmem %s1301_s0, %s873_s22  ;;  %s1181_s6 = scalar_lea.vmem %s1305_s4, %s873_s22 }
  0x10   : > { %v1048_v3 = vld [vmem:[%s1119_s25] sm:$0xff]   ;;  %v1050_v5 = vld [vmem:[%s1119_s25 + $0x8] sm:$0xff]   ;;  %v1052_v7 = vld [vmem:[%s1119_s25 + $0x10] sm:$0xff]  }
  0x11   : > { %v1049_v4 = vld [vmem:[%s1119_s25 + $0x40] sm:$0xff]   ;;  %1000 = vmatprep.mubr.msk.bf16.mxu0 %vm326_vm1, %v1048_v3  ;;  %v1051_v6 = vld [vmem:[%s1119_s25 + $0x48] sm:$0xff]   ;;  %v1053_v8 = vld [vmem:[%s1119_s25 + $0x50] sm:$0xff]  }
  0x12   : > { %1016 = vmatprep.mubr.msk.bf16.mxu1 %vm326_vm1, %v1049_v4  ;;  %1001 = vmatmul.mubr.msk.bf16.vlgmr.msra.gmra.mrb[0].mxu0 %vm326_vm1, %v1050_v5  ;;  %v1054_v9 = vld [vmem:[%s1119_s25 + $0x18] sm:$0xff]   ;;  %v1056_v11 = vld [vmem:[%s1119_s25 + $0x20] sm:$0xff]   ;;  %v1058_v13 = vld [vmem:[%s1119_s25 + $0x28] sm:$0xff]  }
  0x13   : > { %1017 = vmatmul.mubr.msk.bf16.vlgmr.msra.gmra.mrb[0].mxu1 %vm326_vm1, %v1051_v6  ;;  %1004 = vmatprep.mubr.msk.bf16.mxu0 %vm326_vm1, %v1052_v7  ;;  %v1055_v10 = vld [vmem:[%s1119_s25 + $0x58] sm:$0xff]   ;;  %v1057_v12 = vld [vmem:[%s1119_s25 + $0x60] sm:$0xff]   ;;  %v1059_v14 = vld [vmem:[%s1119_s25 + $0x68] sm:$0xff]  }
  0x14   : > { %1020 = vmatprep.mubr.msk.bf16.mxu1 %vm326_vm1, %v1053_v8  ;;  %v1060_v15 = vld [vmem:[%s1119_s25 + $0x30] sm:$0xff]   ;;  %v1062_v17 = vld [vmem:[%s1119_s25 + $0x38] sm:$0xff]  }
  0x15   : > { %v1061_v16 = vld [vmem:[%s1119_s25 + $0x70] sm:$0xff]   ;;  %v1063_v18 = vld [vmem:[%s1119_s25 + $0x78] sm:$0xff]  }
  0x1a   : > { %1005 = vmatmul.mubr.msk.bf16.gmra.mrb[4].mxu0 %vm326_vm1, %v1054_v9 }
  0x1b   : > { %1021 = vmatmul.mubr.msk.bf16.gmra.mrb[4].mxu1 %vm326_vm1, %v1055_v10  ;;  %1008 = vmatprep.mubr.msk.bf16.mxu0 %vm326_vm1, %v1056_v11 }
  0x1c   : > { %1024 = vmatprep.mubr.msk.bf16.mxu1 %vm326_vm1, %v1057_v12 }
  0x22   : > { %1009 = vmatmul.mubr.msk.bf16.gmra.mrb[8].mxu0 %vm326_vm1, %v1058_v13 }
  0x23   : > { %1025 = vmatmul.mubr.msk.bf16.gmra.mrb[8].mxu1 %vm326_vm1, %v1059_v14  ;;  %1012 = vmatprep.mubr.msk.bf16.mxu0 %vm326_vm1, %v1060_v15 }
  0x24   : > { %1028 = vmatprep.mubr.msk.bf16.mxu1 %vm326_vm1, %v1061_v16 }
  0x2a   : > { %1013 = vmatmul.mubr.msk.bf16.gmra.mrb[12].mxu0 %vm326_vm1, %v1062_v17 }
  0x2b   : > { %1029 = vmatmul.mubr.msk.bf16.gmra.mrb[12].mxu1 %vm326_vm1, %v1063_v18 }
  0xe5   : > { %v1002_v20 = vpop.f32.mrb[0].mxu0 }
  0xe6   : > { %v549_v22 = vmul.f32 %v1002_v20, %v1156_v19  ;;  %v1018_v23 = vpop.f32.mrb[0].mxu1  ;;  %v413_v24 = vpop.f32.mrb[1].mxu0 }
  0xe7   : > { %v565_v25 = vmul.f32 %v1018_v23, %v1156_v19  ;;  %v547_v26 = vmul.f32 %v1156_v19, %v413_v24  ;;  %v477_v27 = vpop.f32.mrb[1].mxu1  ;;  %v1003_v28 = vpop.f32.mrb[2].mxu0 }
  0xe8   : > { %v588_v29 = vadd.f32 %v1161_v21, %v549_v22  ;;  %v563_v30 = vmul.f32 %v1156_v19, %v477_v27  ;;  %v550_v31 = vmul.f32 %v1003_v28, %v1156_v19  ;;  %v1019_v32 = vpop.f32.mrb[2].mxu1  ;;  %v416_v33 = vpop.f32.mrb[3].mxu0 }
  0xe9   : > { %v604_v34 = vadd.f32 %v1161_v21, %v565_v25  ;;  %v586_v35 = vadd.f32 %v1161_v21, %v547_v26  ;;  %v566_v36 = vmul.f32 %v1019_v32, %v1156_v19  ;;  %v548_v37 = vmul.f32 %v1156_v19, %v416_v33  ;;  %v480_v38 = vpop.f32.mrb[3].mxu1 }
  0xea   : > { %v620_v39 = vmax.f32 %v588_v29, 0.0  ;;  %v602_v40 = vadd.f32 %v1161_v21, %v563_v30  ;;  %v589_v41 = vadd.f32 %v1161_v21, %v550_v31  ;;  %v564_v42 = vmul.f32 %v1156_v19, %v480_v38 }
  0xeb   : > { %v636_v43 = vmax.f32 %v604_v34, 0.0  ;;  %v618_v44 = vmax.f32 %v586_v35, 0.0  ;;  %v605_v45 = vadd.f32 %v1161_v21, %v566_v36  ;;  %v587_v46 = vadd.f32 %v1161_v21, %v548_v37 }
  0xec   : > { %v948_v47 = vpack.c.bf16 %v620_v39, %v620_v39  ;;  %v634_v48 = vmax.f32 %v602_v40, 0.0  ;;  %v621_v49 = vmax.f32 %v589_v41, 0.0  ;;  %v603_v50 = vadd.f32 %v1161_v21, %v564_v42 }
  0xed   : > { %v964_v51 = vpack.c.bf16 %v636_v43, %v636_v43  ;;  %v946_v52 = vpack.c.bf16 %v618_v44, %v618_v44  ;;  %v637_v53 = vmax.f32 %v605_v45, 0.0  ;;  %v619_v54 = vmax.f32 %v587_v46, 0.0  ;;  %v1006_v55 = vpop.f32.mrb[4].mxu0 }
  0xee   : > { %781 = vst.msk [vmem:[%s1181_s6 + $0x8] sm:$0xf] %vm778_vm2, %v948_v47  ;;  %v962_v56 = vpack.c.bf16 %v634_v48, %v634_v48  ;;  %v949_v57 = vpack.c.bf16 %v621_v49, %v621_v49  ;;  %v635_v58 = vmax.f32 %v603_v50, 0.0  ;;  %v553_v59 = vmul.f32 %v1006_v55, %v1156_v19  ;;  %v1022_v60 = vpop.f32.mrb[4].mxu1  ;;  %v429_v61 = vpop.f32.mrb[5].mxu0 }
  0xef   : > { %797 = vst.msk [vmem:[%s1181_s6 + $0x48] sm:$0xf] %vm778_vm2, %v964_v51  ;;  %779 = vst.msk [vmem:[%s1181_s6] sm:$0xf] %vm778_vm2, %v946_v52  ;;  %v965_v62 = vpack.c.bf16 %v637_v53, %v637_v53  ;;  %v947_v63 = vpack.c.bf16 %v619_v54, %v619_v54  ;;  %v569_v0 = vmul.f32 %v1022_v60, %v1156_v19  ;;  %v493_v2 = vpop.f32.mrb[5].mxu1  ;;  %v1007_v3 = vpop.f32.mrb[6].mxu0 }
  0xf0   : > { %v551_v1 = vmul.f32 %v1156_v19, %v429_v61  ;;  %795 = vst.msk [vmem:[%s1181_s6 + $0x40] sm:$0xf] %vm778_vm2, %v962_v56  ;;  %782 = vst.msk [vmem:[%s1181_s6 + $0xc] sm:$0xf] %vm778_vm2, %v949_v57  ;;  %v963_v4 = vpack.c.bf16 %v635_v58, %v635_v58  ;;  %v592_v5 = vadd.f32 %v1161_v21, %v553_v59  ;;  %v1023_v8 = vpop.f32.mrb[6].mxu1  ;;  %v432_v9 = vpop.f32.mrb[7].mxu0 }
  0xf1   : > { %v567_v6 = vmul.f32 %v1156_v19, %v493_v2  ;;  %v554_v7 = vmul.f32 %v1007_v3, %v1156_v19  ;;  %798 = vst.msk [vmem:[%s1181_s6 + $0x4c] sm:$0xf] %vm778_vm2, %v965_v62  ;;  %780 = vst.msk [vmem:[%s1181_s6 + $0x4] sm:$0xf] %vm778_vm2, %v947_v63  ;;  %v608_v10 = vadd.f32 %v1161_v21, %v569_v0  ;;  %v496_v14 = vpop.f32.mrb[7].mxu1 }
  0xf2   : > { %v590_v11 = vadd.f32 %v1161_v21, %v551_v1  ;;  %v570_v12 = vmul.f32 %v1023_v8, %v1156_v19  ;;  %v552_v13 = vmul.f32 %v1156_v19, %v432_v9  ;;  %796 = vst.msk [vmem:[%s1181_s6 + $0x44] sm:$0xf] %vm778_vm2, %v963_v4  ;;  %v624_v15 = vmax.f32 %v592_v5, 0.0 }
  0xf3   : > { %v606_v16 = vadd.f32 %v1161_v21, %v567_v6  ;;  %v593_v17 = vadd.f32 %v1161_v21, %v554_v7  ;;  %v568_v18 = vmul.f32 %v1156_v19, %v496_v14  ;;  %v640_v20 = vmax.f32 %v608_v10, 0.0 }
  0xf4   : > { %v622_v22 = vmax.f32 %v590_v11, 0.0  ;;  %v609_v23 = vadd.f32 %v1161_v21, %v570_v12  ;;  %v591_v24 = vadd.f32 %v1161_v21, %v552_v13  ;;  %v952_v25 = vpack.c.bf16 %v624_v15, %v624_v15 }
  0xf5   : > { %v638_v26 = vmax.f32 %v606_v16, 0.0  ;;  %v625_v27 = vmax.f32 %v593_v17, 0.0  ;;  %v607_v28 = vadd.f32 %v1161_v21, %v568_v18  ;;  %v968_v29 = vpack.c.bf16 %v640_v20, %v640_v20  ;;  %v1010_v33 = vpop.f32.mrb[8].mxu0 }
  0xf6   : > { %v950_v30 = vpack.c.bf16 %v622_v22, %v622_v22  ;;  %v641_v31 = vmax.f32 %v609_v23, 0.0  ;;  %v623_v32 = vmax.f32 %v591_v24, 0.0  ;;  %785 = vst.msk [vmem:[%s1181_s6 + $0x18] sm:$0xf] %vm778_vm2, %v952_v25  ;;  %v557_v37 = vmul.f32 %v1010_v33, %v1156_v19  ;;  %v1026_v38 = vpop.f32.mrb[8].mxu1  ;;  %v445_v39 = vpop.f32.mrb[9].mxu0 }
  0xf7   : > { %v966_v34 = vpack.c.bf16 %v638_v26, %v638_v26  ;;  %v953_v35 = vpack.c.bf16 %v625_v27, %v625_v27  ;;  %v639_v36 = vmax.f32 %v607_v28, 0.0  ;;  %801 = vst.msk [vmem:[%s1181_s6 + $0x58] sm:$0xf] %vm778_vm2, %v968_v29  ;;  %v573_v42 = vmul.f32 %v1026_v38, %v1156_v19  ;;  %v509_v44 = vpop.f32.mrb[9].mxu1  ;;  %v1011_v45 = vpop.f32.mrb[10].mxu0 }
  0xf8   : > { %783 = vst.msk [vmem:[%s1181_s6 + $0x10] sm:$0xf] %vm778_vm2, %v950_v30  ;;  %v969_v40 = vpack.c.bf16 %v641_v31, %v641_v31  ;;  %v951_v41 = vpack.c.bf16 %v623_v32, %v623_v32  ;;  %v555_v43 = vmul.f32 %v1156_v19, %v445_v39  ;;  %v596_v47 = vadd.f32 %v1161_v21, %v557_v37  ;;  %v1027_v50 = vpop.f32.mrb[10].mxu1  ;;  %v448_v51 = vpop.f32.mrb[11].mxu0 }
  0xf9   : > { %799 = vst.msk [vmem:[%s1181_s6 + $0x50] sm:$0xf] %vm778_vm2, %v966_v34  ;;  %786 = vst.msk [vmem:[%s1181_s6 + $0x1c] sm:$0xf] %vm778_vm2, %v953_v35  ;;  %v967_v46 = vpack.c.bf16 %v639_v36, %v639_v36  ;;  %v571_v48 = vmul.f32 %v1156_v19, %v509_v44  ;;  %v558_v49 = vmul.f32 %v1011_v45, %v1156_v19  ;;  %v512_v56 = vpop.f32.mrb[11].mxu1 }
  0xfa   : > { %802 = vst.msk [vmem:[%s1181_s6 + $0x5c] sm:$0xf] %vm778_vm2, %v969_v40  ;;  %784 = vst.msk [vmem:[%s1181_s6 + $0x14] sm:$0xf] %vm778_vm2, %v951_v41  ;;  %v612_v52 = vadd.f32 %v1161_v21, %v573_v42  ;;  %v594_v53 = vadd.f32 %v1161_v21, %v555_v43  ;;  %v574_v54 = vmul.f32 %v1027_v50, %v1156_v19  ;;  %v628_v57 = vmax.f32 %v596_v47, 0.0 }
  0xfb   : > { %v556_v55 = vmul.f32 %v1156_v19, %v448_v51  ;;  %800 = vst.msk [vmem:[%s1181_s6 + $0x54] sm:$0xf] %vm778_vm2, %v967_v46  ;;  %v610_v58 = vadd.f32 %v1161_v21, %v571_v48  ;;  %v597_v59 = vadd.f32 %v1161_v21, %v558_v49  ;;  %v572_v60 = vmul.f32 %v1156_v19, %v512_v56 }
  0xfc   : > { %v644_v61 = vmax.f32 %v612_v52, 0.0  ;;  %v626_v62 = vmax.f32 %v594_v53, 0.0  ;;  %v613_v63 = vadd.f32 %v1161_v21, %v574_v54  ;;  %v956_v1 = vpack.c.bf16 %v628_v57, %v628_v57 }
  0xfd   : > { %v595_v0 = vadd.f32 %v1161_v21, %v556_v55  ;;  %v642_v2 = vmax.f32 %v610_v58, 0.0  ;;  %v629_v3 = vmax.f32 %v597_v59, 0.0  ;;  %v611_v4 = vadd.f32 %v1161_v21, %v572_v60  ;;  %v1014_v9 = vpop.f32.mrb[12].mxu0 }
  0xfe   : > { %v972_v5 = vpack.c.bf16 %v644_v61, %v644_v61  ;;  %v954_v6 = vpack.c.bf16 %v626_v62, %v626_v62  ;;  %v645_v7 = vmax.f32 %v613_v63, 0.0  ;;  %789 = vst.msk [vmem:[%s1181_s6 + $0x28] sm:$0xf] %vm778_vm2, %v956_v1  ;;  %v561_v13 = vmul.f32 %v1014_v9, %v1156_v19  ;;  %v1030_v14 = vpop.f32.mrb[12].mxu1  ;;  %v461_v15 = vpop.f32.mrb[13].mxu0 }
  0xff   : > { %v627_v8 = vmax.f32 %v595_v0, 0.0  ;;  %v970_v10 = vpack.c.bf16 %v642_v2, %v642_v2  ;;  %v957_v11 = vpack.c.bf16 %v629_v3, %v629_v3  ;;  %v643_v12 = vmax.f32 %v611_v4, 0.0  ;;  %v525_v22 = vpop.f32.mrb[13].mxu1  ;;  %v1015_v23 = vpop.f32.mrb[14].mxu0 }
 0x100   : > { %805 = vst.msk [vmem:[%s1181_s6 + $0x68] sm:$0xf] %vm778_vm2, %v972_v5  ;;  %787 = vst.msk [vmem:[%s1181_s6 + $0x20] sm:$0xf] %vm778_vm2, %v954_v6  ;;  %v973_v16 = vpack.c.bf16 %v645_v7, %v645_v7  ;;  %v577_v18 = vmul.f32 %v1030_v14, %v1156_v19  ;;  %v559_v20 = vmul.f32 %v1156_v19, %v461_v15  ;;  %v1031_v28 = vpop.f32.mrb[14].mxu1  ;;  %v464_v29 = vpop.f32.mrb[15].mxu0 }
 0x101   : > { %v955_v17 = vpack.c.bf16 %v627_v8, %v627_v8  ;;  %803 = vst.msk [vmem:[%s1181_s6 + $0x60] sm:$0xf] %vm778_vm2, %v970_v10  ;;  %790 = vst.msk [vmem:[%s1181_s6 + $0x2c] sm:$0xf] %vm778_vm2, %v957_v11  ;;  %v971_v24 = vpack.c.bf16 %v643_v12, %v643_v12  ;;  %v600_v25 = vadd.f32 %v1161_v21, %v561_v13  ;;  %v528_v34 = vpop.f32.mrb[15].mxu1 }
 0x102   : > { %v575_v26 = vmul.f32 %v1156_v19, %v525_v22  ;;  %v562_v27 = vmul.f32 %v1015_v23, %v1156_v19  ;;  %806 = vst.msk [vmem:[%s1181_s6 + $0x6c] sm:$0xf] %vm778_vm2, %v973_v16  ;;  %v616_v30 = vadd.f32 %v1161_v21, %v577_v18  ;;  %v598_v31 = vadd.f32 %v1161_v21, %v559_v20 }
 0x103   : > { %788 = vst.msk [vmem:[%s1181_s6 + $0x24] sm:$0xf] %vm778_vm2, %v955_v17  ;;  %v578_v32 = vmul.f32 %v1031_v28, %v1156_v19  ;;  %v560_v33 = vmul.f32 %v1156_v19, %v464_v29  ;;  %804 = vst.msk [vmem:[%s1181_s6 + $0x64] sm:$0xf] %vm778_vm2, %v971_v24  ;;  %v632_v35 = vmax.f32 %v600_v25, 0.0  ;;  %v576_v38 = vmul.f32 %v1156_v19, %v528_v34 }
 0x104   : > { %v614_v36 = vadd.f32 %v1161_v21, %v575_v26  ;;  %v601_v37 = vadd.f32 %v1161_v21, %v562_v27  ;;  %v648_v39 = vmax.f32 %v616_v30, 0.0  ;;  %v630_v40 = vmax.f32 %v598_v31, 0.0 }
 0x105   : > { %v617_v41 = vadd.f32 %v1161_v21, %v578_v32  ;;  %v599_v42 = vadd.f32 %v1161_v21, %v560_v33  ;;  %v960_v43 = vpack.c.bf16 %v632_v35, %v632_v35  ;;  %v615_v46 = vadd.f32 %v1161_v21, %v576_v38 }
 0x106   : > { %v646_v44 = vmax.f32 %v614_v36, 0.0  ;;  %v633_v45 = vmax.f32 %v601_v37, 0.0  ;;  %v976_v47 = vpack.c.bf16 %v648_v39, %v648_v39  ;;  %v958_v48 = vpack.c.bf16 %v630_v40, %v630_v40 }
 0x107   : > { %v649_v19 = vmax.f32 %v617_v41, 0.0  ;;  %v631_v49 = vmax.f32 %v599_v42, 0.0  ;;  %793 = vst.msk [vmem:[%s1181_s6 + $0x38] sm:$0xf] %vm778_vm2, %v960_v43  ;;  %v647_v52 = vmax.f32 %v615_v46, 0.0 }
 0x108   : > { %v974_v50 = vpack.c.bf16 %v646_v44, %v646_v44  ;;  %v961_v51 = vpack.c.bf16 %v633_v45, %v633_v45  ;;  %809 = vst.msk [vmem:[%s1181_s6 + $0x78] sm:$0xf] %vm778_vm2, %v976_v47  ;;  %791 = vst.msk [vmem:[%s1181_s6 + $0x30] sm:$0xf] %vm778_vm2, %v958_v48 }
 0x109   : > { %v977_v53 = vpack.c.bf16 %v649_v19, %v649_v19  ;;  %v959_v54 = vpack.c.bf16 %v631_v49, %v631_v49  ;;  %v975_v21 = vpack.c.bf16 %v647_v52, %v647_v52 }
 0x10a   : > { %807 = vst.msk [vmem:[%s1181_s6 + $0x70] sm:$0xf] %vm778_vm2, %v974_v50  ;;  %794 = vst.msk [vmem:[%s1181_s6 + $0x3c] sm:$0xf] %vm778_vm2, %v961_v51 }
 0x10b   : > { %810 = vst.msk [vmem:[%s1181_s6 + $0x7c] sm:$0xf] %vm778_vm2, %v977_v53  ;;  %792 = vst.msk [vmem:[%s1181_s6 + $0x34] sm:$0xf] %vm778_vm2, %v959_v54 }
 0x10c   : > { %808 = vst.msk [vmem:[%s1181_s6 + $0x74] sm:$0xf] %vm778_vm2, %v975_v21 }
 0x10d PF: > { %s14_s15 = sadd.s32 1, %s1070_s15  }
 0x10e   : > { %p11_p4 = scmp.ge.s32.totalorder %s14_s15, 4  }
 0x110   :  { %13 = sbr.rel (!%p11_p4) target bundleno = 1 (0x1), region = 66 }

// kernel: deeplab_forward.15
= control target key start
LH: loop header
LB: loop body
LE: loop exit
PB: predicated region body
PF: predicated region fallthrough
CT: control target
= control target key end

     0   :  { %s1244_s15 = smov 0   ;;  %s1482_s0 = inlined_call_operand.vmem [shape: bf16[512,144], index: 0, kind: input, shape index: {}]   ;;  %s1483_s1 = inlined_call_operand.vmem [shape: bf16[144,24], index: 1, kind: input, shape index: {}]   ;;  %s1484_s2 = inlined_call_operand.vmem [shape: f32[1,24], index: 2, kind: input, shape index: {}]   ;;  %s1485_s3 = inlined_call_operand.vmem [shape: f32[1,24], index: 3, kind: input, shape index: {}]   ;;  %s1486_s4 = inlined_call_operand.vmem [shape: bf16[512,24], index: 4, kind: output, shape index: {}]  }
   0x1 LB: > { %s990_s16 = sadd.s32 4294967295, %s1216_s15   ;;  %p994_p0 = scmp.ge.s32.totalorder %s1216_s15, 1  ;;  %s1216_s15 = sphi %s1244_s15, %s14_s15  }
   0x2   : > { %p164_p1 = scmp.lt.s32.totalorder %s1216_s15, 3 }
   0x4   : > { %p165_p2 = pnand %p994_p0, %p164_p1 }
   0x5   : > { %v1153_v0 = vld [vmem:[%s1483_s1] sm:$0xff] (!%p165_p2)   ;;  %v1218_v1 = vmov (!%p165_p2), 0   ;;  %s995_s19 = sshll.u32 (!%p165_p2), %s990_s16, 5  ;;  %v1154_v2 = vld [vmem:[%s1483_s1 + $0x8] sm:$0xff] (!%p165_p2)   ;;  %v1155_v3 = vld [vmem:[%s1483_s1 + $0x10] sm:$0xff] (!%p165_p2)   ;;  %vm453_vm0 = vcmask (!%p165_p2), 130048  }
   0x6   : > { %168 = sbr.rel (%p165_p2) target bundleno = 321 (0x141), region = 36  ;;  %502 = vmatprep.subr.bf16.mxu0 (!%p165_p2), %v1218_v1  ;;  %1126 = vmatprep.subr.bf16.mxu1 (!%p165_p2), %v1218_v1  ;;  %p192_p3 = scmp.lt.s32.totalorder (!%p165_p2), %s995_s19, 63  ;;  %v1156_v4 = vld [vmem:[%s1483_s1 + $0x18] sm:$0xff] (!%p165_p2)   ;;  %v1157_v7 = vld [vmem:[%s1483_s1 + $0x20] sm:$0xff] (!%p165_p2)   ;;  %v1158_v8 = vld [vmem:[%s1483_s1 + $0x28] sm:$0xff] (!%p165_p2)   ;;  %vm901_vm1 = vcmask (!%p165_p2), 191488  }
   0x7   : > { %503 = vmatpush1.bf16.msra.mxu0 (!%p165_p2), %v1153_v0  ;;  %1135 = vmatpush1.bf16.msra.mxu1 (!%p165_p2), %v1153_v0  ;;  %v1159_v9 = vld [vmem:[%s1483_s1 + $0x30] sm:$0xff] (!%p165_p2)   ;;  %v1160_v10 = vld [vmem:[%s1483_s1 + $0x38] sm:$0xff] (!%p165_p2)   ;;  %v1161_v11 = vld [vmem:[%s1483_s1 + $0x40] sm:$0xff] (!%p165_p2)  }
   0x8   : > { %504 = vmatprep.subr.bf16.mxu0 (!%p165_p2), %v1218_v1  ;;  %1127 = vmatprep.subr.bf16.mxu1 (!%p165_p2), %v1218_v1  ;;  %v1338_v42 = vld [vmem:[%s1484_s2] ss:$0 sm:$0xff] (!%p165_p2) }
   0x9   : > { %v1343_v44 = vld [vmem:[%s1485_s3] ss:$0 sm:$0xff] (!%p165_p2) }
   0xb   : > { %505 = vmatpush1.bf16.msra.mxu0 (!%p165_p2), %v1154_v2  ;;  %1136 = vmatpush1.bf16.msra.mxu1 (!%p165_p2), %v1154_v2 }
   0xc   : > { %506 = vmatprep.subr.bf16.mxu0 (!%p165_p2), %v1218_v1  ;;  %1128 = vmatprep.subr.bf16.mxu1 (!%p165_p2), %v1218_v1 }
   0xd   : > { %s1488_s19 = smov (!%p192_p3, %s995_s19), 63 }
   0xe   : > { %s1093_s24 = sshll.u32 %s1488_s19, 3  ;;  %s999_s20 = sshll.u32 %s1488_s19, 2 }
   0xf   : > { %s1267_s27 = scalar_lea.vmem %s1482_s0, %s1093_s24  ;;  %507 = vmatpush1.bf16.msra.mxu0 %v1155_v3  ;;  %1137 = vmatpush1.bf16.msra.mxu1 %v1155_v3  ;;  %s1357_s19 = scalar_lea.vmem %s1486_s4, %s999_s20 }
  0x10   : > { %v1164_v5 = vld [vmem:[%s1267_s27 + $0x4] ss:$8 sps:$4 sm:$0xff]   ;;  %508 = vmatprep.subr.bf16.mxu0 %v1218_v1  ;;  %1129 = vmatprep.subr.bf16.mxu1 %v1218_v1  ;;  %v1162_v12 = vld [vmem:[%s1267_s27] ss:$8 sps:$4 sm:$0xff]   ;;  %v1168_v14 = vld [vmem:[%s1267_s27 + $0x14] ss:$8 sps:$4 sm:$0xff]  }
  0x11   : > { %v1167_v6 = vld [vmem:[%s1267_s27 + $0x84] ss:$8 sps:$4 sm:$0xff]   ;;  %1041 = vmatprep.mubr.msk.bf16.mxu0 %vm453_vm0, %v1164_v5  ;;  %v1165_v13 = vld [vmem:[%s1267_s27 + $0x80] ss:$8 sps:$4 sm:$0xff]   ;;  %v1170_v15 = vld [vmem:[%s1267_s27 + $0x94] ss:$8 sps:$4 sm:$0xff]  }
  0x12   : > { %1049 = vmatprep.mubr.msk.bf16.mxu1 %vm453_vm0, %v1167_v6  ;;  %v1172_v16 = vld [vmem:[%s1267_s27 + $0x10] ss:$8 sps:$4 sm:$0xff]   ;;  %v1174_v18 = vld [vmem:[%s1267_s27 + $0x24] ss:$8 sps:$4 sm:$0xff]   ;;  %v1178_v20 = vld [vmem:[%s1267_s27 + $0x20] ss:$8 sps:$4 sm:$0xff]  }
  0x13   : > { %509 = vmatpush1.bf16.msra.mxu0 %v1156_v4  ;;  %1138 = vmatpush1.bf16.msra.mxu1 %v1156_v4  ;;  %v1173_v17 = vld [vmem:[%s1267_s27 + $0x90] ss:$8 sps:$4 sm:$0xff]   ;;  %v1176_v19 = vld [vmem:[%s1267_s27 + $0xa4] ss:$8 sps:$4 sm:$0xff]   ;;  %v1179_v21 = vld [vmem:[%s1267_s27 + $0xa0] ss:$8 sps:$4 sm:$0xff]  }
  0x14   : > { %510 = vmatprep.subr.bf16.mxu0 %v1218_v1  ;;  %1130 = vmatprep.subr.bf16.mxu1 %v1218_v1  ;;  %v1180_v22 = vld [vmem:[%s1267_s27 + $0x34] ss:$8 sps:$4 sm:$0xff]   ;;  %v1184_v24 = vld [vmem:[%s1267_s27 + $0x30] ss:$8 sps:$4 sm:$0xff]   ;;  %v1186_v26 = vld [vmem:[%s1267_s27 + $0x44] ss:$8 sps:$4 sm:$0xff]  }
  0x15   : > { %v1182_v23 = vld [vmem:[%s1267_s27 + $0xb4] ss:$8 sps:$4 sm:$0xff]   ;;  %v1185_v25 = vld [vmem:[%s1267_s27 + $0xb0] ss:$8 sps:$4 sm:$0xff]   ;;  %v1188_v27 = vld [vmem:[%s1267_s27 + $0xc4] ss:$8 sps:$4 sm:$0xff]  }
  0x16   : > { %v1190_v28 = vld [vmem:[%s1267_s27 + $0x40] ss:$8 sps:$4 sm:$0xff]   ;;  %v1192_v30 = vld [vmem:[%s1267_s27 + $0x54] ss:$8 sps:$4 sm:$0xff]   ;;  %v1196_v32 = vld [vmem:[%s1267_s27 + $0x50] ss:$8 sps:$4 sm:$0xff]  }
  0x17   : > { %511 = vmatpush1.bf16.msra.mxu0 %v1157_v7  ;;  %1139 = vmatpush1.bf16.msra.mxu1 %v1157_v7  ;;  %v1191_v29 = vld [vmem:[%s1267_s27 + $0xc0] ss:$8 sps:$4 sm:$0xff]   ;;  %v1194_v31 = vld [vmem:[%s1267_s27 + $0xd4] ss:$8 sps:$4 sm:$0xff]   ;;  %v1197_v33 = vld [vmem:[%s1267_s27 + $0xd0] ss:$8 sps:$4 sm:$0xff]  }
  0x18   : > { %512 = vmatprep.subr.bf16.mxu0 %v1218_v1  ;;  %1131 = vmatprep.subr.bf16.mxu1 %v1218_v1  ;;  %v1198_v34 = vld [vmem:[%s1267_s27 + $0x64] ss:$8 sps:$4 sm:$0xff]   ;;  %v1202_v36 = vld [vmem:[%s1267_s27 + $0x60] ss:$8 sps:$4 sm:$0xff]   ;;  %v1204_v38 = vld [vmem:[%s1267_s27 + $0x74] ss:$8 sps:$4 sm:$0xff]  }
  0x19   : > { %v1200_v35 = vld [vmem:[%s1267_s27 + $0xe4] ss:$8 sps:$4 sm:$0xff]   ;;  %v1203_v37 = vld [vmem:[%s1267_s27 + $0xe0] ss:$8 sps:$4 sm:$0xff]   ;;  %v1206_v39 = vld [vmem:[%s1267_s27 + $0xf4] ss:$8 sps:$4 sm:$0xff]  }
  0x1a   : > { %v1208_v40 = vld [vmem:[%s1267_s27 + $0x70] ss:$8 sps:$4 sm:$0xff]  }
  0x1b   : > { %513 = vmatpush1.bf16.msra.mxu0 %v1158_v8  ;;  %1140 = vmatpush1.bf16.msra.mxu1 %v1158_v8  ;;  %v1209_v41 = vld [vmem:[%s1267_s27 + $0xf0] ss:$8 sps:$4 sm:$0xff]  }
  0x1c   : > { %514 = vmatprep.subr.bf16.mxu0 %v1218_v1  ;;  %1132 = vmatprep.subr.bf16.mxu1 %v1218_v1 }
  0x1f   : > { %515 = vmatpush1.bf16.msra.mxu0 %v1159_v9  ;;  %1141 = vmatpush1.bf16.msra.mxu1 %v1159_v9 }
  0x20   : > { %516 = vmatprep.subr.bf16.mxu0 %v1218_v1  ;;  %1133 = vmatprep.subr.bf16.mxu1 %v1218_v1 }
  0x23   : > { %517 = vmatpush1.bf16.msra.mxu0 %v1160_v10  ;;  %1142 = vmatpush1.bf16.msra.mxu1 %v1160_v10 }
  0x24   : > { %518 = vmatprep.subr.bf16.mxu0 %v1218_v1  ;;  %1134 = vmatprep.subr.bf16.mxu1 %v1218_v1 }
  0x27   : > { %519 = vmatpush1.bf16.msra.mxu0 %v1161_v11  ;;  %1143 = vmatpush1.bf16.msra.mxu1 %v1161_v11 }
  0x2a   : > { %535 = vmatmul.mubr.bf16.vlgmr.msra.gmra.mrb[0].mxu0 %v1162_v12  ;;  %599 = vmatmul.mubr.bf16.vlgmr.msra.gmra.mrb[0].mxu1 %v1165_v13 }
  0x2b   : > { %1042 = vmatprep.mubr.msk.bf16.mxu0 %vm453_vm0, %v1168_v14  ;;  %1050 = vmatprep.mubr.msk.bf16.mxu1 %vm453_vm0, %v1170_v15 }
  0x32   : > { %543 = vmatmul.mubr.bf16.gmra.mrb[4].mxu0 %v1172_v16  ;;  %607 = vmatmul.mubr.bf16.gmra.mrb[4].mxu1 %v1173_v17 }
  0x33   : > { %1043 = vmatprep.mubr.msk.bf16.mxu0 %vm453_vm0, %v1174_v18  ;;  %1051 = vmatprep.mubr.msk.bf16.mxu1 %vm453_vm0, %v1176_v19 }
  0x3a   : > { %551 = vmatmul.mubr.bf16.gmra.mrb[8].mxu0 %v1178_v20  ;;  %615 = vmatmul.mubr.bf16.gmra.mrb[8].mxu1 %v1179_v21 }
  0x3b   : > { %1044 = vmatprep.mubr.msk.bf16.mxu0 %vm453_vm0, %v1180_v22  ;;  %1052 = vmatprep.mubr.msk.bf16.mxu1 %vm453_vm0, %v1182_v23 }
  0x42   : > { %559 = vmatmul.mubr.bf16.gmra.mrb[12].mxu0 %v1184_v24  ;;  %623 = vmatmul.mubr.bf16.gmra.mrb[12].mxu1 %v1185_v25 }
  0x43   : > { %1045 = vmatprep.mubr.msk.bf16.mxu0 %vm453_vm0, %v1186_v26  ;;  %1053 = vmatprep.mubr.msk.bf16.mxu1 %vm453_vm0, %v1188_v27 }
  0x4a   : > { %567 = vmatmul.mubr.bf16.gmra.mrb[16].mxu0 %v1190_v28  ;;  %631 = vmatmul.mubr.bf16.gmra.mrb[16].mxu1 %v1191_v29 }
  0x4b   : > { %1046 = vmatprep.mubr.msk.bf16.mxu0 %vm453_vm0, %v1192_v30  ;;  %1054 = vmatprep.mubr.msk.bf16.mxu1 %vm453_vm0, %v1194_v31 }
  0x52   : > { %575 = vmatmul.mubr.bf16.gmra.mrb[20].mxu0 %v1196_v32  ;;  %639 = vmatmul.mubr.bf16.gmra.mrb[20].mxu1 %v1197_v33 }
  0x53   : > { %1047 = vmatprep.mubr.msk.bf16.mxu0 %vm453_vm0, %v1198_v34  ;;  %1055 = vmatprep.mubr.msk.bf16.mxu1 %vm453_vm0, %v1200_v35 }
  0x5a   : > { %583 = vmatmul.mubr.bf16.gmra.mrb[24].mxu0 %v1202_v36  ;;  %647 = vmatmul.mubr.bf16.gmra.mrb[24].mxu1 %v1203_v37 }
  0x5b   : > { %1048 = vmatprep.mubr.msk.bf16.mxu0 %vm453_vm0, %v1204_v38  ;;  %1056 = vmatprep.mubr.msk.bf16.mxu1 %vm453_vm0, %v1206_v39 }
  0x62   : > { %591 = vmatmul.mubr.bf16.gmra.mrb[28].mxu0 %v1208_v40  ;;  %655 = vmatmul.mubr.bf16.gmra.mrb[28].mxu1 %v1209_v41 }
  0xfd   : > { %v536_v43 = vpop.f32.mrb[0].mxu0  ;;  %v600_v45 = vpop.f32.mrb[0].mxu1 }
  0xfe   : > { %v670_v46 = vmul.f32 %v1338_v42, %v536_v43  ;;  %v686_v47 = vmul.f32 %v1338_v42, %v600_v45  ;;  %v538_v48 = vpop.f32.mrb[1].mxu0  ;;  %v602_v49 = vpop.f32.mrb[1].mxu1 }
  0xff   : > { %v539_v50 = vpop.f32.mrb[2].mxu0  ;;  %v603_v51 = vpop.f32.mrb[2].mxu1 }
 0x100   : > { %v709_v52 = vadd.f32 %v1343_v44, %v670_v46  ;;  %v725_v53 = vadd.f32 %v1343_v44, %v686_v47  ;;  %v671_v54 = vmul.f32 %v1338_v42, %v539_v50  ;;  %v687_v55 = vmul.f32 %v1338_v42, %v603_v51  ;;  %v541_v56 = vpop.f32.mrb[3].mxu0  ;;  %v605_v57 = vpop.f32.mrb[3].mxu1 }
 0x102   : > { %v741_v58 = vmax.f32 %v709_v52, 0.0  ;;  %v757_v59 = vmax.f32 %v725_v53, 0.0  ;;  %v710_v60 = vadd.f32 %v1343_v44, %v671_v54  ;;  %v726_v61 = vadd.f32 %v1343_v44, %v687_v55 }
 0x104   : > { %v1094_v62 = vpack.c.bf16 %v741_v58, %v741_v58  ;;  %v1110_v63 = vpack.c.bf16 %v757_v59, %v757_v59  ;;  %v742_v0 = vmax.f32 %v710_v60, 0.0  ;;  %v758_v1 = vmax.f32 %v726_v61, 0.0 }
 0x105   : > { %v544_v2 = vpop.f32.mrb[4].mxu0  ;;  %v608_v3 = vpop.f32.mrb[4].mxu1 }
 0x106   : > { %902 = vst.msk [vmem:[%s1357_s19] sm:$0xf] %vm901_vm1, %v1094_v62  ;;  %918 = vst.msk [vmem:[%s1357_s19 + $0x40] sm:$0xf] %vm901_vm1, %v1110_v63  ;;  %v1095_v4 = vpack.c.bf16 %v742_v0, %v742_v0  ;;  %v1111_v5 = vpack.c.bf16 %v758_v1, %v758_v1  ;;  %v672_v6 = vmul.f32 %v1338_v42, %v544_v2  ;;  %v546_v8 = vpop.f32.mrb[5].mxu0  ;;  %v610_v9 = vpop.f32.mrb[5].mxu1 }
 0x107   : > { %v688_v7 = vmul.f32 %v1338_v42, %v608_v3  ;;  %v547_v10 = vpop.f32.mrb[6].mxu0  ;;  %v611_v11 = vpop.f32.mrb[6].mxu1 }
 0x108   : > { %903 = vst.msk [vmem:[%s1357_s19 + $0x4] sm:$0xf] %vm901_vm1, %v1095_v4  ;;  %919 = vst.msk [vmem:[%s1357_s19 + $0x44] sm:$0xf] %vm901_vm1, %v1111_v5  ;;  %v711_v12 = vadd.f32 %v1343_v44, %v672_v6  ;;  %v673_v14 = vmul.f32 %v1338_v42, %v547_v10  ;;  %v689_v15 = vmul.f32 %v1338_v42, %v611_v11  ;;  %v549_v16 = vpop.f32.mrb[7].mxu0  ;;  %v613_v17 = vpop.f32.mrb[7].mxu1 }
 0x109   : > { %v727_v13 = vadd.f32 %v1343_v44, %v688_v7 }
 0x10a   : > { %v743_v18 = vmax.f32 %v711_v12, 0.0  ;;  %v712_v20 = vadd.f32 %v1343_v44, %v673_v14  ;;  %v728_v21 = vadd.f32 %v1343_v44, %v689_v15 }
 0x10b   : > { %v759_v19 = vmax.f32 %v727_v13, 0.0 }
 0x10c   : > { %v1096_v22 = vpack.c.bf16 %v743_v18, %v743_v18  ;;  %v744_v24 = vmax.f32 %v712_v20, 0.0  ;;  %v760_v25 = vmax.f32 %v728_v21, 0.0 }
 0x10d   : > { %v1112_v23 = vpack.c.bf16 %v759_v19, %v759_v19  ;;  %v552_v26 = vpop.f32.mrb[8].mxu0  ;;  %v616_v27 = vpop.f32.mrb[8].mxu1 }
 0x10e   : > { %904 = vst.msk [vmem:[%s1357_s19 + $0x8] sm:$0xf] %vm901_vm1, %v1096_v22  ;;  %v1097_v28 = vpack.c.bf16 %v744_v24, %v744_v24  ;;  %v1113_v29 = vpack.c.bf16 %v760_v25, %v760_v25  ;;  %v674_v30 = vmul.f32 %v1338_v42, %v552_v26  ;;  %v690_v31 = vmul.f32 %v1338_v42, %v616_v27  ;;  %v554_v32 = vpop.f32.mrb[9].mxu0  ;;  %v618_v33 = vpop.f32.mrb[9].mxu1 }
 0x10f   : > { %920 = vst.msk [vmem:[%s1357_s19 + $0x48] sm:$0xf] %vm901_vm1, %v1112_v23  ;;  %v555_v34 = vpop.f32.mrb[10].mxu0  ;;  %v619_v35 = vpop.f32.mrb[10].mxu1 }
 0x110   : > { %905 = vst.msk [vmem:[%s1357_s19 + $0xc] sm:$0xf] %vm901_vm1, %v1097_v28  ;;  %921 = vst.msk [vmem:[%s1357_s19 + $0x4c] sm:$0xf] %vm901_vm1, %v1113_v29  ;;  %v713_v36 = vadd.f32 %v1343_v44, %v674_v30  ;;  %v729_v37 = vadd.f32 %v1343_v44, %v690_v31  ;;  %v675_v38 = vmul.f32 %v1338_v42, %v555_v34  ;;  %v557_v40 = vpop.f32.mrb[11].mxu0  ;;  %v621_v41 = vpop.f32.mrb[11].mxu1 }
 0x111   : > { %v691_v39 = vmul.f32 %v1338_v42, %v619_v35 }
 0x112   : > { %v745_v43 = vmax.f32 %v713_v36, 0.0  ;;  %v761_v45 = vmax.f32 %v729_v37, 0.0  ;;  %v714_v46 = vadd.f32 %v1343_v44, %v675_v38 }
 0x113   : > { %v730_v47 = vadd.f32 %v1343_v44, %v691_v39 }
 0x114   : > { %v1098_v48 = vpack.c.bf16 %v745_v43, %v745_v43  ;;  %v1114_v49 = vpack.c.bf16 %v761_v45, %v761_v45  ;;  %v746_v50 = vmax.f32 %v714_v46, 0.0 }
 0x115   : > { %v762_v51 = vmax.f32 %v730_v47, 0.0  ;;  %v560_v52 = vpop.f32.mrb[12].mxu0  ;;  %v624_v53 = vpop.f32.mrb[12].mxu1 }
 0x116   : > { %906 = vst.msk [vmem:[%s1357_s19 + $0x10] sm:$0xf] %vm901_vm1, %v1098_v48  ;;  %922 = vst.msk [vmem:[%s1357_s19 + $0x50] sm:$0xf] %vm901_vm1, %v1114_v49  ;;  %v1099_v54 = vpack.c.bf16 %v746_v50, %v746_v50  ;;  %v676_v56 = vmul.f32 %v1338_v42, %v560_v52  ;;  %v692_v57 = vmul.f32 %v1338_v42, %v624_v53  ;;  %v562_v58 = vpop.f32.mrb[13].mxu0  ;;  %v626_v59 = vpop.f32.mrb[13].mxu1 }
 0x117   : > { %v1115_v55 = vpack.c.bf16 %v762_v51, %v762_v51  ;;  %v563_v60 = vpop.f32.mrb[14].mxu0  ;;  %v627_v61 = vpop.f32.mrb[14].mxu1 }
 0x118   : > { %907 = vst.msk [vmem:[%s1357_s19 + $0x14] sm:$0xf] %vm901_vm1, %v1099_v54  ;;  %v715_v62 = vadd.f32 %v1343_v44, %v676_v56  ;;  %v731_v63 = vadd.f32 %v1343_v44, %v692_v57  ;;  %v677_v0 = vmul.f32 %v1338_v42, %v563_v60  ;;  %v693_v1 = vmul.f32 %v1338_v42, %v627_v61  ;;  %v565_v2 = vpop.f32.mrb[15].mxu0  ;;  %v629_v3 = vpop.f32.mrb[15].mxu1 }
 0x119   : > { %923 = vst.msk [vmem:[%s1357_s19 + $0x54] sm:$0xf] %vm901_vm1, %v1115_v55 }
 0x11a   : > { %v747_v4 = vmax.f32 %v715_v62, 0.0  ;;  %v763_v5 = vmax.f32 %v731_v63, 0.0  ;;  %v716_v6 = vadd.f32 %v1343_v44, %v677_v0  ;;  %v732_v7 = vadd.f32 %v1343_v44, %v693_v1 }
 0x11c   : > { %v1100_v8 = vpack.c.bf16 %v747_v4, %v747_v4  ;;  %v1116_v9 = vpack.c.bf16 %v763_v5, %v763_v5  ;;  %v748_v10 = vmax.f32 %v716_v6, 0.0  ;;  %v764_v11 = vmax.f32 %v732_v7, 0.0 }
 0x11d   : > { %v568_v12 = vpop.f32.mrb[16].mxu0  ;;  %v632_v13 = vpop.f32.mrb[16].mxu1 }
 0x11e   : > { %908 = vst.msk [vmem:[%s1357_s19 + $0x18] sm:$0xf] %vm901_vm1, %v1100_v8  ;;  %924 = vst.msk [vmem:[%s1357_s19 + $0x58] sm:$0xf] %vm901_vm1, %v1116_v9  ;;  %v1101_v14 = vpack.c.bf16 %v748_v10, %v748_v10  ;;  %v1117_v15 = vpack.c.bf16 %v764_v11, %v764_v11  ;;  %v678_v16 = vmul.f32 %v1338_v42, %v568_v12  ;;  %v570_v18 = vpop.f32.mrb[17].mxu0  ;;  %v634_v19 = vpop.f32.mrb[17].mxu1 }
 0x11f   : > { %v694_v17 = vmul.f32 %v1338_v42, %v632_v13  ;;  %v571_v20 = vpop.f32.mrb[18].mxu0  ;;  %v635_v21 = vpop.f32.mrb[18].mxu1 }
 0x120   : > { %909 = vst.msk [vmem:[%s1357_s19 + $0x1c] sm:$0xf] %vm901_vm1, %v1101_v14  ;;  %925 = vst.msk [vmem:[%s1357_s19 + $0x5c] sm:$0xf] %vm901_vm1, %v1117_v15  ;;  %v717_v22 = vadd.f32 %v1343_v44, %v678_v16  ;;  %v679_v24 = vmul.f32 %v1338_v42, %v571_v20  ;;  %v695_v25 = vmul.f32 %v1338_v42, %v635_v21  ;;  %v573_v26 = vpop.f32.mrb[19].mxu0  ;;  %v637_v27 = vpop.f32.mrb[19].mxu1 }
 0x121   : > { %v733_v23 = vadd.f32 %v1343_v44, %v694_v17 }
 0x122   : > { %v749_v28 = vmax.f32 %v717_v22, 0.0  ;;  %v718_v30 = vadd.f32 %v1343_v44, %v679_v24  ;;  %v734_v31 = vadd.f32 %v1343_v44, %v695_v25 }
 0x123   : > { %v765_v29 = vmax.f32 %v733_v23, 0.0 }
 0x124   : > { %v1102_v32 = vpack.c.bf16 %v749_v28, %v749_v28  ;;  %v750_v34 = vmax.f32 %v718_v30, 0.0  ;;  %v766_v35 = vmax.f32 %v734_v31, 0.0 }
 0x125   : > { %v1118_v33 = vpack.c.bf16 %v765_v29, %v765_v29  ;;  %v576_v36 = vpop.f32.mrb[20].mxu0  ;;  %v640_v37 = vpop.f32.mrb[20].mxu1 }
 0x126   : > { %910 = vst.msk [vmem:[%s1357_s19 + $0x20] sm:$0xf] %vm901_vm1, %v1102_v32  ;;  %v1103_v38 = vpack.c.bf16 %v750_v34, %v750_v34  ;;  %v1119_v39 = vpack.c.bf16 %v766_v35, %v766_v35  ;;  %v680_v40 = vmul.f32 %v1338_v42, %v576_v36  ;;  %v696_v41 = vmul.f32 %v1338_v42, %v640_v37  ;;  %v578_v43 = vpop.f32.mrb[21].mxu0  ;;  %v642_v45 = vpop.f32.mrb[21].mxu1 }
 0x127   : > { %926 = vst.msk [vmem:[%s1357_s19 + $0x60] sm:$0xf] %vm901_vm1, %v1118_v33  ;;  %v579_v46 = vpop.f32.mrb[22].mxu0  ;;  %v643_v47 = vpop.f32.mrb[22].mxu1 }
 0x128   : > { %911 = vst.msk [vmem:[%s1357_s19 + $0x24] sm:$0xf] %vm901_vm1, %v1103_v38  ;;  %927 = vst.msk [vmem:[%s1357_s19 + $0x64] sm:$0xf] %vm901_vm1, %v1119_v39  ;;  %v719_v48 = vadd.f32 %v1343_v44, %v680_v40  ;;  %v735_v49 = vadd.f32 %v1343_v44, %v696_v41  ;;  %v681_v50 = vmul.f32 %v1338_v42, %v579_v46  ;;  %v581_v52 = vpop.f32.mrb[23].mxu0  ;;  %v645_v53 = vpop.f32.mrb[23].mxu1 }
 0x129   : > { %v697_v51 = vmul.f32 %v1338_v42, %v643_v47 }
 0x12a   : > { %v751_v54 = vmax.f32 %v719_v48, 0.0  ;;  %v767_v55 = vmax.f32 %v735_v49, 0.0  ;;  %v720_v56 = vadd.f32 %v1343_v44, %v681_v50 }
 0x12b   : > { %v736_v57 = vadd.f32 %v1343_v44, %v697_v51 }
 0x12c   : > { %v1104_v58 = vpack.c.bf16 %v751_v54, %v751_v54  ;;  %v1120_v59 = vpack.c.bf16 %v767_v55, %v767_v55  ;;  %v752_v60 = vmax.f32 %v720_v56, 0.0 }
 0x12d   : > { %v768_v61 = vmax.f32 %v736_v57, 0.0  ;;  %v584_v62 = vpop.f32.mrb[24].mxu0  ;;  %v648_v63 = vpop.f32.mrb[24].mxu1 }
 0x12e   : > { %912 = vst.msk [vmem:[%s1357_s19 + $0x28] sm:$0xf] %vm901_vm1, %v1104_v58  ;;  %928 = vst.msk [vmem:[%s1357_s19 + $0x68] sm:$0xf] %vm901_vm1, %v1120_v59  ;;  %v1105_v0 = vpack.c.bf16 %v752_v60, %v752_v60  ;;  %v682_v2 = vmul.f32 %v1338_v42, %v584_v62  ;;  %v698_v3 = vmul.f32 %v1338_v42, %v648_v63  ;;  %v586_v4 = vpop.f32.mrb[25].mxu0  ;;  %v650_v5 = vpop.f32.mrb[25].mxu1 }
 0x12f   : > { %v1121_v1 = vpack.c.bf16 %v768_v61, %v768_v61  ;;  %v587_v6 = vpop.f32.mrb[26].mxu0  ;;  %v651_v7 = vpop.f32.mrb[26].mxu1 }
 0x130   : > { %913 = vst.msk [vmem:[%s1357_s19 + $0x2c] sm:$0xf] %vm901_vm1, %v1105_v0  ;;  %v721_v8 = vadd.f32 %v1343_v44, %v682_v2  ;;  %v737_v9 = vadd.f32 %v1343_v44, %v698_v3  ;;  %v683_v10 = vmul.f32 %v1338_v42, %v587_v6  ;;  %v699_v11 = vmul.f32 %v1338_v42, %v651_v7  ;;  %v589_v12 = vpop.f32.mrb[27].mxu0  ;;  %v653_v13 = vpop.f32.mrb[27].mxu1 }
 0x131   : > { %929 = vst.msk [vmem:[%s1357_s19 + $0x6c] sm:$0xf] %vm901_vm1, %v1121_v1 }
 0x132   : > { %v753_v14 = vmax.f32 %v721_v8, 0.0  ;;  %v769_v15 = vmax.f32 %v737_v9, 0.0  ;;  %v722_v16 = vadd.f32 %v1343_v44, %v683_v10  ;;  %v738_v17 = vadd.f32 %v1343_v44, %v699_v11 }
 0x134   : > { %v1106_v18 = vpack.c.bf16 %v753_v14, %v753_v14  ;;  %v1122_v19 = vpack.c.bf16 %v769_v15, %v769_v15  ;;  %v754_v20 = vmax.f32 %v722_v16, 0.0  ;;  %v770_v21 = vmax.f32 %v738_v17, 0.0 }
 0x135   : > { %v592_v22 = vpop.f32.mrb[28].mxu0  ;;  %v656_v23 = vpop.f32.mrb[28].mxu1 }
 0x136   : > { %914 = vst.msk [vmem:[%s1357_s19 + $0x30] sm:$0xf] %vm901_vm1, %v1106_v18  ;;  %930 = vst.msk [vmem:[%s1357_s19 + $0x70] sm:$0xf] %vm901_vm1, %v1122_v19  ;;  %v1107_v24 = vpack.c.bf16 %v754_v20, %v754_v20  ;;  %v1123_v25 = vpack.c.bf16 %v770_v21, %v770_v21  ;;  %v684_v26 = vmul.f32 %v1338_v42, %v592_v22  ;;  %v594_v28 = vpop.f32.mrb[29].mxu0  ;;  %v658_v29 = vpop.f32.mrb[29].mxu1 }
 0x137   : > { %v700_v27 = vmul.f32 %v1338_v42, %v656_v23  ;;  %v595_v30 = vpop.f32.mrb[30].mxu0  ;;  %v659_v31 = vpop.f32.mrb[30].mxu1 }
 0x138   : > { %915 = vst.msk [vmem:[%s1357_s19 + $0x34] sm:$0xf] %vm901_vm1, %v1107_v24  ;;  %931 = vst.msk [vmem:[%s1357_s19 + $0x74] sm:$0xf] %vm901_vm1, %v1123_v25  ;;  %v723_v32 = vadd.f32 %v1343_v44, %v684_v26  ;;  %v685_v34 = vmul.f32 %v1338_v42, %v595_v30  ;;  %v701_v35 = vmul.f32 %v1338_v42, %v659_v31  ;;  %v597_v36 = vpop.f32.mrb[31].mxu0  ;;  %v661_v37 = vpop.f32.mrb[31].mxu1 }
 0x139   : > { %v739_v33 = vadd.f32 %v1343_v44, %v700_v27 }
 0x13a   : > { %v755_v38 = vmax.f32 %v723_v32, 0.0  ;;  %v724_v40 = vadd.f32 %v1343_v44, %v685_v34  ;;  %v740_v41 = vadd.f32 %v1343_v44, %v701_v35 }
 0x13b   : > { %v771_v39 = vmax.f32 %v739_v33, 0.0 }
 0x13c   : > { %v1108_v43 = vpack.c.bf16 %v755_v38, %v755_v38  ;;  %v756_v46 = vmax.f32 %v724_v40, 0.0  ;;  %v772_v47 = vmax.f32 %v740_v41, 0.0 }
 0x13d   : > { %v1124_v45 = vpack.c.bf16 %v771_v39, %v771_v39 }
 0x13e   : > { %916 = vst.msk [vmem:[%s1357_s19 + $0x38] sm:$0xf] %vm901_vm1, %v1108_v43  ;;  %v1109_v48 = vpack.c.bf16 %v756_v46, %v756_v46  ;;  %v1125_v49 = vpack.c.bf16 %v772_v47, %v772_v47 }
 0x13f   : > { %932 = vst.msk [vmem:[%s1357_s19 + $0x78] sm:$0xf] %vm901_vm1, %v1124_v45 }
 0x140   : > { %917 = vst.msk [vmem:[%s1357_s19 + $0x3c] sm:$0xf] %vm901_vm1, %v1109_v48  ;;  %933 = vst.msk [vmem:[%s1357_s19 + $0x7c] sm:$0xf] %vm901_vm1, %v1125_v49 }
 0x141 PF: > { %s14_s15 = sadd.s32 1, %s1216_s15  }
 0x142   : > { %p11_p4 = scmp.ge.s32.totalorder %s14_s15, 4  }
 0x144   :  { %13 = sbr.rel (!%p11_p4) target bundleno = 1 (0x1), region = 66 }

// kernel: deeplab_forward.16
= control target key start
LH: loop header
LB: loop body
LE: loop exit
PB: predicated region body
PF: predicated region fallthrough
CT: control target
= control target key end

     0   :  { %s728_s15 = smov 0   ;;  %s857_s0 = inlined_call_operand.vmem [shape: bf16[128,216], index: 0, kind: input, shape index: {}]   ;;  %s858_s1 = inlined_call_operand.vmem [shape: bf16[216,32], index: 1, kind: input, shape index: {}]   ;;  %s859_s2 = inlined_call_operand.vmem [shape: f32[1,32], index: 2, kind: input, shape index: {}]   ;;  %s860_s3 = inlined_call_operand.vmem [shape: f32[1,32], index: 3, kind: input, shape index: {}]   ;;  %s861_s4 = inlined_call_operand.vmem [shape: bf16[128,32], index: 4, kind: output, shape index: {}]  }
   0x1 LB: > { %s574_s16 = sadd.s32 4294967295, %s700_s15   ;;  %p578_p0 = scmp.ge.s32.totalorder %s700_s15, 1  ;;  %s700_s15 = sphi %s728_s15, %s14_s15  }
   0x2   : > { %p164_p1 = scmp.lt.s32.totalorder %s700_s15, 3 }
   0x4   : > { %p165_p2 = pnand %p578_p0, %p164_p1 }
   0x5   : > { %v668_v0 = vld [vmem:[%s858_s1] sm:$0xff] (!%p165_p2)   ;;  %v702_v1 = vmov (!%p165_p2), 0   ;;  %v669_v2 = vld [vmem:[%s858_s1 + $0x8] sm:$0xff] (!%p165_p2)   ;;  %s579_s21 = sshll.u32 (!%p165_p2), %s574_s16, 3  ;;  %v670_v3 = vld [vmem:[%s858_s1 + $0x10] sm:$0xff] (!%p165_p2)   ;;  %vm357_vm0 = vcmask (!%p165_p2), 719872  }
   0x6   : > { %168 = sbr.rel (%p165_p2) target bundleno = 293 (0x125), region = 36  ;;  %374 = vmatprep.subr.bf16.mxu0 (!%p165_p2), %v702_v1  ;;  %631 = vmatprep.subr.bf16.mxu1 (!%p165_p2), %v702_v1  ;;  %p192_p3 = scmp.lt.s32.totalorder (!%p165_p2), %s579_s21, 15  ;;  %v671_v4 = vld [vmem:[%s858_s1 + $0x18] sm:$0xff] (!%p165_p2)   ;;  %v672_v5 = vld [vmem:[%s858_s1 + $0x20] sm:$0xff] (!%p165_p2)   ;;  %v673_v8 = vld [vmem:[%s858_s1 + $0x28] sm:$0xff] (!%p165_p2)   ;;  %vm370_vm1 = vcmask (!%p165_p2), 1043456  }
   0x7   : > { %375 = vmatpush1.bf16.msra.mxu0 (!%p165_p2), %v668_v0  ;;  %645 = vmatpush1.bf16.msra.mxu1 (!%p165_p2), %v668_v0  ;;  %v674_v9 = vld [vmem:[%s858_s1 + $0x30] sm:$0xff] (!%p165_p2)   ;;  %v675_v10 = vld [vmem:[%s858_s1 + $0x38] sm:$0xff] (!%p165_p2)   ;;  %v676_v11 = vld [vmem:[%s858_s1 + $0x40] sm:$0xff] (!%p165_p2)   ;;  %vm509_vm2 = vcmask (!%p165_p2), 257024  }
   0x8   : > { %376 = vmatprep.subr.bf16.mxu0 (!%p165_p2), %v702_v1  ;;  %632 = vmatprep.subr.bf16.mxu1 (!%p165_p2), %v702_v1  ;;  %v677_v12 = vld [vmem:[%s858_s1 + $0x48] sm:$0xff] (!%p165_p2)   ;;  %v678_v13 = vld [vmem:[%s858_s1 + $0x50] sm:$0xff] (!%p165_p2)   ;;  %v679_v14 = vld [vmem:[%s858_s1 + $0x58] sm:$0xff] (!%p165_p2)  }
   0x9   : > { %v680_v15 = vld [vmem:[%s858_s1 + $0x60] sm:$0xff] (!%p165_p2)   ;;  %v681_v16 = vld [vmem:[%s858_s1 + $0x68] ss:$0 sps:$4 sm:$0xff] (!%p165_p2)  }
   0xa   : > { %v372_v17 = vsel (!%p165_p2), %vm370_vm1, %v681_v16, 0  ;;  %v610_v24 = vld [vmem:[%s859_s2] ss:$0 sm:$0xff] (!%p165_p2) }
   0xb   : > { %377 = vmatpush1.bf16.msra.mxu0 (!%p165_p2), %v669_v2  ;;  %646 = vmatpush1.bf16.msra.mxu1 (!%p165_p2), %v669_v2  ;;  %v611_v26 = vld [vmem:[%s860_s3] ss:$0 sm:$0xff] (!%p165_p2) }
   0xc   : > { %378 = vmatprep.subr.bf16.mxu0 (!%p165_p2), %v702_v1  ;;  %633 = vmatprep.subr.bf16.mxu1 (!%p165_p2), %v702_v1 }
   0xd   : > { %s863_s21 = smov (!%p192_p3, %s579_s21), 15 }
   0xe   : > { %s622_s24 = sshll.u32 %s863_s21, 3  ;;  %s583_s5 = sshll.u32 %s863_s21, 2 }
   0xf   : > { %379 = vmatpush1.bf16.msra.mxu0 %v670_v3  ;;  %647 = vmatpush1.bf16.msra.mxu1 %v670_v3  ;;  %s762_s29 = scalar_lea.vmem %s857_s0, %s622_s24  ;;  %s836_s7 = scalar_lea.vmem %s861_s4, %s583_s5 }
  0x10   : > { %380 = vmatprep.subr.bf16.mxu0 %v702_v1  ;;  %634 = vmatprep.subr.bf16.mxu1 %v702_v1  ;;  %v684_v6 = vld [vmem:[%s762_s29 + $0x4] ss:$8 sps:$4 sm:$0xff]   ;;  %v682_v18 = vld [vmem:[%s762_s29] ss:$8 sps:$4 sm:$0xff]   ;;  %v688_v20 = vld [vmem:[%s762_s29 + $0x14] ss:$8 sps:$4 sm:$0xff]  }
  0x11   : > { %606 = vmatprep.mubr.msk.bf16.mxu0 %vm357_vm0, %v684_v6  ;;  %v687_v7 = vld [vmem:[%s762_s29 + $0x24] ss:$8 sps:$4 sm:$0xff]   ;;  %v685_v19 = vld [vmem:[%s762_s29 + $0x20] ss:$8 sps:$4 sm:$0xff]   ;;  %v690_v21 = vld [vmem:[%s762_s29 + $0x34] ss:$8 sps:$4 sm:$0xff]  }
  0x12   : > { %608 = vmatprep.mubr.msk.bf16.mxu1 %vm357_vm0, %v687_v7  ;;  %v692_v22 = vld [vmem:[%s762_s29 + $0x10] ss:$8 sps:$4 sm:$0xff]  }
  0x13   : > { %381 = vmatpush1.bf16.msra.mxu0 %v671_v4  ;;  %648 = vmatpush1.bf16.msra.mxu1 %v671_v4  ;;  %v693_v23 = vld [vmem:[%s762_s29 + $0x30] ss:$8 sps:$4 sm:$0xff]  }
  0x14   : > { %382 = vmatprep.subr.bf16.mxu0 %v702_v1  ;;  %635 = vmatprep.subr.bf16.mxu1 %v702_v1 }
  0x17   : > { %383 = vmatpush1.bf16.msra.mxu0 %v672_v5  ;;  %649 = vmatpush1.bf16.msra.mxu1 %v672_v5 }
  0x18   : > { %384 = vmatprep.subr.bf16.mxu0 %v702_v1  ;;  %636 = vmatprep.subr.bf16.mxu1 %v702_v1 }
  0x1b   : > { %385 = vmatpush1.bf16.msra.mxu0 %v673_v8  ;;  %650 = vmatpush1.bf16.msra.mxu1 %v673_v8 }
  0x1c   : > { %386 = vmatprep.subr.bf16.mxu0 %v702_v1  ;;  %637 = vmatprep.subr.bf16.mxu1 %v702_v1 }
  0x1f   : > { %387 = vmatpush1.bf16.msra.mxu0 %v674_v9  ;;  %651 = vmatpush1.bf16.msra.mxu1 %v674_v9 }
  0x20   : > { %388 = vmatprep.subr.bf16.mxu0 %v702_v1  ;;  %638 = vmatprep.subr.bf16.mxu1 %v702_v1 }
  0x23   : > { %389 = vmatpush1.bf16.msra.mxu0 %v675_v10  ;;  %652 = vmatpush1.bf16.msra.mxu1 %v675_v10 }
  0x24   : > { %390 = vmatprep.subr.bf16.mxu0 %v702_v1  ;;  %639 = vmatprep.subr.bf16.mxu1 %v702_v1 }
  0x27   : > { %391 = vmatpush1.bf16.msra.mxu0 %v676_v11  ;;  %653 = vmatpush1.bf16.msra.mxu1 %v676_v11 }
  0x28   : > { %392 = vmatprep.subr.bf16.mxu0 %v702_v1  ;;  %640 = vmatprep.subr.bf16.mxu1 %v702_v1 }
  0x2b   : > { %393 = vmatpush1.bf16.msra.mxu0 %v677_v12  ;;  %654 = vmatpush1.bf16.msra.mxu1 %v677_v12 }
  0x2c   : > { %394 = vmatprep.subr.bf16.mxu0 %v702_v1  ;;  %641 = vmatprep.subr.bf16.mxu1 %v702_v1 }
  0x2f   : > { %395 = vmatpush1.bf16.msra.mxu0 %v678_v13  ;;  %655 = vmatpush1.bf16.msra.mxu1 %v678_v13 }
  0x30   : > { %396 = vmatprep.subr.bf16.mxu0 %v702_v1  ;;  %642 = vmatprep.subr.bf16.mxu1 %v702_v1 }
  0x33   : > { %397 = vmatpush1.bf16.msra.mxu0 %v679_v14  ;;  %656 = vmatpush1.bf16.msra.mxu1 %v679_v14 }
  0x34   : > { %398 = vmatprep.subr.bf16.mxu0 %v702_v1  ;;  %643 = vmatprep.subr.bf16.mxu1 %v702_v1 }
  0x37   : > { %399 = vmatpush1.bf16.msra.mxu0 %v680_v15  ;;  %657 = vmatpush1.bf16.msra.mxu1 %v680_v15 }
  0x38   : > { %400 = vmatprep.subr.bf16.mxu0 %v702_v1  ;;  %644 = vmatprep.subr.bf16.mxu1 %v702_v1 }
  0x3b   : > { %401 = vmatpush1.bf16.msra.mxu0 %v372_v17  ;;  %658 = vmatpush1.bf16.msra.mxu1 %v372_v17 }
  0x3e   : > { %407 = vmatmul.mubr.bf16.vlgmr.msra.gmra.mrb[0].mxu0 %v682_v18  ;;  %423 = vmatmul.mubr.bf16.vlgmr.msra.gmra.mrb[0].mxu1 %v685_v19 }
  0x3f   : > { %607 = vmatprep.mubr.msk.bf16.mxu0 %vm357_vm0, %v688_v20  ;;  %609 = vmatprep.mubr.msk.bf16.mxu1 %vm357_vm0, %v690_v21 }
  0x46   : > { %415 = vmatmul.mubr.bf16.gmra.mrb[4].mxu0 %v692_v22  ;;  %431 = vmatmul.mubr.bf16.gmra.mrb[4].mxu1 %v693_v23 }
 0x111   : > { %v408_v25 = vpop.f32.mrb[0].mxu0  ;;  %v424_v27 = vpop.f32.mrb[0].mxu1 }
 0x112   : > { %v446_v28 = vmul.f32 %v610_v24, %v408_v25  ;;  %v450_v29 = vmul.f32 %v610_v24, %v424_v27  ;;  %v410_v30 = vpop.f32.mrb[1].mxu0  ;;  %v426_v31 = vpop.f32.mrb[1].mxu1 }
 0x113   : > { %v411_v32 = vpop.f32.mrb[2].mxu0  ;;  %v427_v33 = vpop.f32.mrb[2].mxu1 }
 0x114   : > { %v461_v34 = vadd.f32 %v611_v26, %v446_v28  ;;  %v465_v35 = vadd.f32 %v611_v26, %v450_v29  ;;  %v447_v36 = vmul.f32 %v610_v24, %v411_v32  ;;  %v451_v37 = vmul.f32 %v610_v24, %v427_v33  ;;  %v413_v38 = vpop.f32.mrb[3].mxu0  ;;  %v429_v39 = vpop.f32.mrb[3].mxu1 }
 0x116   : > { %v469_v40 = vmax.f32 %v461_v34, 0.0  ;;  %v473_v41 = vmax.f32 %v465_v35, 0.0  ;;  %v462_v42 = vadd.f32 %v611_v26, %v447_v36  ;;  %v466_v43 = vadd.f32 %v611_v26, %v451_v37 }
 0x118   : > { %v623_v44 = vpack.c.bf16 %v469_v40, %v469_v40  ;;  %v627_v45 = vpack.c.bf16 %v473_v41, %v473_v41  ;;  %v470_v46 = vmax.f32 %v462_v42, 0.0  ;;  %v474_v47 = vmax.f32 %v466_v43, 0.0 }
 0x119   : > { %v416_v48 = vpop.f32.mrb[4].mxu0  ;;  %v432_v49 = vpop.f32.mrb[4].mxu1 }
 0x11a   : > { %510 = vst.msk [vmem:[%s836_s7] sm:$0xf] %vm509_vm2, %v623_v44  ;;  %514 = vst.msk [vmem:[%s836_s7 + $0x10] sm:$0xf] %vm509_vm2, %v627_v45  ;;  %v624_v50 = vpack.c.bf16 %v470_v46, %v470_v46  ;;  %v628_v51 = vpack.c.bf16 %v474_v47, %v474_v47  ;;  %v448_v52 = vmul.f32 %v610_v24, %v416_v48  ;;  %v418_v54 = vpop.f32.mrb[5].mxu0  ;;  %v434_v55 = vpop.f32.mrb[5].mxu1 }
 0x11b   : > { %v452_v53 = vmul.f32 %v610_v24, %v432_v49  ;;  %v419_v56 = vpop.f32.mrb[6].mxu0  ;;  %v435_v57 = vpop.f32.mrb[6].mxu1 }
 0x11c   : > { %511 = vst.msk [vmem:[%s836_s7 + $0x4] sm:$0xf] %vm509_vm2, %v624_v50  ;;  %515 = vst.msk [vmem:[%s836_s7 + $0x14] sm:$0xf] %vm509_vm2, %v628_v51  ;;  %v463_v58 = vadd.f32 %v611_v26, %v448_v52  ;;  %v449_v60 = vmul.f32 %v610_v24, %v419_v56  ;;  %v453_v61 = vmul.f32 %v610_v24, %v435_v57  ;;  %v421_v62 = vpop.f32.mrb[7].mxu0  ;;  %v437_v63 = vpop.f32.mrb[7].mxu1 }
 0x11d   : > { %v467_v59 = vadd.f32 %v611_v26, %v452_v53 }
 0x11e   : > { %v471_v0 = vmax.f32 %v463_v58, 0.0  ;;  %v464_v2 = vadd.f32 %v611_v26, %v449_v60  ;;  %v468_v3 = vadd.f32 %v611_v26, %v453_v61 }
 0x11f   : > { %v475_v1 = vmax.f32 %v467_v59, 0.0 }
 0x120   : > { %v625_v4 = vpack.c.bf16 %v471_v0, %v471_v0  ;;  %v472_v6 = vmax.f32 %v464_v2, 0.0  ;;  %v476_v7 = vmax.f32 %v468_v3, 0.0 }
 0x121   : > { %v629_v5 = vpack.c.bf16 %v475_v1, %v475_v1 }
 0x122   : > { %512 = vst.msk [vmem:[%s836_s7 + $0x8] sm:$0xf] %vm509_vm2, %v625_v4  ;;  %v626_v8 = vpack.c.bf16 %v472_v6, %v472_v6  ;;  %v630_v9 = vpack.c.bf16 %v476_v7, %v476_v7 }
 0x123   : > { %516 = vst.msk [vmem:[%s836_s7 + $0x18] sm:$0xf] %vm509_vm2, %v629_v5 }
 0x124   : > { %513 = vst.msk [vmem:[%s836_s7 + $0xc] sm:$0xf] %vm509_vm2, %v626_v8  ;;  %517 = vst.msk [vmem:[%s836_s7 + $0x1c] sm:$0xf] %vm509_vm2, %v630_v9 }
 0x125 PF: > { %s14_s15 = sadd.s32 1, %s700_s15  }
 0x126   : > { %p11_p4 = scmp.ge.s32.totalorder %s14_s15, 4  }
 0x128   :  { %13 = sbr.rel (!%p11_p4) target bundleno = 1 (0x1), region = 66 }

// kernel: deeplab_forward.17
= control target key start
LH: loop header
LB: loop body
LE: loop exit
PB: predicated region body
PF: predicated region fallthrough
CT: control target
= control target key end

     0   :  { %s681_s15 = smov 0   ;;  %s762_s0 = inlined_call_operand.vmem [shape: bf16[32,288], index: 0, kind: input, shape index: {}]   ;;  %s763_s1 = inlined_call_operand.vmem [shape: bf16[288,48], index: 1, kind: input, shape index: {}]   ;;  %s764_s2 = inlined_call_operand.vmem [shape: f32[1,48], index: 2, kind: input, shape index: {}]   ;;  %s765_s3 = inlined_call_operand.vmem [shape: f32[1,48], index: 3, kind: input, shape index: {}]   ;;  %s766_s4 = inlined_call_operand.vmem [shape: bf16[32,48], index: 4, kind: output, shape index: {}]  }
   0x1 LB: > { %s541_s16 = sadd.s32 4294967295, %s652_s15   ;;  %p545_p0 = scmp.ge.s32.totalorder %s652_s15, 1  ;;  %s652_s15 = sphi %s681_s15, %s14_s15  }
   0x2   : > { %p164_p1 = scmp.lt.s32.totalorder %s652_s15, 3 }
   0x4   : > { %p165_p2 = pnand %p545_p0, %p164_p1 }
   0x5   : > { %v624_v0 = vld [vmem:[%s763_s1 + $0x40] sm:$0xff] (!%p165_p2)   ;;  %v654_v2 = vmov (!%p165_p2), 0.0   ;;  %s546_s21 = sshll.u32 (!%p165_p2), %s541_s16, 1  ;;  %v626_v3 = vld [vmem:[%s763_s1 + $0x48] sm:$0xff] (!%p165_p2)   ;;  %v628_v5 = vld [vmem:[%s763_s1 + $0x50] sm:$0xff] (!%p165_p2)   ;;  %vm655_vm0 = vmmov (!%p165_p2), 0  }
   0x6   : > { %168 = sbr.rel (%p165_p2) target bundleno = 266 (0x10a), region = 36  ;;  %v625_v1 = vld [vmem:[%s763_s1] sm:$0xff] (!%p165_p2)   ;;  %605 = vmatprep.subr.bf16.mxu1 (!%p165_p2), %v654_v2  ;;  %580 = vmatprep.subr.bf16.mxu0 (!%p165_p2), %v624_v0  ;;  %v627_v4 = vld [vmem:[%s763_s1 + $0x8] sm:$0xff] (!%p165_p2)   ;;  %p192_p3 = scmp.lt.s32.totalorder (!%p165_p2), %s546_s21, 3  ;;  %v629_v6 = vld [vmem:[%s763_s1 + $0x10] sm:$0xff] (!%p165_p2)   ;;  %vm368_vm1 = vcmask (!%p165_p2), 261120  }
   0x7   : > { %581 = vmatpush3.bf16.msra.mxu0 (!%p165_p2), %v625_v1  ;;  %609 = vmatprep.mubr.msk.bf16.mxu1 (!%p165_p2), %vm655_vm0, %v654_v2  ;;  %v630_v7 = vld [vmem:[%s763_s1 + $0x58] sm:$0xff] (!%p165_p2)   ;;  %v632_v9 = vld [vmem:[%s763_s1 + $0x60] sm:$0xff] (!%p165_p2)   ;;  %v634_v12 = vld [vmem:[%s763_s1 + $0x68] sm:$0xff] (!%p165_p2)   ;;  %vm482_vm2 = vcmask (!%p165_p2), 388096  }
   0x8   : > { %582 = vmatprep.subr.bf16.mxu0 (!%p165_p2), %v626_v3  ;;  %v631_v8 = vld [vmem:[%s763_s1 + $0x18] sm:$0xff] (!%p165_p2)   ;;  %v638_v10 = vld [vmem:[%s763_s1 + $0x80] sm:$0xff] (!%p165_p2)   ;;  %v641_v13 = vld [vmem:[%s763_s1 + $0x88] sm:$0xff] (!%p165_p2)  }
   0x9   : > { %v633_v11 = vld [vmem:[%s763_s1 + $0x20] sm:$0xff] (!%p165_p2)   ;;  %606 = vmatpush3.bf16.msra.mxu1 (!%p165_p2), %v638_v10  ;;  %v635_v14 = vld [vmem:[%s763_s1 + $0x28] sm:$0xff] (!%p165_p2)   ;;  %v636_v16 = vld [vmem:[%s763_s1 + $0x70] sm:$0xff] (!%p165_p2)  }
   0xa   : > { %607 = vmatprep.subr.bf16.mxu1 (!%p165_p2), %v654_v2  ;;  %v637_v18 = vld [vmem:[%s763_s1 + $0x30] sm:$0xff] (!%p165_p2)   ;;  %v639_v19 = vld [vmem:[%s763_s1 + $0x78] sm:$0xff] (!%p165_p2)   ;;  %v572_v30 = vld [vmem:[%s764_s2] ss:$0 sm:$0xff] (!%p165_p2) }
   0xb   : > { %583 = vmatpush3.bf16.msra.mxu0 (!%p165_p2), %v627_v4  ;;  %v640_v20 = vld [vmem:[%s763_s1 + $0x38] sm:$0xff] (!%p165_p2)   ;;  %v573_v34 = vld [vmem:[%s765_s3] ss:$0 sm:$0xff] (!%p165_p2) }
   0xc   : > { %584 = vmatprep.subr.bf16.mxu0 (!%p165_p2), %v628_v5 }
   0xd   : > { %s768_s21 = smov (!%p192_p3, %s546_s21), 3  ;;  %608 = vmatpush3.bf16.msra.mxu1 %v641_v13 }
   0xe   : > { %s613_s10 = smul.u32 12, %s768_s21  ;;  %s549_s12 = sshll.u32 %s768_s21, 2 }
   0xf   : > { %585 = vmatpush3.bf16.msra.mxu0 %v629_v6  ;;  %s202_s16 = scalar_lea.vmem %s766_s4, %s549_s12 }
  0x10   : > { %586 = vmatprep.subr.bf16.mxu0 %v630_v7  ;;  %s196_s20 = scalar_lea.vmem %s762_s0, %s613_s10 }
  0x11   : > { %v644_v15 = vld [vmem:[%s196_s20 + $0x4] ss:$12 sps:$4 sm:$0xff]   ;;  %v645_v17 = vld [vmem:[%s196_s20 + $0x8] ss:$12 sps:$4 sm:$0xff]   ;;  %v642_v21 = vld [vmem:[%s196_s20] ss:$12 sps:$4 sm:$0xff]  }
  0x12   : > { %404 = vmatprep.mubr.bf16.mxu0 %v644_v15  ;;  %610 = vmatmul.mubr.msk.bf16.vlgmr.msra.gmra.mrb[0].mxu1 %vm368_vm1, %v645_v17 }
  0x13   : > { %587 = vmatpush3.bf16.msra.mxu0 %v631_v8 }
  0x14   : > { %588 = vmatprep.subr.bf16.mxu0 %v632_v9 }
  0x17   : > { %589 = vmatpush3.bf16.msra.mxu0 %v633_v11 }
  0x18   : > { %590 = vmatprep.subr.bf16.mxu0 %v634_v12 }
  0x1b   : > { %591 = vmatpush3.bf16.msra.mxu0 %v635_v14 }
  0x1c   : > { %592 = vmatprep.subr.bf16.mxu0 %v636_v16 }
  0x1f   : > { %593 = vmatpush3.bf16.msra.mxu0 %v637_v18 }
  0x20   : > { %594 = vmatprep.subr.bf16.mxu0 %v639_v19 }
  0x23   : > { %595 = vmatpush3.bf16.msra.mxu0 %v640_v20 }
  0x26   : > { %405 = vmatmul.mubr.bf16.vlgmr.msra.gmra.mrb[0].mxu0 %v642_v21 }
  0xe5   : > { %v447_v22 = vpop.f32.mrb[0].mxu1 }
  0xe6   : > { %v611_v23 = vpop.f32.mrb[1].mxu1 }
  0xe7   : > { %v450_v24 = vpop.f32.mrb[2].mxu1 }
  0xe8   : > { %v612_v25 = vpop.f32.mrb[3].mxu1 }
  0xf9   : > { %v596_v26 = vpop.f32.mrb[0].mxu0 }
  0xfa   : > { %v597_v27 = vpop.f32.mrb[1].mxu0 }
  0xfb   : > { %v598_v28 = vadd.f32 %v597_v27, %v596_v26  ;;  %v599_v29 = vpop.f32.mrb[2].mxu0 }
  0xfc   : > { %v600_v31 = vpop.f32.mrb[3].mxu0 }
  0xfd   : > { %v448_v32 = vadd.f32 %v598_v28, %v447_v22  ;;  %v601_v33 = vadd.f32 %v600_v31, %v599_v29 }
  0xff   : > { %v461_v35 = vmul.f32 %v572_v30, %v448_v32  ;;  %v451_v36 = vadd.f32 %v601_v33, %v450_v24 }
 0x101   : > { %v470_v37 = vadd.f32 %v573_v34, %v461_v35  ;;  %v462_v38 = vmul.f32 %v572_v30, %v451_v36 }
 0x103   : > { %v472_v39 = vmax.f32 %v470_v37, 0.0  ;;  %v471_v40 = vadd.f32 %v573_v34, %v462_v38 }
 0x105   : > { %v578_v41 = vpack.c.bf16 %v472_v39, %v472_v39  ;;  %v473_v42 = vmax.f32 %v471_v40, 0.0 }
 0x107   : > { %483 = vst.msk [vmem:[%s202_s16] sm:$0xf] %vm482_vm2, %v578_v41  ;;  %v579_v43 = vpack.c.bf16 %v473_v42, %v473_v42 }
 0x109   : > { %484 = vst.msk [vmem:[%s202_s16 + $0x4] sm:$0xf] %vm482_vm2, %v579_v43 }
 0x10a PF: > { %s14_s15 = sadd.s32 1, %s652_s15  }
 0x10b   : > { %p11_p4 = scmp.ge.s32.totalorder %s14_s15, 4  }
 0x10d   :  { %13 = sbr.rel (!%p11_p4) target bundleno = 1 (0x1), region = 66 }

// kernel: deeplab_forward.19
= control target key start
LH: loop header
LB: loop body
LE: loop exit
PB: predicated region body
PF: predicated region fallthrough
CT: control target
= control target key end

     0   :  { %s766_s15 = smov 0   ;;  %s885_s0 = inlined_call_operand.vmem [shape: bf16[32,432], index: 0, kind: input, shape index: {}]   ;;  %s886_s1 = inlined_call_operand.vmem [shape: bf16[432,32], index: 1, kind: input, shape index: {}]   ;;  %s887_s2 = inlined_call_operand.vmem [shape: f32[1,32], index: 2, kind: input, shape index: {}]   ;;  %s888_s3 = inlined_call_operand.vmem [shape: f32[1,32], index: 3, kind: input, shape index: {}]   ;;  %s889_s4 = inlined_call_operand.vmem [shape: bf16[32,32], index: 4, kind: output, shape index: {}]  }
   0x1 LB: > { %s617_s16 = sadd.s32 4294967295, %s738_s15   ;;  %p621_p0 = scmp.ge.s32.totalorder %s738_s15, 1  ;;  %s738_s15 = sphi %s766_s15, %s14_s15  }
   0x2   : > { %p164_p1 = scmp.lt.s32.totalorder %s738_s15, 3 }
   0x4   : > { %p165_p2 = pnand %p621_p0, %p164_p1 }
   0x5   : > { %v699_v0 = vld [vmem:[%s886_s1 + $0x80] sm:$0xff] (!%p165_p2)   ;;  %v740_v1 = vmov (!%p165_p2), 0   ;;  %v700_v2 = vld [vmem:[%s886_s1 + $0x88] sm:$0xff] (!%p165_p2)   ;;  %v703_v5 = vld [vmem:[%s886_s1 + $0x90] sm:$0xff] (!%p165_p2)   ;;  %s622_s9 = sshll.u32 (!%p165_p2), %s617_s16, 1  ;;  %vm444_vm0 = vcmask (!%p165_p2), 392192  }
   0x6   : > { %168 = sbr.rel (%p165_p2) target bundleno = 275 (0x113), region = 36  ;;  %489 = vmatprep.subr.bf16.mxu1 (!%p165_p2), %v740_v1  ;;  %v701_v3 = vld [vmem:[%s886_s1 + $0x40] sm:$0xff] (!%p165_p2)   ;;  %v704_v6 = vld [vmem:[%s886_s1 + $0x48] sm:$0xff] (!%p165_p2)   ;;  %v707_v8 = vld [vmem:[%s886_s1 + $0x50] sm:$0xff] (!%p165_p2)   ;;  %p192_p3 = scmp.lt.s32.totalorder (!%p165_p2), %s622_s9, 3  ;;  %vm558_vm1 = vcmask (!%p165_p2), 257024  }
   0x7   : > { %490 = vmatpush1.bf16.msra.mxu1 (!%p165_p2), %v699_v0  ;;  %v702_v4 = vld [vmem:[%s886_s1] sm:$0xff] (!%p165_p2)   ;;  %668 = vmatprep.subr.bf16.mxu0 (!%p165_p2), %v701_v3  ;;  %v705_v7 = vld [vmem:[%s886_s1 + $0x8] sm:$0xff] (!%p165_p2)   ;;  %v708_v9 = vld [vmem:[%s886_s1 + $0x10] sm:$0xff] (!%p165_p2)  }
   0x8   : > { %491 = vmatprep.subr.bf16.mxu1 (!%p165_p2), %v740_v1  ;;  %669 = vmatpush3.bf16.msra.mxu0 (!%p165_p2), %v702_v4  ;;  %v706_v10 = vld [vmem:[%s886_s1 + $0x98] sm:$0xff] (!%p165_p2)   ;;  %v709_v12 = vld [vmem:[%s886_s1 + $0xa0] sm:$0xff] (!%p165_p2)   ;;  %v712_v15 = vld [vmem:[%s886_s1 + $0xa8] sm:$0xff] (!%p165_p2)  }
   0x9   : > { %670 = vmatprep.subr.bf16.mxu0 (!%p165_p2), %v704_v6  ;;  %v710_v11 = vld [vmem:[%s886_s1 + $0x58] sm:$0xff] (!%p165_p2)   ;;  %v713_v14 = vld [vmem:[%s886_s1 + $0x60] sm:$0xff] (!%p165_p2)   ;;  %v716_v17 = vld [vmem:[%s886_s1 + $0x68] sm:$0xff] (!%p165_p2)  }
   0xa   : > { %v711_v13 = vld [vmem:[%s886_s1 + $0x18] sm:$0xff] (!%p165_p2)   ;;  %v714_v16 = vld [vmem:[%s886_s1 + $0x20] sm:$0xff] (!%p165_p2)   ;;  %v715_v18 = vld [vmem:[%s886_s1 + $0xb0] sm:$0xff] (!%p165_p2)  }
   0xb   : > { %492 = vmatpush1.bf16.msra.mxu1 (!%p165_p2), %v700_v2  ;;  %v717_v19 = vld [vmem:[%s886_s1 + $0x28] sm:$0xff] (!%p165_p2)   ;;  %v719_v20 = vld [vmem:[%s886_s1 + $0x70] sm:$0xff] (!%p165_p2)   ;;  %v718_v21 = vld [vmem:[%s886_s1 + $0xb8] sm:$0xff] (!%p165_p2)  }
   0xc   : > { %493 = vmatprep.subr.bf16.mxu1 (!%p165_p2), %v740_v1  ;;  %671 = vmatpush3.bf16.msra.mxu0 (!%p165_p2), %v705_v7  ;;  %v720_v22 = vld [vmem:[%s886_s1 + $0x30] sm:$0xff] (!%p165_p2)   ;;  %v722_v23 = vld [vmem:[%s886_s1 + $0x78] sm:$0xff] (!%p165_p2)   ;;  %v721_v27 = vld [vmem:[%s886_s1 + $0xc0] sm:$0xff] (!%p165_p2)  }
   0xd   : > { %672 = vmatprep.subr.bf16.mxu0 %v707_v8  ;;  %s891_s9 = smov (!%p192_p3, %s622_s9), 3  ;;  %v723_v25 = vld [vmem:[%s886_s1 + $0x38] sm:$0xff]   ;;  %v727_v29 = vld [vmem:[%s886_s1 + $0xc8] sm:$0xff]   ;;  %v728_v30 = vld [vmem:[%s886_s1 + $0xd0] sm:$0xff]  }
   0xe   : > { %s665_s29 = sshll.u32 %s891_s9, 4  ;;  %v659_v39 = vld [vmem:[%s887_s2] ss:$0 sm:$0xff]  ;;  %s626_s5 = sshll.u32 %s891_s9, 2 }
   0xf   : > { %494 = vmatpush1.bf16.msra.mxu1 %v703_v5  ;;  %s196_s11 = scalar_lea.vmem %s885_s0, %s665_s29  ;;  %v660_v42 = vld [vmem:[%s888_s3] ss:$0 sm:$0xff]  ;;  %s202_s8 = scalar_lea.vmem %s889_s4, %s626_s5 }
  0x10   : > { %495 = vmatprep.subr.bf16.mxu1 %v740_v1  ;;  %673 = vmatpush3.bf16.msra.mxu0 %v708_v9  ;;  %v726_v24 = vld [vmem:[%s196_s11 + $0x4] ss:$16 sps:$4 sm:$0xff]   ;;  %v731_v26 = vld [vmem:[%s196_s11 + $0xc] ss:$16 sps:$4 sm:$0xff]   ;;  %v724_v28 = vld [vmem:[%s196_s11] ss:$16 sps:$4 sm:$0xff]  }
  0x11   : > { %674 = vmatprep.subr.bf16.mxu0 %v710_v11  ;;  %480 = vmatprep.mubr.bf16.mxu0 %v726_v24  ;;  %v729_v31 = vld [vmem:[%s196_s11 + $0x8] ss:$16 sps:$4 sm:$0xff]  }
  0x12   : > { %658 = vmatprep.mubr.msk.bf16.mxu1 %vm444_vm0, %v731_v26 }
  0x13   : > { %496 = vmatpush1.bf16.msra.mxu1 %v706_v10 }
  0x14   : > { %497 = vmatprep.subr.bf16.mxu1 %v740_v1  ;;  %675 = vmatpush3.bf16.msra.mxu0 %v711_v13 }
  0x15   : > { %676 = vmatprep.subr.bf16.mxu0 %v713_v14 }
  0x17   : > { %498 = vmatpush1.bf16.msra.mxu1 %v709_v12 }
  0x18   : > { %499 = vmatprep.subr.bf16.mxu1 %v740_v1  ;;  %677 = vmatpush3.bf16.msra.mxu0 %v714_v16 }
  0x19   : > { %678 = vmatprep.subr.bf16.mxu0 %v716_v17 }
  0x1b   : > { %500 = vmatpush1.bf16.msra.mxu1 %v712_v15 }
  0x1c   : > { %501 = vmatprep.subr.bf16.mxu1 %v740_v1  ;;  %679 = vmatpush3.bf16.msra.mxu0 %v717_v19 }
  0x1d   : > { %680 = vmatprep.subr.bf16.mxu0 %v719_v20 }
  0x1f   : > { %502 = vmatpush1.bf16.msra.mxu1 %v715_v18 }
  0x20   : > { %503 = vmatprep.subr.bf16.mxu1 %v740_v1  ;;  %681 = vmatpush3.bf16.msra.mxu0 %v720_v22 }
  0x21   : > { %682 = vmatprep.subr.bf16.mxu0 %v722_v23 }
  0x23   : > { %504 = vmatpush1.bf16.msra.mxu1 %v718_v21 }
  0x24   : > { %505 = vmatprep.subr.bf16.mxu1 %v740_v1  ;;  %683 = vmatpush3.bf16.msra.mxu0 %v723_v25 }
  0x27   : > { %506 = vmatpush1.bf16.msra.mxu1 %v721_v27  ;;  %481 = vmatmul.mubr.bf16.vlgmr.msra.gmra.mrb[0].mxu0 %v724_v28 }
  0x28   : > { %507 = vmatprep.subr.bf16.mxu1 %v740_v1 }
  0x2b   : > { %508 = vmatpush1.bf16.msra.mxu1 %v727_v29 }
  0x2c   : > { %509 = vmatprep.subr.bf16.mxu1 %v740_v1 }
  0x2f   : > { %510 = vmatpush1.bf16.msra.mxu1 %v728_v30 }
  0x32   : > { %522 = vmatmul.mubr.bf16.vlgmr.msra.gmra.mrb[0].mxu1 %v729_v31 }
  0xfa   : > { %v684_v32 = vpop.f32.mrb[0].mxu0 }
  0xfb   : > { %v685_v33 = vpop.f32.mrb[1].mxu0 }
  0xfc   : > { %v686_v34 = vadd.f32 %v685_v33, %v684_v32  ;;  %v687_v35 = vpop.f32.mrb[2].mxu0 }
  0xfd   : > { %v688_v36 = vpop.f32.mrb[3].mxu0 }
  0xfe   : > { %v689_v37 = vadd.f32 %v688_v36, %v687_v35 }
 0x105   : > { %v523_v38 = vpop.f32.mrb[0].mxu1 }
 0x106   : > { %v524_v40 = vadd.f32 %v686_v34, %v523_v38  ;;  %v525_v41 = vpop.f32.mrb[1].mxu1 }
 0x107   : > { %v526_v43 = vpop.f32.mrb[2].mxu1 }
 0x108   : > { %v537_v44 = vmul.f32 %v659_v39, %v524_v40  ;;  %v527_v45 = vadd.f32 %v689_v37, %v526_v43  ;;  %v528_v46 = vpop.f32.mrb[3].mxu1 }
 0x10a   : > { %v546_v47 = vadd.f32 %v660_v42, %v537_v44  ;;  %v538_v48 = vmul.f32 %v659_v39, %v527_v45 }
 0x10c   : > { %v548_v49 = vmax.f32 %v546_v47, 0.0  ;;  %v547_v50 = vadd.f32 %v660_v42, %v538_v48 }
 0x10e   : > { %v666_v51 = vpack.c.bf16 %v548_v49, %v548_v49  ;;  %v549_v52 = vmax.f32 %v547_v50, 0.0 }
 0x110   : > { %559 = vst.msk [vmem:[%s202_s8] sm:$0xf] %vm558_vm1, %v666_v51  ;;  %v667_v53 = vpack.c.bf16 %v549_v52, %v549_v52 }
 0x112   : > { %560 = vst.msk [vmem:[%s202_s8 + $0x4] sm:$0xf] %vm558_vm1, %v667_v53 }
 0x113 PF: > { %s14_s15 = sadd.s32 1, %s738_s15  }
 0x114   : > { %p11_p4 = scmp.ge.s32.totalorder %s14_s15, 4  }
 0x116   :  { %13 = sbr.rel (!%p11_p4) target bundleno = 1 (0x1), region = 66 }

// kernel: deeplab_forward.22
= control target key start
LH: loop header
LB: loop body
LE: loop exit
PB: predicated region body
PF: predicated region fallthrough
CT: control target
= control target key end

     0   :  { %s1036_s13 = smov 0   ;;  %s1111_s0 = inlined_call_operand.vmem [shape: bf16[32,32], index: 0, kind: input, shape index: {}]   ;;  %s1112_s1 = inlined_call_operand.vmem [shape: bf16[32,32], index: 1, kind: input, shape index: {}]   ;;  %s1113_s2 = inlined_call_operand.vmem [shape: bf16[32,32], index: 2, kind: input, shape index: {}]   ;;  %s1114_s3 = inlined_call_operand.vmem [shape: bf16[32,32], index: 3, kind: input, shape index: {}]   ;;  %s1115_s4 = inlined_call_operand.vmem [shape: bf16[32,32], index: 4, kind: input, shape index: {}]   ;;  %s1116_s5 = inlined_call_operand.vmem [shape: bf16[32,32], index: 5, kind: input, shape index: {}]   ;;  %s1117_s6 = inlined_call_operand.vmem [shape: bf16[32,32], index: 6, kind: input, shape index: {}]   ;;  %s1118_s7 = inlined_call_operand.vmem [shape: bf16[32,32], index: 7, kind: input, shape index: {}]   ;;  %s1119_s8 = inlined_call_operand.vmem [shape: f32[1,32], index: 8, kind: input, shape index: {}]   ;;  %s1120_s9 = inlined_call_operand.vmem [shape: f32[32,32], index: 9, kind: input, shape index: {}]   ;;  %s1121_s10 = inlined_call_operand.vmem [shape: bf16[32,32], index: 10, kind: output, shape index: {}]  }
   0x1 LB: > { %s855_s14 = sadd.s32 4294967295, %s977_s13   ;;  %p859_p0 = scmp.ge.s32.totalorder %s977_s13, 1  ;;  %s977_s13 = sphi %s1036_s13, %s20_s13  }
   0x2   : > { %p357_p1 = scmp.lt.s32.totalorder %s977_s13, 3 }
   0x4   : > { %p358_p2 = pnand %p859_p0, %p357_p1 }
   0x5   : > { %v959_v0 = vld [vmem:[%s1116_s5] sm:$0xff] (!%p358_p2)   ;;  %v979_v1 = vmov (!%p358_p2), 0.0   ;;  %v961_v3 = vld [vmem:[%s1116_s5 + $0x8] sm:$0xff] (!%p358_p2)   ;;  %vm980_vm0 = vmmov (!%p358_p2), 0   ;;  %s860_s21 = sshll.u32 (!%p358_p2), %s855_s14, 1  ;;  %vm481_vm1 = vcmask (!%p358_p2), 261120  }
   0x6   : > { %361 = sbr.rel (%p358_p2) target bundleno = 255 (0xff), region = 60  ;;  %907 = vmatprep.subr.bf16.mxu1 (!%p358_p2), %v979_v1  ;;  %923 = vmatprep.subr.bf16.mxu0 (!%p358_p2), %v979_v1  ;;  %v960_v2 = vld [vmem:[%s1117_s6] sm:$0xff] (!%p358_p2)   ;;  %v962_v4 = vld [vmem:[%s1117_s6 + $0x8] sm:$0xff] (!%p358_p2)   ;;  %p416_p3 = scmp.lt.s32.totalorder (!%p358_p2), %s860_s21, 3  ;;  %vm748_vm2 = vcmask (!%p358_p2), 257024  }
   0x7   : > { %908 = vmatpush3.bf16.msra.mxu1 (!%p358_p2), %v959_v0  ;;  %911 = vmatprep.mubr.msk.bf16.mxu1 (!%p358_p2), %vm980_vm0, %v979_v1  ;;  %v965_v5 = vld [vmem:[%s1115_s4] sm:$0xff] (!%p358_p2)   ;;  %v967_v9 = vld [vmem:[%s1115_s4 + $0x8] sm:$0xff] (!%p358_p2)  }
   0x8   : > { %924 = vmatpush3.bf16.msra.mxu0 (!%p358_p2), %v960_v2  ;;  %909 = vmatprep.subr.bf16.mxu1 (!%p358_p2), %v979_v1  ;;  %v966_v6 = vld [vmem:[%s1118_s7] sm:$0xff] (!%p358_p2)   ;;  %v968_v10 = vld [vmem:[%s1118_s7 + $0x8] sm:$0xff] (!%p358_p2)  }
   0x9   : > { %925 = vmatprep.subr.bf16.mxu0 (!%p358_p2), %v979_v1  ;;  %927 = vmatprep.mubr.msk.bf16.mxu0 (!%p358_p2), %vm980_vm0, %v979_v1  ;;  %v888_v15 = vld [vmem:[%s1119_s8] ss:$0 sm:$0xff] (!%p358_p2) }
   0xb   : > { %910 = vmatpush3.bf16.msra.mxu1 (!%p358_p2), %v961_v3 }
   0xc   : > { %926 = vmatpush3.bf16.msra.mxu0 (!%p358_p2), %v962_v4  ;;  %915 = vmatprep.subr.bf16.mxu1 (!%p358_p2), %v979_v1 }
   0xd   : > { %s1123_s21 = smov (!%p416_p3, %s860_s21), 3  ;;  %931 = vmatprep.subr.bf16.mxu0 %v979_v1 }
   0xe   : > { %s1061_s24 = sshll.u32 %s1123_s21, 2  ;;  %s869_s28 = sshll.u32 %s1123_s21, 3 }
   0xf   : > { %s425_s27 = scalar_lea.vmem %s1112_s1, %s1061_s24  ;;  %s431_s30 = scalar_lea.vmem %s1113_s2, %s1061_s24 }
  0x10   : > { %v963_v7 = vld [vmem:[%s425_s27] sm:$0xff]   ;;  %s419_s18 = scalar_lea.vmem %s1111_s0, %s1061_s24  ;;  %s437_s22 = scalar_lea.vmem %s1114_s3, %s1061_s24 }
  0x11   : > { %v964_v8 = vld [vmem:[%s431_s30] sm:$0xff]   ;;  %912 = vmatmul.mubr.msk.bf16.vlgmr.msra.gmra.mrb[0].mxu1 %vm481_vm1, %v963_v7  ;;  %s443_s11 = scalar_lea.vmem %s1120_s9, %s869_s28  ;;  %s449_s16 = scalar_lea.vmem %s1121_s10, %s1061_s24 }
  0x12   : > { %928 = vmatmul.mubr.msk.bf16.vlgmr.msra.gmra.mrb[0].mxu0 %vm481_vm1, %v964_v8  ;;  %916 = vmatpush3.bf16.msra.mxu1 %v965_v5  ;;  %v969_v11 = vld [vmem:[%s419_s18] sm:$0xff]   ;;  %v735_v26 = vld [vmem:[%s443_s11 + $0x8] sm:$0xff] }
  0x13   : > { %932 = vmatpush3.bf16.msra.mxu0 %v966_v6  ;;  %917 = vmatprep.subr.bf16.mxu1 %v979_v1  ;;  %v970_v12 = vld [vmem:[%s437_s22] sm:$0xff]  }
  0x14   : > { %933 = vmatprep.subr.bf16.mxu0 %v979_v1  ;;  %919 = vmatprep.mubr.msk.bf16.mxu1 %vm980_vm0, %v979_v1  ;;  %v734_v20 = vld [vmem:[%s443_s11] sm:$0xff] }
  0x15   : > { %935 = vmatprep.mubr.msk.bf16.mxu0 %vm980_vm0, %v979_v1 }
  0x16   : > { %918 = vmatpush3.bf16.msra.mxu1 %v967_v9 }
  0x17   : > { %934 = vmatpush3.bf16.msra.mxu0 %v968_v10 }
  0x1d   : > { %920 = vmatmul.mubr.msk.bf16.vlgmr.msra.gmra.mrb[0].mxu1 %vm481_vm1, %v969_v11 }
  0x1e   : > { %936 = vmatmul.mubr.msk.bf16.vlgmr.msra.gmra.mrb[0].mxu0 %vm481_vm1, %v970_v12 }
  0xf0   : > { %v580_v13 = vpop.f32.mrb[0].mxu1 }
  0xf1   : > { %v716_v14 = vpop.f32.mrb[0].mxu0  ;;  %v921_v16 = vpop.f32.mrb[1].mxu1 }
  0xf2   : > { %v939_v17 = vadd.f32 %v716_v14, %v580_v13  ;;  %v937_v18 = vpop.f32.mrb[1].mxu0  ;;  %v583_v19 = vpop.f32.mrb[2].mxu1 }
  0xf3   : > { %v719_v21 = vpop.f32.mrb[2].mxu0  ;;  %v922_v22 = vpop.f32.mrb[3].mxu1 }
  0xf4   : > { %v732_v23 = vmul.f32 %v939_v17, %v888_v15  ;;  %v940_v24 = vadd.f32 %v719_v21, %v583_v19  ;;  %v938_v25 = vpop.f32.mrb[3].mxu0 }
  0xf6   : > { %v736_v27 = vadd.f32 %v734_v20, %v732_v23  ;;  %v733_v28 = vmul.f32 %v940_v24, %v888_v15 }
  0xf8   : > { %v738_v29 = vmax.f32 %v736_v27, 0.0  ;;  %v737_v30 = vadd.f32 %v735_v26, %v733_v28 }
  0xfa   : > { %v893_v31 = vpack.c.bf16 %v738_v29, %v738_v29  ;;  %v739_v32 = vmax.f32 %v737_v30, 0.0 }
  0xfc   : > { %749 = vst.msk [vmem:[%s449_s16] sm:$0xf] %vm748_vm2, %v893_v31  ;;  %v894_v33 = vpack.c.bf16 %v739_v32, %v739_v32 }
  0xfe   : > { %750 = vst.msk [vmem:[%s449_s16 + $0x4] sm:$0xf] %vm748_vm2, %v894_v33 }
  0xff PF: > { %s20_s13 = sadd.s32 1, %s977_s13  }
 0x100   : > { %p17_p4 = scmp.ge.s32.totalorder %s20_s13, 4  }
 0x102   :  { %19 = sbr.rel (!%p17_p4) target bundleno = 1 (0x1), region = 102 }

// kernel: deeplab_forward.18
= control target key start
LH: loop header
LB: loop body
LE: loop exit
PB: predicated region body
PF: predicated region fallthrough
CT: control target
= control target key end

     0   :  { %s450_s15 = smov 0   ;;  %s482_s0 = inlined_call_operand.vmem [shape: bf16[32,48], index: 0, kind: input, shape index: {}]   ;;  %s483_s1 = inlined_call_operand.vmem [shape: bf16[48,32], index: 1, kind: input, shape index: {}]   ;;  %s484_s2 = inlined_call_operand.vmem [shape: f32[1,32], index: 2, kind: input, shape index: {}]   ;;  %s485_s3 = inlined_call_operand.vmem [shape: f32[1,32], index: 3, kind: input, shape index: {}]   ;;  %s486_s4 = inlined_call_operand.vmem [shape: bf16[32,32], index: 4, kind: output, shape index: {}]  }
   0x1 LB: > { %s365_s16 = sadd.s32 4294967295, %s421_s15   ;;  %p369_p0 = scmp.ge.s32.totalorder %s421_s15, 1  ;;  %s421_s15 = sphi %s450_s15, %s14_s15  }
   0x2   : > { %p163_p1 = scmp.lt.s32.totalorder %s421_s15, 3 }
   0x4   : > { %p164_p2 = pnand %p369_p0, %p163_p1 }
   0x5   : > { %v411_v0 = vld [vmem:[%s483_s1] sm:$0xff] (!%p164_p2)   ;;  %v423_v1 = vmov (!%p164_p2), 0.0   ;;  %v412_v2 = vld [vmem:[%s483_s1 + $0x8] sm:$0xff] (!%p164_p2)   ;;  %vm424_vm0 = vmmov (!%p164_p2), 0   ;;  %s370_s21 = sshll.u32 (!%p164_p2), %s365_s16, 1  ;;  %v413_v3 = vld [vmem:[%s483_s1 + $0x10] sm:$0xff] (!%p164_p2)  }
   0x6   : > { %167 = sbr.rel (%p164_p2) target bundleno = 241 (0xf1), region = 36  ;;  %391 = vmatprep.subr.bf16.mxu0 (!%p164_p2), %v423_v1  ;;  %397 = vmatprep.mubr.msk.bf16.mxu0 (!%p164_p2), %vm424_vm0, %v423_v1  ;;  %p190_p3 = scmp.lt.s32.totalorder (!%p164_p2), %s370_s21, 3  ;;  %vm233_vm1 = vcmask (!%p164_p2), 392192   ;;  %v379_v5 = vld [vmem:[%s484_s2] ss:$0 sm:$0xff] (!%p164_p2)  ;;  %vm306_vm2 = vcmask (!%p164_p2), 257024  }
   0x7   : > { %392 = vmatpush3.bf16.msra.mxu0 (!%p164_p2), %v411_v0  ;;  %v380_v7 = vld [vmem:[%s485_s3] ss:$0 sm:$0xff] (!%p164_p2) }
   0x8   : > { %393 = vmatprep.subr.bf16.mxu0 (!%p164_p2), %v423_v1 }
   0xb   : > { %394 = vmatpush3.bf16.msra.mxu0 (!%p164_p2), %v412_v2 }
   0xc   : > { %395 = vmatprep.subr.bf16.mxu0 (!%p164_p2), %v423_v1 }
   0xd   : > { %s488_s21 = smov (!%p190_p3, %s370_s21), 3 }
   0xe   : > { %s371_s24 = sshll.u32 %s488_s21, 2 }
   0xf   : > { %s193_s27 = scalar_lea.vmem %s482_s0, %s371_s24  ;;  %396 = vmatpush3.bf16.msra.mxu0 %v413_v3  ;;  %s199_s8 = scalar_lea.vmem %s486_s4, %s371_s24 }
  0x10   : > { %v414_v4 = vld [vmem:[%s193_s27] sm:$0xff]  }
  0x12   : > { %398 = vmatmul.mubr.msk.bf16.vlgmr.msra.gmra.mrb[0].mxu0 %vm233_vm1, %v414_v4 }
  0xe5   : > { %v271_v6 = vpop.f32.mrb[0].mxu0 }
  0xe6   : > { %v285_v8 = vmul.f32 %v379_v5, %v271_v6  ;;  %v399_v9 = vpop.f32.mrb[1].mxu0 }
  0xe7   : > { %v274_v10 = vpop.f32.mrb[2].mxu0 }
  0xe8   : > { %v294_v11 = vadd.f32 %v380_v7, %v285_v8  ;;  %v286_v12 = vmul.f32 %v379_v5, %v274_v10  ;;  %v400_v13 = vpop.f32.mrb[3].mxu0 }
  0xea   : > { %v296_v14 = vmax.f32 %v294_v11, 0.0  ;;  %v295_v15 = vadd.f32 %v380_v7, %v286_v12 }
  0xec   : > { %v385_v16 = vpack.c.bf16 %v296_v14, %v296_v14  ;;  %v297_v17 = vmax.f32 %v295_v15, 0.0 }
  0xee   : > { %307 = vst.msk [vmem:[%s199_s8] sm:$0xf] %vm306_vm2, %v385_v16  ;;  %v386_v18 = vpack.c.bf16 %v297_v17, %v297_v17 }
  0xf0   : > { %308 = vst.msk [vmem:[%s199_s8 + $0x4] sm:$0xf] %vm306_vm2, %v386_v18 }
  0xf1 PF: > { %s14_s15 = sadd.s32 1, %s421_s15  }
  0xf2   : > { %p11_p4 = scmp.ge.s32.totalorder %s14_s15, 4  }
  0xf4   :  { %13 = sbr.rel (!%p11_p4) target bundleno = 1 (0x1), region = 66 }

// kernel: tile.12
= control target key start
LH: loop header
LB: loop body
LE: loop exit
PB: predicated region body
PF: predicated region fallthrough
CT: control target
= control target key end

     0   :  { %s22_s0 = inlined_call_operand.vmem [shape: f32[16], index: 0, kind: input, shape index: {}]   ;;  %s23_s1 = inlined_call_operand.vmem [shape: f32[2,16], index: 1, kind: output, shape index: {}]  }
   0x1   :  { %v4_v0 = vld [vmem:[%s22_s0] ss:$0 sm:$0xff] }
   0x2   :  { %5 = vst [vmem:[%s23_s1] sm:$0x3] %v4_v0 }

// kernel: tile.0
= control target key start
LH: loop header
LB: loop body
LE: loop exit
PB: predicated region body
PF: predicated region fallthrough
CT: control target
= control target key end

     0   :  { %s130_s8 = smov 125   ;;  %s131_s9 = smov 126   ;;  %vm7_vm0 = vcmask 7168   ;;  %s221_s0 = inlined_call_operand.vmem [shape: f32[2,16], index: 0, kind: input, shape index: {}]   ;;  %s222_s1 = inlined_call_operand.vmem [shape: f32[32,1], index: 1, kind: output, shape index: {}]  }
   0x1   :  { %v4_v0 = vld [vmem:[%s221_s0] sm:$0x3]  ;;  %s129_s0 = smov 127   ;;  %s132_s10 = smov 124  }
   0x2   :  { %5 = vst [vmem:[#allocation0] sm:$0x3] %v4_v0  ;;  %s133_s11 = smov 123   ;;  %s134_s12 = smov 122  }
   0x3   :  { %s135_s13 = smov 121   ;;  %s136_s14 = smov 120  }
   0x4   :  { %s137_s17 = smov 119   ;;  %s138_s18 = smov 118  }
   0x5   :  { %s139_s19 = smov 117   ;;  %s140_s20 = smov 116  }
   0x6   :  { %s141_s21 = smov 115   ;;  %s142_s22 = smov 114  }
   0x7   :  { %s143_s23 = smov 113  }
   0x9   :  { %v9_v1 = vld [vmem:[#allocation0] sm:$0x3]  }
   0xa   :  { %v21_v2 = vld [vmem:[#allocation0] sm:$0x3]   ;;  %10 = vrot.lane.b32.xlu0 %v9_v1, %s129_s0 }
   0xb   :  { %22 = vrot.lane.b32.xlu1 %v21_v2, %s130_s8  ;;  %v15_v3 = vld [vmem:[#allocation0] sm:$0x3]  }
   0xc   :  { %v27_v4 = vld [vmem:[#allocation0] sm:$0x3]  }
   0xd   :  { %v33_v5 = vld [vmem:[#allocation0] sm:$0x3]  }
   0xe   :  { %16 = vrot.lane.b32.xlu0 %v15_v3, %s131_s9  ;;  %v39_v6 = vld [vmem:[#allocation0] sm:$0x3]  }
   0xf   :  { %28 = vrot.lane.b32.xlu1 %v27_v4, %s132_s10  ;;  %v45_v7 = vld [vmem:[#allocation0] sm:$0x3]  }
  0x10   :  { %v51_v8 = vld [vmem:[#allocation0] sm:$0x3]  }
  0x11   :  { %v57_v9 = vld [vmem:[#allocation0] sm:$0x3]  }
  0x12   :  { %34 = vrot.lane.b32.xlu0 %v33_v5, %s133_s11  ;;  %v63_v10 = vld [vmem:[#allocation0] sm:$0x3]  }
  0x13   :  { %40 = vrot.lane.b32.xlu1 %v39_v6, %s134_s12  ;;  %v6_v11 = vld [vmem:[#allocation0] sm:$0x3]  }
  0x14   :  { %8 = vst.msk [vmem:[%s222_s1] ss:$16 sm:$0x3] %vm7_vm0, %v6_v11   ;;  %v69_v12 = vld [vmem:[#allocation0] sm:$0x3]  }
  0x15   :  { %v75_v13 = vld [vmem:[#allocation0] sm:$0x3]  }
  0x16   :  { %46 = vrot.lane.b32.xlu0 %v45_v7, %s135_s13  ;;  %v81_v14 = vld [vmem:[#allocation0] sm:$0x3]  }
  0x17   :  { %52 = vrot.lane.b32.xlu1 %v51_v8, %s136_s14  ;;  %v87_v15 = vld [vmem:[#allocation0] sm:$0x3]  }
  0x18   :  { %v93_v16 = vld [vmem:[#allocation0] sm:$0x3]  }
  0x1a   :  { %58 = vrot.lane.b32.xlu0 %v57_v9, %s137_s17 }
  0x1b   :  { %64 = vrot.lane.b32.xlu1 %v63_v10, %s138_s18 }
  0x1e   :  { %70 = vrot.lane.b32.xlu0 %v69_v12, %s139_s19 }
  0x1f   :  { %76 = vrot.lane.b32.xlu1 %v75_v13, %s140_s20 }
  0x22   :  { %82 = vrot.lane.b32.xlu0 %v81_v14, %s141_s21 }
  0x23   :  { %88 = vrot.lane.b32.xlu1 %v87_v15, %s142_s22 }
  0x26   :  { %94 = vrot.lane.b32.xlu0 %v93_v16, %s143_s23 }
  0x7c   :  { %v11_v17 = vpop.permute.xlu0 %10  }
  0x7d   :  { %v23_v18 = vpop.permute.xlu1 %22   ;;  %99 = vst.msk [vmem:[%s222_s1 + $0x1] ss:$16 sm:$0x3] %vm7_vm0, %v11_v17  }
  0x7e   :  { %101 = vst.msk [vmem:[%s222_s1 + $0x3] ss:$16 sm:$0x3] %vm7_vm0, %v23_v18  }
  0x80   :  { %v17_v19 = vpop.permute.xlu0 %16  }
  0x81   :  { %v29_v20 = vpop.permute.xlu1 %28   ;;  %100 = vst.msk [vmem:[%s222_s1 + $0x2] ss:$16 sm:$0x3] %vm7_vm0, %v17_v19  }
  0x82   :  { %102 = vst.msk [vmem:[%s222_s1 + $0x4] ss:$16 sm:$0x3] %vm7_vm0, %v29_v20  }
  0x84   :  { %v35_v21 = vpop.permute.xlu0 %34  }
  0x85   :  { %v41_v22 = vpop.permute.xlu1 %40   ;;  %103 = vst.msk [vmem:[%s222_s1 + $0x5] ss:$16 sm:$0x3] %vm7_vm0, %v35_v21  }
  0x86   :  { %104 = vst.msk [vmem:[%s222_s1 + $0x6] ss:$16 sm:$0x3] %vm7_vm0, %v41_v22  }
  0x88   :  { %v47_v23 = vpop.permute.xlu0 %46  }
  0x89   :  { %v53_v24 = vpop.permute.xlu1 %52   ;;  %105 = vst.msk [vmem:[%s222_s1 + $0x7] ss:$16 sm:$0x3] %vm7_vm0, %v47_v23  }
  0x8a   :  { %106 = vst.msk [vmem:[%s222_s1 + $0x8] ss:$16 sm:$0x3] %vm7_vm0, %v53_v24  }
  0x8c   :  { %v59_v25 = vpop.permute.xlu0 %58  }
  0x8d   :  { %v65_v26 = vpop.permute.xlu1 %64   ;;  %107 = vst.msk [vmem:[%s222_s1 + $0x9] ss:$16 sm:$0x3] %vm7_vm0, %v59_v25  }
  0x8e   :  { %108 = vst.msk [vmem:[%s222_s1 + $0xa] ss:$16 sm:$0x3] %vm7_vm0, %v65_v26  }
  0x90   :  { %v71_v27 = vpop.permute.xlu0 %70  }
  0x91   :  { %v77_v28 = vpop.permute.xlu1 %76   ;;  %109 = vst.msk [vmem:[%s222_s1 + $0xb] ss:$16 sm:$0x3] %vm7_vm0, %v71_v27  }
  0x92   :  { %110 = vst.msk [vmem:[%s222_s1 + $0xc] ss:$16 sm:$0x3] %vm7_vm0, %v77_v28  }
  0x94   :  { %v83_v29 = vpop.permute.xlu0 %82  }
  0x95   :  { %v89_v30 = vpop.permute.xlu1 %88   ;;  %111 = vst.msk [vmem:[%s222_s1 + $0xd] ss:$16 sm:$0x3] %vm7_vm0, %v83_v29  }
  0x96   :  { %112 = vst.msk [vmem:[%s222_s1 + $0xe] ss:$16 sm:$0x3] %vm7_vm0, %v89_v30  }
  0x98   :  { %v95_v31 = vpop.permute.xlu0 %94  }
  0x99   :  { %113 = vst.msk [vmem:[%s222_s1 + $0xf] ss:$16 sm:$0x3] %vm7_vm0, %v95_v31  }

// kernel: deeplab_forward.24
= control target key start
LH: loop header
LB: loop body
LE: loop exit
PB: predicated region body
PF: predicated region fallthrough
CT: control target
= control target key end

     0   :  { %v434_v0 = vmov 0   ;;  %v130_v9 = vlaneseq  ;;  %s733_s4 = inlined_call_operand.vmem [shape: f32[32,1], index: 4, kind: input, shape index: {}]   ;;  %s734_s5 = inlined_call_operand.vmem [shape: f32[1,512], index: 5, kind: input, shape index: {}]   ;;  %s735_s0 = inlined_call_operand.vmem [shape: bf16[32,512], index: 0, kind: input, shape index: {}]   ;;  %s736_s1 = inlined_call_operand.vmem [shape: bf16[32,512], index: 1, kind: input, shape index: {}]   ;;  %s737_s2 = inlined_call_operand.vmem [shape: bf16[32,512], index: 2, kind: input, shape index: {}]   ;;  %s738_s3 = inlined_call_operand.vmem [shape: bf16[32,512], index: 3, kind: input, shape index: {}]   ;;  %s739_s6 = inlined_call_operand.vmem [shape: bf16[32,512], index: 6, kind: output, shape index: {}]  }
   0x1   :  { %433 = vset.pattern.permute.xlu1 %v434_v0  ;;  %432 = vset.pattern.permute.xlu0 %v434_v0  ;;  %v25_v1 = vld [vmem:[%s733_s4 + $0x10] sm:$0xff]  ;;  %v23_v2 = vld [vmem:[%s733_s4] sm:$0xff]  ;;  %v26_v3 = vld [vmem:[%s733_s4 + $0x18] sm:$0xff] }
   0x2   :  { %v30_v4 = vsub.f32 1.0, %v25_v1  ;;  %v28_v5 = vsub.f32 1.0, %v23_v2  ;;  %v24_v6 = vld [vmem:[%s733_s4 + $0x8] sm:$0xff]  ;;  %v31_v7 = vsub.f32 1.0, %v26_v3  ;;  %v27_v10 = vld [vmem:[%s734_s5] sm:$0xf] }
   0x3   :  { %v29_v8 = vsub.f32 1.0, %v24_v6  ;;  %v131_v11 = vshrl.u32 %v130_v9, 7  ;;  %v32_v12 = vsub.f32 1.0, %v27_v10  ;;  %v37_v13 = vld [vmem:[%s735_s0 + $0x20] sm:$0xff]  ;;  %v38_v14 = vld [vmem:[%s735_s0 + $0x28] sm:$0xff]  ;;  %v39_v61 = vld [vmem:[%s735_s0 + $0x30] sm:$0xff] }
   0x4   :  { %231 = vperm.xlu1 %433, %v30_v4   ;;  %221 = vperm.xlu0 %432, %v28_v5   ;;  %v61_v19 = vld [vmem:[%s736_s1 + $0x20] sm:$0xff]  ;;  %v62_v20 = vld [vmem:[%s736_s1 + $0x28] sm:$0xff]  ;;  %v49_v21 = vunpack.c.l.bf16 %v37_v13  ;;  %v50_v22 = vunpack.c.h.bf16 %v37_v13  ;;  %v51_v23 = vunpack.c.l.bf16 %v38_v14  ;;  %v52_v24 = vunpack.c.h.bf16 %v38_v14  ;;  %v40_v62 = vld [vmem:[%s735_s0 + $0x38] sm:$0xff] }
   0x5   :  { %v132_v15 = vsub.s32 0, %v131_v11  ;;  %v136_v16 = vsub.s32 1, %v131_v11  ;;  %v140_v17 = vsub.s32 2, %v131_v11  ;;  %v144_v18 = vsub.s32 3, %v131_v11  ;;  %v33_v37 = vld [vmem:[%s735_s0] sm:$0xff]  ;;  %v34_v38 = vld [vmem:[%s735_s0 + $0x8] sm:$0xff] }
   0x6   :  { %v73_v25 = vunpack.c.l.bf16 %v61_v19  ;;  %v74_v26 = vunpack.c.h.bf16 %v61_v19  ;;  %v75_v27 = vunpack.c.l.bf16 %v62_v20  ;;  %v76_v28 = vunpack.c.h.bf16 %v62_v20  ;;  %v57_v43 = vld [vmem:[%s736_s1] sm:$0xff]  ;;  %v58_v44 = vld [vmem:[%s736_s1 + $0x8] sm:$0xff]  ;;  %v64_v4 = vld [vmem:[%s736_s1 + $0x38] sm:$0xff] }
   0x7   :  { %v497_v29 = vrot.slane %v32_v12, %v132_v15  ;;  %v499_v30 = vrot.slane %v32_v12, %v136_v16  ;;  %v501_v31 = vrot.slane %v32_v12, %v140_v17  ;;  %v503_v32 = vrot.slane %v32_v12, %v144_v18  ;;  %v35_v9 = vld [vmem:[%s735_s0 + $0x10] sm:$0xff] }
   0x8   :  { %236 = vperm.xlu1 %433, %v31_v7   ;;  %226 = vperm.xlu0 %432, %v29_v8   ;;  %v505_v33 = vrot.slane %v27_v10, %v132_v15  ;;  %v507_v34 = vrot.slane %v27_v10, %v136_v16  ;;  %v509_v35 = vrot.slane %v27_v10, %v140_v17  ;;  %v41_v49 = vunpack.c.l.bf16 %v33_v37  ;;  %v59_v15 = vld [vmem:[%s736_s1 + $0x10] sm:$0xff]  ;;  %v60_v16 = vld [vmem:[%s736_s1 + $0x18] sm:$0xff] }
   0x9   :  { %v511_v36 = vrot.slane %v27_v10, %v144_v18  ;;  %v158_v39 = vmul.f32 %v497_v29, %v49_v21  ;;  %v159_v40 = vmul.f32 %v499_v30, %v50_v22  ;;  %v160_v41 = vmul.f32 %v501_v31, %v51_v23  ;;  %v36_v10 = vld [vmem:[%s735_s0 + $0x18] sm:$0xff] }
   0xa   :  { %v161_v42 = vmul.f32 %v503_v32, %v52_v24  ;;  %v195_v45 = vmul.f32 %v505_v33, %v73_v25  ;;  %v196_v46 = vmul.f32 %v507_v34, %v74_v26  ;;  %v197_v47 = vmul.f32 %v509_v35, %v75_v27 }
   0xb   :  { %v198_v48 = vmul.f32 %v511_v36, %v76_v28  ;;  %v42_v50 = vunpack.c.h.bf16 %v33_v37  ;;  %v43_v51 = vunpack.c.l.bf16 %v34_v38  ;;  %v44_v52 = vunpack.c.h.bf16 %v34_v38 }
   0xc   :  { %310 = vperm.xlu1 %433, %v24_v6   ;;  %305 = vperm.xlu0 %432, %v23_v2   ;;  %v65_v53 = vunpack.c.l.bf16 %v57_v43  ;;  %v66_v54 = vunpack.c.h.bf16 %v57_v43  ;;  %v67_v55 = vunpack.c.l.bf16 %v58_v44  ;;  %v68_v56 = vunpack.c.h.bf16 %v58_v44 }
   0xd   :  { %v533_v57 = vadd.f32 %v195_v45, %v158_v39  ;;  %v535_v58 = vadd.f32 %v196_v46, %v159_v40  ;;  %v537_v59 = vadd.f32 %v197_v47, %v160_v41  ;;  %v539_v60 = vadd.f32 %v198_v48, %v161_v42 }
   0xe   :  { %v150_v63 = vmul.f32 %v497_v29, %v41_v49  ;;  %v151_v0 = vmul.f32 %v499_v30, %v42_v50  ;;  %v153_v2 = vmul.f32 %v503_v32, %v44_v52  ;;  %v187_v5 = vmul.f32 %v505_v33, %v65_v53  ;;  %v83_v53 = vld [vmem:[%s737_s2 + $0x10] sm:$0xff] }
   0xf   :  { %v188_v6 = vmul.f32 %v507_v34, %v66_v54  ;;  %v189_v7 = vmul.f32 %v509_v35, %v67_v55  ;;  %v190_v8 = vmul.f32 %v511_v36, %v68_v56  ;;  %v53_v11 = vunpack.c.l.bf16 %v39_v61  ;;  %v84_v54 = vld [vmem:[%s737_s2 + $0x18] sm:$0xff] }
  0x10   :  { %320 = vperm.xlu1 %433, %v26_v3   ;;  %315 = vperm.xlu0 %432, %v25_v1   ;;  %v152_v1 = vmul.f32 %v501_v31, %v43_v51  ;;  %v63_v3 = vld [vmem:[%s736_s1 + $0x30] sm:$0xff]  ;;  %v54_v12 = vunpack.c.h.bf16 %v39_v61  ;;  %v55_v13 = vunpack.c.l.bf16 %v40_v62  ;;  %v56_v14 = vunpack.c.h.bf16 %v40_v62 }
  0x11   :  { %v77_v17 = vunpack.c.l.bf16 %v63_v3  ;;  %v78_v18 = vunpack.c.h.bf16 %v63_v3  ;;  %v79_v19 = vunpack.c.l.bf16 %v64_v4  ;;  %v80_v20 = vunpack.c.h.bf16 %v64_v4 }
  0x12   :  { %v45_v21 = vunpack.c.l.bf16 %v35_v9  ;;  %v46_v22 = vunpack.c.h.bf16 %v35_v9  ;;  %v47_v23 = vunpack.c.l.bf16 %v36_v10  ;;  %v48_v24 = vunpack.c.h.bf16 %v36_v10 }
  0x13   :  { %v69_v25 = vunpack.c.l.bf16 %v59_v15  ;;  %v70_v26 = vunpack.c.h.bf16 %v59_v15  ;;  %v71_v27 = vunpack.c.l.bf16 %v60_v16  ;;  %v72_v28 = vunpack.c.h.bf16 %v60_v16  ;;  %v105_v15 = vld [vmem:[%s738_s3] sm:$0xff]  ;;  %v106_v16 = vld [vmem:[%s738_s3 + $0x8] sm:$0xff] }
  0x14   :  { %v162_v37 = vmul.f32 %v497_v29, %v53_v11  ;;  %v163_v38 = vmul.f32 %v499_v30, %v54_v12  ;;  %v164_v39 = vmul.f32 %v501_v31, %v55_v13  ;;  %v165_v40 = vmul.f32 %v503_v32, %v56_v14  ;;  %v107_v11 = vld [vmem:[%s738_s3 + $0x10] sm:$0xff] }
  0x15   :  { %v199_v41 = vmul.f32 %v505_v33, %v77_v17  ;;  %v200_v42 = vmul.f32 %v507_v34, %v78_v18  ;;  %v201_v43 = vmul.f32 %v509_v35, %v79_v19  ;;  %v202_v44 = vmul.f32 %v511_v36, %v80_v20 }
  0x16   :  { %v154_v45 = vmul.f32 %v497_v29, %v45_v21  ;;  %v155_v46 = vmul.f32 %v499_v30, %v46_v22  ;;  %v156_v47 = vmul.f32 %v501_v31, %v47_v23  ;;  %v157_v48 = vmul.f32 %v503_v32, %v48_v24 }
  0x17   :  { %v191_v49 = vmul.f32 %v505_v33, %v69_v25  ;;  %v192_v50 = vmul.f32 %v507_v34, %v70_v26  ;;  %v193_v51 = vmul.f32 %v509_v35, %v71_v27  ;;  %v194_v52 = vmul.f32 %v511_v36, %v72_v28 }
  0x18   :  { %v595_v55 = vadd.f32 %v187_v5, %v150_v63  ;;  %v597_v56 = vadd.f32 %v188_v6, %v151_v0  ;;  %v599_v61 = vadd.f32 %v189_v7, %v152_v1  ;;  %v601_v62 = vadd.f32 %v190_v8, %v153_v2  ;;  %v108_v63 = vld [vmem:[%s738_s3 + $0x18] sm:$0xff]  ;;  %v81_v6 = vld [vmem:[%s737_s2] sm:$0xff]  ;;  %v82_v7 = vld [vmem:[%s737_s2 + $0x8] sm:$0xff] }
  0x19   :  { %v603_v3 = vadd.f32 %v199_v41, %v162_v37  ;;  %v605_v4 = vadd.f32 %v200_v42, %v163_v38  ;;  %v607_v9 = vadd.f32 %v201_v43, %v164_v39  ;;  %v609_v10 = vadd.f32 %v202_v44, %v165_v40 }
  0x1a   :  { %v93_v0 = vunpack.c.l.bf16 %v83_v53  ;;  %v94_v1 = vunpack.c.h.bf16 %v83_v53  ;;  %v95_v2 = vunpack.c.l.bf16 %v84_v54  ;;  %v96_v5 = vunpack.c.h.bf16 %v84_v54 }
  0x1b   :  { %740 = vst [vmem:[#allocation2_spill] sm:$0xff] %v605_v4  ;;  %741 = vst [vmem:[#allocation3_spill] sm:$0xff] %v607_v9  ;;  %v623_v8 = vadd.f32 %v191_v49, %v154_v45  ;;  %v625_v12 = vadd.f32 %v192_v50, %v155_v46  ;;  %v627_v13 = vadd.f32 %v193_v51, %v156_v47  ;;  %v117_v17 = vunpack.c.l.bf16 %v107_v11  ;;  %v87_v45 = vld [vmem:[%s737_s2 + $0x30] sm:$0xff]  ;;  %v88_v46 = vld [vmem:[%s737_s2 + $0x38] sm:$0xff] }
  0x1c   :  { %742 = vst [vmem:[#allocation4_spill] sm:$0xff] %v609_v10  ;;  %v629_v14 = vadd.f32 %v194_v52, %v157_v48  ;;  %v118_v18 = vunpack.c.h.bf16 %v107_v11  ;;  %v119_v19 = vunpack.c.l.bf16 %v108_v63  ;;  %v120_v20 = vunpack.c.h.bf16 %v108_v63  ;;  %v111_v51 = vld [vmem:[%s738_s3 + $0x30] sm:$0xff]  ;;  %v112_v52 = vld [vmem:[%s738_s3 + $0x38] sm:$0xff] }
  0x1d   :  { %743 = vst [vmem:[#allocation5_spill] sm:$0xff] %v623_v8  ;;  %744 = vst [vmem:[#allocation6_spill] sm:$0xff] %v625_v12  ;;  %v89_v21 = vunpack.c.l.bf16 %v81_v6  ;;  %v90_v22 = vunpack.c.h.bf16 %v81_v6  ;;  %v91_v23 = vunpack.c.l.bf16 %v82_v7  ;;  %v92_v24 = vunpack.c.h.bf16 %v82_v7 }
  0x1e   :  { %745 = vst [vmem:[#allocation7_spill] sm:$0xff] %v627_v13  ;;  %746 = vst [vmem:[#allocation8_spill] sm:$0xff] %v629_v14  ;;  %v113_v25 = vunpack.c.l.bf16 %v105_v15  ;;  %v114_v26 = vunpack.c.h.bf16 %v105_v15  ;;  %v115_v27 = vunpack.c.l.bf16 %v106_v16  ;;  %v116_v28 = vunpack.c.h.bf16 %v106_v16  ;;  %v109_v15 = vld [vmem:[%s738_s3 + $0x20] sm:$0xff]  ;;  %v110_v16 = vld [vmem:[%s738_s3 + $0x28] sm:$0xff] }
  0x1f   :  { %v259_v37 = vmul.f32 %v497_v29, %v93_v0  ;;  %v260_v38 = vmul.f32 %v499_v30, %v94_v1  ;;  %v261_v39 = vmul.f32 %v501_v31, %v95_v2  ;;  %v262_v40 = vmul.f32 %v503_v32, %v96_v5  ;;  %v85_v0 = vld [vmem:[%s737_s2 + $0x20] sm:$0xff]  ;;  %v86_v1 = vld [vmem:[%s737_s2 + $0x28] sm:$0xff] }
  0x20   :  { %v275_v41 = vmul.f32 %v505_v33, %v117_v17  ;;  %v276_v42 = vmul.f32 %v507_v34, %v118_v18  ;;  %v277_v43 = vmul.f32 %v509_v35, %v119_v19  ;;  %v278_v44 = vmul.f32 %v511_v36, %v120_v20 }
  0x21   :  { %v255_v47 = vmul.f32 %v497_v29, %v89_v21  ;;  %v256_v48 = vmul.f32 %v499_v30, %v90_v22  ;;  %v257_v49 = vmul.f32 %v501_v31, %v91_v23  ;;  %v258_v50 = vmul.f32 %v503_v32, %v92_v24 }
  0x22   :  { %v271_v53 = vmul.f32 %v505_v33, %v113_v25  ;;  %v272_v54 = vmul.f32 %v507_v34, %v114_v26  ;;  %v273_v11 = vmul.f32 %v509_v35, %v115_v27  ;;  %v274_v63 = vmul.f32 %v511_v36, %v116_v28 }
  0x23   :  { %v101_v2 = vunpack.c.l.bf16 %v87_v45  ;;  %v102_v5 = vunpack.c.h.bf16 %v87_v45  ;;  %v103_v6 = vunpack.c.l.bf16 %v88_v46  ;;  %v104_v7 = vunpack.c.h.bf16 %v88_v46 }
  0x24   :  { %v125_v17 = vunpack.c.l.bf16 %v111_v51  ;;  %v126_v18 = vunpack.c.h.bf16 %v111_v51  ;;  %v127_v19 = vunpack.c.l.bf16 %v112_v52  ;;  %v128_v20 = vunpack.c.h.bf16 %v112_v52 }
  0x25   :  { %v97_v21 = vunpack.c.l.bf16 %v85_v0  ;;  %v98_v22 = vunpack.c.h.bf16 %v85_v0  ;;  %v99_v23 = vunpack.c.l.bf16 %v86_v1  ;;  %v100_v24 = vunpack.c.h.bf16 %v86_v1 }
  0x26   :  { %v121_v25 = vunpack.c.l.bf16 %v109_v15  ;;  %v122_v26 = vunpack.c.h.bf16 %v109_v15  ;;  %v123_v27 = vunpack.c.l.bf16 %v110_v16  ;;  %v124_v28 = vunpack.c.h.bf16 %v110_v16 }
  0x27   :  { %v267_v45 = vmul.f32 %v497_v29, %v101_v2  ;;  %v268_v46 = vmul.f32 %v499_v30, %v102_v5  ;;  %v269_v14 = vmul.f32 %v501_v31, %v103_v6  ;;  %v270_v13 = vmul.f32 %v503_v32, %v104_v7 }
  0x28   :  { %v283_v51 = vmul.f32 %v505_v33, %v125_v17  ;;  %v284_v52 = vmul.f32 %v507_v34, %v126_v18  ;;  %v285_v0 = vmul.f32 %v509_v35, %v127_v19  ;;  %v286_v1 = vmul.f32 %v511_v36, %v128_v20 }
  0x29   :  { %v263_v15 = vmul.f32 %v497_v29, %v97_v21  ;;  %v264_v16 = vmul.f32 %v499_v30, %v98_v22  ;;  %v265_v2 = vmul.f32 %v501_v31, %v99_v23  ;;  %v266_v5 = vmul.f32 %v503_v32, %v100_v24 }
  0x2a   :  { %v279_v7 = vmul.f32 %v505_v33, %v121_v25  ;;  %v280_v17 = vmul.f32 %v507_v34, %v122_v26  ;;  %v281_v18 = vmul.f32 %v509_v35, %v123_v27  ;;  %v282_v19 = vmul.f32 %v511_v36, %v124_v28 }
  0x2b   :  { %v291_v8 = vadd.f32 %v275_v41, %v259_v37  ;;  %v292_v20 = vadd.f32 %v276_v42, %v260_v38  ;;  %v293_v10 = vadd.f32 %v277_v43, %v261_v39  ;;  %v294_v29 = vadd.f32 %v278_v44, %v262_v40  ;;  %v747_v43 = vld [vmem:[#allocation2_spill] sm:$0xff] }
  0x2c   :  { %v287_v21 = vadd.f32 %v271_v53, %v255_v47  ;;  %v288_v30 = vadd.f32 %v272_v54, %v256_v48  ;;  %v289_v22 = vadd.f32 %v273_v11, %v257_v49  ;;  %v290_v31 = vadd.f32 %v274_v63, %v258_v50  ;;  %v748_v47 = vld [vmem:[#allocation3_spill] sm:$0xff]  ;;  %v749_v48 = vld [vmem:[#allocation4_spill] sm:$0xff]  ;;  %v750_v49 = vld [vmem:[#allocation5_spill] sm:$0xff] }
  0x2d   :  { %v299_v23 = vadd.f32 %v283_v51, %v267_v45  ;;  %v300_v32 = vadd.f32 %v284_v52, %v268_v46  ;;  %v301_v24 = vadd.f32 %v285_v0, %v269_v14  ;;  %v302_v9 = vadd.f32 %v286_v1, %v270_v13  ;;  %v751_v50 = vld [vmem:[#allocation6_spill] sm:$0xff]  ;;  %v753_v53 = vld [vmem:[#allocation8_spill] sm:$0xff] }
  0x2e   :  { %v295_v25 = vadd.f32 %v279_v7, %v263_v15  ;;  %v296_v34 = vadd.f32 %v280_v17, %v264_v16  ;;  %v297_v26 = vadd.f32 %v281_v18, %v265_v2  ;;  %v298_v35 = vadd.f32 %v282_v19, %v266_v5 }
  0x83   :  { %v232_v12 = vpop.permute.xlu1 %231  ;;  %v222_v6 = vpop.permute.xlu0 %221 }
  0x84   :  { %v247_v36 = vmul.f32 %v232_v12, %v533_v57  ;;  %v248_v37 = vmul.f32 %v232_v12, %v535_v58  ;;  %v249_v38 = vmul.f32 %v232_v12, %v537_v59  ;;  %v250_v39 = vmul.f32 %v232_v12, %v539_v60  ;;  %v752_v12 = vld [vmem:[#allocation7_spill] sm:$0xff] }
  0x85   :  { %v239_v40 = vmul.f32 %v222_v6, %v595_v55  ;;  %v240_v41 = vmul.f32 %v222_v6, %v597_v56  ;;  %v241_v13 = vmul.f32 %v222_v6, %v599_v61  ;;  %v242_v14 = vmul.f32 %v222_v6, %v601_v62 }
  0x87   :  { %v237_v4 = vpop.permute.xlu1 %236  ;;  %v227_v33 = vpop.permute.xlu0 %226 }
  0x88   :  { %v251_v42 = vmul.f32 %v237_v4, %v603_v3  ;;  %v252_v44 = vmul.f32 %v237_v4, %v747_v43  ;;  %v253_v57 = vmul.f32 %v237_v4, %v748_v47  ;;  %v254_v58 = vmul.f32 %v237_v4, %v749_v48 }
  0x89   :  { %v243_v59 = vmul.f32 %v227_v33, %v750_v49  ;;  %v244_v60 = vmul.f32 %v227_v33, %v751_v50  ;;  %v245_v55 = vmul.f32 %v227_v33, %v752_v12  ;;  %v246_v56 = vmul.f32 %v227_v33, %v753_v53 }
  0x8b   :  { %v311_v54 = vpop.permute.xlu1 %310  ;;  %v306_v61 = vpop.permute.xlu0 %305 }
  0x8c   :  { %v327_v11 = vmul.f32 %v311_v54, %v291_v8  ;;  %v328_v62 = vmul.f32 %v311_v54, %v292_v20  ;;  %v329_v63 = vmul.f32 %v311_v54, %v293_v10  ;;  %v330_v3 = vmul.f32 %v311_v54, %v294_v29 }
  0x8d   :  { %v323_v27 = vmul.f32 %v306_v61, %v287_v21  ;;  %v324_v28 = vmul.f32 %v306_v61, %v288_v30  ;;  %v325_v45 = vmul.f32 %v306_v61, %v289_v22  ;;  %v326_v46 = vmul.f32 %v306_v61, %v290_v31 }
  0x8e   :  { %v343_v51 = vadd.f32 %v327_v11, %v243_v59  ;;  %v344_v4 = vadd.f32 %v328_v62, %v244_v60  ;;  %v345_v52 = vadd.f32 %v329_v63, %v245_v55  ;;  %v346_v0 = vadd.f32 %v330_v3, %v246_v56 }
  0x8f   :  { %v339_v1 = vadd.f32 %v323_v27, %v239_v40  ;;  %v340_v15 = vadd.f32 %v324_v28, %v240_v41  ;;  %v341_v16 = vadd.f32 %v325_v45, %v241_v13  ;;  %v342_v2 = vadd.f32 %v326_v46, %v242_v14  ;;  %v321_v5 = vpop.permute.xlu1 %320  ;;  %v316_v6 = vpop.permute.xlu0 %315 }
  0x90   :  { %v425_v7 = vpack.c.bf16 %v344_v4, %v343_v51  ;;  %v426_v17 = vpack.c.bf16 %v346_v0, %v345_v52  ;;  %v335_v8 = vmul.f32 %v321_v5, %v299_v23  ;;  %v336_v18 = vmul.f32 %v321_v5, %v300_v32 }
  0x91   :  { %v423_v10 = vpack.c.bf16 %v340_v15, %v339_v1  ;;  %v424_v19 = vpack.c.bf16 %v342_v2, %v341_v16  ;;  %v337_v20 = vmul.f32 %v321_v5, %v301_v24  ;;  %v338_v29 = vmul.f32 %v321_v5, %v302_v9 }
  0x92   :  { %405 = vst [vmem:[%s739_s6 + $0x10] sm:$0xff] %v425_v7  ;;  %406 = vst [vmem:[%s739_s6 + $0x18] sm:$0xff] %v426_v17  ;;  %v351_v21 = vadd.f32 %v335_v8, %v251_v42  ;;  %v352_v30 = vadd.f32 %v336_v18, %v252_v44  ;;  %v331_v22 = vmul.f32 %v316_v6, %v295_v25 }
  0x93   :  { %v332_v31 = vmul.f32 %v316_v6, %v296_v34  ;;  %403 = vst [vmem:[%s739_s6] sm:$0xff] %v423_v10  ;;  %404 = vst [vmem:[%s739_s6 + $0x8] sm:$0xff] %v424_v19  ;;  %v353_v9 = vadd.f32 %v337_v20, %v253_v57  ;;  %v354_v23 = vadd.f32 %v338_v29, %v254_v58 }
  0x94   :  { %v333_v32 = vmul.f32 %v316_v6, %v297_v26  ;;  %v334_v24 = vmul.f32 %v316_v6, %v298_v35  ;;  %v429_v33 = vpack.c.bf16 %v352_v30, %v351_v21  ;;  %v347_v40 = vadd.f32 %v331_v22, %v247_v36 }
  0x95   :  { %v348_v41 = vadd.f32 %v332_v31, %v248_v37  ;;  %v430_v13 = vpack.c.bf16 %v354_v23, %v353_v9 }
  0x96   :  { %v349_v14 = vadd.f32 %v333_v32, %v249_v38  ;;  %v350_v42 = vadd.f32 %v334_v24, %v250_v39  ;;  %409 = vst [vmem:[%s739_s6 + $0x30] sm:$0xff] %v429_v33 }
  0x97   :  { %v427_v25 = vpack.c.bf16 %v348_v41, %v347_v40  ;;  %410 = vst [vmem:[%s739_s6 + $0x38] sm:$0xff] %v430_v13 }
  0x98   :  { %v428_v34 = vpack.c.bf16 %v350_v42, %v349_v14 }
  0x99   :  { %407 = vst [vmem:[%s739_s6 + $0x20] sm:$0xff] %v427_v25 }
  0x9a   :  { %408 = vst [vmem:[%s739_s6 + $0x28] sm:$0xff] %v428_v34 }

// kernel: deeplab_forward.25
= control target key start
LH: loop header
LB: loop body
LE: loop exit
PB: predicated region body
PF: predicated region fallthrough
CT: control target
= control target key end

     0   :  { %s2477_s21 = smov 0   ;;  %s2871_s0 = inlined_call_operand.vmem [shape: bf16[512,288], index: 0, kind: input, shape index: {}]   ;;  %s2872_s1 = inlined_call_operand.vmem [shape: bf16[512,108], index: 1, kind: input, shape index: {}]   ;;  %s2873_s2 = inlined_call_operand.vmem [shape: bf16[288,32], index: 2, kind: input, shape index: {}]   ;;  %s2874_s3 = inlined_call_operand.vmem [shape: bf16[108,32], index: 3, kind: input, shape index: {}]   ;;  %s2875_s4 = inlined_call_operand.vmem [shape: f32[1,32], index: 4, kind: input, shape index: {}]   ;;  %s2876_s5 = inlined_call_operand.vmem [shape: f32[1,32], index: 5, kind: input, shape index: {}]   ;;  %s2877_s6 = inlined_call_operand.vmem [shape: bf16[512,32], index: 6, kind: output, shape index: {}]  }
   0x1 LB: > { %s1820_s22 = sadd.s32 4294967295, %s2440_s21   ;;  %p1824_p0 = scmp.ge.s32.totalorder %s2440_s21, 1  ;;  %s2440_s21 = sphi %s2477_s21, %s16_s21  }
   0x2   : > { %p225_p1 = scmp.lt.s32.totalorder %s2440_s21, 3 }
   0x4   : > { %p226_p2 = pnand %p1824_p0, %p225_p1 }
   0x5   : > { %v2329_v0 = vld [vmem:[%s2874_s3] sm:$0xff] (!%p226_p2)   ;;  %v2332_v3 = vld [vmem:[%s2874_s3 + $0x8] sm:$0xff] (!%p226_p2)   ;;  %s1825_s9 = sshll.u32 (!%p226_p2), %s1820_s22, 5  ;;  %v2335_v6 = vld [vmem:[%s2874_s3 + $0x10] sm:$0xff] (!%p226_p2)   ;;  %vm548_vm0 = vcmask (!%p226_p2), 883712   ;;  %vm597_vm1 = vcmask (!%p226_p2), 1045504  }
   0x6   : > { %229 = sbr.rel (%p226_p2) target bundleno = 387 (0x183), region = 44  ;;  %v2330_v1 = vld [vmem:[%s2873_s2 + $0x40] sm:$0xff] (!%p226_p2)   ;;  %2173 = vmatprep.subr.bf16.mxu0 (!%p226_p2), %v2329_v0  ;;  %v2333_v4 = vld [vmem:[%s2873_s2 + $0x48] sm:$0xff] (!%p226_p2)   ;;  %v2336_v7 = vld [vmem:[%s2873_s2 + $0x50] sm:$0xff] (!%p226_p2)   ;;  %p262_p3 = scmp.lt.s32.totalorder (!%p226_p2), %s1825_s9, 63  ;;  %vm1110_vm2 = vcmask (!%p226_p2), 261120  }
   0x7   : > { %v2331_v2 = vld [vmem:[%s2873_s2] sm:$0xff] (!%p226_p2)   ;;  %2043 = vmatprep.subr.bf16.mxu1 (!%p226_p2), %v2330_v1  ;;  %2174 = vmatpush3.bf16.msra.mxu0 (!%p226_p2), %v2329_v0  ;;  %v2334_v5 = vld [vmem:[%s2873_s2 + $0x8] sm:$0xff] (!%p226_p2)   ;;  %v2337_v8 = vld [vmem:[%s2873_s2 + $0x10] sm:$0xff] (!%p226_p2)   ;;  %vm1719_vm3 = vcmask (!%p226_p2), 257024  }
   0x8   : > { %2044 = vmatpush3.bf16.msra.mxu1 (!%p226_p2), %v2331_v2  ;;  %2175 = vmatprep.subr.bf16.mxu0 (!%p226_p2), %v2332_v3  ;;  %v2338_v9 = vld [vmem:[%s2874_s3 + $0x18] sm:$0xff] (!%p226_p2)   ;;  %v2341_v12 = vld [vmem:[%s2874_s3 + $0x20] sm:$0xff] (!%p226_p2)   ;;  %v2344_v15 = vld [vmem:[%s2874_s3 + $0x28] sm:$0xff] (!%p226_p2)  }
   0x9   : > { %2045 = vmatprep.subr.bf16.mxu1 (!%p226_p2), %v2333_v4  ;;  %v2339_v10 = vld [vmem:[%s2873_s2 + $0x58] sm:$0xff] (!%p226_p2)   ;;  %v2342_v13 = vld [vmem:[%s2873_s2 + $0x60] sm:$0xff] (!%p226_p2)   ;;  %v2345_v16 = vld [vmem:[%s2873_s2 + $0x68] sm:$0xff] (!%p226_p2)  }
   0xa   : > { %v2340_v11 = vld [vmem:[%s2873_s2 + $0x18] sm:$0xff] (!%p226_p2)   ;;  %v2343_v14 = vld [vmem:[%s2873_s2 + $0x20] sm:$0xff] (!%p226_p2)   ;;  %v2346_v17 = vld [vmem:[%s2873_s2 + $0x28] sm:$0xff] (!%p226_p2)  }
   0xb   : > { %2176 = vmatpush3.bf16.msra.mxu0 (!%p226_p2), %v2332_v3  ;;  %v2347_v18 = vld [vmem:[%s2874_s3 + $0x30] sm:$0x3f] (!%p226_p2)   ;;  %v2352_v24 = vld [vmem:[%s2873_s2 + $0x78] sm:$0xff] (!%p226_p2)   ;;  %v2357_v27 = vld [vmem:[%s2873_s2 + $0x80] sm:$0xff] (!%p226_p2)  }
   0xc   : > { %2046 = vmatpush3.bf16.msra.mxu1 (!%p226_p2), %v2334_v5  ;;  %2177 = vmatprep.subr.bf16.mxu0 (!%p226_p2), %v2335_v6  ;;  %v2348_v19 = vld [vmem:[%s2873_s2 + $0x70] sm:$0xff] (!%p226_p2)   ;;  %v599_v22 = vsel (!%p226_p2), %vm597_vm1, %v2347_v18, 0  ;;  %v2353_v25 = vld [vmem:[%s2873_s2 + $0x38] sm:$0xff] (!%p226_p2)   ;;  %v2378_v35 = vld [vmem:[%s2873_s2 + $0x88] sm:$0xff] (!%p226_p2)  }
   0xd   : > { %2047 = vmatprep.subr.bf16.mxu1 %v2336_v7  ;;  %s2879_s9 = smov (!%p262_p3, %s1825_s9), 63  ;;  %v2349_v21 = vld [vmem:[%s2873_s2 + $0x30] sm:$0xff]  }
   0xe   : > { %s1828_s7 = sshll.u32 %s2879_s9, 2  ;;  %s2320_s15 = smul.u32 12, %s2879_s9 }
   0xf   : > { %2178 = vmatpush3.bf16.msra.mxu0 %v2335_v6  ;;  %s2548_s18 = scalar_lea.vmem %s2872_s1, %s1828_s7  ;;  %s2718_s22 = scalar_lea.vmem %s2877_s6, %s1828_s7 }
  0x10   : > { %2048 = vmatpush3.bf16.msra.mxu1 %v2337_v8  ;;  %2179 = vmatprep.subr.bf16.mxu0 %v2338_v9  ;;  %v2350_v20 = vld [vmem:[%s2548_s18] sm:$0xff]   ;;  %s2563_s28 = scalar_lea.vmem %s2871_s0, %s2320_s15  ;;  %v2351_v23 = vld [vmem:[%s2548_s18 + $0x8] sm:$0xff]   ;;  %v2358_v28 = vld [vmem:[%s2548_s18 + $0x10] sm:$0xff]  }
  0x11   : > { %2049 = vmatprep.subr.bf16.mxu1 %v2339_v10  ;;  %2187 = vmatprep.mubr.msk.bf16.mxu0 %vm548_vm0, %v2350_v20  ;;  %v2356_v26 = vld [vmem:[%s2563_s28 + $0x4] ss:$12 sps:$4 sm:$0xff]   ;;  %v2354_v29 = vld [vmem:[%s2563_s28] ss:$12 sps:$4 sm:$0xff]   ;;  %v2360_v30 = vld [vmem:[%s2563_s28 + $0x1c] ss:$12 sps:$4 sm:$0xff]  }
  0x12   : > { %1191 = vmatprep.mubr.bf16.mxu1 %v2356_v26  ;;  %v2359_v31 = vld [vmem:[%s2548_s18 + $0x18] sm:$0xff]   ;;  %v2363_v32 = vld [vmem:[%s2548_s18 + $0x20] sm:$0xff]   ;;  %v2364_v36 = vld [vmem:[%s2548_s18 + $0x28] sm:$0xff]  }
  0x13   : > { %2180 = vmatpush3.bf16.msra.mxu0 %v2338_v9  ;;  %v2362_v33 = vld [vmem:[%s2563_s28 + $0x18] ss:$12 sps:$4 sm:$0xff]   ;;  %v2365_v34 = vld [vmem:[%s2563_s28 + $0x34] ss:$12 sps:$4 sm:$0xff]   ;;  %v2367_v38 = vld [vmem:[%s2563_s28 + $0x30] ss:$12 sps:$4 sm:$0xff]  }
  0x14   : > { %2050 = vmatpush3.bf16.msra.mxu1 %v2340_v11  ;;  %2181 = vmatprep.subr.bf16.mxu0 %v2341_v12  ;;  %v2368_v37 = vld [vmem:[%s2548_s18 + $0x30] sm:$0xff]   ;;  %v2370_v39 = vld [vmem:[%s2563_s28 + $0x4c] ss:$12 sps:$4 sm:$0xff]   ;;  %v2373_v41 = vld [vmem:[%s2548_s18 + $0x40] sm:$0xff]  }
  0x15   : > { %2051 = vmatprep.subr.bf16.mxu1 %v2342_v13  ;;  %v2369_v40 = vld [vmem:[%s2548_s18 + $0x38] sm:$0xff]   ;;  %v2372_v42 = vld [vmem:[%s2563_s28 + $0x48] ss:$12 sps:$4 sm:$0xff]   ;;  %v2375_v43 = vld [vmem:[%s2563_s28 + $0x64] ss:$12 sps:$4 sm:$0xff]  }
  0x16   : > { %v2374_v44 = vld [vmem:[%s2548_s18 + $0x48] sm:$0xff]   ;;  %v2379_v45 = vld [vmem:[%s2548_s18 + $0x50] sm:$0xff]   ;;  %v2380_v48 = vld [vmem:[%s2548_s18 + $0x58] sm:$0xff]  }
  0x17   : > { %2182 = vmatpush3.bf16.msra.mxu0 %v2341_v12  ;;  %v2377_v46 = vld [vmem:[%s2563_s28 + $0x60] ss:$12 sps:$4 sm:$0xff]   ;;  %v2381_v47 = vld [vmem:[%s2563_s28 + $0x7c] ss:$12 sps:$4 sm:$0xff]   ;;  %v2383_v50 = vld [vmem:[%s2563_s28 + $0x78] ss:$12 sps:$4 sm:$0xff]  }
  0x18   : > { %2052 = vmatpush3.bf16.msra.mxu1 %v2343_v14  ;;  %2183 = vmatprep.subr.bf16.mxu0 %v2344_v15  ;;  %v2384_v49 = vld [vmem:[%s2548_s18 + $0x60] sm:$0xff]   ;;  %v2385_v52 = vld [vmem:[%s2548_s18 + $0x68] sm:$0xff]   ;;  %v2389_v53 = vld [vmem:[%s2548_s18 + $0x70] sm:$0xff]  }
  0x19   : > { %2053 = vmatprep.subr.bf16.mxu1 %v2345_v16  ;;  %v2386_v51 = vld [vmem:[%s2563_s28 + $0x94] ss:$12 sps:$4 sm:$0xff]   ;;  %v2388_v54 = vld [vmem:[%s2563_s28 + $0x90] ss:$12 sps:$4 sm:$0xff]   ;;  %v2391_v55 = vld [vmem:[%s2563_s28 + $0xac] ss:$12 sps:$4 sm:$0xff]  }
  0x1a   : > { %v2390_v56 = vld [vmem:[%s2548_s18 + $0x78] sm:$0xff]   ;;  %v2394_v57 = vld [vmem:[%s2563_s28 + $0x8] ss:$12 sps:$4 sm:$0xff]   ;;  %v2396_v59 = vld [vmem:[%s2563_s28 + $0xc4] ss:$12 sps:$4 sm:$0xff]  }
  0x1b   : > { %2184 = vmatpush3.bf16.msra.mxu0 %v2344_v15  ;;  %v2393_v58 = vld [vmem:[%s2563_s28 + $0xa8] ss:$12 sps:$4 sm:$0xff]   ;;  %v2395_v60 = vld [vmem:[%s2563_s28 + $0x20] ss:$12 sps:$4 sm:$0xff]   ;;  %v2399_v61 = vld [vmem:[%s2563_s28 + $0x38] ss:$12 sps:$4 sm:$0xff]  }
  0x1c   : > { %2054 = vmatpush3.bf16.msra.mxu1 %v2346_v17  ;;  %2319 = vmatprep.subr.msk.bf16.mxu0 %vm597_vm1, %v2347_v18  ;;  %v2398_v62 = vld [vmem:[%s2563_s28 + $0xc0] ss:$12 sps:$4 sm:$0xff]   ;;  %v2401_v63 = vld [vmem:[%s2563_s28 + $0xdc] ss:$12 sps:$4 sm:$0xff]   ;;  %v2403_v2 = vld [vmem:[%s2563_s28 + $0xd8] ss:$12 sps:$4 sm:$0xff]  }
  0x1d   : > { %2055 = vmatprep.subr.bf16.mxu1 %v2348_v19  ;;  %v2400_v0 = vld [vmem:[%s2563_s28 + $0x50] ss:$12 sps:$4 sm:$0xff]   ;;  %v2404_v1 = vld [vmem:[%s2563_s28 + $0x68] ss:$12 sps:$4 sm:$0xff]   ;;  %v2405_v4 = vld [vmem:[%s2563_s28 + $0x80] ss:$12 sps:$4 sm:$0xff]  }
  0x1e   : > { %v2406_v3 = vld [vmem:[%s2563_s28 + $0xf4] ss:$12 sps:$4 sm:$0xff]   ;;  %v2409_v5 = vld [vmem:[%s2563_s28 + $0x98] ss:$12 sps:$4 sm:$0xff]   ;;  %v2408_v6 = vld [vmem:[%s2563_s28 + $0xf0] ss:$12 sps:$4 sm:$0xff]  }
  0x1f   : > { %2186 = vmatpush3.bf16.msra.mxu0 %v599_v22  ;;  %v2411_v7 = vld [vmem:[%s2563_s28 + $0x10c] ss:$12 sps:$4 sm:$0xff]   ;;  %v2410_v8 = vld [vmem:[%s2563_s28 + $0xb0] ss:$12 sps:$4 sm:$0xff]   ;;  %v2414_v9 = vld [vmem:[%s2563_s28 + $0xc8] ss:$12 sps:$4 sm:$0xff]  }
  0x20   : > { %2056 = vmatpush3.bf16.msra.mxu1 %v2349_v21  ;;  %2219 = vmatprep.subr.bf16.mxu0 %v2357_v27  ;;  %v2413_v10 = vld [vmem:[%s2563_s28 + $0x108] ss:$12 sps:$4 sm:$0xff]   ;;  %v2416_v11 = vld [vmem:[%s2563_s28 + $0x124] ss:$12 sps:$4 sm:$0xff]   ;;  %v2415_v12 = vld [vmem:[%s2563_s28 + $0xe0] ss:$12 sps:$4 sm:$0xff]  }
  0x21   : > { %2057 = vmatprep.subr.bf16.mxu1 %v2352_v24  ;;  %v2419_v13 = vld [vmem:[%s2563_s28 + $0xf8] ss:$12 sps:$4 sm:$0xff]   ;;  %v2418_v14 = vld [vmem:[%s2563_s28 + $0x120] ss:$12 sps:$4 sm:$0xff]   ;;  %v2421_v15 = vld [vmem:[%s2563_s28 + $0x13c] ss:$12 sps:$4 sm:$0xff]  }
  0x22   : > { %2188 = vmatmul.mubr.msk.bf16.vlgmr.msra.gmra.mrb[0].mxu0 %vm548_vm0, %v2351_v23  ;;  %v2420_v16 = vld [vmem:[%s2563_s28 + $0x110] ss:$12 sps:$4 sm:$0xff]   ;;  %v2424_v17 = vld [vmem:[%s2563_s28 + $0x128] ss:$12 sps:$4 sm:$0xff]   ;;  %v2423_v18 = vld [vmem:[%s2563_s28 + $0x138] ss:$12 sps:$4 sm:$0xff]  }
  0x23   : > { %2220 = vmatpush3.bf16.msra.mxu0 %v2357_v27  ;;  %2191 = vmatprep.mubr.msk.bf16.mxu0 %vm548_vm0, %v2358_v28  ;;  %v2426_v19 = vld [vmem:[%s2563_s28 + $0x154] ss:$12 sps:$4 sm:$0xff]   ;;  %v2429_v21 = vld [vmem:[%s2563_s28 + $0x158] ss:$12 sps:$4 sm:$0xff]   ;;  %v2428_v22 = vld [vmem:[%s2563_s28 + $0x150] ss:$12 sps:$4 sm:$0xff]  }
  0x24   : > { %2058 = vmatpush3.bf16.msra.mxu1 %v2353_v25  ;;  %2221 = vmatprep.subr.bf16.mxu0 %v2378_v35  ;;  %v2425_v20 = vld [vmem:[%s2563_s28 + $0x140] ss:$12 sps:$4 sm:$0xff]   ;;  %v2430_v24 = vld [vmem:[%s2563_s28 + $0x170] ss:$12 sps:$4 sm:$0xff]   ;;  %v2433_v25 = vld [vmem:[%s2563_s28 + $0x168] ss:$12 sps:$4 sm:$0xff]  }
  0x25   : > { %v2431_v23 = vld [vmem:[%s2563_s28 + $0x16c] ss:$12 sps:$4 sm:$0xff]  }
  0x27   : > { %1192 = vmatmul.mubr.bf16.vlgmr.msra.gmra.mrb[0].mxu1 %v2354_v29  ;;  %2222 = vmatpush3.bf16.msra.mxu0 %v2378_v35 }
  0x28   : > { %1199 = vmatprep.mubr.bf16.mxu1 %v2360_v30 }
  0x2a   : > { %2192 = vmatmul.mubr.msk.bf16.gmra.mrb[4].mxu0 %vm548_vm0, %v2359_v31 }
  0x2b   : > { %2195 = vmatprep.mubr.msk.bf16.mxu0 %vm548_vm0, %v2363_v32 }
  0x2f   : > { %1200 = vmatmul.mubr.bf16.gmra.mrb[4].mxu1 %v2362_v33 }
  0x30   : > { %1207 = vmatprep.mubr.bf16.mxu1 %v2365_v34 }
  0x32   : > { %2196 = vmatmul.mubr.msk.bf16.gmra.mrb[8].mxu0 %vm548_vm0, %v2364_v36 }
  0x33   : > { %2199 = vmatprep.mubr.msk.bf16.mxu0 %vm548_vm0, %v2368_v37 }
  0x37   : > { %1208 = vmatmul.mubr.bf16.gmra.mrb[8].mxu1 %v2367_v38 }
  0x38   : > { %1215 = vmatprep.mubr.bf16.mxu1 %v2370_v39 }
  0x3a   : > { %2200 = vmatmul.mubr.msk.bf16.gmra.mrb[12].mxu0 %vm548_vm0, %v2369_v40 }
  0x3b   : > { %2203 = vmatprep.mubr.msk.bf16.mxu0 %vm548_vm0, %v2373_v41 }
  0x3f   : > { %1216 = vmatmul.mubr.bf16.gmra.mrb[12].mxu1 %v2372_v42 }
  0x40   : > { %1223 = vmatprep.mubr.bf16.mxu1 %v2375_v43 }
  0x42   : > { %2204 = vmatmul.mubr.msk.bf16.gmra.mrb[16].mxu0 %vm548_vm0, %v2374_v44 }
  0x43   : > { %2207 = vmatprep.mubr.msk.bf16.mxu0 %vm548_vm0, %v2379_v45 }
  0x47   : > { %1224 = vmatmul.mubr.bf16.gmra.mrb[16].mxu1 %v2377_v46 }
  0x48   : > { %1231 = vmatprep.mubr.bf16.mxu1 %v2381_v47 }
  0x4a   : > { %2208 = vmatmul.mubr.msk.bf16.gmra.mrb[20].mxu0 %vm548_vm0, %v2380_v48 }
  0x4b   : > { %2211 = vmatprep.mubr.msk.bf16.mxu0 %vm548_vm0, %v2384_v49 }
  0x4f   : > { %1232 = vmatmul.mubr.bf16.gmra.mrb[20].mxu1 %v2383_v50 }
  0x50   : > { %1239 = vmatprep.mubr.bf16.mxu1 %v2386_v51 }
  0x52   : > { %2212 = vmatmul.mubr.msk.bf16.gmra.mrb[24].mxu0 %vm548_vm0, %v2385_v52 }
  0x53   : > { %2215 = vmatprep.mubr.msk.bf16.mxu0 %vm548_vm0, %v2389_v53 }
  0x57   : > { %1240 = vmatmul.mubr.bf16.gmra.mrb[24].mxu1 %v2388_v54 }
  0x58   : > { %1247 = vmatprep.mubr.bf16.mxu1 %v2391_v55 }
  0x5a   : > { %2216 = vmatmul.mubr.msk.bf16.gmra.mrb[28].mxu0 %vm548_vm0, %v2390_v56 }
  0x5b   : > { %2223 = vmatprep.mubr.msk.bf16.mxu0 %vm1110_vm2, %v2394_v57 }
  0x5f   : > { %1248 = vmatmul.mubr.bf16.gmra.mrb[28].mxu1 %v2393_v58 }
  0x60   : > { %1255 = vmatprep.mubr.bf16.mxu1 %v2396_v59 }
  0x62   : > { %2224 = vmatmul.mubr.msk.bf16.vlgmr.msra.gmra.mrb[0].mxu0 %vm1110_vm2, %v2395_v60 }
  0x63   : > { %2227 = vmatprep.mubr.msk.bf16.mxu0 %vm1110_vm2, %v2399_v61 }
  0x67   : > { %1256 = vmatmul.mubr.bf16.gmra.mrb[32].mxu1 %v2398_v62 }
  0x68   : > { %1263 = vmatprep.mubr.bf16.mxu1 %v2401_v63 }
  0x6a   : > { %2228 = vmatmul.mubr.msk.bf16.gmra.mrb[4].mxu0 %vm1110_vm2, %v2400_v0 }
  0x6b   : > { %2231 = vmatprep.mubr.msk.bf16.mxu0 %vm1110_vm2, %v2404_v1 }
  0x6f   : > { %1264 = vmatmul.mubr.bf16.gmra.mrb[36].mxu1 %v2403_v2 }
  0x70   : > { %1271 = vmatprep.mubr.bf16.mxu1 %v2406_v3 }
  0x72   : > { %2232 = vmatmul.mubr.msk.bf16.gmra.mrb[8].mxu0 %vm1110_vm2, %v2405_v4 }
  0x73   : > { %2235 = vmatprep.mubr.msk.bf16.mxu0 %vm1110_vm2, %v2409_v5 }
  0x77   : > { %1272 = vmatmul.mubr.bf16.gmra.mrb[40].mxu1 %v2408_v6 }
  0x78   : > { %1279 = vmatprep.mubr.bf16.mxu1 %v2411_v7 }
  0x7a   : > { %2236 = vmatmul.mubr.msk.bf16.gmra.mrb[12].mxu0 %vm1110_vm2, %v2410_v8 }
  0x7b   : > { %2239 = vmatprep.mubr.msk.bf16.mxu0 %vm1110_vm2, %v2414_v9 }
  0x7f   : > { %1280 = vmatmul.mubr.bf16.gmra.mrb[44].mxu1 %v2413_v10  ;;  %v2695_v10 = vld [vmem:[%s2875_s4] ss:$0 sm:$0xff] }
  0x80   : > { %1287 = vmatprep.mubr.bf16.mxu1 %v2416_v11 }
  0x82   : > { %2240 = vmatmul.mubr.msk.bf16.gmra.mrb[16].mxu0 %vm1110_vm2, %v2415_v12 }
  0x83   : > { %2243 = vmatprep.mubr.msk.bf16.mxu0 %vm1110_vm2, %v2419_v13 }
  0x87   : > { %1288 = vmatmul.mubr.bf16.gmra.mrb[48].mxu1 %v2418_v14  ;;  %v2702_v14 = vld [vmem:[%s2876_s5] ss:$0 sm:$0xff] }
  0x88   : > { %1295 = vmatprep.mubr.bf16.mxu1 %v2421_v15 }
  0x8a   : > { %2244 = vmatmul.mubr.msk.bf16.gmra.mrb[20].mxu0 %vm1110_vm2, %v2420_v16 }
  0x8b   : > { %2247 = vmatprep.mubr.msk.bf16.mxu0 %vm1110_vm2, %v2424_v17 }
  0x8f   : > { %1296 = vmatmul.mubr.bf16.gmra.mrb[52].mxu1 %v2423_v18 }
  0x90   : > { %1303 = vmatprep.mubr.bf16.mxu1 %v2426_v19 }
  0x92   : > { %2248 = vmatmul.mubr.msk.bf16.gmra.mrb[24].mxu0 %vm1110_vm2, %v2425_v20 }
  0x93   : > { %2251 = vmatprep.mubr.msk.bf16.mxu0 %vm1110_vm2, %v2429_v21 }
  0x97   : > { %1304 = vmatmul.mubr.bf16.gmra.mrb[56].mxu1 %v2428_v22 }
  0x98   : > { %1311 = vmatprep.mubr.bf16.mxu1 %v2431_v23 }
  0x9a   : > { %2252 = vmatmul.mubr.msk.bf16.gmra.mrb[28].mxu0 %vm1110_vm2, %v2430_v24 }
  0x9f   : > { %1312 = vmatmul.mubr.bf16.gmra.mrb[60].mxu1 %v2433_v25 }
  0xfa   : > { %v2059_v26 = vpop.f32.mrb[0].mxu1 }
  0xfb   : > { %v2060_v27 = vpop.f32.mrb[1].mxu1 }
  0xfc   : > { %v2061_v28 = vadd.f32 %v2060_v27, %v2059_v26  ;;  %v2062_v29 = vpop.f32.mrb[2].mxu1 }
  0xfd   : > { %v2063_v30 = vpop.f32.mrb[3].mxu1 }
  0xfe   : > { %v2064_v31 = vadd.f32 %v2063_v30, %v2062_v29 }
 0x102   : > { %v2065_v32 = vpop.f32.mrb[4].mxu1 }
 0x103   : > { %v2066_v33 = vpop.f32.mrb[5].mxu1 }
 0x104   : > { %v2067_v34 = vadd.f32 %v2066_v33, %v2065_v32  ;;  %v2068_v35 = vpop.f32.mrb[6].mxu1 }
 0x105   : > { %v2069_v36 = vpop.f32.mrb[7].mxu1 }
 0x106   : > { %v2070_v37 = vadd.f32 %v2069_v36, %v2068_v35 }
 0x10a   : > { %v2071_v38 = vpop.f32.mrb[8].mxu1 }
 0x10b   : > { %v2072_v39 = vpop.f32.mrb[9].mxu1 }
 0x10c   : > { %v2672_v40 = vadd.f32 %v2072_v39, %v2071_v38  ;;  %v2074_v41 = vpop.f32.mrb[10].mxu1 }
 0x10d   : > { %v2075_v42 = vpop.f32.mrb[11].mxu1 }
 0x10e   : > { %v2674_v43 = vadd.f32 %v2075_v42, %v2074_v41 }
 0x112   : > { %v2077_v44 = vpop.f32.mrb[12].mxu1 }
 0x113   : > { %v2078_v45 = vpop.f32.mrb[13].mxu1 }
 0x114   : > { %v2079_v46 = vadd.f32 %v2078_v45, %v2077_v44  ;;  %v2080_v47 = vpop.f32.mrb[14].mxu1 }
 0x115   : > { %v2081_v48 = vpop.f32.mrb[15].mxu1 }
 0x116   : > { %v2676_v49 = vadd.f32 %v2081_v48, %v2080_v47 }
 0x11a   : > { %v2083_v50 = vpop.f32.mrb[16].mxu1 }
 0x11b   : > { %v2084_v51 = vpop.f32.mrb[17].mxu1 }
 0x11c   : > { %v2678_v52 = vadd.f32 %v2084_v51, %v2083_v50  ;;  %v2086_v53 = vpop.f32.mrb[18].mxu1 }
 0x11d   : > { %v2087_v54 = vpop.f32.mrb[19].mxu1 }
 0x11e   : > { %v2680_v55 = vadd.f32 %v2087_v54, %v2086_v53 }
 0x122   : > { %v2089_v56 = vpop.f32.mrb[20].mxu1 }
 0x123   : > { %v2090_v57 = vpop.f32.mrb[21].mxu1 }
 0x124   : > { %v2682_v58 = vadd.f32 %v2090_v57, %v2089_v56  ;;  %v2092_v59 = vpop.f32.mrb[22].mxu1 }
 0x125   : > { %v2093_v60 = vpop.f32.mrb[23].mxu1 }
 0x126   : > { %v2684_v61 = vadd.f32 %v2093_v60, %v2092_v59 }
 0x12a   : > { %v2095_v62 = vpop.f32.mrb[24].mxu1 }
 0x12b   : > { %v2096_v63 = vpop.f32.mrb[25].mxu1 }
 0x12c   : > { %v2686_v0 = vadd.f32 %v2096_v63, %v2095_v62  ;;  %v2098_v1 = vpop.f32.mrb[26].mxu1 }
 0x12d   : > { %v2099_v2 = vpop.f32.mrb[27].mxu1 }
 0x12e   : > { %v2688_v3 = vadd.f32 %v2099_v2, %v2098_v1 }
 0x132   : > { %v2101_v4 = vpop.f32.mrb[28].mxu1 }
 0x133   : > { %v2102_v5 = vpop.f32.mrb[29].mxu1 }
 0x134   : > { %v2690_v6 = vadd.f32 %v2102_v5, %v2101_v4  ;;  %v2104_v7 = vpop.f32.mrb[30].mxu1 }
 0x135   : > { %v2105_v8 = vpop.f32.mrb[31].mxu1  ;;  %v2225_v9 = vpop.f32.mrb[0].mxu0 }
 0x136   : > { %v2697_v11 = vadd.f32 %v2105_v8, %v2104_v7  ;;  %v2255_v12 = vadd.f32 %v2225_v9, %v2067_v34  ;;  %v1354_v13 = vpop.f32.mrb[1].mxu0 }
 0x137   : > { %v2256_v15 = vadd.f32 %v2061_v28, %v1354_v13  ;;  %v2226_v16 = vpop.f32.mrb[2].mxu0 }
 0x138   : > { %v1490_v17 = vmul.f32 %v2255_v12, %v2695_v10  ;;  %v2257_v18 = vadd.f32 %v2226_v16, %v2070_v37  ;;  %v1357_v19 = vpop.f32.mrb[3].mxu0 }
 0x139   : > { %v1488_v20 = vmul.f32 %v2256_v15, %v2695_v10  ;;  %v2258_v21 = vadd.f32 %v2064_v31, %v1357_v19 }
 0x13a   : > { %v1529_v22 = vadd.f32 %v2702_v14, %v1490_v17  ;;  %v1491_v23 = vmul.f32 %v2257_v18, %v2695_v10  ;;  %v2107_v24 = vpop.f32.mrb[32].mxu1 }
 0x13b   : > { %v1527_v25 = vadd.f32 %v2702_v14, %v1488_v20  ;;  %v1489_v26 = vmul.f32 %v2258_v21, %v2695_v10  ;;  %v2108_v27 = vpop.f32.mrb[33].mxu1 }
 0x13c   : > { %v1561_v28 = vmax.f32 %v1529_v22, 0.0  ;;  %v1530_v29 = vadd.f32 %v2702_v14, %v1491_v23  ;;  %v2711_v30 = vadd.f32 %v2108_v27, %v2107_v24  ;;  %v2110_v32 = vpop.f32.mrb[34].mxu1 }
 0x13d   : > { %v1559_v31 = vmax.f32 %v1527_v25, 0.0  ;;  %v1528_v33 = vadd.f32 %v2702_v14, %v1489_v26  ;;  %v2111_v34 = vpop.f32.mrb[35].mxu1  ;;  %v2229_v35 = vpop.f32.mrb[4].mxu0 }
 0x13e   : > { %v1990_v36 = vpack.c.bf16 %v1561_v28, %v1561_v28  ;;  %v1562_v37 = vmax.f32 %v1530_v29, 0.0  ;;  %v2721_v38 = vadd.f32 %v2111_v34, %v2110_v32  ;;  %v2259_v39 = vadd.f32 %v2229_v35, %v2079_v46  ;;  %v1370_v41 = vpop.f32.mrb[5].mxu0 }
 0x13f   : > { %v1988_v42 = vpack.c.bf16 %v1559_v31, %v1559_v31  ;;  %v1560_v44 = vmax.f32 %v1528_v33, 0.0  ;;  %v2260_v45 = vadd.f32 %v2672_v40, %v1370_v41  ;;  %v2230_v47 = vpop.f32.mrb[6].mxu0 }
 0x140   : > { %1722 = vst.msk [vmem:[%s2718_s22 + $0x8] sm:$0xf] %vm1719_vm3, %v1990_v36  ;;  %v1991_v48 = vpack.c.bf16 %v1562_v37, %v1562_v37  ;;  %v1494_v50 = vmul.f32 %v2259_v39, %v2695_v10  ;;  %v2261_v51 = vadd.f32 %v2230_v47, %v2676_v49  ;;  %v1373_v53 = vpop.f32.mrb[7].mxu0 }
 0x141   : > { %1720 = vst.msk [vmem:[%s2718_s22] sm:$0xf] %vm1719_vm3, %v1988_v42  ;;  %v1989_v54 = vpack.c.bf16 %v1560_v44, %v1560_v44  ;;  %v1492_v46 = vmul.f32 %v2260_v45, %v2695_v10  ;;  %v2262_v56 = vadd.f32 %v2674_v43, %v1373_v53 }
 0x142   : > { %1723 = vst.msk [vmem:[%s2718_s22 + $0xc] sm:$0xf] %vm1719_vm3, %v1991_v48  ;;  %v1533_v40 = vadd.f32 %v2702_v14, %v1494_v50  ;;  %v1495_v57 = vmul.f32 %v2261_v51, %v2695_v10  ;;  %v2113_v59 = vpop.f32.mrb[36].mxu1 }
 0x143   : > { %1721 = vst.msk [vmem:[%s2718_s22 + $0x4] sm:$0xf] %vm1719_vm3, %v1989_v54  ;;  %v1531_v60 = vadd.f32 %v2702_v14, %v1492_v46  ;;  %v1493_v49 = vmul.f32 %v2262_v56, %v2695_v10  ;;  %v2114_v62 = vpop.f32.mrb[37].mxu1 }
 0x144   : > { %v1565_v63 = vmax.f32 %v1533_v40, 0.0  ;;  %v1534_v1 = vadd.f32 %v2702_v14, %v1495_v57  ;;  %v2741_v2 = vadd.f32 %v2114_v62, %v2113_v59  ;;  %v2116_v43 = vpop.f32.mrb[38].mxu1 }
 0x145   : > { %v1563_v4 = vmax.f32 %v1531_v60, 0.0  ;;  %v1532_v5 = vadd.f32 %v2702_v14, %v1493_v49  ;;  %v2117_v7 = vpop.f32.mrb[39].mxu1  ;;  %v2233_v8 = vpop.f32.mrb[8].mxu0 }
 0x146   : > { %v1994_v9 = vpack.c.bf16 %v1565_v63, %v1565_v63  ;;  %v1566_v12 = vmax.f32 %v1534_v1, 0.0  ;;  %v2744_v13 = vadd.f32 %v2117_v7, %v2116_v43  ;;  %v2263_v15 = vadd.f32 %v2233_v8, %v2682_v58  ;;  %v1386_v16 = vpop.f32.mrb[9].mxu0 }
 0x147   : > { %v1992_v17 = vpack.c.bf16 %v1563_v4, %v1563_v4  ;;  %v1564_v18 = vmax.f32 %v1532_v5, 0.0  ;;  %v2264_v19 = vadd.f32 %v2678_v52, %v1386_v16  ;;  %v2234_v20 = vpop.f32.mrb[10].mxu0 }
 0x148   : > { %1726 = vst.msk [vmem:[%s2718_s22 + $0x18] sm:$0xf] %vm1719_vm3, %v1994_v9  ;;  %v1995_v21 = vpack.c.bf16 %v1566_v12, %v1566_v12  ;;  %v1498_v22 = vmul.f32 %v2263_v15, %v2695_v10  ;;  %v2265_v23 = vadd.f32 %v2234_v20, %v2684_v61  ;;  %v1389_v24 = vpop.f32.mrb[11].mxu0 }
 0x149   : > { %1724 = vst.msk [vmem:[%s2718_s22 + $0x10] sm:$0xf] %vm1719_vm3, %v1992_v17  ;;  %v1993_v25 = vpack.c.bf16 %v1564_v18, %v1564_v18  ;;  %v1496_v58 = vmul.f32 %v2264_v19, %v2695_v10  ;;  %v2266_v26 = vadd.f32 %v2680_v55, %v1389_v24 }
 0x14a   : > { %1727 = vst.msk [vmem:[%s2718_s22 + $0x1c] sm:$0xf] %vm1719_vm3, %v1995_v21  ;;  %v1537_v52 = vadd.f32 %v2702_v14, %v1498_v22  ;;  %v1499_v27 = vmul.f32 %v2265_v23, %v2695_v10  ;;  %v2119_v28 = vpop.f32.mrb[40].mxu1 }
 0x14b   : > { %1725 = vst.msk [vmem:[%s2718_s22 + $0x14] sm:$0xf] %vm1719_vm3, %v1993_v25  ;;  %v1535_v29 = vadd.f32 %v2702_v14, %v1496_v58  ;;  %v1497_v61 = vmul.f32 %v2266_v26, %v2695_v10  ;;  %v2120_v32 = vpop.f32.mrb[41].mxu1 }
 0x14c   : > { %v1569_v31 = vmax.f32 %v1537_v52, 0.0  ;;  %v1538_v33 = vadd.f32 %v2702_v14, %v1499_v27  ;;  %v2765_v34 = vadd.f32 %v2120_v32, %v2119_v28  ;;  %v2122_v55 = vpop.f32.mrb[42].mxu1 }
 0x14d   : > { %v1567_v35 = vmax.f32 %v1535_v29, 0.0  ;;  %v1536_v36 = vadd.f32 %v2702_v14, %v1497_v61  ;;  %v2123_v37 = vpop.f32.mrb[43].mxu1  ;;  %v2237_v39 = vpop.f32.mrb[12].mxu0 }
 0x14e   : > { %v1998_v41 = vpack.c.bf16 %v1569_v31, %v1569_v31  ;;  %v1570_v42 = vmax.f32 %v1538_v33, 0.0  ;;  %v2768_v44 = vadd.f32 %v2123_v37, %v2122_v55  ;;  %v2267_v45 = vadd.f32 %v2237_v39, %v2690_v6  ;;  %v1402_v47 = vpop.f32.mrb[13].mxu0 }
 0x14f   : > { %v1996_v48 = vpack.c.bf16 %v1567_v35, %v1567_v35  ;;  %v1568_v50 = vmax.f32 %v1536_v36, 0.0  ;;  %v2268_v51 = vadd.f32 %v2686_v0, %v1402_v47  ;;  %v2238_v53 = vpop.f32.mrb[14].mxu0 }
 0x150   : > { %1730 = vst.msk [vmem:[%s2718_s22 + $0x28] sm:$0xf] %vm1719_vm3, %v1998_v41  ;;  %v1999_v54 = vpack.c.bf16 %v1570_v42, %v1570_v42  ;;  %v1502_v46 = vmul.f32 %v2267_v45, %v2695_v10  ;;  %v2269_v56 = vadd.f32 %v2238_v53, %v2697_v11  ;;  %v1405_v40 = vpop.f32.mrb[15].mxu0 }
 0x151   : > { %1728 = vst.msk [vmem:[%s2718_s22 + $0x20] sm:$0xf] %vm1719_vm3, %v1996_v48  ;;  %v1997_v57 = vpack.c.bf16 %v1568_v50, %v1568_v50  ;;  %v1500_v6 = vmul.f32 %v2268_v51, %v2695_v10  ;;  %v2270_v59 = vadd.f32 %v2688_v3, %v1405_v40 }
 0x152   : > { %1731 = vst.msk [vmem:[%s2718_s22 + $0x2c] sm:$0xf] %vm1719_vm3, %v1999_v54  ;;  %v1541_v0 = vadd.f32 %v2702_v14, %v1502_v46  ;;  %v1503_v60 = vmul.f32 %v2269_v56, %v2695_v10  ;;  %v2125_v49 = vpop.f32.mrb[44].mxu1 }
 0x153   : > { %1729 = vst.msk [vmem:[%s2718_s22 + $0x24] sm:$0xf] %vm1719_vm3, %v1997_v57  ;;  %v1539_v62 = vadd.f32 %v2702_v14, %v1500_v6  ;;  %v1501_v11 = vmul.f32 %v2270_v59, %v2695_v10  ;;  %v2126_v63 = vpop.f32.mrb[45].mxu1 }
 0x154   : > { %v1573_v1 = vmax.f32 %v1541_v0, 0.0  ;;  %v1542_v43 = vadd.f32 %v2702_v14, %v1503_v60  ;;  %v2127_v4 = vadd.f32 %v2126_v63, %v2125_v49  ;;  %v2128_v3 = vpop.f32.mrb[46].mxu1 }
 0x155   : > { %v1571_v5 = vmax.f32 %v1539_v62, 0.0  ;;  %v1540_v7 = vadd.f32 %v2702_v14, %v1501_v11  ;;  %v2129_v8 = vpop.f32.mrb[47].mxu1  ;;  %v2241_v9 = vpop.f32.mrb[16].mxu0 }
 0x156   : > { %v2002_v12 = vpack.c.bf16 %v1573_v1, %v1573_v1  ;;  %v1574_v15 = vmax.f32 %v1542_v43, 0.0  ;;  %v2130_v16 = vadd.f32 %v2129_v8, %v2128_v3  ;;  %v2271_v17 = vadd.f32 %v2241_v9, %v2741_v2  ;;  %v1418_v18 = vpop.f32.mrb[17].mxu0 }
 0x157   : > { %v2000_v19 = vpack.c.bf16 %v1571_v5, %v1571_v5  ;;  %v1572_v20 = vmax.f32 %v1540_v7, 0.0  ;;  %v2272_v21 = vadd.f32 %v2711_v30, %v1418_v18  ;;  %v2242_v22 = vpop.f32.mrb[18].mxu0 }
 0x158   : > { %1734 = vst.msk [vmem:[%s2718_s22 + $0x38] sm:$0xf] %vm1719_vm3, %v2002_v12  ;;  %v2003_v23 = vpack.c.bf16 %v1574_v15, %v1574_v15  ;;  %v1506_v24 = vmul.f32 %v2271_v17, %v2695_v10  ;;  %v2273_v25 = vadd.f32 %v2242_v22, %v2744_v13  ;;  %v1421_v58 = vpop.f32.mrb[19].mxu0 }
 0x159   : > { %1732 = vst.msk [vmem:[%s2718_s22 + $0x30] sm:$0xf] %vm1719_vm3, %v2000_v19  ;;  %v2001_v26 = vpack.c.bf16 %v1572_v20, %v1572_v20  ;;  %v1504_v2 = vmul.f32 %v2272_v21, %v2695_v10  ;;  %v2274_v52 = vadd.f32 %v2721_v38, %v1421_v58 }
 0x15a   : > { %1735 = vst.msk [vmem:[%s2718_s22 + $0x3c] sm:$0xf] %vm1719_vm3, %v2003_v23  ;;  %v1545_v30 = vadd.f32 %v2702_v14, %v1506_v24  ;;  %v1507_v27 = vmul.f32 %v2273_v25, %v2695_v10  ;;  %v2131_v28 = vpop.f32.mrb[48].mxu1 }
 0x15b   : > { %1733 = vst.msk [vmem:[%s2718_s22 + $0x34] sm:$0xf] %vm1719_vm3, %v2001_v26  ;;  %v1543_v29 = vadd.f32 %v2702_v14, %v1504_v2  ;;  %v1505_v13 = vmul.f32 %v2274_v52, %v2695_v10  ;;  %v2132_v61 = vpop.f32.mrb[49].mxu1 }
 0x15c   : > { %v1577_v32 = vmax.f32 %v1545_v30, 0.0  ;;  %v1546_v31 = vadd.f32 %v2702_v14, %v1507_v27  ;;  %v2133_v33 = vadd.f32 %v2132_v61, %v2131_v28  ;;  %v2134_v38 = vpop.f32.mrb[50].mxu1 }
 0x15d   : > { %v1575_v55 = vmax.f32 %v1543_v29, 0.0  ;;  %v1544_v35 = vadd.f32 %v2702_v14, %v1505_v13  ;;  %v2135_v36 = vpop.f32.mrb[51].mxu1  ;;  %v2245_v37 = vpop.f32.mrb[20].mxu0 }
 0x15e   : > { %v2006_v39 = vpack.c.bf16 %v1577_v32, %v1577_v32  ;;  %v1578_v41 = vmax.f32 %v1546_v31, 0.0  ;;  %v2136_v42 = vadd.f32 %v2135_v36, %v2134_v38  ;;  %v2275_v45 = vadd.f32 %v2245_v37, %v2127_v4  ;;  %v1434_v47 = vpop.f32.mrb[21].mxu0 }
 0x15f   : > { %v2004_v48 = vpack.c.bf16 %v1575_v55, %v1575_v55  ;;  %v1576_v50 = vmax.f32 %v1544_v35, 0.0  ;;  %v2276_v51 = vadd.f32 %v2765_v34, %v1434_v47  ;;  %v2246_v53 = vpop.f32.mrb[22].mxu0 }
 0x160   : > { %1738 = vst.msk [vmem:[%s2718_s22 + $0x48] sm:$0xf] %vm1719_vm3, %v2006_v39  ;;  %v2007_v54 = vpack.c.bf16 %v1578_v41, %v1578_v41  ;;  %v1510_v46 = vmul.f32 %v2275_v45, %v2695_v10  ;;  %v2277_v56 = vadd.f32 %v2246_v53, %v2130_v16  ;;  %v1437_v40 = vpop.f32.mrb[23].mxu0 }
 0x161   : > { %1736 = vst.msk [vmem:[%s2718_s22 + $0x40] sm:$0xf] %vm1719_vm3, %v2004_v48  ;;  %v2005_v57 = vpack.c.bf16 %v1576_v50, %v1576_v50  ;;  %v1508_v6 = vmul.f32 %v2276_v51, %v2695_v10  ;;  %v2278_v59 = vadd.f32 %v2768_v44, %v1437_v40 }
 0x162   : > { %1739 = vst.msk [vmem:[%s2718_s22 + $0x4c] sm:$0xf] %vm1719_vm3, %v2007_v54  ;;  %v1549_v0 = vadd.f32 %v2702_v14, %v1510_v46  ;;  %v1511_v34 = vmul.f32 %v2277_v56, %v2695_v10  ;;  %v2137_v60 = vpop.f32.mrb[52].mxu1 }
 0x163   : > { %1737 = vst.msk [vmem:[%s2718_s22 + $0x44] sm:$0xf] %vm1719_vm3, %v2005_v57  ;;  %v1547_v49 = vadd.f32 %v2702_v14, %v1508_v6  ;;  %v1509_v62 = vmul.f32 %v2278_v59, %v2695_v10  ;;  %v2138_v11 = vpop.f32.mrb[53].mxu1 }
 0x164   : > { %v1581_v63 = vmax.f32 %v1549_v0, 0.0  ;;  %v1550_v1 = vadd.f32 %v2702_v14, %v1511_v34  ;;  %v2139_v43 = vadd.f32 %v2138_v11, %v2137_v60  ;;  %v2140_v44 = vpop.f32.mrb[54].mxu1 }
 0x165   : > { %v1579_v4 = vmax.f32 %v1547_v49, 0.0  ;;  %v1548_v3 = vadd.f32 %v2702_v14, %v1509_v62  ;;  %v2141_v5 = vpop.f32.mrb[55].mxu1  ;;  %v2249_v7 = vpop.f32.mrb[24].mxu0 }
 0x166   : > { %v2010_v8 = vpack.c.bf16 %v1581_v63, %v1581_v63  ;;  %v1582_v9 = vmax.f32 %v1550_v1, 0.0  ;;  %v2142_v12 = vadd.f32 %v2141_v5, %v2140_v44  ;;  %v2279_v15 = vadd.f32 %v2249_v7, %v2139_v43  ;;  %v1450_v16 = vpop.f32.mrb[25].mxu0 }
 0x167   : > { %v2008_v17 = vpack.c.bf16 %v1579_v4, %v1579_v4  ;;  %v1580_v18 = vmax.f32 %v1548_v3, 0.0  ;;  %v2280_v19 = vadd.f32 %v2133_v33, %v1450_v16  ;;  %v2250_v20 = vpop.f32.mrb[26].mxu0 }
 0x168   : > { %1742 = vst.msk [vmem:[%s2718_s22 + $0x58] sm:$0xf] %vm1719_vm3, %v2010_v8  ;;  %v2011_v21 = vpack.c.bf16 %v1582_v9, %v1582_v9  ;;  %v1514_v22 = vmul.f32 %v2279_v15, %v2695_v10  ;;  %v2281_v23 = vadd.f32 %v2250_v20, %v2142_v12  ;;  %v1453_v24 = vpop.f32.mrb[27].mxu0 }
 0x169   : > { %1740 = vst.msk [vmem:[%s2718_s22 + $0x50] sm:$0xf] %vm1719_vm3, %v2008_v17  ;;  %v2009_v25 = vpack.c.bf16 %v1580_v18, %v1580_v18  ;;  %v1512_v58 = vmul.f32 %v2280_v19, %v2695_v10  ;;  %v2282_v26 = vadd.f32 %v2136_v42, %v1453_v24 }
 0x16a   : > { %1743 = vst.msk [vmem:[%s2718_s22 + $0x5c] sm:$0xf] %vm1719_vm3, %v2011_v21  ;;  %v1553_v2 = vadd.f32 %v2702_v14, %v1514_v22  ;;  %v1515_v52 = vmul.f32 %v2281_v23, %v2695_v10  ;;  %v2143_v30 = vpop.f32.mrb[56].mxu1 }
 0x16b   : > { %1741 = vst.msk [vmem:[%s2718_s22 + $0x54] sm:$0xf] %vm1719_vm3, %v2009_v25  ;;  %v1551_v27 = vadd.f32 %v2702_v14, %v1512_v58  ;;  %v1513_v28 = vmul.f32 %v2282_v26, %v2695_v10  ;;  %v2144_v29 = vpop.f32.mrb[57].mxu1 }
 0x16c   : > { %v1585_v13 = vmax.f32 %v1553_v2, 0.0  ;;  %v1554_v61 = vadd.f32 %v2702_v14, %v1515_v52  ;;  %v2145_v32 = vadd.f32 %v2144_v29, %v2143_v30  ;;  %v2146_v31 = vpop.f32.mrb[58].mxu1 }
 0x16d   : > { %v1583_v33 = vmax.f32 %v1551_v27, 0.0  ;;  %v1552_v38 = vadd.f32 %v2702_v14, %v1513_v28  ;;  %v2147_v55 = vpop.f32.mrb[59].mxu1  ;;  %v2253_v35 = vpop.f32.mrb[28].mxu0 }
 0x16e   : > { %v2014_v36 = vpack.c.bf16 %v1585_v13, %v1585_v13  ;;  %v1586_v37 = vmax.f32 %v1554_v61, 0.0  ;;  %v2148_v39 = vadd.f32 %v2147_v55, %v2146_v31  ;;  %v1466_v41 = vpop.f32.mrb[29].mxu0 }
 0x16f   : > { %v2012_v42 = vpack.c.bf16 %v1583_v33, %v1583_v33  ;;  %v1584_v45 = vmax.f32 %v1552_v38, 0.0  ;;  %v2284_v47 = vadd.f32 %v2145_v32, %v1466_v41  ;;  %v2254_v48 = vpop.f32.mrb[30].mxu0 }
 0x170   : > { %1746 = vst.msk [vmem:[%s2718_s22 + $0x68] sm:$0xf] %vm1719_vm3, %v2014_v36  ;;  %v2015_v50 = vpack.c.bf16 %v1586_v37, %v1586_v37  ;;  %v1469_v51 = vpop.f32.mrb[31].mxu0 }
 0x171   : > { %1744 = vst.msk [vmem:[%s2718_s22 + $0x60] sm:$0xf] %vm1719_vm3, %v2012_v42  ;;  %v2013_v53 = vpack.c.bf16 %v1584_v45, %v1584_v45  ;;  %v1516_v54 = vmul.f32 %v2284_v47, %v2695_v10  ;;  %v2286_v46 = vadd.f32 %v2148_v39, %v1469_v51 }
 0x172   : > { %1747 = vst.msk [vmem:[%s2718_s22 + $0x6c] sm:$0xf] %vm1719_vm3, %v2015_v50  ;;  %v2149_v56 = vpop.f32.mrb[60].mxu1 }
 0x173   : > { %1745 = vst.msk [vmem:[%s2718_s22 + $0x64] sm:$0xf] %vm1719_vm3, %v2013_v53  ;;  %v1555_v40 = vadd.f32 %v2702_v14, %v1516_v54  ;;  %v1517_v57 = vmul.f32 %v2286_v46, %v2695_v10  ;;  %v2150_v6 = vpop.f32.mrb[61].mxu1 }
 0x174   : > { %v2151_v59 = vadd.f32 %v2150_v6, %v2149_v56  ;;  %v2152_v0 = vpop.f32.mrb[62].mxu1 }
 0x175   : > { %v1587_v34 = vmax.f32 %v1555_v40, 0.0  ;;  %v1556_v60 = vadd.f32 %v2702_v14, %v1517_v57  ;;  %v2153_v49 = vpop.f32.mrb[63].mxu1 }
 0x176   : > { %v2283_v62 = vadd.f32 %v2253_v35, %v2151_v59  ;;  %v2154_v11 = vadd.f32 %v2153_v49, %v2152_v0 }
 0x177   : > { %v2016_v63 = vpack.c.bf16 %v1587_v34, %v1587_v34  ;;  %v1588_v1 = vmax.f32 %v1556_v60, 0.0 }
 0x178   : > { %v1518_v43 = vmul.f32 %v2283_v62, %v2695_v10  ;;  %v2285_v44 = vadd.f32 %v2254_v48, %v2154_v11 }
 0x179   : > { %1748 = vst.msk [vmem:[%s2718_s22 + $0x70] sm:$0xf] %vm1719_vm3, %v2016_v63  ;;  %v2017_v4 = vpack.c.bf16 %v1588_v1, %v1588_v1 }
 0x17a   : > { %v1557_v3 = vadd.f32 %v2702_v14, %v1518_v43  ;;  %v1519_v5 = vmul.f32 %v2285_v44, %v2695_v10 }
 0x17b   : > { %1749 = vst.msk [vmem:[%s2718_s22 + $0x74] sm:$0xf] %vm1719_vm3, %v2017_v4 }
 0x17c   : > { %v1589_v7 = vmax.f32 %v1557_v3, 0.0  ;;  %v1558_v8 = vadd.f32 %v2702_v14, %v1519_v5 }
 0x17e   : > { %v2018_v9 = vpack.c.bf16 %v1589_v7, %v1589_v7  ;;  %v1590_v12 = vmax.f32 %v1558_v8, 0.0 }
 0x180   : > { %1750 = vst.msk [vmem:[%s2718_s22 + $0x78] sm:$0xf] %vm1719_vm3, %v2018_v9  ;;  %v2019_v15 = vpack.c.bf16 %v1590_v12, %v1590_v12 }
 0x182   : > { %1751 = vst.msk [vmem:[%s2718_s22 + $0x7c] sm:$0xf] %vm1719_vm3, %v2019_v15 }
 0x183 PF: > { %s16_s21 = sadd.s32 1, %s2440_s21  }
 0x184   : > { %p13_p4 = scmp.ge.s32.totalorder %s16_s21, 4  }
 0x186   :  { %15 = sbr.rel (!%p13_p4) target bundleno = 1 (0x1), region = 77 }

// kernel: deeplab_forward.26
= control target key start
LH: loop header
LB: loop body
LE: loop exit
PB: predicated region body
PF: predicated region fallthrough
CT: control target
= control target key end

     0   :  { %s2000_s23 = smov 0   ;;  %s2415_s0 = inlined_call_operand.vmem [shape: bf16[512,288], index: 0, kind: input, shape index: {}]   ;;  %s2416_s1 = inlined_call_operand.vmem [shape: bf16[288,32], index: 1, kind: input, shape index: {}]   ;;  %s2417_s2 = inlined_call_operand.vmem [shape: f32[1,32], index: 2, kind: input, shape index: {}]   ;;  %s2418_s3 = inlined_call_operand.vmem [shape: f32[1,32], index: 3, kind: input, shape index: {}]   ;;  %s2419_s4 = inlined_call_operand.vmem [shape: bf16[32,1], index: 4, kind: input, shape index: {}]   ;;  %s2420_s5 = inlined_call_operand.<no memory space> [shape: f32[1,1], index: 5, kind: input, shape index: {}]   ;;  %s2421_s6 = inlined_call_operand.vmem [shape: f32[512,1], index: 6, kind: output, shape index: {}]  }
   0x1   :  { %v11_v0 = vstv %s2420_s5 }
   0x2   :  { %12 = vst [vmem:[#allocation2] sm:$0x1] %v11_v0 }
   0x3 LB: > { %s1527_s24 = sadd.s32 4294967295, %s1960_s23   ;;  %p1531_p0 = scmp.ge.s32.totalorder %s1960_s23, 1  ;;  %s1960_s23 = sphi %s2000_s23, %s18_s23  }
   0x4   : > { %p216_p1 = scmp.lt.s32.totalorder %s1960_s23, 3 }
   0x6   : > { %p217_p2 = pnand %p1531_p0, %p216_p1 }
   0x7   : > { %v1870_v1 = vld [vmem:[%s2416_s1 + $0x40] sm:$0xff] (!%p217_p2)   ;;  %s1532_s28 = sshll.u32 (!%p217_p2), %s1527_s24, 5  ;;  %v1872_v3 = vld [vmem:[%s2416_s1 + $0x48] sm:$0xff] (!%p217_p2)   ;;  %v1874_v5 = vld [vmem:[%s2416_s1 + $0x50] sm:$0xff] (!%p217_p2)   ;;  %vm709_vm0 = vcmask (!%p217_p2), 261120   ;;  %vm1438_vm1 = vcmask (!%p217_p2), 7168  }
   0x8   : > { %220 = sbr.rel (%p217_p2) target bundleno = 605 (0x25d), region = 44  ;;  %v1871_v2 = vld [vmem:[%s2416_s1] sm:$0xff] (!%p217_p2)   ;;  %1641 = vmatprep.subr.bf16.mxu0 (!%p217_p2), %v1870_v1  ;;  %v1873_v4 = vld [vmem:[%s2416_s1 + $0x8] sm:$0xff] (!%p217_p2)   ;;  %p248_p3 = scmp.lt.s32.totalorder (!%p217_p2), %s1532_s28, 63  ;;  %v1875_v6 = vld [vmem:[%s2416_s1 + $0x10] sm:$0xff] (!%p217_p2)  }
   0x9   : > { %1642 = vmatpush3.bf16.msra.mxu0 (!%p217_p2), %v1871_v2  ;;  %v1876_v7 = vld [vmem:[%s2416_s1 + $0x58] sm:$0xff] (!%p217_p2)   ;;  %v1878_v9 = vld [vmem:[%s2416_s1 + $0x60] sm:$0xff] (!%p217_p2)   ;;  %v1880_v12 = vld [vmem:[%s2416_s1 + $0x68] sm:$0xff] (!%p217_p2)  }
   0xa   : > { %1643 = vmatprep.subr.bf16.mxu0 (!%p217_p2), %v1872_v3  ;;  %v1877_v8 = vld [vmem:[%s2416_s1 + $0x18] sm:$0xff] (!%p217_p2)   ;;  %v1884_v10 = vld [vmem:[%s2416_s1 + $0x80] sm:$0xff] (!%p217_p2)   ;;  %v1881_v13 = vld [vmem:[%s2416_s1 + $0x28] sm:$0xff] (!%p217_p2)  }
   0xb   : > { %v1879_v11 = vld [vmem:[%s2416_s1 + $0x20] sm:$0xff] (!%p217_p2)   ;;  %1789 = vmatprep.subr.bf16.mxu1 (!%p217_p2), %v1884_v10  ;;  %v1887_v14 = vld [vmem:[%s2416_s1 + $0x88] sm:$0xff] (!%p217_p2)   ;;  %v1882_v15 = vld [vmem:[%s2416_s1 + $0x70] sm:$0xff] (!%p217_p2)  }
   0xc   : > { %1790 = vmatpush3.bf16.msra.mxu1 (!%p217_p2), %v1884_v10  ;;  %v1883_v19 = vld [vmem:[%s2416_s1 + $0x30] sm:$0xff] (!%p217_p2)   ;;  %v1885_v20 = vld [vmem:[%s2416_s1 + $0x78] sm:$0xff] (!%p217_p2)   ;;  %v1952_v62 = vld [vmem:[%s2419_s4] sm:$0xff] (!%p217_p2)  }
   0xd   : > { %1644 = vmatpush3.bf16.msra.mxu0 (!%p217_p2), %v1873_v4  ;;  %1791 = vmatprep.subr.bf16.mxu1 (!%p217_p2), %v1887_v14  ;;  %v1886_v22 = vld [vmem:[%s2416_s1 + $0x38] sm:$0xff] (!%p217_p2)   ;;  %v1953_v1 = vld [vmem:[%s2419_s4 + $0x8] sm:$0xff] (!%p217_p2)  }
   0xe   : > { %1645 = vmatprep.subr.bf16.mxu0 (!%p217_p2), %v1874_v5 }
   0xf   : > { %s2423_s28 = smov (!%p248_p3, %s1532_s28), 63 }
  0x10   : > { %s1861_s19 = smul.u32 12, %s2423_s28  ;;  %1792 = vmatpush3.bf16.msra.mxu1 %v1887_v14  ;;  %s1535_s5 = sshll.u32 %s2423_s28, 3 }
  0x11   : > { %1646 = vmatpush3.bf16.msra.mxu0 %v1875_v6  ;;  %1825 = vmatprep.subr.bf16.mxu1 %v1952_v62  ;;  %s2314_s30 = scalar_lea.vmem %s2421_s6, %s1535_s5 }
  0x12   : > { %1647 = vmatprep.subr.bf16.mxu0 %v1876_v7  ;;  %s2050_s29 = scalar_lea.vmem %s2415_s0, %s1861_s19 }
  0x13   : > { %v1890_v16 = vld [vmem:[%s2050_s29 + $0x4] ss:$12 sps:$4 sm:$0xff]   ;;  %v1891_v17 = vld [vmem:[%s2050_s29 + $0x8] ss:$12 sps:$4 sm:$0xff]   ;;  %v1892_v18 = vld [vmem:[%s2050_s29 + $0x20] ss:$12 sps:$4 sm:$0xff]  }
  0x14   : > { %790 = vmatprep.mubr.bf16.mxu0 %v1890_v16  ;;  %1793 = vmatprep.mubr.msk.bf16.mxu1 %vm709_vm0, %v1891_v17  ;;  %v1899_v21 = vld [vmem:[%s2050_s29 + $0x38] ss:$12 sps:$4 sm:$0xff]   ;;  %v1900_v23 = vld [vmem:[%s2050_s29 + $0x50] ss:$12 sps:$4 sm:$0xff]   ;;  %v1907_v24 = vld [vmem:[%s2050_s29 + $0x68] ss:$12 sps:$4 sm:$0xff]  }
  0x15   : > { %1648 = vmatpush3.bf16.msra.mxu0 %v1877_v8  ;;  %1794 = vmatmul.mubr.msk.bf16.vlgmr.msra.gmra.mrb[0].mxu1 %vm709_vm0, %v1892_v18  ;;  %v1888_v25 = vld [vmem:[%s2050_s29] ss:$12 sps:$4 sm:$0xff]   ;;  %v1893_v26 = vld [vmem:[%s2050_s29 + $0x1c] ss:$12 sps:$4 sm:$0xff]   ;;  %v1915_v28 = vld [vmem:[%s2050_s29 + $0x98] ss:$12 sps:$4 sm:$0xff]  }
  0x16   : > { %1649 = vmatprep.subr.bf16.mxu0 %v1878_v9  ;;  %1797 = vmatprep.mubr.msk.bf16.mxu1 %vm709_vm0, %v1899_v21  ;;  %v1908_v27 = vld [vmem:[%s2050_s29 + $0x80] ss:$12 sps:$4 sm:$0xff]   ;;  %v1895_v29 = vld [vmem:[%s2050_s29 + $0x18] ss:$12 sps:$4 sm:$0xff]   ;;  %v1916_v31 = vld [vmem:[%s2050_s29 + $0xb0] ss:$12 sps:$4 sm:$0xff]  }
  0x17   : > { %v1896_v30 = vld [vmem:[%s2050_s29 + $0x34] ss:$12 sps:$4 sm:$0xff]   ;;  %v1898_v33 = vld [vmem:[%s2050_s29 + $0x30] ss:$12 sps:$4 sm:$0xff]   ;;  %v1901_v34 = vld [vmem:[%s2050_s29 + $0x4c] ss:$12 sps:$4 sm:$0xff]   ;;  %1826 = vmatpush3.bf16.msra.mxu1 %v1952_v62 }
  0x18   : > { %v1923_v32 = vld [vmem:[%s2050_s29 + $0xc8] ss:$12 sps:$4 sm:$0xff]   ;;  %v1924_v35 = vld [vmem:[%s2050_s29 + $0xe0] ss:$12 sps:$4 sm:$0xff]   ;;  %v1931_v36 = vld [vmem:[%s2050_s29 + $0xf8] ss:$12 sps:$4 sm:$0xff]   ;;  %1827 = vmatprep.subr.bf16.mxu1 %v1953_v1 }
  0x19   : > { %1650 = vmatpush3.bf16.msra.mxu0 %v1879_v11  ;;  %v1903_v37 = vld [vmem:[%s2050_s29 + $0x48] ss:$12 sps:$4 sm:$0xff]   ;;  %v1904_v38 = vld [vmem:[%s2050_s29 + $0x64] ss:$12 sps:$4 sm:$0xff]   ;;  %v1906_v41 = vld [vmem:[%s2050_s29 + $0x60] ss:$12 sps:$4 sm:$0xff]  }
  0x1a   : > { %1651 = vmatprep.subr.bf16.mxu0 %v1880_v12  ;;  %v1932_v39 = vld [vmem:[%s2050_s29 + $0x110] ss:$12 sps:$4 sm:$0xff]   ;;  %v1939_v40 = vld [vmem:[%s2050_s29 + $0x128] ss:$12 sps:$4 sm:$0xff]   ;;  %v1940_v43 = vld [vmem:[%s2050_s29 + $0x140] ss:$12 sps:$4 sm:$0xff]  }
  0x1b   : > { %v1909_v42 = vld [vmem:[%s2050_s29 + $0x7c] ss:$12 sps:$4 sm:$0xff]   ;;  %v1947_v44 = vld [vmem:[%s2050_s29 + $0x158] ss:$12 sps:$4 sm:$0xff]   ;;  %v1912_v46 = vld [vmem:[%s2050_s29 + $0x94] ss:$12 sps:$4 sm:$0xff]   ;;  %1828 = vmatpush3.bf16.msra.mxu1 %v1953_v1 }
  0x1c   : > { %v1911_v45 = vld [vmem:[%s2050_s29 + $0x78] ss:$12 sps:$4 sm:$0xff]   ;;  %v1948_v47 = vld [vmem:[%s2050_s29 + $0x170] ss:$12 sps:$4 sm:$0xff]   ;;  %v1919_v50 = vld [vmem:[%s2050_s29 + $0xa8] ss:$12 sps:$4 sm:$0xff]  }
  0x1d   : > { %1652 = vmatpush3.bf16.msra.mxu0 %v1881_v13  ;;  %1798 = vmatmul.mubr.msk.bf16.gmra.mrb[4].mxu1 %vm709_vm0, %v1900_v23  ;;  %v1914_v48 = vld [vmem:[%s2050_s29 + $0x90] ss:$12 sps:$4 sm:$0xff]   ;;  %v1917_v49 = vld [vmem:[%s2050_s29 + $0xac] ss:$12 sps:$4 sm:$0xff]   ;;  %v1928_v55 = vld [vmem:[%s2050_s29 + $0xf4] ss:$12 sps:$4 sm:$0xff]  }
  0x1e   : > { %1653 = vmatprep.subr.bf16.mxu0 %v1882_v15  ;;  %1801 = vmatprep.mubr.msk.bf16.mxu1 %vm709_vm0, %v1907_v24  ;;  %v1920_v51 = vld [vmem:[%s2050_s29 + $0xc4] ss:$12 sps:$4 sm:$0xff]   ;;  %v1922_v52 = vld [vmem:[%s2050_s29 + $0xc0] ss:$12 sps:$4 sm:$0xff]   ;;  %v1925_v53 = vld [vmem:[%s2050_s29 + $0xdc] ss:$12 sps:$4 sm:$0xff]  }
  0x1f   : > { %v1927_v54 = vld [vmem:[%s2050_s29 + $0xd8] ss:$12 sps:$4 sm:$0xff]   ;;  %v1930_v56 = vld [vmem:[%s2050_s29 + $0xf0] ss:$12 sps:$4 sm:$0xff]   ;;  %v1935_v58 = vld [vmem:[%s2050_s29 + $0x108] ss:$12 sps:$4 sm:$0xff]  }
  0x20   : > { %v1933_v57 = vld [vmem:[%s2050_s29 + $0x10c] ss:$12 sps:$4 sm:$0xff]   ;;  %v1936_v59 = vld [vmem:[%s2050_s29 + $0x124] ss:$12 sps:$4 sm:$0xff]   ;;  %v1941_v61 = vld [vmem:[%s2050_s29 + $0x13c] ss:$12 sps:$4 sm:$0xff]  }
  0x21   : > { %1654 = vmatpush3.bf16.msra.mxu0 %v1883_v19  ;;  %v1938_v60 = vld [vmem:[%s2050_s29 + $0x120] ss:$12 sps:$4 sm:$0xff]   ;;  %v1943_v63 = vld [vmem:[%s2050_s29 + $0x138] ss:$12 sps:$4 sm:$0xff]   ;;  %v1946_v2 = vld [vmem:[%s2050_s29 + $0x150] ss:$12 sps:$4 sm:$0xff]  }
  0x22   : > { %1655 = vmatprep.subr.bf16.mxu0 %v1885_v20  ;;  %v1944_v0 = vld [vmem:[%s2050_s29 + $0x154] ss:$12 sps:$4 sm:$0xff]   ;;  %v1949_v3 = vld [vmem:[%s2050_s29 + $0x16c] ss:$12 sps:$4 sm:$0xff]  }
  0x23   : > { %v1951_v4 = vld [vmem:[%s2050_s29 + $0x168] ss:$12 sps:$4 sm:$0xff]   ;;  %v2147_v18 = vld [vmem:[%s2417_s2] ss:$0 sm:$0xff] }
  0x24   : > { %v2152_v21 = vld [vmem:[%s2418_s3] ss:$0 sm:$0xff] }
  0x25   : > { %1656 = vmatpush3.bf16.msra.mxu0 %v1886_v22  ;;  %1802 = vmatmul.mubr.msk.bf16.gmra.mrb[8].mxu1 %vm709_vm0, %v1908_v27 }
  0x26   : > { %1805 = vmatprep.mubr.msk.bf16.mxu1 %vm709_vm0, %v1915_v28 }
  0x28   : > { %791 = vmatmul.mubr.bf16.vlgmr.msra.gmra.mrb[0].mxu0 %v1888_v25 }
  0x29   : > { %798 = vmatprep.mubr.bf16.mxu0 %v1893_v26 }
  0x2d   : > { %1806 = vmatmul.mubr.msk.bf16.gmra.mrb[12].mxu1 %vm709_vm0, %v1916_v31 }
  0x2e   : > { %1809 = vmatprep.mubr.msk.bf16.mxu1 %vm709_vm0, %v1923_v32 }
  0x30   : > { %799 = vmatmul.mubr.bf16.gmra.mrb[4].mxu0 %v1895_v29 }
  0x31   : > { %806 = vmatprep.mubr.bf16.mxu0 %v1896_v30 }
  0x35   : > { %1810 = vmatmul.mubr.msk.bf16.gmra.mrb[16].mxu1 %vm709_vm0, %v1924_v35 }
  0x36   : > { %1813 = vmatprep.mubr.msk.bf16.mxu1 %vm709_vm0, %v1931_v36 }
  0x38   : > { %807 = vmatmul.mubr.bf16.gmra.mrb[8].mxu0 %v1898_v33 }
  0x39   : > { %814 = vmatprep.mubr.bf16.mxu0 %v1901_v34 }
  0x3d   : > { %1814 = vmatmul.mubr.msk.bf16.gmra.mrb[20].mxu1 %vm709_vm0, %v1932_v39 }
  0x3e   : > { %1817 = vmatprep.mubr.msk.bf16.mxu1 %vm709_vm0, %v1939_v40 }
  0x40   : > { %815 = vmatmul.mubr.bf16.gmra.mrb[12].mxu0 %v1903_v37 }
  0x41   : > { %822 = vmatprep.mubr.bf16.mxu0 %v1904_v38 }
  0x45   : > { %1818 = vmatmul.mubr.msk.bf16.gmra.mrb[24].mxu1 %vm709_vm0, %v1940_v43 }
  0x46   : > { %1821 = vmatprep.mubr.msk.bf16.mxu1 %vm709_vm0, %v1947_v44 }
  0x48   : > { %823 = vmatmul.mubr.bf16.gmra.mrb[16].mxu0 %v1906_v41 }
  0x49   : > { %830 = vmatprep.mubr.bf16.mxu0 %v1909_v42 }
  0x4d   : > { %1822 = vmatmul.mubr.msk.bf16.gmra.mrb[28].mxu1 %vm709_vm0, %v1948_v47 }
  0x50   : > { %831 = vmatmul.mubr.bf16.gmra.mrb[20].mxu0 %v1911_v45 }
  0x51   : > { %838 = vmatprep.mubr.bf16.mxu0 %v1912_v46 }
  0x58   : > { %839 = vmatmul.mubr.bf16.gmra.mrb[24].mxu0 %v1914_v48 }
  0x59   : > { %846 = vmatprep.mubr.bf16.mxu0 %v1917_v49 }
  0x60   : > { %847 = vmatmul.mubr.bf16.gmra.mrb[28].mxu0 %v1919_v50 }
  0x61   : > { %854 = vmatprep.mubr.bf16.mxu0 %v1920_v51 }
  0x68   : > { %855 = vmatmul.mubr.bf16.gmra.mrb[32].mxu0 %v1922_v52 }
  0x69   : > { %862 = vmatprep.mubr.bf16.mxu0 %v1925_v53 }
  0x70   : > { %863 = vmatmul.mubr.bf16.gmra.mrb[36].mxu0 %v1927_v54 }
  0x71   : > { %870 = vmatprep.mubr.bf16.mxu0 %v1928_v55 }
  0x78   : > { %871 = vmatmul.mubr.bf16.gmra.mrb[40].mxu0 %v1930_v56 }
  0x79   : > { %878 = vmatprep.mubr.bf16.mxu0 %v1933_v57 }
  0x80   : > { %879 = vmatmul.mubr.bf16.gmra.mrb[44].mxu0 %v1935_v58 }
  0x81   : > { %886 = vmatprep.mubr.bf16.mxu0 %v1936_v59 }
  0x88   : > { %887 = vmatmul.mubr.bf16.gmra.mrb[48].mxu0 %v1938_v60 }
  0x89   : > { %894 = vmatprep.mubr.bf16.mxu0 %v1941_v61 }
  0x90   : > { %895 = vmatmul.mubr.bf16.gmra.mrb[52].mxu0 %v1943_v63 }
  0x91   : > { %902 = vmatprep.mubr.bf16.mxu0 %v1944_v0 }
  0x98   : > { %903 = vmatmul.mubr.bf16.gmra.mrb[56].mxu0 %v1946_v2 }
  0x99   : > { %910 = vmatprep.mubr.bf16.mxu0 %v1949_v3 }
  0xa0   : > { %911 = vmatmul.mubr.bf16.gmra.mrb[60].mxu0 %v1951_v4 }
  0xe8   : > { %v1795_v5 = vpop.f32.mrb[0].mxu1 }
  0xe9   : > { %v953_v6 = vpop.f32.mrb[1].mxu1 }
  0xea   : > { %v1796_v7 = vpop.f32.mrb[2].mxu1 }
  0xeb   : > { %v956_v8 = vpop.f32.mrb[3].mxu1 }
  0xf0   : > { %v2140_v9 = vpop.f32.mrb[4].mxu1 }
  0xf1   : > { %v969_v10 = vpop.f32.mrb[5].mxu1 }
  0xf2   : > { %v2142_v12 = vpop.f32.mrb[6].mxu1 }
  0xf3   : > { %v972_v14 = vpop.f32.mrb[7].mxu1 }
  0xf8   : > { %v2155_v24 = vpop.f32.mrb[8].mxu1 }
  0xf9   : > { %v2157_v25 = vpop.f32.mrb[9].mxu1 }
  0xfa   : > { %v2161_v29 = vpop.f32.mrb[10].mxu1 }
  0xfb   : > { %v1657_v11 = vpop.f32.mrb[0].mxu0  ;;  %v2163_v31 = vpop.f32.mrb[11].mxu1 }
  0xfc   : > { %v1658_v13 = vpop.f32.mrb[1].mxu0 }
  0xfd   : > { %v1659_v15 = vadd.f32 %v1658_v13, %v1657_v11  ;;  %v1660_v16 = vpop.f32.mrb[2].mxu0 }
  0xfe   : > { %v1661_v17 = vpop.f32.mrb[3].mxu0 }
  0xff   : > { %v1662_v19 = vadd.f32 %v1661_v17, %v1660_v16  ;;  %v954_v20 = vadd.f32 %v1659_v15, %v953_v6 }
 0x100   : > { %v2167_v43 = vpop.f32.mrb[12].mxu1 }
 0x101   : > { %v1087_v22 = vmul.f32 %v2147_v18, %v954_v20  ;;  %v957_v23 = vadd.f32 %v1662_v19, %v956_v8  ;;  %v2169_v44 = vpop.f32.mrb[13].mxu1 }
 0x102   : > { %v2174_v48 = vpop.f32.mrb[14].mxu1 }
 0x103   : > { %v1126_v26 = vadd.f32 %v2152_v21, %v1087_v22  ;;  %v1088_v27 = vmul.f32 %v2147_v18, %v957_v23  ;;  %v1663_v28 = vpop.f32.mrb[4].mxu0  ;;  %v2176_v50 = vpop.f32.mrb[15].mxu1 }
 0x104   : > { %v1664_v30 = vpop.f32.mrb[5].mxu0 }
 0x105   : > { %v1127_v32 = vadd.f32 %v2152_v21, %v1088_v27  ;;  %v1665_v33 = vadd.f32 %v1664_v30, %v1663_v28  ;;  %v1666_v34 = vpop.f32.mrb[6].mxu0  ;;  %v1158_v36 = vmax.f32 %v1126_v26, 0.0 }
 0x106   : > { %v1667_v35 = vpop.f32.mrb[7].mxu0 }
 0x107   : > { %v1159_v37 = vmax.f32 %v1127_v32, 0.0  ;;  %v962_v38 = vadd.f32 %v1795_v5, %v1665_v33  ;;  %v1668_v39 = vadd.f32 %v1667_v35, %v1666_v34 }
 0x108   : > { %v2180_v62 = vpop.f32.mrb[16].mxu1 }
 0x109   : > { %v1190_v40 = vpack.c.bf16 %v1159_v37, %v1158_v36  ;;  %v1089_v41 = vmul.f32 %v2147_v18, %v962_v38  ;;  %v965_v42 = vadd.f32 %v1796_v7, %v1668_v39  ;;  %v2182_v63 = vpop.f32.mrb[17].mxu1 }
 0x10a   : > { %v2187_v3 = vpop.f32.mrb[18].mxu1 }
 0x10b   : > { %v1128_v45 = vadd.f32 %v2152_v21, %v1089_v41  ;;  %v1090_v46 = vmul.f32 %v2147_v18, %v965_v42  ;;  %v1669_v47 = vpop.f32.mrb[8].mxu0  ;;  %1829 = vmatprep.mubr.msk.bf16.mxu1 %vm709_vm0, %v1190_v40  ;;  %v2189_v5 = vpop.f32.mrb[19].mxu1 }
 0x10c   : > { %v1670_v49 = vpop.f32.mrb[9].mxu0 }
 0x10d   : > { %v1129_v51 = vadd.f32 %v2152_v21, %v1090_v46  ;;  %v1671_v52 = vadd.f32 %v1670_v49, %v1669_v47  ;;  %v1672_v53 = vpop.f32.mrb[10].mxu0  ;;  %v1160_v55 = vmax.f32 %v1128_v45, 0.0 }
 0x10e   : > { %v1673_v54 = vpop.f32.mrb[11].mxu0 }
 0x10f   : > { %v1161_v56 = vmax.f32 %v1129_v51, 0.0  ;;  %v1674_v57 = vadd.f32 %v1673_v54, %v1672_v53  ;;  %v970_v58 = vadd.f32 %v1671_v52, %v969_v10 }
 0x110   : > { %v2195_v20 = vpop.f32.mrb[20].mxu1 }
 0x111   : > { %v1191_v59 = vpack.c.bf16 %v1161_v56, %v1160_v55  ;;  %v1091_v60 = vmul.f32 %v2147_v18, %v970_v58  ;;  %v973_v61 = vadd.f32 %v1674_v57, %v972_v14  ;;  %v2197_v22 = vpop.f32.mrb[21].mxu1 }
 0x112   : > { %v2202_v28 = vpop.f32.mrb[22].mxu1 }
 0x113   : > { %v1130_v0 = vadd.f32 %v2152_v21, %v1091_v60  ;;  %v1092_v1 = vmul.f32 %v2147_v18, %v973_v61  ;;  %v1675_v2 = vpop.f32.mrb[12].mxu0  ;;  %1830 = vmatmul.mubr.msk.bf16.vlgmr.msra.gmra.mrb[32].mxu1 %vm709_vm0, %v1191_v59  ;;  %v2204_v30 = vpop.f32.mrb[23].mxu1 }
 0x114   : > { %v1676_v4 = vpop.f32.mrb[13].mxu0 }
 0x115   : > { %v1131_v6 = vadd.f32 %v2152_v21, %v1092_v1  ;;  %v1677_v7 = vadd.f32 %v1676_v4, %v1675_v2  ;;  %v1678_v8 = vpop.f32.mrb[14].mxu0  ;;  %v1162_v11 = vmax.f32 %v1130_v0, 0.0 }
 0x116   : > { %v1679_v10 = vpop.f32.mrb[15].mxu0 }
 0x117   : > { %v1163_v13 = vmax.f32 %v1131_v6, 0.0  ;;  %v978_v14 = vadd.f32 %v2140_v9, %v1677_v7  ;;  %v1680_v15 = vadd.f32 %v1679_v10, %v1678_v8 }
 0x118   : > { %v2210_v42 = vpop.f32.mrb[24].mxu1 }
 0x119   : > { %v1192_v16 = vpack.c.bf16 %v1163_v13, %v1162_v11  ;;  %v1093_v17 = vmul.f32 %v2147_v18, %v978_v14  ;;  %v981_v19 = vadd.f32 %v2142_v12, %v1680_v15  ;;  %v2212_v45 = vpop.f32.mrb[25].mxu1 }
 0x11a   : > { %v2217_v51 = vpop.f32.mrb[26].mxu1 }
 0x11b   : > { %v1132_v23 = vadd.f32 %v2152_v21, %v1093_v17  ;;  %v1094_v26 = vmul.f32 %v2147_v18, %v981_v19  ;;  %v1681_v27 = vpop.f32.mrb[16].mxu0  ;;  %1833 = vmatprep.mubr.msk.bf16.mxu1 %vm709_vm0, %v1192_v16 }
 0x11c   : > { %v1682_v9 = vpop.f32.mrb[17].mxu0 }
 0x11d   : > { %v1133_v32 = vadd.f32 %v2152_v21, %v1094_v26  ;;  %v1683_v33 = vadd.f32 %v1682_v9, %v1681_v27  ;;  %v1684_v12 = vpop.f32.mrb[18].mxu0  ;;  %v1164_v35 = vmax.f32 %v1132_v23, 0.0 }
 0x11e   : > { %v1685_v34 = vpop.f32.mrb[19].mxu0 }
 0x11f   : > { %v1165_v36 = vmax.f32 %v1133_v32, 0.0  ;;  %v1686_v37 = vadd.f32 %v1685_v34, %v1684_v12  ;;  %v986_v38 = vadd.f32 %v1683_v33, %v2157_v25  ;;  %v2219_v25 = vpop.f32.mrb[27].mxu1 }
 0x120   : > { %v2225_v1 = vpop.f32.mrb[28].mxu1 }
 0x121   : > { %v1095_v39 = vmul.f32 %v2147_v18, %v986_v38  ;;  %v989_v40 = vadd.f32 %v1686_v37, %v2163_v31  ;;  %v1193_v41 = vpack.c.bf16 %v1165_v36, %v1164_v35  ;;  %v2227_v2 = vpop.f32.mrb[29].mxu1 }
 0x122   : > { %v2232_v8 = vpop.f32.mrb[30].mxu1 }
 0x123   : > { %v1134_v46 = vadd.f32 %v2152_v21, %v1095_v39  ;;  %v1096_v47 = vmul.f32 %v2147_v18, %v989_v40  ;;  %v1687_v49 = vpop.f32.mrb[20].mxu0  ;;  %1834 = vmatmul.mubr.msk.bf16.gmra.mrb[36].mxu1 %vm709_vm0, %v1193_v41  ;;  %v2234_v10 = vpop.f32.mrb[31].mxu1 }
 0x124   : > { %v1688_v52 = vpop.f32.mrb[21].mxu0 }
 0x125   : > { %v1135_v53 = vadd.f32 %v2152_v21, %v1096_v47  ;;  %v1689_v31 = vadd.f32 %v1688_v52, %v1687_v49  ;;  %v1690_v54 = vpop.f32.mrb[22].mxu0  ;;  %v1166_v56 = vmax.f32 %v1134_v46, 0.0 }
 0x126   : > { %v1691_v55 = vpop.f32.mrb[23].mxu0 }
 0x127   : > { %v1167_v57 = vmax.f32 %v1135_v53, 0.0  ;;  %v994_v58 = vadd.f32 %v2155_v24, %v1689_v31  ;;  %v1692_v59 = vadd.f32 %v1691_v55, %v1690_v54 }
 0x129   : > { %v1194_v60 = vpack.c.bf16 %v1167_v57, %v1166_v56  ;;  %v1097_v61 = vmul.f32 %v2147_v18, %v994_v58  ;;  %v997_v0 = vadd.f32 %v2161_v29, %v1692_v59 }
 0x12b   : > { %v1136_v4 = vadd.f32 %v2152_v21, %v1097_v61  ;;  %v1098_v6 = vmul.f32 %v2147_v18, %v997_v0  ;;  %v1693_v7 = vpop.f32.mrb[24].mxu0  ;;  %1837 = vmatprep.mubr.msk.bf16.mxu1 %vm709_vm0, %v1194_v60 }
 0x12c   : > { %v1694_v24 = vpop.f32.mrb[25].mxu0 }
 0x12d   : > { %v1137_v11 = vadd.f32 %v2152_v21, %v1098_v6  ;;  %v1695_v13 = vadd.f32 %v1694_v24, %v1693_v7  ;;  %v1696_v29 = vpop.f32.mrb[26].mxu0  ;;  %v1168_v15 = vmax.f32 %v1136_v4, 0.0 }
 0x12e   : > { %v1697_v14 = vpop.f32.mrb[27].mxu0 }
 0x12f   : > { %v1169_v16 = vmax.f32 %v1137_v11, 0.0  ;;  %v1698_v17 = vadd.f32 %v1697_v14, %v1696_v29  ;;  %v1002_v19 = vadd.f32 %v1695_v13, %v2169_v44 }
 0x131   : > { %v1099_v23 = vmul.f32 %v2147_v18, %v1002_v19  ;;  %v1005_v26 = vadd.f32 %v1698_v17, %v2176_v50  ;;  %v1195_v27 = vpack.c.bf16 %v1169_v16, %v1168_v15 }
 0x133   : > { %v1138_v9 = vadd.f32 %v2152_v21, %v1099_v23  ;;  %v1100_v32 = vmul.f32 %v2147_v18, %v1005_v26  ;;  %v1699_v33 = vpop.f32.mrb[28].mxu0  ;;  %1838 = vmatmul.mubr.msk.bf16.gmra.mrb[40].mxu1 %vm709_vm0, %v1195_v27 }
 0x134   : > { %v1700_v12 = vpop.f32.mrb[29].mxu0 }
 0x135   : > { %v1139_v34 = vadd.f32 %v2152_v21, %v1100_v32  ;;  %v1701_v35 = vadd.f32 %v1700_v12, %v1699_v33  ;;  %v1702_v36 = vpop.f32.mrb[30].mxu0  ;;  %v1170_v38 = vmax.f32 %v1138_v9, 0.0 }
 0x136   : > { %v1703_v37 = vpop.f32.mrb[31].mxu0 }
 0x137   : > { %v1171_v44 = vmax.f32 %v1139_v34, 0.0  ;;  %v1010_v39 = vadd.f32 %v2167_v43, %v1701_v35  ;;  %v1704_v40 = vadd.f32 %v1703_v37, %v1702_v36 }
 0x139   : > { %v1196_v50 = vpack.c.bf16 %v1171_v44, %v1170_v38  ;;  %v1101_v41 = vmul.f32 %v2147_v18, %v1010_v39  ;;  %v1013_v46 = vadd.f32 %v2174_v48, %v1704_v40 }
 0x13b   : > { %v1140_v47 = vadd.f32 %v2152_v21, %v1101_v41  ;;  %v1102_v49 = vmul.f32 %v2147_v18, %v1013_v46  ;;  %v1705_v52 = vpop.f32.mrb[32].mxu0  ;;  %1841 = vmatprep.mubr.msk.bf16.mxu1 %vm709_vm0, %v1196_v50 }
 0x13c   : > { %v1706_v53 = vpop.f32.mrb[33].mxu0 }
 0x13d   : > { %v1141_v31 = vadd.f32 %v2152_v21, %v1102_v49  ;;  %v1707_v54 = vadd.f32 %v1706_v53, %v1705_v52  ;;  %v1708_v55 = vpop.f32.mrb[34].mxu0  ;;  %v1172_v43 = vmax.f32 %v1140_v47, 0.0 }
 0x13e   : > { %v1709_v56 = vpop.f32.mrb[35].mxu0 }
 0x13f   : > { %v1173_v57 = vmax.f32 %v1141_v31, 0.0  ;;  %v1710_v58 = vadd.f32 %v1709_v56, %v1708_v55  ;;  %v1018_v59 = vadd.f32 %v1707_v54, %v2182_v63 }
 0x141   : > { %v1103_v48 = vmul.f32 %v2147_v18, %v1018_v59  ;;  %v1021_v60 = vadd.f32 %v1710_v58, %v2189_v5  ;;  %v1197_v61 = vpack.c.bf16 %v1173_v57, %v1172_v43 }
 0x143   : > { %v1142_v0 = vadd.f32 %v2152_v21, %v1103_v48  ;;  %v1104_v4 = vmul.f32 %v2147_v18, %v1021_v60  ;;  %v1711_v6 = vpop.f32.mrb[36].mxu0  ;;  %1842 = vmatmul.mubr.msk.bf16.gmra.mrb[44].mxu1 %vm709_vm0, %v1197_v61 }
 0x144   : > { %v1712_v7 = vpop.f32.mrb[37].mxu0 }
 0x145   : > { %v1143_v24 = vadd.f32 %v2152_v21, %v1104_v4  ;;  %v1713_v11 = vadd.f32 %v1712_v7, %v1711_v6  ;;  %v1714_v13 = vpop.f32.mrb[38].mxu0  ;;  %v1174_v14 = vmax.f32 %v1142_v0, 0.0 }
 0x146   : > { %v1715_v29 = vpop.f32.mrb[39].mxu0 }
 0x147   : > { %v1175_v63 = vmax.f32 %v1143_v24, 0.0  ;;  %v1026_v15 = vadd.f32 %v2180_v62, %v1713_v11  ;;  %v1716_v16 = vadd.f32 %v1715_v29, %v1714_v13 }
 0x149   : > { %v1198_v5 = vpack.c.bf16 %v1175_v63, %v1174_v14  ;;  %v1105_v17 = vmul.f32 %v2147_v18, %v1026_v15  ;;  %v1029_v19 = vadd.f32 %v2187_v3, %v1716_v16 }
 0x14b   : > { %v1144_v23 = vadd.f32 %v2152_v21, %v1105_v17  ;;  %v1106_v26 = vmul.f32 %v2147_v18, %v1029_v19  ;;  %v1717_v27 = vpop.f32.mrb[40].mxu0  ;;  %1845 = vmatprep.mubr.msk.bf16.mxu1 %vm709_vm0, %v1198_v5 }
 0x14c   : > { %v1718_v9 = vpop.f32.mrb[41].mxu0 }
 0x14d   : > { %v1145_v32 = vadd.f32 %v2152_v21, %v1106_v26  ;;  %v1719_v33 = vadd.f32 %v1718_v9, %v1717_v27  ;;  %v1720_v12 = vpop.f32.mrb[42].mxu0  ;;  %v1176_v62 = vmax.f32 %v1144_v23, 0.0 }
 0x14e   : > { %v1721_v34 = vpop.f32.mrb[43].mxu0 }
 0x14f   : > { %v1177_v35 = vmax.f32 %v1145_v32, 0.0  ;;  %v1722_v36 = vadd.f32 %v1721_v34, %v1720_v12  ;;  %v1034_v37 = vadd.f32 %v1719_v33, %v2197_v22 }
 0x151   : > { %v1107_v3 = vmul.f32 %v2147_v18, %v1034_v37  ;;  %v1037_v38 = vadd.f32 %v1722_v36, %v2204_v30  ;;  %v1199_v44 = vpack.c.bf16 %v1177_v35, %v1176_v62 }
 0x153   : > { %v1146_v39 = vadd.f32 %v2152_v21, %v1107_v3  ;;  %v1108_v40 = vmul.f32 %v2147_v18, %v1037_v38  ;;  %v1723_v50 = vpop.f32.mrb[44].mxu0  ;;  %1846 = vmatmul.mubr.msk.bf16.gmra.mrb[48].mxu1 %vm709_vm0, %v1199_v44 }
 0x154   : > { %v1724_v41 = vpop.f32.mrb[45].mxu0 }
 0x155   : > { %v1147_v46 = vadd.f32 %v2152_v21, %v1108_v40  ;;  %v1725_v47 = vadd.f32 %v1724_v41, %v1723_v50  ;;  %v1726_v49 = vpop.f32.mrb[46].mxu0  ;;  %v1178_v53 = vmax.f32 %v1146_v39, 0.0 }
 0x156   : > { %v1727_v52 = vpop.f32.mrb[47].mxu0 }
 0x157   : > { %v1179_v22 = vmax.f32 %v1147_v46, 0.0  ;;  %v1042_v31 = vadd.f32 %v2195_v20, %v1725_v47  ;;  %v1728_v54 = vadd.f32 %v1727_v52, %v1726_v49 }
 0x159   : > { %v1200_v30 = vpack.c.bf16 %v1179_v22, %v1178_v53  ;;  %v1109_v55 = vmul.f32 %v2147_v18, %v1042_v31  ;;  %v1045_v56 = vadd.f32 %v2202_v28, %v1728_v54 }
 0x15b   : > { %v1148_v43 = vadd.f32 %v2152_v21, %v1109_v55  ;;  %v1110_v57 = vmul.f32 %v2147_v18, %v1045_v56  ;;  %v1729_v58 = vpop.f32.mrb[48].mxu0  ;;  %1849 = vmatprep.mubr.msk.bf16.mxu1 %vm709_vm0, %v1200_v30 }
 0x15c   : > { %v1730_v59 = vpop.f32.mrb[49].mxu0 }
 0x15d   : > { %v1149_v48 = vadd.f32 %v2152_v21, %v1110_v57  ;;  %v1731_v60 = vadd.f32 %v1730_v59, %v1729_v58  ;;  %v1732_v61 = vpop.f32.mrb[50].mxu0  ;;  %v1180_v20 = vmax.f32 %v1148_v43, 0.0 }
 0x15e   : > { %v1733_v0 = vpop.f32.mrb[51].mxu0 }
 0x15f   : > { %v1181_v4 = vmax.f32 %v1149_v48, 0.0  ;;  %v1734_v6 = vadd.f32 %v1733_v0, %v1732_v61  ;;  %v1050_v7 = vadd.f32 %v1731_v60, %v2212_v45 }
 0x161   : > { %v1111_v28 = vmul.f32 %v2147_v18, %v1050_v7  ;;  %v1053_v24 = vadd.f32 %v1734_v6, %v2219_v25  ;;  %v1201_v11 = vpack.c.bf16 %v1181_v4, %v1180_v20 }
 0x163   : > { %v1150_v13 = vadd.f32 %v2152_v21, %v1111_v28  ;;  %v1112_v29 = vmul.f32 %v2147_v18, %v1053_v24  ;;  %v1735_v14 = vpop.f32.mrb[52].mxu0  ;;  %1850 = vmatmul.mubr.msk.bf16.gmra.mrb[52].mxu1 %vm709_vm0, %v1201_v11 }
 0x164   : > { %v1736_v63 = vpop.f32.mrb[53].mxu0 }
 0x165   : > { %v1151_v15 = vadd.f32 %v2152_v21, %v1112_v29  ;;  %v1737_v16 = vadd.f32 %v1736_v63, %v1735_v14  ;;  %v1738_v5 = vpop.f32.mrb[54].mxu0  ;;  %v1182_v19 = vmax.f32 %v1150_v13, 0.0 }
 0x166   : > { %v1739_v17 = vpop.f32.mrb[55].mxu0 }
 0x167   : > { %v1183_v45 = vmax.f32 %v1151_v15, 0.0  ;;  %v1058_v23 = vadd.f32 %v2210_v42, %v1737_v16  ;;  %v1740_v26 = vadd.f32 %v1739_v17, %v1738_v5 }
 0x169   : > { %v1202_v25 = vpack.c.bf16 %v1183_v45, %v1182_v19  ;;  %v1113_v27 = vmul.f32 %v2147_v18, %v1058_v23  ;;  %v1061_v9 = vadd.f32 %v2217_v51, %v1740_v26 }
 0x16b   : > { %v1152_v32 = vadd.f32 %v2152_v21, %v1113_v27  ;;  %v1114_v33 = vmul.f32 %v2147_v18, %v1061_v9  ;;  %v1741_v12 = vpop.f32.mrb[56].mxu0  ;;  %1853 = vmatprep.mubr.msk.bf16.mxu1 %vm709_vm0, %v1202_v25 }
 0x16c   : > { %v1742_v34 = vpop.f32.mrb[57].mxu0 }
 0x16d   : > { %v1153_v62 = vadd.f32 %v2152_v21, %v1114_v33  ;;  %v1743_v35 = vadd.f32 %v1742_v34, %v1741_v12  ;;  %v1744_v36 = vpop.f32.mrb[58].mxu0  ;;  %v1184_v42 = vmax.f32 %v1152_v32, 0.0 }
 0x16e   : > { %v1745_v37 = vpop.f32.mrb[59].mxu0 }
 0x16f   : > { %v1185_v3 = vmax.f32 %v1153_v62, 0.0  ;;  %v1746_v38 = vadd.f32 %v1745_v37, %v1744_v36  ;;  %v1066_v44 = vadd.f32 %v1743_v35, %v2227_v2 }
 0x171   : > { %v1115_v51 = vmul.f32 %v2147_v18, %v1066_v44  ;;  %v1069_v39 = vadd.f32 %v1746_v38, %v2234_v10  ;;  %v1203_v40 = vpack.c.bf16 %v1185_v3, %v1184_v42 }
 0x173   : > { %v1154_v50 = vadd.f32 %v2152_v21, %v1115_v51  ;;  %v1116_v41 = vmul.f32 %v2147_v18, %v1069_v39  ;;  %v1747_v46 = vpop.f32.mrb[60].mxu0  ;;  %1854 = vmatmul.mubr.msk.bf16.gmra.mrb[56].mxu1 %vm709_vm0, %v1203_v40 }
 0x174   : > { %v1748_v47 = vpop.f32.mrb[61].mxu0 }
 0x175   : > { %v1155_v49 = vadd.f32 %v2152_v21, %v1116_v41  ;;  %v1749_v52 = vadd.f32 %v1748_v47, %v1747_v46  ;;  %v1750_v53 = vpop.f32.mrb[62].mxu0  ;;  %v1186_v2 = vmax.f32 %v1154_v50, 0.0 }
 0x176   : > { %v1751_v22 = vpop.f32.mrb[63].mxu0 }
 0x177   : > { %v1187_v31 = vmax.f32 %v1155_v49, 0.0  ;;  %v1074_v54 = vadd.f32 %v2225_v1, %v1749_v52  ;;  %v1752_v10 = vadd.f32 %v1751_v22, %v1750_v53  ;;  %v2309_v1 = vld [vmem:[#allocation2] ss:$0 sm:$0xff] }
 0x179   : > { %v1204_v30 = vpack.c.bf16 %v1187_v31, %v1186_v2  ;;  %v1117_v55 = vmul.f32 %v2147_v18, %v1074_v54  ;;  %v1077_v56 = vadd.f32 %v2232_v8, %v1752_v10 }
 0x17b   : > { %v1156_v43 = vadd.f32 %v2152_v21, %v1117_v55  ;;  %v1118_v57 = vmul.f32 %v2147_v18, %v1077_v56  ;;  %1857 = vmatprep.mubr.msk.bf16.mxu1 %vm709_vm0, %v1204_v30 }
 0x17d   : > { %v1157_v58 = vadd.f32 %v2152_v21, %v1118_v57  ;;  %v1188_v59 = vmax.f32 %v1156_v43, 0.0 }
 0x17f   : > { %v1189_v48 = vmax.f32 %v1157_v58, 0.0 }
 0x181   : > { %v1205_v60 = vpack.c.bf16 %v1189_v48, %v1188_v59 }
 0x183   : > { %1858 = vmatmul.mubr.msk.bf16.gmra.mrb[60].mxu1 %vm709_vm0, %v1205_v60 }
 0x1e6   : > { %v1831_v18 = vpop.f32.mrb[32].mxu1 }
 0x1e7   : > { %v1320_v21 = vadd.f32 %v1831_v18, %v2309_v1  ;;  %v1311_v8 = vpop.f32.mrb[33].mxu1 }
 0x1e8   : > { %v1312_v61 = vadd.f32 %v2309_v1, %v1311_v8  ;;  %v1832_v0 = vpop.f32.mrb[34].mxu1 }
 0x1e9   : > { %1441 = vst.msk [vmem:[%s2314_s30 + $0x10] sm:$0xff] %vm1438_vm1, %v1320_v21  ;;  %v1323_v20 = vadd.f32 %v1832_v0, %v2309_v1  ;;  %v1314_v4 = vpop.f32.mrb[35].mxu1 }
 0x1ea   : > { %1439 = vst.msk [vmem:[%s2314_s30] sm:$0xff] %vm1438_vm1, %v1312_v61  ;;  %v1315_v6 = vadd.f32 %v2309_v1, %v1314_v4 }
 0x1eb   : > { %1442 = vst.msk [vmem:[%s2314_s30 + $0x18] sm:$0xff] %vm1438_vm1, %v1323_v20 }
 0x1ec   : > { %1440 = vst.msk [vmem:[%s2314_s30 + $0x8] sm:$0xff] %vm1438_vm1, %v1315_v6 }
 0x1f6   : > { %v1835_v7 = vpop.f32.mrb[36].mxu1 }
 0x1f7   : > { %v1336_v28 = vadd.f32 %v1835_v7, %v2309_v1  ;;  %v1327_v24 = vpop.f32.mrb[37].mxu1 }
 0x1f8   : > { %v1328_v11 = vadd.f32 %v2309_v1, %v1327_v24  ;;  %v1836_v13 = vpop.f32.mrb[38].mxu1 }
 0x1f9   : > { %1445 = vst.msk [vmem:[%s2314_s30 + $0x30] sm:$0xff] %vm1438_vm1, %v1336_v28  ;;  %v1339_v29 = vadd.f32 %v1836_v13, %v2309_v1  ;;  %v1330_v14 = vpop.f32.mrb[39].mxu1 }
 0x1fa   : > { %1443 = vst.msk [vmem:[%s2314_s30 + $0x20] sm:$0xff] %vm1438_vm1, %v1328_v11  ;;  %v1331_v63 = vadd.f32 %v2309_v1, %v1330_v14 }
 0x1fb   : > { %1446 = vst.msk [vmem:[%s2314_s30 + $0x38] sm:$0xff] %vm1438_vm1, %v1339_v29 }
 0x1fc   : > { %1444 = vst.msk [vmem:[%s2314_s30 + $0x28] sm:$0xff] %vm1438_vm1, %v1331_v63 }
 0x206   : > { %v1839_v15 = vpop.f32.mrb[40].mxu1 }
 0x207   : > { %v1352_v16 = vadd.f32 %v1839_v15, %v2309_v1  ;;  %v1343_v5 = vpop.f32.mrb[41].mxu1 }
 0x208   : > { %v1344_v17 = vadd.f32 %v2309_v1, %v1343_v5  ;;  %v1840_v19 = vpop.f32.mrb[42].mxu1 }
 0x209   : > { %1449 = vst.msk [vmem:[%s2314_s30 + $0x50] sm:$0xff] %vm1438_vm1, %v1352_v16  ;;  %v1355_v45 = vadd.f32 %v1840_v19, %v2309_v1  ;;  %v1346_v23 = vpop.f32.mrb[43].mxu1 }
 0x20a   : > { %1447 = vst.msk [vmem:[%s2314_s30 + $0x40] sm:$0xff] %vm1438_vm1, %v1344_v17  ;;  %v1347_v26 = vadd.f32 %v2309_v1, %v1346_v23 }
 0x20b   : > { %1450 = vst.msk [vmem:[%s2314_s30 + $0x58] sm:$0xff] %vm1438_vm1, %v1355_v45 }
 0x20c   : > { %1448 = vst.msk [vmem:[%s2314_s30 + $0x48] sm:$0xff] %vm1438_vm1, %v1347_v26 }
 0x216   : > { %v1843_v25 = vpop.f32.mrb[44].mxu1 }
 0x217   : > { %v1368_v27 = vadd.f32 %v1843_v25, %v2309_v1  ;;  %v1359_v9 = vpop.f32.mrb[45].mxu1 }
 0x218   : > { %v1360_v32 = vadd.f32 %v2309_v1, %v1359_v9  ;;  %v1844_v33 = vpop.f32.mrb[46].mxu1 }
 0x219   : > { %1453 = vst.msk [vmem:[%s2314_s30 + $0x70] sm:$0xff] %vm1438_vm1, %v1368_v27  ;;  %v1371_v12 = vadd.f32 %v1844_v33, %v2309_v1  ;;  %v1362_v34 = vpop.f32.mrb[47].mxu1 }
 0x21a   : > { %1451 = vst.msk [vmem:[%s2314_s30 + $0x60] sm:$0xff] %vm1438_vm1, %v1360_v32  ;;  %v1363_v62 = vadd.f32 %v2309_v1, %v1362_v34 }
 0x21b   : > { %1454 = vst.msk [vmem:[%s2314_s30 + $0x78] sm:$0xff] %vm1438_vm1, %v1371_v12 }
 0x21c   : > { %1452 = vst.msk [vmem:[%s2314_s30 + $0x68] sm:$0xff] %vm1438_vm1, %v1363_v62 }
 0x226   : > { %v1847_v35 = vpop.f32.mrb[48].mxu1 }
 0x227   : > { %v1384_v36 = vadd.f32 %v1847_v35, %v2309_v1  ;;  %v1375_v37 = vpop.f32.mrb[49].mxu1 }
 0x228   : > { %v1376_v42 = vadd.f32 %v2309_v1, %v1375_v37  ;;  %v1848_v3 = vpop.f32.mrb[50].mxu1 }
 0x229   : > { %1457 = vst.msk [vmem:[%s2314_s30 + $0x90] sm:$0xff] %vm1438_vm1, %v1384_v36  ;;  %v1387_v38 = vadd.f32 %v1848_v3, %v2309_v1  ;;  %v1378_v44 = vpop.f32.mrb[51].mxu1 }
 0x22a   : > { %1455 = vst.msk [vmem:[%s2314_s30 + $0x80] sm:$0xff] %vm1438_vm1, %v1376_v42  ;;  %v1379_v51 = vadd.f32 %v2309_v1, %v1378_v44 }
 0x22b   : > { %1458 = vst.msk [vmem:[%s2314_s30 + $0x98] sm:$0xff] %vm1438_vm1, %v1387_v38 }
 0x22c   : > { %1456 = vst.msk [vmem:[%s2314_s30 + $0x88] sm:$0xff] %vm1438_vm1, %v1379_v51 }
 0x236   : > { %v1851_v39 = vpop.f32.mrb[52].mxu1 }
 0x237   : > { %v1400_v40 = vadd.f32 %v1851_v39, %v2309_v1  ;;  %v1391_v50 = vpop.f32.mrb[53].mxu1 }
 0x238   : > { %v1392_v41 = vadd.f32 %v2309_v1, %v1391_v50  ;;  %v1852_v46 = vpop.f32.mrb[54].mxu1 }
 0x239   : > { %1461 = vst.msk [vmem:[%s2314_s30 + $0xb0] sm:$0xff] %vm1438_vm1, %v1400_v40  ;;  %v1403_v47 = vadd.f32 %v1852_v46, %v2309_v1  ;;  %v1394_v49 = vpop.f32.mrb[55].mxu1 }
 0x23a   : > { %1459 = vst.msk [vmem:[%s2314_s30 + $0xa0] sm:$0xff] %vm1438_vm1, %v1392_v41  ;;  %v1395_v52 = vadd.f32 %v2309_v1, %v1394_v49 }
 0x23b   : > { %1462 = vst.msk [vmem:[%s2314_s30 + $0xb8] sm:$0xff] %vm1438_vm1, %v1403_v47 }
 0x23c   : > { %1460 = vst.msk [vmem:[%s2314_s30 + $0xa8] sm:$0xff] %vm1438_vm1, %v1395_v52 }
 0x246   : > { %v1855_v53 = vpop.f32.mrb[56].mxu1 }
 0x247   : > { %v1416_v22 = vadd.f32 %v1855_v53, %v2309_v1  ;;  %v1407_v2 = vpop.f32.mrb[57].mxu1 }
 0x248   : > { %v1408_v31 = vadd.f32 %v2309_v1, %v1407_v2  ;;  %v1856_v54 = vpop.f32.mrb[58].mxu1 }
 0x249   : > { %1465 = vst.msk [vmem:[%s2314_s30 + $0xd0] sm:$0xff] %vm1438_vm1, %v1416_v22  ;;  %v1419_v10 = vadd.f32 %v1856_v54, %v2309_v1  ;;  %v1410_v30 = vpop.f32.mrb[59].mxu1 }
 0x24a   : > { %1463 = vst.msk [vmem:[%s2314_s30 + $0xc0] sm:$0xff] %vm1438_vm1, %v1408_v31  ;;  %v1411_v55 = vadd.f32 %v2309_v1, %v1410_v30 }
 0x24b   : > { %1466 = vst.msk [vmem:[%s2314_s30 + $0xd8] sm:$0xff] %vm1438_vm1, %v1419_v10 }
 0x24c   : > { %1464 = vst.msk [vmem:[%s2314_s30 + $0xc8] sm:$0xff] %vm1438_vm1, %v1411_v55 }
 0x256   : > { %v1859_v56 = vpop.f32.mrb[60].mxu1 }
 0x257   : > { %v1432_v43 = vadd.f32 %v1859_v56, %v2309_v1  ;;  %v1423_v57 = vpop.f32.mrb[61].mxu1 }
 0x258   : > { %v1424_v58 = vadd.f32 %v2309_v1, %v1423_v57  ;;  %v1860_v59 = vpop.f32.mrb[62].mxu1 }
 0x259   : > { %1469 = vst.msk [vmem:[%s2314_s30 + $0xf0] sm:$0xff] %vm1438_vm1, %v1432_v43  ;;  %v1435_v48 = vadd.f32 %v1860_v59, %v2309_v1  ;;  %v1426_v60 = vpop.f32.mrb[63].mxu1 }
 0x25a   : > { %1467 = vst.msk [vmem:[%s2314_s30 + $0xe0] sm:$0xff] %vm1438_vm1, %v1424_v58  ;;  %v1427_v18 = vadd.f32 %v2309_v1, %v1426_v60 }
 0x25b   : > { %1470 = vst.msk [vmem:[%s2314_s30 + $0xf8] sm:$0xff] %vm1438_vm1, %v1435_v48 }
 0x25c   : > { %1468 = vst.msk [vmem:[%s2314_s30 + $0xe8] sm:$0xff] %vm1438_vm1, %v1427_v18 }
 0x25d PF: > { %s18_s23 = sadd.s32 1, %s1960_s23  }
 0x25e   : > { %p15_p4 = scmp.ge.s32.totalorder %s18_s23, 4  }
 0x260   :  { %17 = sbr.rel (!%p15_p4) target bundleno = 3 (0x3), region = 74 }

// kernel: tile.16
= control target key start
LH: loop header
LB: loop body
LE: loop exit
PB: predicated region body
PF: predicated region fallthrough
CT: control target
= control target key end

     0   :  { %s64_s0 = inlined_call_operand.vmem [shape: f32[64], index: 0, kind: input, shape index: {}]   ;;  %s65_s1 = inlined_call_operand.vmem [shape: f32[64,64], index: 1, kind: output, shape index: {}]  }
   0x1   :  { %v4_v0 = vld [vmem:[%s64_s0] ss:$0 sm:$0xff] }
   0x2   :  { %5 = vst [vmem:[%s65_s1] sm:$0xff] %v4_v0  ;;  %20 = vst [vmem:[%s65_s1 + $0x8] sm:$0xff] %v4_v0 }
   0x3   :  { %21 = vst [vmem:[%s65_s1 + $0x10] sm:$0xff] %v4_v0  ;;  %22 = vst [vmem:[%s65_s1 + $0x18] sm:$0xff] %v4_v0 }
   0x4   :  { %23 = vst [vmem:[%s65_s1 + $0x20] sm:$0xff] %v4_v0  ;;  %24 = vst [vmem:[%s65_s1 + $0x28] sm:$0xff] %v4_v0 }
   0x5   :  { %25 = vst [vmem:[%s65_s1 + $0x30] sm:$0xff] %v4_v0  ;;  %26 = vst [vmem:[%s65_s1 + $0x38] sm:$0xff] %v4_v0 }

// kernel: deeplab_forward.27
= control target key start
LH: loop header
LB: loop body
LE: loop exit
PB: predicated region body
PF: predicated region fallthrough
CT: control target
= control target key end

     0   :  { %v75_v0 = vlaneseq  ;;  %v1636_v4 = vmov 1983009808   ;;  %s2591_s4 = inlined_call_operand.vmem [shape: f32[1,4096], index: 4, kind: input, shape index: {}]   ;;  %s2592_s5 = inlined_call_operand.vmem [shape: f32[1,4096], index: 5, kind: input, shape index: {}]   ;;  %s2593_s0 = inlined_call_operand.vmem [shape: f32[2,4096], index: 0, kind: input, shape index: {}]   ;;  %s2594_s1 = inlined_call_operand.vmem [shape: f32[2,4096], index: 1, kind: input, shape index: {}]   ;;  %s2595_s2 = inlined_call_operand.vmem [shape: f32[2,4096], index: 2, kind: input, shape index: {}]   ;;  %s2596_s3 = inlined_call_operand.vmem [shape: f32[2,4096], index: 3, kind: input, shape index: {}]   ;;  %s2597_s6 = inlined_call_operand.vmem [shape: f32[2,4096], index: 6, kind: output, shape index: {}]  }
   0x1   :  { %v1675_v1 = vld [vmem:[%s2591_s4] sm:$0xff]  ;;  %v1680_v2 = vld [vmem:[%s2591_s4 + $0x8] sm:$0xff]  ;;  %v1685_v3 = vld [vmem:[%s2591_s4 + $0x10] sm:$0xff]  ;;  %v206_v5 = vunpack.c.l.s4 %v1636_v4 }
   0x2   :  { %2619 = vst [vmem:[#allocation2_spill] sm:$0xff] %v1675_v1  ;;  %2620 = vst [vmem:[#allocation3_spill] sm:$0xff] %v1680_v2  ;;  %v1690_v6 = vld [vmem:[%s2591_s4 + $0x18] sm:$0xff]  ;;  %v1695_v7 = vld [vmem:[%s2592_s5] sm:$0xff]  ;;  %v1713_v12 = vsub.f32 1.0, %v1675_v1  ;;  %v1716_v13 = vsub.f32 1.0, %v1680_v2 }
   0x3   :  { %2621 = vst [vmem:[#allocation4_spill] sm:$0xff] %v1685_v3  ;;  %2622 = vst [vmem:[#allocation5_spill] sm:$0xff] %v1690_v6  ;;  %v1700_v8 = vld [vmem:[%s2592_s5 + $0x8] sm:$0xff]  ;;  %v1705_v9 = vld [vmem:[%s2592_s5 + $0x10] sm:$0xff]  ;;  %v207_v11 = vunpack.c.0.s8 %v206_v5  ;;  %v35_v14 = vsub.f32 1.0, %v1695_v7  ;;  %v76_v15 = vshrl.u32 %v75_v0, 7 }
   0x4   :  { %v1710_v10 = vld [vmem:[%s2592_s5 + $0x18] sm:$0xff]  ;;  %2623 = vst [vmem:[#allocation6_spill] sm:$0xff] %v1716_v13  ;;  %v1720_v16 = vsub.f32 1.0, %v1685_v3  ;;  %v1723_v17 = vsub.f32 1.0, %v1690_v6  ;;  %v36_v18 = vsub.f32 1.0, %v1700_v8  ;;  %v1727_v19 = vsub.f32 1.0, %v1705_v9 }
   0x5   :  { %v1730_v20 = vsub.f32 1.0, %v1710_v10  ;;  %v1732_v21 = vsub.s32 0, %v76_v15  ;;  %v1734_v22 = vsub.s32 1, %v76_v15  ;;  %v1736_v23 = vsub.s32 2, %v76_v15 }
   0x6   :  { %2624 = vst [vmem:[#allocation7_spill] sm:$0xff] %v1720_v16  ;;  %2625 = vst [vmem:[#allocation8_spill] sm:$0xff] %v1723_v17  ;;  %v1738_v24 = vsub.s32 3, %v76_v15  ;;  %v1740_v25 = vsub.s32 4, %v76_v15  ;;  %v1742_v26 = vsub.s32 5, %v76_v15  ;;  %v1744_v27 = vsub.s32 %v207_v11, %v76_v15 }
   0x7   :  { %v78_v28 = vrot.slane %v35_v14, %v1732_v21  ;;  %v82_v29 = vrot.slane %v35_v14, %v1734_v22  ;;  %v86_v30 = vrot.slane %v35_v14, %v1736_v23  ;;  %v1749_v31 = vsub.s32 6, %v76_v15 }
   0x8   :  { %2626 = vst [vmem:[#allocation9_spill] sm:$0xff] %v1744_v27  ;;  %v90_v32 = vrot.slane %v35_v14, %v1738_v24  ;;  %v94_v33 = vrot.slane %v35_v14, %v1740_v25  ;;  %v98_v34 = vrot.slane %v35_v14, %v1742_v26  ;;  %v1754_v35 = vsub.s32 7, %v76_v15 }
   0x9   :  { %v102_v36 = vrot.slane %v35_v14, %v1749_v31  ;;  %v110_v37 = vrot.slane %v36_v18, %v1732_v21  ;;  %v114_v38 = vrot.slane %v36_v18, %v1734_v22  ;;  %v118_v39 = vrot.slane %v36_v18, %v1736_v23 }
   0xa   :  { %v106_v40 = vrot.slane %v35_v14, %v1754_v35  ;;  %v122_v41 = vrot.slane %v36_v18, %v1738_v24  ;;  %v126_v42 = vrot.slane %v36_v18, %v1740_v25  ;;  %v130_v43 = vrot.slane %v36_v18, %v1742_v26 }
   0xb   :  { %v134_v44 = vrot.slane %v36_v18, %v1749_v31  ;;  %v138_v45 = vrot.slane %v36_v18, %v1754_v35  ;;  %v142_v46 = vrot.slane %v1727_v19, %v1732_v21  ;;  %v146_v47 = vrot.slane %v1727_v19, %v1734_v22 }
   0xc   :  { %v150_v48 = vrot.slane %v1727_v19, %v1736_v23  ;;  %v154_v49 = vrot.slane %v1727_v19, %v1738_v24  ;;  %v158_v50 = vrot.slane %v1727_v19, %v1740_v25  ;;  %v162_v51 = vrot.slane %v1727_v19, %v1742_v26 }
   0xd   :  { %v166_v52 = vrot.slane %v1727_v19, %v1749_v31  ;;  %v170_v53 = vrot.slane %v1727_v19, %v1754_v35  ;;  %v174_v54 = vrot.slane %v1730_v20, %v1732_v21  ;;  %v178_v55 = vrot.slane %v1730_v20, %v1734_v22 }
   0xe   :  { %v182_v56 = vrot.slane %v1730_v20, %v1736_v23  ;;  %v186_v57 = vrot.slane %v1730_v20, %v1738_v24  ;;  %v190_v58 = vrot.slane %v1730_v20, %v1740_v25  ;;  %v194_v59 = vrot.slane %v1730_v20, %v1742_v26 }
   0xf   :  { %v198_v60 = vrot.slane %v1730_v20, %v1749_v31  ;;  %v202_v61 = vrot.slane %v1730_v20, %v1754_v35  ;;  %v203_v62 = vcombine.low %v78_v28, %v82_v29  ;;  %v204_v63 = vcombine.low %v86_v30, %v90_v32 }
  0x10   :  { %v220_v0 = vcombine.low %v94_v33, %v98_v34  ;;  %v221_v4 = vcombine.low %v102_v36, %v106_v40  ;;  %v237_v5 = vcombine.low %v110_v37, %v114_v38  ;;  %v238_v11 = vcombine.low %v118_v39, %v122_v41  ;;  %v39_v33 = vld [vmem:[%s2593_s0] sm:$0xff]  ;;  %v40_v39 = vld [vmem:[%s2593_s0 + $0x8] sm:$0xff] }
  0x11   :  { %v211_v14 = vrot.slane %v203_v62, %v1744_v27  ;;  %v218_v15 = vrot.slane %v204_v63, %v1744_v27  ;;  %v254_v18 = vcombine.low %v126_v42, %v130_v43  ;;  %v255_v19 = vcombine.low %v134_v44, %v138_v45  ;;  %v41_v44 = vld [vmem:[%s2593_s0 + $0x10] sm:$0xff]  ;;  %v46_v62 = vld [vmem:[%s2593_s0 + $0x38] sm:$0xff] }
  0x12   :  { %v228_v6 = vrot.slane %v220_v0, %v1744_v27  ;;  %v235_v3 = vrot.slane %v221_v4, %v1744_v27  ;;  %v245_v2 = vrot.slane %v237_v5, %v1744_v27  ;;  %v252_v20 = vrot.slane %v238_v11, %v1744_v27 }
  0x13   :  { %v1804_v28 = vcombine.low %v211_v14, %v218_v15  ;;  %v262_v29 = vrot.slane %v254_v18, %v1744_v27  ;;  %v269_v30 = vrot.slane %v255_v19, %v1744_v27  ;;  %v271_v32 = vcombine.low %v142_v46, %v146_v47  ;;  %v43_v47 = vld [vmem:[%s2593_s0 + $0x20] sm:$0xff] }
  0x14   :  { %v1811_v34 = vcombine.low %v228_v6, %v235_v3  ;;  %v1813_v36 = vcombine.low %v245_v2, %v252_v20  ;;  %v272_v37 = vcombine.low %v150_v48, %v154_v49  ;;  %v288_v38 = vcombine.low %v158_v50, %v162_v51  ;;  %v42_v2 = vld [vmem:[%s2593_s0 + $0x18] sm:$0xff] }
  0x15   :  { %2627 = vst [vmem:[#allocation10_spill] sm:$0xff] %v1804_v28  ;;  %v1818_v40 = vcombine.low %v262_v29, %v269_v30  ;;  %v279_v41 = vrot.slane %v271_v32, %v1744_v27  ;;  %v289_v42 = vcombine.low %v166_v52, %v170_v53  ;;  %v305_v43 = vcombine.low %v174_v54, %v178_v55  ;;  %v44_v52 = vld [vmem:[%s2593_s0 + $0x28] sm:$0xff] }
  0x16   :  { %2628 = vst [vmem:[#allocation11_spill] sm:$0xff] %v1811_v34  ;;  %2629 = vst [vmem:[#allocation12_spill] sm:$0xff] %v1813_v36  ;;  %v286_v3 = vrot.slane %v272_v37, %v1744_v27  ;;  %v296_v6 = vrot.slane %v288_v38, %v1744_v27  ;;  %v306_v45 = vcombine.low %v182_v56, %v186_v57  ;;  %v45_v57 = vld [vmem:[%s2593_s0 + $0x30] sm:$0xff] }
  0x17   :  { %2630 = vst [vmem:[#allocation13_spill] sm:$0xff] %v1818_v40  ;;  %v322_v46 = vcombine.low %v190_v58, %v194_v59  ;;  %v303_v48 = vrot.slane %v289_v42, %v1744_v27  ;;  %v313_v49 = vrot.slane %v305_v43, %v1744_v27  ;;  %v323_v50 = vcombine.low %v198_v60, %v202_v61 }
  0x18   :  { %v1835_v51 = vmul.f32 %v1804_v28, %v39_v33  ;;  %v1840_v53 = vcombine.low %v279_v41, %v286_v3  ;;  %v320_v54 = vrot.slane %v306_v45, %v1744_v27  ;;  %v1845_v56 = vmul.f32 %v1811_v34, %v40_v39 }
  0x19   :  { %v330_v55 = vrot.slane %v322_v46, %v1744_v27  ;;  %v1850_v58 = vcombine.low %v296_v6, %v303_v48  ;;  %v337_v59 = vrot.slane %v323_v50, %v1744_v27  ;;  %v1854_v60 = vmul.f32 %v1813_v36, %v41_v44 }
  0x1a   :  { %2631 = vst [vmem:[#allocation14_spill] sm:$0xff] %v1840_v53  ;;  %v1857_v61 = vmul.f32 %v1818_v40, %v42_v2  ;;  %v1862_v63 = vcombine.low %v313_v49, %v320_v54  ;;  %v1865_v0 = vmul.f32 %v1840_v53, %v43_v47  ;;  %v362_v4 = vrot.slane %v1695_v7, %v1732_v21 }
  0x1b   :  { %2632 = vst [vmem:[#allocation15_spill] sm:$0xff] %v1850_v58  ;;  %v366_v5 = vrot.slane %v1695_v7, %v1734_v22  ;;  %v1871_v11 = vcombine.low %v330_v55, %v337_v59  ;;  %v1874_v14 = vmul.f32 %v1850_v58, %v44_v52  ;;  %v370_v15 = vrot.slane %v1695_v7, %v1736_v23 }
  0x1c   :  { %2633 = vst [vmem:[#allocation16_spill] sm:$0xff] %v1862_v63  ;;  %v374_v18 = vrot.slane %v1695_v7, %v1738_v24  ;;  %v1881_v19 = vmul.f32 %v1862_v63, %v45_v57  ;;  %v378_v20 = vrot.slane %v1695_v7, %v1740_v25  ;;  %v382_v29 = vrot.slane %v1695_v7, %v1742_v26 }
  0x1d   :  { %2634 = vst [vmem:[#allocation17_spill] sm:$0xff] %v1871_v11  ;;  %v386_v30 = vrot.slane %v1695_v7, %v1749_v31  ;;  %v1890_v32 = vmul.f32 %v1871_v11, %v46_v62  ;;  %v390_v33 = vrot.slane %v1695_v7, %v1754_v35  ;;  %v394_v37 = vrot.slane %v1700_v8, %v1732_v21 }
  0x1e   :  { %v398_v38 = vrot.slane %v1700_v8, %v1734_v22  ;;  %v402_v39 = vrot.slane %v1700_v8, %v1736_v23  ;;  %v406_v41 = vrot.slane %v1700_v8, %v1738_v24  ;;  %v410_v42 = vrot.slane %v1700_v8, %v1740_v25 }
  0x1f   :  { %v414_v43 = vrot.slane %v1700_v8, %v1742_v26  ;;  %v418_v7 = vrot.slane %v1700_v8, %v1749_v31  ;;  %v422_v44 = vrot.slane %v1700_v8, %v1754_v35  ;;  %v426_v2 = vrot.slane %v1705_v9, %v1732_v21 }
  0x20   :  { %v430_v3 = vrot.slane %v1705_v9, %v1734_v22  ;;  %v434_v6 = vrot.slane %v1705_v9, %v1736_v23  ;;  %v438_v45 = vrot.slane %v1705_v9, %v1738_v24  ;;  %v442_v46 = vrot.slane %v1705_v9, %v1740_v25 }
  0x21   :  { %v446_v47 = vrot.slane %v1705_v9, %v1742_v26  ;;  %v450_v8 = vrot.slane %v1705_v9, %v1749_v31  ;;  %v454_v48 = vrot.slane %v1705_v9, %v1754_v35  ;;  %v458_v49 = vrot.slane %v1710_v10, %v1732_v21 }
  0x22   :  { %v462_v50 = vrot.slane %v1710_v10, %v1734_v22  ;;  %v466_v52 = vrot.slane %v1710_v10, %v1736_v23  ;;  %v470_v54 = vrot.slane %v1710_v10, %v1738_v24  ;;  %v474_v55 = vrot.slane %v1710_v10, %v1740_v25 }
  0x23   :  { %v478_v57 = vrot.slane %v1710_v10, %v1742_v26  ;;  %v482_v9 = vrot.slane %v1710_v10, %v1749_v31  ;;  %v486_v59 = vrot.slane %v1710_v10, %v1754_v35  ;;  %v487_v62 = vcombine.low %v362_v4, %v366_v5 }
  0x24   :  { %v488_v1 = vcombine.low %v370_v15, %v374_v18  ;;  %v504_v11 = vcombine.low %v378_v20, %v382_v29  ;;  %v505_v63 = vcombine.low %v386_v30, %v390_v33  ;;  %v521_v58 = vcombine.low %v394_v37, %v398_v38  ;;  %v51_v37 = vld [vmem:[%s2594_s1 + $0x20] sm:$0xff] }
  0x25   :  { %v522_v53 = vcombine.low %v402_v39, %v406_v41  ;;  %v495_v40 = vrot.slane %v487_v62, %v1744_v27  ;;  %v538_v34 = vcombine.low %v410_v42, %v414_v43  ;;  %v539_v28 = vcombine.low %v418_v7, %v422_v44  ;;  %v52_v43 = vld [vmem:[%s2594_s1 + $0x28] sm:$0xff] }
  0x26   :  { %v502_v36 = vrot.slane %v488_v1, %v1744_v27  ;;  %v512_v17 = vrot.slane %v504_v11, %v1744_v27  ;;  %v519_v16 = vrot.slane %v505_v63, %v1744_v27  ;;  %v529_v13 = vrot.slane %v521_v58, %v1744_v27  ;;  %v47_v1 = vld [vmem:[%s2594_s1] sm:$0xff]  ;;  %v49_v58 = vld [vmem:[%s2594_s1 + $0x10] sm:$0xff] }
  0x27   :  { %v536_v10 = vrot.slane %v522_v53, %v1744_v27  ;;  %v546_v5 = vrot.slane %v538_v34, %v1744_v27  ;;  %v553_v15 = vrot.slane %v539_v28, %v1744_v27  ;;  %v555_v18 = vcombine.low %v426_v2, %v430_v3 }
  0x28   :  { %v1948_v4 = vcombine.low %v495_v40, %v502_v36  ;;  %v1955_v20 = vcombine.low %v512_v17, %v519_v16  ;;  %v556_v63 = vcombine.low %v434_v6, %v438_v45  ;;  %v572_v29 = vcombine.low %v442_v46, %v446_v47  ;;  %v48_v36 = vld [vmem:[%s2594_s1 + $0x8] sm:$0xff]  ;;  %v53_v6 = vld [vmem:[%s2594_s1 + $0x30] sm:$0xff] }
  0x29   :  { %v1957_v11 = vcombine.low %v529_v13, %v536_v10  ;;  %v1962_v40 = vcombine.low %v546_v5, %v553_v15  ;;  %v563_v34 = vrot.slane %v555_v18, %v1744_v27  ;;  %v573_v28 = vcombine.low %v450_v8, %v454_v48  ;;  %v50_v13 = vld [vmem:[%s2594_s1 + $0x18] sm:$0xff] }
  0x2a   :  { %v589_v53 = vcombine.low %v458_v49, %v462_v50  ;;  %v570_v16 = vrot.slane %v556_v63, %v1744_v27  ;;  %v580_v17 = vrot.slane %v572_v29, %v1744_v27  ;;  %v590_v30 = vcombine.low %v466_v52, %v470_v54  ;;  %v54_v48 = vld [vmem:[%s2594_s1 + $0x38] sm:$0xff] }
  0x2b   :  { %v606_v33 = vcombine.low %v474_v55, %v478_v57  ;;  %v587_v38 = vrot.slane %v573_v28, %v1744_v27  ;;  %v607_v41 = vcombine.low %v482_v9, %v486_v59  ;;  %v631_v42 = vmul.f32 %v1948_v4, %v47_v1 }
  0x2c   :  { %v597_v39 = vrot.slane %v589_v53, %v1744_v27  ;;  %v1982_v7 = vcombine.low %v563_v34, %v570_v16  ;;  %v604_v44 = vrot.slane %v590_v30, %v1744_v27  ;;  %v632_v3 = vmul.f32 %v1955_v20, %v48_v36  ;;  %v2635_v36 = vld [vmem:[#allocation6_spill] sm:$0xff] }
  0x2d   :  { %v614_v2 = vrot.slane %v606_v33, %v1744_v27  ;;  %v1990_v45 = vcombine.low %v580_v17, %v587_v38  ;;  %v621_v46 = vrot.slane %v607_v41, %v1744_v27  ;;  %v633_v47 = vmul.f32 %v1957_v11, %v49_v58  ;;  %v2636_v17 = vld [vmem:[#allocation7_spill] sm:$0xff] }
  0x2e   :  { %v634_v8 = vmul.f32 %v1962_v40, %v50_v13  ;;  %v1998_v49 = vcombine.low %v597_v39, %v604_v44  ;;  %v635_v50 = vmul.f32 %v1982_v7, %v51_v37  ;;  %v639_v52 = vadd.f32 %v631_v42, %v1835_v51  ;;  %v2637_v44 = vld [vmem:[#allocation8_spill] sm:$0xff] }
  0x2f   :  { %v640_v54 = vadd.f32 %v632_v3, %v1845_v56  ;;  %v2003_v55 = vcombine.low %v614_v2, %v621_v46  ;;  %v636_v57 = vmul.f32 %v1990_v45, %v52_v43  ;;  %v641_v9 = vadd.f32 %v633_v47, %v1854_v60 }
  0x30   :  { %v642_v59 = vadd.f32 %v634_v8, %v1857_v61  ;;  %v637_v62 = vmul.f32 %v1998_v49, %v53_v6  ;;  %v643_v10 = vadd.f32 %v635_v50, %v1865_v0  ;;  %v654_v5 = vrot.slane %v1713_v12, %v1732_v21 }
  0x31   :  { %v658_v51 = vrot.slane %v1713_v12, %v1734_v22  ;;  %v638_v56 = vmul.f32 %v2003_v55, %v54_v48  ;;  %v644_v15 = vadd.f32 %v636_v57, %v1874_v14  ;;  %v662_v18 = vrot.slane %v1713_v12, %v1736_v23 }
  0x32   :  { %v666_v60 = vrot.slane %v1713_v12, %v1738_v24  ;;  %v2021_v61 = vadd.f32 %v637_v62, %v1881_v19  ;;  %v670_v0 = vrot.slane %v1713_v12, %v1740_v25  ;;  %v674_v1 = vrot.slane %v1713_v12, %v1742_v26 }
  0x33   :  { %v678_v63 = vrot.slane %v1713_v12, %v1749_v31  ;;  %v2030_v14 = vadd.f32 %v638_v56, %v1890_v32  ;;  %v819_v57 = vcombine.high %v639_v52, %v639_v52  ;;  %v826_v62 = vrot.slane %v639_v52, %v1744_v27 }
  0x34   :  { %v836_v56 = vcombine.high %v640_v54, %v640_v54  ;;  %v843_v6 = vrot.slane %v640_v54, %v1744_v27  ;;  %v853_v3 = vcombine.high %v641_v9, %v641_v9  ;;  %v860_v46 = vrot.slane %v641_v9, %v1744_v27 }
  0x35   :  { %v833_v47 = vrot.slane %v819_v57, %v1744_v27  ;;  %v834_v2 = vcombine.high %v826_v62, %v826_v62  ;;  %v870_v43 = vcombine.high %v642_v59, %v642_v59  ;;  %v877_v8 = vrot.slane %v642_v59, %v1744_v27 }
  0x36   :  { %v850_v48 = vrot.slane %v836_v56, %v1744_v27  ;;  %v851_v42 = vcombine.high %v843_v6, %v843_v6  ;;  %v867_v50 = vrot.slane %v853_v3, %v1744_v27  ;;  %v868_v41 = vcombine.high %v860_v46, %v860_v46 }
  0x37   :  { %v835_v39 = vcombine.high %v833_v47, %v833_v47  ;;  %v884_v52 = vrot.slane %v870_v43, %v1744_v27  ;;  %v885_v38 = vcombine.high %v877_v8, %v877_v8  ;;  %v887_v54 = vcombine.high %v643_v10, %v643_v10 }
  0x38   :  { %v852_v37 = vcombine.high %v850_v48, %v850_v48  ;;  %v869_v33 = vcombine.high %v867_v50, %v867_v50  ;;  %v894_v9 = vrot.slane %v643_v10, %v1744_v27  ;;  %v904_v57 = vcombine.high %v644_v15, %v644_v15 }
  0x39   :  { %v886_v30 = vcombine.high %v884_v52, %v884_v52  ;;  %v901_v16 = vrot.slane %v887_v54, %v1744_v27  ;;  %v911_v59 = vrot.slane %v644_v15, %v1744_v27  ;;  %v921_v56 = vcombine.high %v2021_v61, %v2021_v61 }
  0x3a   :  { %v902_v3 = vcombine.high %v894_v9, %v894_v9  ;;  %v918_v13 = vrot.slane %v904_v57, %v1744_v27  ;;  %v928_v43 = vrot.slane %v2021_v61, %v1744_v27  ;;  %v938_v32 = vcombine.high %v2030_v14, %v2030_v14 }
  0x3b   :  { %v903_v58 = vcombine.high %v901_v16, %v901_v16  ;;  %v919_v10 = vcombine.high %v911_v59, %v911_v59  ;;  %v935_v53 = vrot.slane %v921_v56, %v1744_v27  ;;  %v945_v54 = vrot.slane %v2030_v14, %v1744_v27 }
  0x3c   :  { %v920_v15 = vcombine.high %v918_v13, %v918_v13  ;;  %v936_v28 = vcombine.high %v928_v43, %v928_v43  ;;  %v952_v19 = vrot.slane %v938_v32, %v1744_v27  ;;  %v2107_v57 = vmul.f32 %v826_v62, %v654_v5  ;;  %v56_v62 = vld [vmem:[%s2595_s2 + $0x8] sm:$0xff] }
  0x3d   :  { %v937_v61 = vcombine.high %v935_v53, %v935_v53  ;;  %v953_v34 = vcombine.high %v945_v54, %v945_v54  ;;  %v2112_v29 = vmul.f32 %v834_v2, %v658_v51  ;;  %v2117_v14 = vmul.f32 %v833_v47, %v662_v18 }
  0x3e   :  { %v954_v56 = vcombine.high %v952_v19, %v952_v19  ;;  %v2122_v32 = vmul.f32 %v835_v39, %v666_v60  ;;  %v2127_v5 = vmul.f32 %v843_v6, %v670_v0  ;;  %v2132_v51 = vmul.f32 %v851_v42, %v674_v1 }
  0x3f   :  { %v2137_v18 = vmul.f32 %v850_v48, %v678_v63  ;;  %v2638_v2 = vrot.slane %v1713_v12, %v1754_v35  ;;  %v2639_v39 = vrot.slane %v2635_v36, %v1732_v21  ;;  %v2640_v6 = vrot.slane %v2635_v36, %v1734_v22 }
  0x40   :  { %v2642_v42 = vrot.slane %v2635_v36, %v1736_v23  ;;  %v2644_v12 = vrot.slane %v2635_v36, %v1738_v24  ;;  %v2646_v47 = vrot.slane %v2635_v36, %v1740_v25  ;;  %v2648_v48 = vrot.slane %v2635_v36, %v1742_v26 }
  0x41   :  { %v2142_v60 = vmul.f32 %v852_v37, %v2638_v2  ;;  %v2147_v0 = vmul.f32 %v860_v46, %v2639_v39  ;;  %v2152_v1 = vmul.f32 %v868_v41, %v2640_v6 }
  0x42   :  { %v2157_v63 = vmul.f32 %v867_v50, %v2642_v42  ;;  %v2162_v37 = vmul.f32 %v869_v33, %v2644_v12  ;;  %v2167_v46 = vmul.f32 %v877_v8, %v2646_v47  ;;  %v2172_v41 = vmul.f32 %v885_v38, %v2648_v48  ;;  %v55_v50 = vld [vmem:[%s2595_s2] sm:$0xff] }
  0x43   :  { %2641 = vst [vmem:[#allocation6_spill] sm:$0xff] %v2152_v1  ;;  %v2650_v33 = vrot.slane %v2635_v36, %v1749_v31  ;;  %v2652_v8 = vrot.slane %v2635_v36, %v1754_v35  ;;  %v2654_v38 = vrot.slane %v2636_v17, %v1732_v21  ;;  %v2656_v42 = vrot.slane %v2636_v17, %v1734_v22  ;;  %v58_v36 = vld [vmem:[%s2595_s2 + $0x18] sm:$0xff] }
  0x44   :  { %2643 = vst [vmem:[#allocation7_spill] sm:$0xff] %v2157_v63  ;;  %2645 = vst [vmem:[#allocation8_spill] sm:$0xff] %v2162_v37 }
  0x45   :  { %2647 = vst [vmem:[#allocation18_spill] sm:$0xff] %v2167_v46  ;;  %2649 = vst [vmem:[#allocation19_spill] sm:$0xff] %v2172_v41  ;;  %v2183_v2 = vmul.f32 %v884_v52, %v2650_v33  ;;  %v2188_v39 = vmul.f32 %v886_v30, %v2652_v8  ;;  %v2193_v6 = vmul.f32 %v894_v9, %v2654_v38  ;;  %v57_v52 = vld [vmem:[%s2595_s2 + $0x10] sm:$0xff]  ;;  %v59_v30 = vld [vmem:[%s2595_s2 + $0x20] sm:$0xff] }
  0x46   :  { %v2198_v12 = vmul.f32 %v902_v3, %v2656_v42  ;;  %v2658_v9 = vrot.slane %v2636_v17, %v1736_v23  ;;  %v2660_v3 = vrot.slane %v2636_v17, %v1738_v24  ;;  %v2662_v33 = vrot.slane %v2636_v17, %v1740_v25 }
  0x47   :  { %2651 = vst [vmem:[#allocation20_spill] sm:$0xff] %v2183_v2  ;;  %2653 = vst [vmem:[#allocation21_spill] sm:$0xff] %v2188_v39  ;;  %v2664_v38 = vrot.slane %v2636_v17, %v1742_v26 }
  0x48   :  { %2655 = vst [vmem:[#allocation22_spill] sm:$0xff] %v2193_v6  ;;  %2657 = vst [vmem:[#allocation23_spill] sm:$0xff] %v2198_v12  ;;  %v2212_v47 = vmul.f32 %v901_v16, %v2658_v9  ;;  %v2217_v48 = vmul.f32 %v903_v58, %v2660_v3  ;;  %v2222_v8 = vmul.f32 %v911_v59, %v2662_v33  ;;  %v60_v16 = vld [vmem:[%s2595_s2 + $0x28] sm:$0xff]  ;;  %v61_v9 = vld [vmem:[%s2595_s2 + $0x30] sm:$0xff] }
  0x49   :  { %v2227_v42 = vmul.f32 %v919_v10, %v2664_v38  ;;  %v62_v58 = vld [vmem:[%s2595_s2 + $0x38] sm:$0xff]  ;;  %v2666_v59 = vrot.slane %v2636_v17, %v1749_v31  ;;  %v2668_v10 = vrot.slane %v2636_v17, %v1754_v35  ;;  %v2670_v38 = vrot.slane %v2637_v44, %v1732_v21  ;;  %v64_v17 = vld [vmem:[%s2596_s3 + $0x8] sm:$0xff] }
  0x4a   :  { %2659 = vst [vmem:[#allocation24_spill] sm:$0xff] %v2212_v47  ;;  %2661 = vst [vmem:[#allocation25_spill] sm:$0xff] %v2217_v48  ;;  %v2690_v47 = vld [vmem:[#allocation14_spill] sm:$0xff]  ;;  %v1028_v12 = vmul.f32 %v1955_v20, %v64_v17 }
  0x4b   :  { %2663 = vst [vmem:[#allocation26_spill] sm:$0xff] %v2222_v8  ;;  %2665 = vst [vmem:[#allocation27_spill] sm:$0xff] %v2227_v42  ;;  %v2241_v3 = vmul.f32 %v918_v13, %v2666_v59  ;;  %v2246_v33 = vmul.f32 %v920_v15, %v2668_v10  ;;  %v2251_v42 = vmul.f32 %v928_v43, %v2670_v38  ;;  %v63_v13 = vld [vmem:[%s2596_s3] sm:$0xff]  ;;  %v65_v15 = vld [vmem:[%s2596_s3 + $0x10] sm:$0xff] }
  0x4c   :  { %v2672_v8 = vrot.slane %v2637_v44, %v1734_v22  ;;  %v2674_v43 = vrot.slane %v2637_v44, %v1736_v23  ;;  %v2678_v10 = vrot.slane %v2637_v44, %v1740_v25  ;;  %v1029_v6 = vmul.f32 %v1957_v11, %v65_v15 }
  0x4d   :  { %2667 = vst [vmem:[#allocation28_spill] sm:$0xff] %v2241_v3  ;;  %2669 = vst [vmem:[#allocation29_spill] sm:$0xff] %v2246_v33  ;;  %v70_v33 = vld [vmem:[%s2596_s3 + $0x38] sm:$0xff]  ;;  %v2688_v3 = vld [vmem:[#allocation12_spill] sm:$0xff] }
  0x4e   :  { %2671 = vst [vmem:[#allocation30_spill] sm:$0xff] %v2251_v42  ;;  %v2256_v48 = vmul.f32 %v936_v28, %v2672_v8  ;;  %v2270_v59 = vmul.f32 %v935_v53, %v2674_v43  ;;  %v2676_v28 = vrot.slane %v2637_v44, %v1738_v24  ;;  %v2280_v38 = vmul.f32 %v945_v54, %v2678_v10  ;;  %v66_v53 = vld [vmem:[%s2596_s3 + $0x18] sm:$0xff]  ;;  %v67_v43 = vld [vmem:[%s2596_s3 + $0x20] sm:$0xff] }
  0x4f   :  { %v2682_v54 = vrot.slane %v2637_v44, %v1749_v31  ;;  %v2686_v10 = vld [vmem:[#allocation10_spill] sm:$0xff]  ;;  %v1030_v39 = vmul.f32 %v1962_v40, %v66_v53 }
  0x50   :  { %2673 = vst [vmem:[#allocation31_spill] sm:$0xff] %v2256_v48  ;;  %2675 = vst [vmem:[#allocation32_spill] sm:$0xff] %v2270_v59  ;;  %v2275_v8 = vmul.f32 %v937_v61, %v2676_v28  ;;  %v2680_v48 = vrot.slane %v2637_v44, %v1742_v26  ;;  %v68_v61 = vld [vmem:[%s2596_s3 + $0x28] sm:$0xff]  ;;  %v69_v59 = vld [vmem:[%s2596_s3 + $0x30] sm:$0xff] }
  0x51   :  { %2679 = vst [vmem:[#allocation34_spill] sm:$0xff] %v2280_v38  ;;  %v2299_v28 = vmul.f32 %v952_v19, %v2682_v54  ;;  %v2687_v38 = vld [vmem:[#allocation11_spill] sm:$0xff]  ;;  %v1021_v19 = vmul.f32 %v2688_v3, %v57_v52  ;;  %v2689_v54 = vld [vmem:[#allocation13_spill] sm:$0xff]  ;;  %v1031_v52 = vmul.f32 %v1982_v7, %v67_v43  ;;  %v2694_v40 = vld [vmem:[#allocation2_spill] sm:$0xff] }
  0x52   :  { %2677 = vst [vmem:[#allocation33_spill] sm:$0xff] %v2275_v8  ;;  %v2285_v42 = vmul.f32 %v953_v34, %v2680_v48  ;;  %v2684_v34 = vrot.slane %v2637_v44, %v1754_v35  ;;  %v1020_v8 = vmul.f32 %v2687_v38, %v56_v62  ;;  %v1023_v44 = vmul.f32 %v2690_v47, %v59_v30 }
  0x53   :  { %2683 = vst [vmem:[#allocation36_spill] sm:$0xff] %v2299_v28  ;;  %v1022_v28 = vmul.f32 %v2689_v54, %v58_v36  ;;  %v1027_v38 = vmul.f32 %v1948_v4, %v63_v13  ;;  %v1032_v36 = vmul.f32 %v1990_v45, %v68_v61  ;;  %v1033_v30 = vmul.f32 %v1998_v49, %v69_v59 }
  0x54   :  { %2681 = vst [vmem:[#allocation35_spill] sm:$0xff] %v2285_v42  ;;  %v2304_v48 = vmul.f32 %v954_v56, %v2684_v34  ;;  %v1019_v42 = vmul.f32 %v2686_v10, %v55_v50  ;;  %v2691_v56 = vld [vmem:[#allocation15_spill] sm:$0xff]  ;;  %v2693_v10 = vld [vmem:[#allocation17_spill] sm:$0xff]  ;;  %v1034_v47 = vmul.f32 %v2003_v55, %v70_v33  ;;  %v1037_v3 = vadd.f32 %v1029_v6, %v1021_v19 }
  0x55   :  { %v1024_v34 = vmul.f32 %v2691_v56, %v60_v16  ;;  %v1026_v62 = vmul.f32 %v2693_v10, %v62_v58  ;;  %v1038_v58 = vadd.f32 %v1030_v39, %v1022_v28  ;;  %v1050_v7 = vrot.slane %v2694_v40, %v1732_v21  ;;  %v2695_v33 = vld [vmem:[#allocation3_spill] sm:$0xff]  ;;  %v2696_v28 = vld [vmem:[#allocation4_spill] sm:$0xff] }
  0x56   :  { %2685 = vst [vmem:[#allocation37_spill] sm:$0xff] %v2304_v48  ;;  %v2692_v48 = vld [vmem:[#allocation16_spill] sm:$0xff]  ;;  %v1035_v16 = vadd.f32 %v1027_v38, %v1019_v42  ;;  %v2697_v38 = vld [vmem:[#allocation5_spill] sm:$0xff]  ;;  %v2698_v2 = vrot.slane %v2694_v40, %v1734_v22  ;;  %v2705_v1 = vrot.slane %v2695_v33, %v1732_v21 }
  0x57   :  { %v1025_v50 = vmul.f32 %v2692_v48, %v61_v9  ;;  %v1036_v9 = vadd.f32 %v1028_v12, %v1020_v8  ;;  %v1039_v48 = vadd.f32 %v1031_v52, %v1023_v44  ;;  %v2328_v4 = vadd.f32 %v1032_v36, %v1024_v34 }
  0x58   :  { %v2332_v11 = vadd.f32 %v1034_v47, %v1026_v62  ;;  %v1215_v34 = vcombine.high %v1035_v16, %v1035_v16  ;;  %v1222_v36 = vrot.slane %v1035_v16, %v1744_v27  ;;  %v1249_v44 = vcombine.high %v1037_v3, %v1037_v3 }
  0x59   :  { %v2330_v20 = vadd.f32 %v1033_v30, %v1025_v50  ;;  %v1232_v56 = vcombine.high %v1036_v9, %v1036_v9  ;;  %v1239_v30 = vrot.slane %v1036_v9, %v1744_v27  ;;  %v1256_v47 = vrot.slane %v1037_v3, %v1744_v27 }
  0x5a   :  { %v1229_v50 = vrot.slane %v1215_v34, %v1744_v27  ;;  %v1230_v54 = vcombine.high %v1222_v36, %v1222_v36  ;;  %v1266_v19 = vcombine.high %v1038_v58, %v1038_v58  ;;  %v1273_v10 = vrot.slane %v1038_v58, %v1744_v27 }
  0x5b   :  { %v1246_v62 = vrot.slane %v1232_v56, %v1744_v27  ;;  %v1247_v61 = vcombine.high %v1239_v30, %v1239_v30  ;;  %v1263_v52 = vrot.slane %v1249_v44, %v1744_v27  ;;  %v1264_v43 = vcombine.high %v1256_v47, %v1256_v47 }
  0x5c   :  { %v1231_v53 = vcombine.high %v1229_v50, %v1229_v50  ;;  %v1280_v16 = vrot.slane %v1266_v19, %v1744_v27  ;;  %v1281_v8 = vcombine.high %v1273_v10, %v1273_v10  ;;  %v1283_v9 = vcombine.high %v1039_v48, %v1039_v48 }
  0x5d   :  { %v1248_v59 = vcombine.high %v1246_v62, %v1246_v62  ;;  %v1265_v15 = vcombine.high %v1263_v52, %v1263_v52  ;;  %v1290_v3 = vrot.slane %v1039_v48, %v1744_v27  ;;  %v1300_v34 = vcombine.high %v2328_v4, %v2328_v4 }
  0x5e   :  { %v1282_v17 = vcombine.high %v1280_v16, %v1280_v16  ;;  %v1297_v58 = vrot.slane %v1283_v9, %v1744_v27  ;;  %v1307_v56 = vrot.slane %v2328_v4, %v1744_v27  ;;  %v1317_v44 = vcombine.high %v2330_v20, %v2330_v20 }
  0x5f   :  { %v1298_v13 = vcombine.high %v1290_v3, %v1290_v3  ;;  %v1314_v19 = vrot.slane %v1300_v34, %v1744_v27  ;;  %v1324_v42 = vrot.slane %v2330_v20, %v1744_v27  ;;  %v1334_v48 = vcombine.high %v2332_v11, %v2332_v11 }
  0x60   :  { %v1299_v12 = vcombine.high %v1297_v58, %v1297_v58  ;;  %v1315_v6 = vcombine.high %v1307_v56, %v1307_v56  ;;  %v1331_v39 = vrot.slane %v1317_v44, %v1744_v27  ;;  %v1341_v9 = vrot.slane %v2332_v11, %v1744_v27 }
  0x61   :  { %v1316_v4 = vcombine.high %v1314_v19, %v1314_v19  ;;  %v1332_v55 = vcombine.high %v1324_v42, %v1324_v42  ;;  %v1348_v49 = vrot.slane %v1334_v48, %v1744_v27  ;;  %v1383_v34 = vmul.f32 %v1222_v36, %v1050_v7 }
  0x62   :  { %v1333_v45 = vcombine.high %v1331_v39, %v1331_v39  ;;  %v1349_v20 = vcombine.high %v1341_v9, %v1341_v9  ;;  %v1384_v41 = vmul.f32 %v1230_v54, %v2698_v2  ;;  %v2699_v44 = vrot.slane %v2694_v40, %v1736_v23 }
  0x63   :  { %v1350_v37 = vcombine.high %v1348_v49, %v1348_v49  ;;  %v2700_v11 = vrot.slane %v2694_v40, %v1738_v24  ;;  %v2701_v48 = vrot.slane %v2694_v40, %v1740_v25  ;;  %v2702_v7 = vrot.slane %v2694_v40, %v1742_v26 }
  0x64   :  { %v1385_v46 = vmul.f32 %v1229_v50, %v2699_v44  ;;  %v2703_v2 = vrot.slane %v2694_v40, %v1749_v31  ;;  %v2704_v50 = vrot.slane %v2694_v40, %v1754_v35  ;;  %v2709_v40 = vrot.slane %v2695_v33, %v1740_v25 }
  0x65   :  { %v1386_v63 = vmul.f32 %v1231_v53, %v2700_v11  ;;  %v1387_v27 = vmul.f32 %v1239_v30, %v2701_v48  ;;  %v1388_v36 = vmul.f32 %v1247_v61, %v2702_v7  ;;  %v1391_v53 = vmul.f32 %v1256_v47, %v2705_v1 }
  0x66   :  { %v1389_v54 = vmul.f32 %v1246_v62, %v2703_v2  ;;  %v1390_v44 = vmul.f32 %v1248_v59, %v2704_v50  ;;  %v2706_v11 = vrot.slane %v2695_v33, %v1734_v22  ;;  %v2707_v48 = vrot.slane %v2695_v33, %v1736_v23 }
  0x67   :  { %v2708_v7 = vrot.slane %v2695_v33, %v1738_v24  ;;  %v1395_v59 = vmul.f32 %v1273_v10, %v2709_v40  ;;  %v2710_v2 = vrot.slane %v2695_v33, %v1742_v26  ;;  %v2711_v47 = vrot.slane %v2695_v33, %v1749_v31 }
  0x68   :  { %v1392_v30 = vmul.f32 %v1264_v43, %v2706_v11  ;;  %v1393_v61 = vmul.f32 %v1263_v52, %v2707_v48  ;;  %v2712_v50 = vrot.slane %v2695_v33, %v1754_v35  ;;  %v2713_v11 = vrot.slane %v2696_v28, %v1732_v21 }
  0x69   :  { %v1394_v62 = vmul.f32 %v1265_v15, %v2708_v7  ;;  %v1396_v1 = vmul.f32 %v1281_v8, %v2710_v2  ;;  %v1397_v43 = vmul.f32 %v1280_v16, %v2711_v47  ;;  %v2714_v48 = vrot.slane %v2696_v28, %v1734_v22 }
  0x6a   :  { %v1398_v52 = vmul.f32 %v1282_v17, %v2712_v50  ;;  %v1399_v15 = vmul.f32 %v1290_v3, %v2713_v11  ;;  %v2715_v7 = vrot.slane %v2696_v28, %v1736_v23  ;;  %v2716_v40 = vrot.slane %v2696_v28, %v1738_v24 }
  0x6b   :  { %v1400_v10 = vmul.f32 %v1298_v13, %v2714_v48  ;;  %v2717_v33 = vrot.slane %v2696_v28, %v1740_v25  ;;  %v2718_v2 = vrot.slane %v2696_v28, %v1742_v26  ;;  %v2719_v47 = vrot.slane %v2696_v28, %v1749_v31 }
  0x6c   :  { %v1401_v8 = vmul.f32 %v1297_v58, %v2715_v7  ;;  %v1402_v16 = vmul.f32 %v1299_v12, %v2716_v40  ;;  %v2720_v50 = vrot.slane %v2696_v28, %v1754_v35  ;;  %v2721_v11 = vrot.slane %v2697_v38, %v1732_v21 }
  0x6d   :  { %v1403_v17 = vmul.f32 %v1307_v56, %v2717_v33  ;;  %v1404_v3 = vmul.f32 %v1315_v6, %v2718_v2  ;;  %v1405_v13 = vmul.f32 %v1314_v19, %v2719_v47  ;;  %v2722_v48 = vrot.slane %v2697_v38, %v1734_v22  ;;  %v2740_v2 = vld [vmem:[#allocation26_spill] sm:$0xff]  ;;  %v2741_v47 = vld [vmem:[#allocation27_spill] sm:$0xff] }
  0x6e   :  { %v1406_v58 = vmul.f32 %v1316_v4, %v2720_v50  ;;  %v1407_v12 = vmul.f32 %v1324_v42, %v2721_v11  ;;  %v2723_v7 = vrot.slane %v2697_v38, %v1736_v23  ;;  %v2724_v40 = vrot.slane %v2697_v38, %v1738_v24  ;;  %v2742_v50 = vld [vmem:[#allocation28_spill] sm:$0xff]  ;;  %v2743_v11 = vld [vmem:[#allocation29_spill] sm:$0xff] }
  0x6f   :  { %v1408_v56 = vmul.f32 %v1332_v55, %v2722_v48  ;;  %v2725_v28 = vrot.slane %v2697_v38, %v1740_v25  ;;  %v2726_v21 = vrot.slane %v2697_v38, %v1742_v26  ;;  %v2727_v22 = vrot.slane %v2697_v38, %v1749_v31  ;;  %v2744_v48 = vld [vmem:[#allocation30_spill] sm:$0xff] }
  0x70   :  { %v1409_v6 = vmul.f32 %v1331_v39, %v2723_v7  ;;  %v1410_v19 = vmul.f32 %v1333_v45, %v2724_v40  ;;  %v2728_v23 = vrot.slane %v2697_v38, %v1754_v35  ;;  %v1415_v33 = vadd.f32 %v1383_v34, %v2107_v57  ;;  %v2729_v35 = vld [vmem:[#allocation6_spill] sm:$0xff]  ;;  %v2730_v38 = vld [vmem:[#allocation7_spill] sm:$0xff]  ;;  %v2731_v34 = vld [vmem:[#allocation8_spill] sm:$0xff] }
  0x71   :  { %v1411_v4 = vmul.f32 %v1341_v9, %v2725_v28  ;;  %v1412_v42 = vmul.f32 %v1349_v20, %v2726_v21  ;;  %v1413_v55 = vmul.f32 %v1348_v49, %v2727_v22  ;;  %v1416_v24 = vadd.f32 %v1384_v41, %v2112_v29  ;;  %v2732_v41 = vld [vmem:[#allocation18_spill] sm:$0xff]  ;;  %v2745_v7 = vld [vmem:[#allocation31_spill] sm:$0xff]  ;;  %v2746_v40 = vld [vmem:[#allocation32_spill] sm:$0xff] }
  0x72   :  { %v1414_v39 = vmul.f32 %v1350_v37, %v2728_v23  ;;  %v1417_v45 = vadd.f32 %v1385_v46, %v2117_v14  ;;  %v1418_v25 = vadd.f32 %v1386_v63, %v2122_v32  ;;  %v1419_v9 = vadd.f32 %v1387_v27, %v2127_v5  ;;  %v2733_v46 = vld [vmem:[#allocation19_spill] sm:$0xff]  ;;  %v2734_v63 = vld [vmem:[#allocation20_spill] sm:$0xff]  ;;  %v2735_v5 = vld [vmem:[#allocation21_spill] sm:$0xff] }
  0x73   :  { %v1420_v26 = vadd.f32 %v1388_v36, %v2132_v51  ;;  %v1421_v20 = vadd.f32 %v1389_v54, %v2137_v18  ;;  %v1422_v31 = vadd.f32 %v1390_v44, %v2142_v60  ;;  %v1423_v49 = vadd.f32 %v1391_v53, %v2147_v0  ;;  %v2736_v36 = vld [vmem:[#allocation22_spill] sm:$0xff]  ;;  %v2737_v54 = vld [vmem:[#allocation23_spill] sm:$0xff]  ;;  %v2738_v44 = vld [vmem:[#allocation24_spill] sm:$0xff] }
  0x74   :  { %v1424_v37 = vadd.f32 %v1392_v30, %v2729_v35  ;;  %v1425_v57 = vadd.f32 %v1393_v61, %v2730_v38  ;;  %v1426_v29 = vadd.f32 %v1394_v62, %v2731_v34  ;;  %v1427_v14 = vadd.f32 %v1395_v59, %v2732_v41  ;;  %v2739_v53 = vld [vmem:[#allocation25_spill] sm:$0xff]  ;;  %v2748_v21 = vld [vmem:[#allocation34_spill] sm:$0xff]  ;;  %v2749_v22 = vld [vmem:[#allocation35_spill] sm:$0xff] }
  0x75   :  { %v1428_v32 = vadd.f32 %v1396_v1, %v2733_v46  ;;  %v1429_v27 = vadd.f32 %v1397_v43, %v2734_v63  ;;  %v1430_v51 = vadd.f32 %v1398_v52, %v2735_v5  ;;  %v1431_v18 = vadd.f32 %v1399_v15, %v2736_v36  ;;  %v2747_v28 = vld [vmem:[#allocation33_spill] sm:$0xff]  ;;  %v2750_v23 = vld [vmem:[#allocation36_spill] sm:$0xff] }
  0x76   :  { %v1432_v60 = vadd.f32 %v1400_v10, %v2737_v54  ;;  %v1433_v0 = vadd.f32 %v1401_v8, %v2738_v44  ;;  %v1434_v30 = vadd.f32 %v1402_v16, %v2739_v53  ;;  %v1435_v61 = vadd.f32 %v1403_v17, %v2740_v2  ;;  %v2751_v35 = vld [vmem:[#allocation37_spill] sm:$0xff] }
  0x77   :  { %v1436_v62 = vadd.f32 %v1404_v3, %v2741_v47  ;;  %v1437_v59 = vadd.f32 %v1405_v13, %v2742_v50  ;;  %v1438_v1 = vadd.f32 %v1406_v58, %v2743_v11  ;;  %v1439_v43 = vadd.f32 %v1407_v12, %v2744_v48  ;;  %v2752_v46 = vld [vmem:[#allocation9_spill] sm:$0xff] }
  0x78   :  { %v1440_v52 = vadd.f32 %v1408_v56, %v2745_v7  ;;  %v1441_v15 = vadd.f32 %v1409_v6, %v2746_v40  ;;  %v1442_v10 = vadd.f32 %v1410_v19, %v2747_v28  ;;  %v1443_v8 = vadd.f32 %v1411_v4, %v2748_v21 }
  0x79   :  { %v1444_v16 = vadd.f32 %v1412_v42, %v2749_v22  ;;  %v1445_v17 = vadd.f32 %v1413_v55, %v2750_v23  ;;  %v1446_v3 = vadd.f32 %v1414_v39, %v2751_v35  ;;  %v1479_v38 = vcombine.low %v1415_v33, %v1416_v24 }
  0x7a   :  { %v1480_v13 = vcombine.low %v1417_v45, %v1418_v25  ;;  %v1496_v34 = vcombine.low %v1419_v9, %v1420_v26  ;;  %v1497_v58 = vcombine.low %v1421_v20, %v1422_v31  ;;  %v1513_v41 = vcombine.low %v1423_v49, %v1424_v37 }
  0x7b   :  { %v1514_v12 = vcombine.low %v1425_v57, %v1426_v29  ;;  %v1487_v56 = vrot.slane %v1479_v38, %v2752_v46  ;;  %v1530_v63 = vcombine.low %v1427_v14, %v1428_v32  ;;  %v1531_v19 = vcombine.low %v1429_v27, %v1430_v51 }
  0x7c   :  { %v1494_v6 = vrot.slane %v1480_v13, %v2752_v46  ;;  %v1504_v4 = vrot.slane %v1496_v34, %v2752_v46  ;;  %v1511_v42 = vrot.slane %v1497_v58, %v2752_v46  ;;  %v1521_v55 = vrot.slane %v1513_v41, %v2752_v46 }
  0x7d   :  { %v1528_v39 = vrot.slane %v1514_v12, %v2752_v46  ;;  %v1538_v24 = vrot.slane %v1530_v63, %v2752_v46  ;;  %v1545_v45 = vrot.slane %v1531_v19, %v2752_v46  ;;  %v1547_v25 = vcombine.low %v1431_v18, %v1432_v60 }
  0x7e   :  { %v1495_v33 = vcombine.low %v1487_v56, %v1494_v6  ;;  %v1512_v9 = vcombine.low %v1504_v4, %v1511_v42  ;;  %v1548_v20 = vcombine.low %v1433_v0, %v1434_v30  ;;  %v1564_v31 = vcombine.low %v1435_v61, %v1436_v62 }
  0x7f   :  { %v1529_v26 = vcombine.low %v1521_v55, %v1528_v39  ;;  %v1546_v49 = vcombine.low %v1538_v24, %v1545_v45  ;;  %v1555_v37 = vrot.slane %v1547_v25, %v2752_v46  ;;  %v1565_v57 = vcombine.low %v1437_v59, %v1438_v1 }
  0x80   :  { %v1581_v29 = vcombine.low %v1439_v43, %v1440_v52  ;;  %1623 = vst [vmem:[%s2597_s6] sm:$0xff] %v1495_v33  ;;  %v1562_v14 = vrot.slane %v1548_v20, %v2752_v46  ;;  %v1572_v32 = vrot.slane %v1564_v31, %v2752_v46  ;;  %v1582_v27 = vcombine.low %v1441_v15, %v1442_v10 }
  0x81   :  { %v1598_v5 = vcombine.low %v1443_v8, %v1444_v16  ;;  %1624 = vst [vmem:[%s2597_s6 + $0x8] sm:$0xff] %v1512_v9  ;;  %1625 = vst [vmem:[%s2597_s6 + $0x10] sm:$0xff] %v1529_v26  ;;  %v1579_v51 = vrot.slane %v1565_v57, %v2752_v46  ;;  %v1599_v18 = vcombine.low %v1445_v17, %v1446_v3 }
  0x82   :  { %v1589_v36 = vrot.slane %v1581_v29, %v2752_v46  ;;  %1626 = vst [vmem:[%s2597_s6 + $0x18] sm:$0xff] %v1546_v49  ;;  %v1563_v54 = vcombine.low %v1555_v37, %v1562_v14  ;;  %v1596_v60 = vrot.slane %v1582_v27, %v2752_v46 }
  0x83   :  { %v1606_v44 = vrot.slane %v1598_v5, %v2752_v46  ;;  %v1580_v0 = vcombine.low %v1572_v32, %v1579_v51  ;;  %v1613_v53 = vrot.slane %v1599_v18, %v2752_v46 }
  0x84   :  { %v1597_v30 = vcombine.low %v1589_v36, %v1596_v60  ;;  %1627 = vst [vmem:[%s2597_s6 + $0x20] sm:$0xff] %v1563_v54 }
  0x85   :  { %v1614_v2 = vcombine.low %v1606_v44, %v1613_v53  ;;  %1628 = vst [vmem:[%s2597_s6 + $0x28] sm:$0xff] %v1580_v0 }
  0x86   :  { %1629 = vst [vmem:[%s2597_s6 + $0x30] sm:$0xff] %v1597_v30 }
  0x87   :  { %1630 = vst [vmem:[%s2597_s6 + $0x38] sm:$0xff] %v1614_v2 }

</bundles_post_ra>
